<compile_context>
chip_gen: v7x
topology: tpu7x:2x2x1
jax: 0.10.0
libtpu: 0.0.40
codegen_flags: <defaults>
</compile_context>

<pallas_src>
import functools
import math

import jax
import jax.numpy as jnp
from jax.experimental import pallas as pl
from jax.experimental.pallas import tpu as pltpu

EPS = 1e-5                               # PyTorch BatchNorm default eps
VMEM_LIMIT_BYTES = 32 * 1024 * 1024      # safe scoped-VMEM budget incl. v7x
ACT_DTYPE = jnp.bfloat16                 # inter-layer activation storage dtype


def _round_up(v, m):
    return (v + m - 1) // m * m


def _full_spec(shape):
    # whole-array block for grid-less calls
    return pl.BlockSpec(shape, lambda: (0,) * len(shape))


# ----------------------------- Pallas kernels ------------------------------

def _matmul_bias_act_kernel(x_ref, w_ref, b_ref, o_ref, *, act):
    """o = act((x @ w_folded) + bias); bf16 MXU inputs, fp32 accumulation."""
    y = jnp.dot(x_ref[...], w_ref[...], preferred_element_type=jnp.float32)
    y = y + b_ref[...]
    if act == "relu6":
        y = jnp.clip(y, 0.0, 6.0)
    o_ref[...] = y.astype(o_ref.dtype)


def _matmul_bias_res_kernel(x_ref, w_ref, b_ref, r_ref, o_ref):
    """Projection 1x1 conv with the residual add fused in (no activation)."""
    y = jnp.dot(x_ref[...], w_ref[...], preferred_element_type=jnp.float32)
    y = y + b_ref[...] + r_ref[...].astype(jnp.float32)
    o_ref[...] = y.astype(o_ref.dtype)


def _dw_s1_kernel(x_ref, w_ref, b_ref, o_ref, xp_ref, *, h, w, c):
    """3x3 depthwise, stride 1, folded BN + ReLU6, lane-packed (H, W*C) layout.

    The zero halo is built in a VMEM scratch (no XLA pad round-trip); the dx
    taps are lane-offset slices, the dy taps are sublane slices."""
    xp_ref[...] = jnp.zeros_like(xp_ref)
    xp_ref[1:h + 1, c:c + w * c] = x_ref[0].astype(jnp.float32)
    wv = w_ref[...]                               # (9, W*C), BN scale folded
    acc = jnp.zeros((h, w * c), jnp.float32)
    for dy in range(3):
        for dx in range(3):
            tap = xp_ref[dy:dy + h, dx * c:dx * c + w * c]
            acc = acc + tap * wv[dy * 3 + dx]
    o_ref[0] = jnp.clip(acc + b_ref[...], 0.0, 6.0).astype(o_ref.dtype)


def _dw_s2_kernel(x_ref, w_ref, b_ref, o_ref, *, ho, wo, c):
    """3x3 depthwise, stride 2, folded BN + ReLU6.

    x_ref: (Hp//2, 2, Wp//2, 2*C) where x_ref[i, r, j, s*C+ch] == x_pad[2i+r,
    2j+s, ch] (a free row-major reshape of the padded input), so the four
    phases are read with plain static slices — no XLA phase materialization
    and no over-compute."""
    wv = w_ref[...]                               # (9, C)
    acc = jnp.zeros((ho, wo, c), jnp.float32)
    for dy in range(3):
        hy, r = dy // 2, dy % 2
        for dx in range(3):
            hx, s = dx // 2, dx % 2
            tap = x_ref[hy:hy + ho, r, hx:hx + wo, s * c:(s + 1) * c]
            acc = acc + tap.astype(jnp.float32) * wv[dy * 3 + dx]
    o_ref[0] = jnp.clip(acc + b_ref[...], 0.0, 6.0).astype(o_ref.dtype)


def _convlast_pool_kernel(x_ref, w_ref, b_ref, o_ref):
    """Fused conv_last (1x1) + folded BN + ReLU6 + global average pool for
    one image; the (H,W,512) map never leaves VMEM."""
    y = jnp.dot(x_ref[0], w_ref[...], preferred_element_type=jnp.float32)
    y = jnp.clip(y + b_ref[...], 0.0, 6.0)
    o_ref[0] = jnp.mean(y, axis=0, keepdims=True)


def _se_fc_kernel(p_ref, w1_ref, b1_ref, w2_ref, b2_ref, fw_ref, fb_ref,
                  o_ref):
    """SE gate + FC (no bias) + folded BN1d on the pooled vector.

    Uses mean(x * g) == mean(x) * g (the SE gate is constant over spatial
    dims), so only the pooled (B, C) vector is needed."""
    pooled = p_ref[...]                                        # (B, C) fp32
    h = jnp.dot(pooled.astype(jnp.bfloat16), w1_ref[...],
                preferred_element_type=jnp.float32) + b1_ref[...]
    h = jnp.maximum(h, 0.0)
    g = jnp.dot(h.astype(jnp.bfloat16), w2_ref[...],
                preferred_element_type=jnp.float32) + b2_ref[...]
    g = 1.0 / (1.0 + jnp.exp(-g))                              # sigmoid
    z = pooled * g                                             # pool(se(x))
    y = jnp.dot(z.astype(jnp.bfloat16), fw_ref[...],
                preferred_element_type=jnp.float32)
    o_ref[...] = y + fb_ref[...]


# --------------------------- pallas_call wrappers ---------------------------

def matmul_bias_act(x, w_bf16, bias, *, act="none", residual=None, tm=512,
                    out_dtype=ACT_DTYPE):
    """Row-tiled matmul with folded-BN bias (+ optional ReLU6 / residual).

    No input padding: the last partial M block is masked by Pallas.  An extra
    parallel N axis is used for small-M / wide-N layers (v7x megacore)."""
    M, K = x.shape
    N = w_bf16.shape[1]
    tm = M if M <= tm else tm
    nm = pl.cdiv(M, tm)
    nn = 2 if (N >= 512 and N % 256 == 0 and nm <= 2) else 1
    tn = N // nn
    grid = (nm, nn)

    bias2 = bias.reshape(1, N)
    in_specs = [pl.BlockSpec((tm, K), lambda i, j: (i, 0)),
                pl.BlockSpec((K, tn), lambda i, j: (0, j)),
                pl.BlockSpec((1, tn), lambda i, j: (0, j))]
    args = [x, w_bf16, bias2]
    if residual is not None:
        in_specs.append(pl.BlockSpec((tm, tn), lambda i, j: (i, j)))
        args.append(residual)
        kern = _matmul_bias_res_kernel
    else:
        kern = functools.partial(_matmul_bias_act_kernel, act=act)

    cost = pl.CostEstimate(flops=2 * M * K * N, transcendentals=0,
                           bytes_accessed=2 * M * (K + N) + 2 * K * N + 4 * N)
    return pl.pallas_call(
        kern,
        out_shape=jax.ShapeDtypeStruct((M, N), out_dtype),
        grid=grid,
        in_specs=in_specs,
        out_specs=pl.BlockSpec((tm, tn), lambda i, j: (i, j)),
        compiler_params=pltpu.CompilerParams(
            dimension_semantics=("parallel", "parallel"),
            vmem_limit_bytes=VMEM_LIMIT_BYTES),
        cost_estimate=cost,
    )(*args)


def conv1x1(x, w_bf16, bias, act, residual=None):
    B, H, W, Cin = x.shape
    N = w_bf16.shape[1]
    xm = x.reshape(B * H * W, Cin)
    rm = None if residual is None else residual.reshape(B * H * W, N)
    y = matmul_bias_act(xm, w_bf16, bias, act=act, residual=rm)
    return y.reshape(B, H, W, N)


def conv1_3x3_s2(x, w_bf16, bias):
    """First 3x3 stride-2 conv: im2col (Cin=3, tiny) + Pallas matmul.
    The K dim is zero-padded 27 -> 32 so MXU loads are unmasked."""
    B, H, W, C = x.shape
    xp = jnp.pad(x, ((0, 0), (1, 1), (1, 1), (0, 0)))
    Ho = (H - 1) // 2 + 1
    Wo = (W - 1) // 2 + 1
    cols = []
    for dy in range(3):
        for dx in range(3):
            cols.append(xp[:, dy:dy + 2 * (Ho - 1) + 1:2,
                           dx:dx + 2 * (Wo - 1) + 1:2, :])
    cols.append(jnp.zeros((B, Ho, Wo, 32 - 9 * C), x.dtype))   # pad K to 32
    patches = jnp.concatenate(cols, axis=-1)                   # (B,Ho,Wo,32)
    # TODO(synk): the im2col gather stays in XLA; with Cin=3 the patch tensor
    # is tiny so a fully in-kernel gather is not worth it.
    Cout = w_bf16.shape[1]
    y = matmul_bias_act(patches.reshape(B * Ho * Wo, 32), w_bf16, bias,
                        act="relu6")
    return y.reshape(B, Ho, Wo, Cout)


def dw_conv_bn_relu6(x, w9, bias, stride):
    """Depthwise 3x3 + folded BN + ReLU6, gridded over batch."""
    B, H, W, C = x.shape
    cp = pltpu.CompilerParams(dimension_semantics=("parallel",),
                              vmem_limit_bytes=VMEM_LIMIT_BYTES)

    if stride == 1:
        # lane-packed (H, W*C) layout; weights / bias tiled across W so each
        # lane position j*C+ch sees its own channel weight.
        wt = jnp.tile(w9, (1, W))                     # (9, W*C)
        bt = jnp.tile(bias.reshape(1, C), (1, W))     # (1, W*C)
        xf = x.reshape(B, H, W * C)                   # free (row-major) view
        out = pl.pallas_call(
            functools.partial(_dw_s1_kernel, h=H, w=W, c=C),
            out_shape=jax.ShapeDtypeStruct((B, H, W * C), ACT_DTYPE),
            grid=(B,),
            in_specs=[pl.BlockSpec((1, H, W * C), lambda b: (b, 0, 0)),
                      pl.BlockSpec((9, W * C), lambda b: (0, 0)),
                      pl.BlockSpec((1, W * C), lambda b: (0, 0))],
            out_specs=pl.BlockSpec((1, H, W * C), lambda b: (b, 0, 0)),
            scratch_shapes=[pltpu.VMEM((H + 2, (W + 2) * C), jnp.float32)],
            compiler_params=cp,
        )(xf, wt, bt)
        return out.reshape(B, H, W, C)

    # stride == 2: pad once (bf16), then a free reshape splits even/odd rows
    # (dim 1) and interleaves even/odd columns along the lane dim (last dim).
    ho = (H - 1) // 2 + 1
    wo = (W - 1) // 2 + 1
    Hp, Wp = 2 * (ho + 1), 2 * (wo + 1)
    xp = jnp.pad(x, ((0, 0), (1, Hp - H - 1), (1, Wp - W - 1), (0, 0)))
    xf = xp.reshape(B * (Hp // 2), 2, Wp // 2, 2 * C)          # free reshape
    return pl.pallas_call(
        functools.partial(_dw_s2_kernel, ho=ho, wo=wo, c=C),
        out_shape=jax.ShapeDtypeStruct((B, ho, wo, C), ACT_DTYPE),
        grid=(B,),
        in_specs=[pl.BlockSpec((Hp // 2, 2, Wp // 2, 2 * C),
                               lambda b: (b, 0, 0, 0)),
                  pl.BlockSpec((9, C), lambda b: (0, 0)),
                  pl.BlockSpec((1, C), lambda b: (0, 0))],
        out_specs=pl.BlockSpec((1, ho, wo, C), lambda b: (b, 0, 0, 0)),
        compiler_params=cp,
    )(xf, w9, bias.reshape(1, C))


def conv_last_pool(x, w_bf16, bias):
    """Fused conv_last (1x1) + BN + ReLU6 + global average pool per image."""
    B, H, W, Cin = x.shape
    N = w_bf16.shape[1]
    x3 = x.reshape(B, H * W, Cin)
    out = pl.pallas_call(
        _convlast_pool_kernel,
        out_shape=jax.ShapeDtypeStruct((B, 1, N), jnp.float32),
        grid=(B,),
        in_specs=[pl.BlockSpec((1, H * W, Cin), lambda b: (b, 0, 0)),
                  pl.BlockSpec((Cin, N), lambda b: (0, 0)),
                  pl.BlockSpec((1, N), lambda b: (0, 0))],
        out_specs=pl.BlockSpec((1, 1, N), lambda b: (b, 0, 0)),
        compiler_params=pltpu.CompilerParams(
            dimension_semantics=("parallel",),
            vmem_limit_bytes=VMEM_LIMIT_BYTES),
    )(x3, w_bf16, bias.reshape(1, N))
    return out.reshape(B, N)


def se_fc_bn(pooled, se, fc_w_bf16, fc_bias):
    """SE gate * pooled + FC + folded BN1d (single small kernel)."""
    B, C = pooled.shape
    E = fc_w_bf16.shape[1]
    fcb = fc_bias.reshape(1, E)
    return pl.pallas_call(
        _se_fc_kernel,
        out_shape=jax.ShapeDtypeStruct((B, E), jnp.float32),
        in_specs=[_full_spec(pooled.shape),
                  _full_spec(se["w1"].shape), _full_spec(se["b1"].shape),
                  _full_spec(se["w2"].shape), _full_spec(se["b2"].shape),
                  _full_spec(fc_w_bf16.shape), _full_spec((1, E))],
        out_specs=_full_spec((B, E)),
        compiler_params=pltpu.CompilerParams(vmem_limit_bytes=VMEM_LIMIT_BYTES),
    )(pooled, se["w1"], se["b1"], se["w2"], se["b2"], fc_w_bf16, fcb)


# ------------------------------ parameters ----------------------------------

def _make_divisible(v, divisor=8):
    new_v = max(divisor, int(v + divisor / 2) // divisor * divisor)
    if new_v < 0.9 * v:
        new_v += divisor
    return new_v


def _bn_fold(c):
    gamma = jnp.ones((c,), jnp.float32)
    beta = jnp.zeros((c,), jnp.float32)
    mean = jnp.zeros((c,), jnp.float32)
    var = jnp.ones((c,), jnp.float32)
    scale = gamma / jnp.sqrt(var + EPS)
    bias = beta - mean * scale
    return scale, bias


def _conv_w(key, shape, fan_out):
    std = math.sqrt(2.0 / fan_out)     # kaiming_normal, mode='fan_out'
    return std * jax.random.normal(key, shape, jnp.float32)


def init_params(key, embedding_dim=128, width=1.0):
    """Inference-ready params: BN scale folded into weights, matmul weights
    stored in bf16 (fp32 MXU accumulation inside the kernels)."""
    keys = iter(jax.random.split(key, 128))
    p = {}
    c1 = _make_divisible(32 * width)                                    # 32

    w = _conv_w(next(keys), (3, 3, 3, c1), c1 * 9).reshape(27, c1)
    s, b = _bn_fold(c1)
    w = jnp.pad(w * s[None, :], ((0, 5), (0, 0)))            # K: 27 -> 32
    p["conv1"] = dict(w=w.astype(jnp.bfloat16), b=b)

    w = _conv_w(next(keys), (3, 3, c1), 9)
    s, b = _bn_fold(c1)
    p["conv2_dw"] = dict(w=w.reshape(9, c1) * s[None, :], b=b)

    configs = [(1, 64, 5, 2), (6, 128, 1, 2), (6, 128, 6, 1),
               (6, 128, 1, 2), (6, 128, 2, 1)]
    blocks = []
    in_c = c1
    for exp, out_c, n, stride in configs:
        out_c = _make_divisible(out_c * width)
        for i in range(n):
            st = stride if i == 0 else 1
            hid = in_c * exp
            blk = dict(in_c=in_c, out_c=out_c, stride=st, exp=exp)
            if exp != 1:
                w = _conv_w(next(keys), (in_c, hid), hid)
                s, b = _bn_fold(hid)
                blk["expand_w"] = (w * s[None, :]).astype(jnp.bfloat16)
                blk["expand_b"] = b
            w = _conv_w(next(keys), (3, 3, hid), 9)
            s, b = _bn_fold(hid)
            blk["dw_w"] = w.reshape(9, hid) * s[None, :]
            blk["dw_b"] = b
            w = _conv_w(next(keys), (hid, out_c), out_c)
            s, b = _bn_fold(out_c)
            blk["proj_w"] = (w * s[None, :]).astype(jnp.bfloat16)
            blk["proj_b"] = b
            blocks.append(blk)
            in_c = out_c
    p["blocks"] = blocks

    last = _make_divisible(512 * width)                                 # 512
    w = _conv_w(next(keys), (in_c, last), last)
    s, b = _bn_fold(last)
    p["conv_last"] = dict(w=(w * s[None, :]).astype(jnp.bfloat16), b=b)

    cr = last // 16   # SEBlock reduction (assumed 16; class not shown)
    p["se"] = dict(
        w1=(0.01 * jax.random.normal(next(keys), (last, cr), jnp.float32)
            ).astype(jnp.bfloat16),
        b1=jnp.zeros((1, cr), jnp.float32),
        w2=(0.01 * jax.random.normal(next(keys), (cr, last), jnp.float32)
            ).astype(jnp.bfloat16),
        b2=jnp.zeros((1, last), jnp.float32),
    )
    w = 0.01 * jax.random.normal(next(keys), (last, embedding_dim), jnp.float32)
    s, b = _bn_fold(embedding_dim)
    p["fc_w"] = (w * s[None, :]).astype(jnp.bfloat16)   # BN1d scale folded
    p["fc_b"] = b
    return p


# ------------------------------- forward ------------------------------------

def mobilefacenet_forward(params, x_nchw):
    # NCHW -> NHWC, bf16 activations end-to-end (fp32 accumulation in-kernel)
    x = jnp.transpose(x_nchw, (0, 2, 3, 1)).astype(ACT_DTYPE)

    # conv1: 3x3 stride-2 + BN + ReLU6
    x = conv1_3x3_s2(x, params["conv1"]["w"], params["conv1"]["b"])

    # conv2_dw: depthwise 3x3 stride-1 + BN + ReLU6
    x = dw_conv_bn_relu6(x, params["conv2_dw"]["w"], params["conv2_dw"]["b"],
                         stride=1)

    # inverted-residual bottlenecks
    for blk in params["blocks"]:
        r = x
        h = x
        if blk["exp"] != 1:
            h = conv1x1(h, blk["expand_w"], blk["expand_b"], act="relu6")
        h = dw_conv_bn_relu6(h, blk["dw_w"], blk["dw_b"], stride=blk["stride"])
        use_res = blk["stride"] == 1 and blk["in_c"] == blk["out_c"]
        h = conv1x1(h, blk["proj_w"], blk["proj_b"], act="none",
                    residual=r if use_res else None)   # residual add fused
        x = h
        # TODO(synk): nn.Dropout2d between blocks is identity at inference.

    # conv_last + BN + ReLU6 + global average pool (fused, never hits HBM)
    pooled = conv_last_pool(x, params["conv_last"]["w"],
                            params["conv_last"]["b"])

    # SE gate * pooled == global_pool(se(conv_last(x))) since the gate is
    # constant over spatial dims; post_se / global dropouts are identity.
    emb = se_fc_bn(pooled, params["se"], params["fc_w"], params["fc_b"])
    return emb


if __name__ == "__main__":
    key = jax.random.PRNGKey(0)
    pkey, xkey = jax.random.split(key)
    params = init_params(pkey, embedding_dim=128, width=1.0)
    x = jax.random.normal(xkey, (2, 3, 16, 16), jnp.float32)   # NCHW (PyTorch)

    fwd = jax.jit(functools.partial(mobilefacenet_forward, params))
    out = fwd(x)
    jax.block_until_ready(out)
    assert out.shape == (2, 128) and out.dtype == jnp.float32
    print("KERNEL_OK")
</pallas_src>

<mosaic_0001>
module attributes {stable_mosaic.version = 11 : i64} {
  func.func @_dw_s1_kernel(%arg0: i32, %arg1: memref<1x8x256xbf16, #tpu.memory_space<vmem>>, %arg2: memref<9x256xf32, #tpu.memory_space<vmem>>, %arg3: memref<1x256xf32, #tpu.memory_space<vmem>>, %arg4: memref<1x8x256xbf16, #tpu.memory_space<vmem>>, %arg5: memref<10x320xf32, #tpu.memory_space<vmem>>) attributes {dimension_semantics = [#tpu.dimension_semantics<parallel>], iteration_bounds = array<i64: 2>, scalar_prefetch = 0 : i64, scratch_operands = 1 : i64, tpu.core_type = #tpu.core_type<tc>, window_params = [{transform_indices = @transform_0, window_bounds = array<i64: 1, 8, 256>}, {pipeline_mode = #tpu.pipeline_mode<synchronous>, transform_indices = @transform_1, window_bounds = array<i64: 9, 256>}, {pipeline_mode = #tpu.pipeline_mode<synchronous>, transform_indices = @transform_2, window_bounds = array<i64: 1, 256>}, {transform_indices = @transform_3, window_bounds = array<i64: 1, 8, 256>}]} {
    %cst = arith.constant 0.000000e+00 : f32
    %0 = vector.broadcast %cst : f32 to vector<10x320xf32>
    %c0 = arith.constant 0 : index
    %c0_0 = arith.constant 0 : index
    %1 = vector.load %arg5[%c0, %c0_0] : memref<10x320xf32, #tpu.memory_space<vmem>>, vector<10x320xf32>
    tpu.vector_store %arg5[%c0, %c0_0], %0 {strides = array<i32>} : memref<10x320xf32, #tpu.memory_space<vmem>>, vector<10x320xf32>,
    %c0_1 = arith.constant 0 : index
    %c0_2 = arith.constant 0 : index
    %c0_3 = arith.constant 0 : index
    %2 = vector.load %arg1[%c0_1, %c0_2, %c0_3] : memref<1x8x256xbf16, #tpu.memory_space<vmem>>, vector<1x8x256xbf16>
    %3 = vector.shape_cast %2 : vector<1x8x256xbf16> to vector<8x256xbf16>
    %4 = arith.extf %3 : vector<8x256xbf16> to vector<8x256xf32>
    %c1 = arith.constant 1 : index
    %c32 = arith.constant 32 : index
    %5 = vector.load %arg5[%c1, %c32] : memref<10x320xf32, #tpu.memory_space<vmem>>, vector<8x256xf32>
    tpu.vector_store %arg5[%c1, %c32], %4 {strides = array<i32>} : memref<10x320xf32, #tpu.memory_space<vmem>>, vector<8x256xf32>,
    %c0_4 = arith.constant 0 : index
    %c0_5 = arith.constant 0 : index
    %6 = vector.load %arg2[%c0_4, %c0_5] : memref<9x256xf32, #tpu.memory_space<vmem>>, vector<9x256xf32>
    %cst_6 = arith.constant 0.000000e+00 : f32
    %7 = vector.broadcast %cst_6 : f32 to vector<8x256xf32>
    %c0_7 = arith.constant 0 : index
    %c0_8 = arith.constant 0 : index
    %8 = vector.load %arg5[%c0_7, %c0_8] : memref<10x320xf32, #tpu.memory_space<vmem>>, vector<8x256xf32>
    %9 = vector.extract_strided_slice %6 {offsets = [0, 0], sizes = [1, 256], strides = [1, 1]} : vector<9x256xf32> to vector<1x256xf32>
    %10 = vector.shape_cast %9 : vector<1x256xf32> to vector<256xf32>
    %11 = vector.shape_cast %10 : vector<256xf32> to vector<1x256xf32>
    %12 = vector.broadcast %11 : vector<1x256xf32> to vector<8x256xf32>
    %13 = arith.mulf %8, %12 : vector<8x256xf32>
    %14 = arith.addf %7, %13 : vector<8x256xf32>
    %c0_9 = arith.constant 0 : index
    %c32_10 = arith.constant 32 : index
    %15 = vector.load %arg5[%c0_9, %c32_10] : memref<10x320xf32, #tpu.memory_space<vmem>>, vector<8x256xf32>
    %16 = vector.extract_strided_slice %6 {offsets = [1, 0], sizes = [1, 256], strides = [1, 1]} : vector<9x256xf32> to vector<1x256xf32>
    %17 = vector.shape_cast %16 : vector<1x256xf32> to vector<256xf32>
    %18 = vector.shape_cast %17 : vector<256xf32> to vector<1x256xf32>
    %19 = vector.broadcast %18 : vector<1x256xf32> to vector<8x256xf32>
    %20 = arith.mulf %15, %19 : vector<8x256xf32>
    %21 = arith.addf %14, %20 : vector<8x256xf32>
    %c0_11 = arith.constant 0 : index
    %c64 = arith.constant 64 : index
    %22 = vector.load %arg5[%c0_11, %c64] : memref<10x320xf32, #tpu.memory_space<vmem>>, vector<8x256xf32>
    %23 = vector.extract_strided_slice %6 {offsets = [2, 0], sizes = [1, 256], strides = [1, 1]} : vector<9x256xf32> to vector<1x256xf32>
    %24 = vector.shape_cast %23 : vector<1x256xf32> to vector<256xf32>
    %25 = vector.shape_cast %24 : vector<256xf32> to vector<1x256xf32>
    %26 = vector.broadcast %25 : vector<1x256xf32> to vector<8x256xf32>
    %27 = arith.mulf %22, %26 : vector<8x256xf32>
    %28 = arith.addf %21, %27 : vector<8x256xf32>
    %c1_12 = arith.constant 1 : index
    %c0_13 = arith.constant 0 : index
    %29 = vector.load %arg5[%c1_12, %c0_13] : memref<10x320xf32, #tpu.memory_space<vmem>>, vector<8x256xf32>
    %30 = vector.extract_strided_slice %6 {offsets = [3, 0], sizes = [1, 256], strides = [1, 1]} : vector<9x256xf32> to vector<1x256xf32>
    %31 = vector.shape_cast %30 : vector<1x256xf32> to vector<256xf32>
    %32 = vector.shape_cast %31 : vector<256xf32> to vector<1x256xf32>
    %33 = vector.broadcast %32 : vector<1x256xf32> to vector<8x256xf32>
    %34 = arith.mulf %29, %33 : vector<8x256xf32>
    %35 = arith.addf %28, %34 : vector<8x256xf32>
    %c1_14 = arith.constant 1 : index
    %c32_15 = arith.constant 32 : index
    %36 = vector.load %arg5[%c1_14, %c32_15] : memref<10x320xf32, #tpu.memory_space<vmem>>, vector<8x256xf32>
    %37 = vector.extract_strided_slice %6 {offsets = [4, 0], sizes = [1, 256], strides = [1, 1]} : vector<9x256xf32> to vector<1x256xf32>
    %38 = vector.shape_cast %37 : vector<1x256xf32> to vector<256xf32>
    %39 = vector.shape_cast %38 : vector<256xf32> to vector<1x256xf32>
    %40 = vector.broadcast %39 : vector<1x256xf32> to vector<8x256xf32>
    %41 = arith.mulf %36, %40 : vector<8x256xf32>
    %42 = arith.addf %35, %41 : vector<8x256xf32>
    %c1_16 = arith.constant 1 : index
    %c64_17 = arith.constant 64 : index
    %43 = vector.load %arg5[%c1_16, %c64_17] : memref<10x320xf32, #tpu.memory_space<vmem>>, vector<8x256xf32>
    %44 = vector.extract_strided_slice %6 {offsets = [5, 0], sizes = [1, 256], strides = [1, 1]} : vector<9x256xf32> to vector<1x256xf32>
    %45 = vector.shape_cast %44 : vector<1x256xf32> to vector<256xf32>
    %46 = vector.shape_cast %45 : vector<256xf32> to vector<1x256xf32>
    %47 = vector.broadcast %46 : vector<1x256xf32> to vector<8x256xf32>
    %48 = arith.mulf %43, %47 : vector<8x256xf32>
    %49 = arith.addf %42, %48 : vector<8x256xf32>
    %c2 = arith.constant 2 : index
    %c0_18 = arith.constant 0 : index
    %50 = vector.load %arg5[%c2, %c0_18] : memref<10x320xf32, #tpu.memory_space<vmem>>, vector<8x256xf32>
    %51 = vector.extract_strided_slice %6 {offsets = [6, 0], sizes = [1, 256], strides = [1, 1]} : vector<9x256xf32> to vector<1x256xf32>
    %52 = vector.shape_cast %51 : vector<1x256xf32> to vector<256xf32>
    %53 = vector.shape_cast %52 : vector<256xf32> to vector<1x256xf32>
    %54 = vector.broadcast %53 : vector<1x256xf32> to vector<8x256xf32>
    %55 = arith.mulf %50, %54 : vector<8x256xf32>
    %56 = arith.addf %49, %55 : vector<8x256xf32>
    %c2_19 = arith.constant 2 : index
    %c32_20 = arith.constant 32 : index
    %57 = vector.load %arg5[%c2_19, %c32_20] : memref<10x320xf32, #tpu.memory_space<vmem>>, vector<8x256xf32>
    %58 = vector.extract_strided_slice %6 {offsets = [7, 0], sizes = [1, 256], strides = [1, 1]} : vector<9x256xf32> to vector<1x256xf32>
    %59 = vector.shape_cast %58 : vector<1x256xf32> to vector<256xf32>
    %60 = vector.shape_cast %59 : vector<256xf32> to vector<1x256xf32>
    %61 = vector.broadcast %60 : vector<1x256xf32> to vector<8x256xf32>
    %62 = arith.mulf %57, %61 : vector<8x256xf32>
    %63 = arith.addf %56, %62 : vector<8x256xf32>
    %c2_21 = arith.constant 2 : index
    %c64_22 = arith.constant 64 : index
    %64 = vector.load %arg5[%c2_21, %c64_22] : memref<10x320xf32, #tpu.memory_space<vmem>>, vector<8x256xf32>
    %65 = vector.extract_strided_slice %6 {offsets = [8, 0], sizes = [1, 256], strides = [1, 1]} : vector<9x256xf32> to vector<1x256xf32>
    %66 = vector.shape_cast %65 : vector<1x256xf32> to vector<256xf32>
    %67 = vector.shape_cast %66 : vector<256xf32> to vector<1x256xf32>
    %68 = vector.broadcast %67 : vector<1x256xf32> to vector<8x256xf32>
    %69 = arith.mulf %64, %68 : vector<8x256xf32>
    %70 = arith.addf %63, %69 : vector<8x256xf32>
    %c0_23 = arith.constant 0 : index
    %c0_24 = arith.constant 0 : index
    %71 = vector.load %arg3[%c0_23, %c0_24] : memref<1x256xf32, #tpu.memory_space<vmem>>, vector<1x256xf32>
    %72 = vector.broadcast %71 : vector<1x256xf32> to vector<8x256xf32>
    %73 = arith.addf %70, %72 : vector<8x256xf32>
    %cst_25 = arith.constant 0.000000e+00 : f32
    %cst_26 = arith.constant 6.000000e+00 : f32
    %74 = vector.broadcast %cst_25 : f32 to vector<8x256xf32>
    %75 = arith.maximumf %74, %73 : vector<8x256xf32>
    %76 = vector.broadcast %cst_26 : f32 to vector<8x256xf32>
    %77 = arith.minimumf %76, %75 : vector<8x256xf32>
    %78 = arith.truncf %77 : vector<8x256xf32> to vector<8x256xbf16>
    %c0_27 = arith.constant 0 : index
    %c0_28 = arith.constant 0 : index
    %c0_29 = arith.constant 0 : index
    %79 = vector.load %arg4[%c0_27, %c0_28, %c0_29] : memref<1x8x256xbf16, #tpu.memory_space<vmem>>, vector<1x8x256xbf16>
    %80 = vector.shape_cast %79 : vector<1x8x256xbf16> to vector<8x256xbf16>
    %81 = vector.shape_cast %78 : vector<8x256xbf16> to vector<1x8x256xbf16>
    tpu.vector_store %arg4[%c0_27, %c0_28, %c0_29], %81 {strides = array<i32>} : memref<1x8x256xbf16, #tpu.memory_space<vmem>>, vector<1x8x256xbf16>,
    return
  }
  func.func @transform_0(%arg0: i32) -> (i32, i32, i32) {
    %c0_i32 = arith.constant 0 : i32
    %c0_i32_0 = arith.constant 0 : i32
    %c0_i32_1 = arith.constant 0 : i32
    return %arg0, %c0_i32, %c0_i32_0 : i32, i32, i32
  }
  func.func @transform_1(%arg0: i32) -> (i32, i32) {
    %c0_i32 = arith.constant 0 : i32
    %c0_i32_0 = arith.constant 0 : i32
    %c0_i32_1 = arith.constant 0 : i32
    return %c0_i32, %c0_i32_0 : i32, i32
  }
  func.func @transform_2(%arg0: i32) -> (i32, i32) {
    %c0_i32 = arith.constant 0 : i32
    %c0_i32_0 = arith.constant 0 : i32
    %c0_i32_1 = arith.constant 0 : i32
    return %c0_i32, %c0_i32_0 : i32, i32
  }
  func.func @transform_3(%arg0: i32) -> (i32, i32, i32) {
    %c0_i32 = arith.constant 0 : i32
    %c0_i32_0 = arith.constant 0 : i32
    %c0_i32_1 = arith.constant 0 : i32
    return %arg0, %c0_i32, %c0_i32_0 : i32, i32, i32
  }
}

module attributes {stable_mosaic.version = 11 : i64} {
  func.func @_matmul_bias_act_kernel(%arg0: i32, %arg1: i32, %arg2: memref<128x32xbf16, #tpu.memory_space<vmem>>, %arg3: memref<32x32xbf16, #tpu.memory_space<vmem>>, %arg4: memref<1x32xf32, #tpu.memory_space<vmem>>, %arg5: memref<128x32xbf16, #tpu.memory_space<vmem>>) attributes {dimension_semantics = [#tpu.dimension_semantics<parallel>, #tpu.dimension_semantics<parallel>], iteration_bounds = array<i64: 1, 1>, scalar_prefetch = 0 : i64, scratch_operands = 0 : i64, tpu.core_type = #tpu.core_type<tc>, window_params = [{transform_indices = @transform_0, window_bounds = array<i64: 128, 32>}, {transform_indices = @transform_1, window_bounds = array<i64: 32, 32>}, {transform_indices = @transform_2, window_bounds = array<i64: 1, 32>}, {transform_indices = @transform_3, window_bounds = array<i64: 128, 32>}]} {
    %c0 = arith.constant 0 : index
    %c0_0 = arith.constant 0 : index
    %0 = vector.load %arg2[%c0, %c0_0] : memref<128x32xbf16, #tpu.memory_space<vmem>>, vector<128x32xbf16>
    %c0_1 = arith.constant 0 : index
    %c0_2 = arith.constant 0 : index
    %1 = vector.load %arg3[%c0_1, %c0_2] : memref<32x32xbf16, #tpu.memory_space<vmem>>, vector<32x32xbf16>
    %cst = arith.constant dense<0.000000e+00> : vector<128x32xf32>
    %2 = tpu.matmul %0, %1, %cst {dimension_numbers = #tpu.dot_dimension_numbers<[1], [0], [0], [1], [0, 0, 1, 1], [], []>} : vector<128x32xbf16>, vector<32x32xbf16>, vector<128x32xf32> -> vector<128x32xf32>
    %c0_3 = arith.constant 0 : index
    %c0_4 = arith.constant 0 : index
    %3 = vector.load %arg4[%c0_3, %c0_4] : memref<1x32xf32, #tpu.memory_space<vmem>>, vector<1x32xf32>
    %4 = vector.broadcast %3 : vector<1x32xf32> to vector<128x32xf32>
    %5 = arith.addf %2, %4 : vector<128x32xf32>
    %cst_5 = arith.constant 0.000000e+00 : f32
    %cst_6 = arith.constant 6.000000e+00 : f32
    %6 = vector.broadcast %cst_5 : f32 to vector<128x32xf32>
    %7 = arith.maximumf %6, %5 : vector<128x32xf32>
    %8 = vector.broadcast %cst_6 : f32 to vector<128x32xf32>
    %9 = arith.minimumf %8, %7 : vector<128x32xf32>
    %10 = arith.truncf %9 : vector<128x32xf32> to vector<128x32xbf16>
    %c0_7 = arith.constant 0 : index
    %c0_8 = arith.constant 0 : index
    %11 = vector.load %arg5[%c0_7, %c0_8] : memref<128x32xbf16, #tpu.memory_space<vmem>>, vector<128x32xbf16>
    tpu.vector_store %arg5[%c0_7, %c0_8], %10 {strides = array<i32>} : memref<128x32xbf16, #tpu.memory_space<vmem>>, vector<128x32xbf16>,
    return
  }
  func.func @transform_0(%arg0: i32, %arg1: i32) -> (i32, i32) {
    %c0_i32 = arith.constant 0 : i32
    %c0_i32_0 = arith.constant 0 : i32
    return %arg0, %c0_i32 : i32, i32
  }
  func.func @transform_1(%arg0: i32, %arg1: i32) -> (i32, i32) {
    %c0_i32 = arith.constant 0 : i32
    %c0_i32_0 = arith.constant 0 : i32
    return %c0_i32, %arg1 : i32, i32
  }
  func.func @transform_2(%arg0: i32, %arg1: i32) -> (i32, i32) {
    %c0_i32 = arith.constant 0 : i32
    %c0_i32_0 = arith.constant 0 : i32
    return %c0_i32, %arg1 : i32, i32
  }
  func.func @transform_3(%arg0: i32, %arg1: i32) -> (i32, i32) {
    %c0_i32 = arith.constant 0 : i32
    return %arg0, %arg1 : i32, i32
  }
}

module attributes {stable_mosaic.version = 11 : i64} {
  func.func @_dw_s1_kernel(%arg0: i32, %arg1: memref<1x4x256xbf16, #tpu.memory_space<vmem>>, %arg2: memref<9x256xf32, #tpu.memory_space<vmem>>, %arg3: memref<1x256xf32, #tpu.memory_space<vmem>>, %arg4: memref<1x4x256xbf16, #tpu.memory_space<vmem>>, %arg5: memref<6x384xf32, #tpu.memory_space<vmem>>) attributes {dimension_semantics = [#tpu.dimension_semantics<parallel>], iteration_bounds = array<i64: 2>, scalar_prefetch = 0 : i64, scratch_operands = 1 : i64, tpu.core_type = #tpu.core_type<tc>, window_params = [{transform_indices = @transform_0, window_bounds = array<i64: 1, 4, 256>}, {pipeline_mode = #tpu.pipeline_mode<synchronous>, transform_indices = @transform_1, window_bounds = array<i64: 9, 256>}, {pipeline_mode = #tpu.pipeline_mode<synchronous>, transform_indices = @transform_2, window_bounds = array<i64: 1, 256>}, {transform_indices = @transform_3, window_bounds = array<i64: 1, 4, 256>}]} {
    %cst = arith.constant 0.000000e+00 : f32
    %0 = vector.broadcast %cst : f32 to vector<6x384xf32>
    %c0 = arith.constant 0 : index
    %c0_0 = arith.constant 0 : index
    %1 = vector.load %arg5[%c0, %c0_0] : memref<6x384xf32, #tpu.memory_space<vmem>>, vector<6x384xf32>
    tpu.vector_store %arg5[%c0, %c0_0], %0 {strides = array<i32>} : memref<6x384xf32, #tpu.memory_space<vmem>>, vector<6x384xf32>,
    %c0_1 = arith.constant 0 : index
    %c0_2 = arith.constant 0 : index
    %c0_3 = arith.constant 0 : index
    %2 = vector.load %arg1[%c0_1, %c0_2, %c0_3] : memref<1x4x256xbf16, #tpu.memory_space<vmem>>, vector<1x4x256xbf16>
    %3 = vector.shape_cast %2 : vector<1x4x256xbf16> to vector<4x256xbf16>
    %4 = arith.extf %3 : vector<4x256xbf16> to vector<4x256xf32>
    %c1 = arith.constant 1 : index
    %c64 = arith.constant 64 : index
    %5 = vector.load %arg5[%c1, %c64] : memref<6x384xf32, #tpu.memory_space<vmem>>, vector<4x256xf32>
    tpu.vector_store %arg5[%c1, %c64], %4 {strides = array<i32>} : memref<6x384xf32, #tpu.memory_space<vmem>>, vector<4x256xf32>,
    %c0_4 = arith.constant 0 : index
    %c0_5 = arith.constant 0 : index
    %6 = vector.load %arg2[%c0_4, %c0_5] : memref<9x256xf32, #tpu.memory_space<vmem>>, vector<9x256xf32>
    %cst_6 = arith.constant 0.000000e+00 : f32
    %7 = vector.broadcast %cst_6 : f32 to vector<4x256xf32>
    %c0_7 = arith.constant 0 : index
    %c0_8 = arith.constant 0 : index
    %8 = vector.load %arg5[%c0_7, %c0_8] : memref<6x384xf32, #tpu.memory_space<vmem>>, vector<4x256xf32>
    %9 = vector.extract_strided_slice %6 {offsets = [0, 0], sizes = [1, 256], strides = [1, 1]} : vector<9x256xf32> to vector<1x256xf32>
    %10 = vector.shape_cast %9 : vector<1x256xf32> to vector<256xf32>
    %11 = vector.shape_cast %10 : vector<256xf32> to vector<1x256xf32>
    %12 = vector.broadcast %11 : vector<1x256xf32> to vector<4x256xf32>
    %13 = arith.mulf %8, %12 : vector<4x256xf32>
    %14 = arith.addf %7, %13 : vector<4x256xf32>
    %c0_9 = arith.constant 0 : index
    %c64_10 = arith.constant 64 : index
    %15 = vector.load %arg5[%c0_9, %c64_10] : memref<6x384xf32, #tpu.memory_space<vmem>>, vector<4x256xf32>
    %16 = vector.extract_strided_slice %6 {offsets = [1, 0], sizes = [1, 256], strides = [1, 1]} : vector<9x256xf32> to vector<1x256xf32>
    %17 = vector.shape_cast %16 : vector<1x256xf32> to vector<256xf32>
    %18 = vector.shape_cast %17 : vector<256xf32> to vector<1x256xf32>
    %19 = vector.broadcast %18 : vector<1x256xf32> to vector<4x256xf32>
    %20 = arith.mulf %15, %19 : vector<4x256xf32>
    %21 = arith.addf %14, %20 : vector<4x256xf32>
    %c0_11 = arith.constant 0 : index
    %c128 = arith.constant 128 : index
    %22 = vector.load %arg5[%c0_11, %c128] : memref<6x384xf32, #tpu.memory_space<vmem>>, vector<4x256xf32>
    %23 = vector.extract_strided_slice %6 {offsets = [2, 0], sizes = [1, 256], strides = [1, 1]} : vector<9x256xf32> to vector<1x256xf32>
    %24 = vector.shape_cast %23 : vector<1x256xf32> to vector<256xf32>
    %25 = vector.shape_cast %24 : vector<256xf32> to vector<1x256xf32>
    %26 = vector.broadcast %25 : vector<1x256xf32> to vector<4x256xf32>
    %27 = arith.mulf %22, %26 : vector<4x256xf32>
    %28 = arith.addf %21, %27 : vector<4x256xf32>
    %c1_12 = arith.constant 1 : index
    %c0_13 = arith.constant 0 : index
    %29 = vector.load %arg5[%c1_12, %c0_13] : memref<6x384xf32, #tpu.memory_space<vmem>>, vector<4x256xf32>
    %30 = vector.extract_strided_slice %6 {offsets = [3, 0], sizes = [1, 256], strides = [1, 1]} : vector<9x256xf32> to vector<1x256xf32>
    %31 = vector.shape_cast %30 : vector<1x256xf32> to vector<256xf32>
    %32 = vector.shape_cast %31 : vector<256xf32> to vector<1x256xf32>
    %33 = vector.broadcast %32 : vector<1x256xf32> to vector<4x256xf32>
    %34 = arith.mulf %29, %33 : vector<4x256xf32>
    %35 = arith.addf %28, %34 : vector<4x256xf32>
    %c1_14 = arith.constant 1 : index
    %c64_15 = arith.constant 64 : index
    %36 = vector.load %arg5[%c1_14, %c64_15] : memref<6x384xf32, #tpu.memory_space<vmem>>, vector<4x256xf32>
    %37 = vector.extract_strided_slice %6 {offsets = [4, 0], sizes = [1, 256], strides = [1, 1]} : vector<9x256xf32> to vector<1x256xf32>
    %38 = vector.shape_cast %37 : vector<1x256xf32> to vector<256xf32>
    %39 = vector.shape_cast %38 : vector<256xf32> to vector<1x256xf32>
    %40 = vector.broadcast %39 : vector<1x256xf32> to vector<4x256xf32>
    %41 = arith.mulf %36, %40 : vector<4x256xf32>
    %42 = arith.addf %35, %41 : vector<4x256xf32>
    %c1_16 = arith.constant 1 : index
    %c128_17 = arith.constant 128 : index
    %43 = vector.load %arg5[%c1_16, %c128_17] : memref<6x384xf32, #tpu.memory_space<vmem>>, vector<4x256xf32>
    %44 = vector.extract_strided_slice %6 {offsets = [5, 0], sizes = [1, 256], strides = [1, 1]} : vector<9x256xf32> to vector<1x256xf32>
    %45 = vector.shape_cast %44 : vector<1x256xf32> to vector<256xf32>
    %46 = vector.shape_cast %45 : vector<256xf32> to vector<1x256xf32>
    %47 = vector.broadcast %46 : vector<1x256xf32> to vector<4x256xf32>
    %48 = arith.mulf %43, %47 : vector<4x256xf32>
    %49 = arith.addf %42, %48 : vector<4x256xf32>
    %c2 = arith.constant 2 : index
    %c0_18 = arith.constant 0 : index
    %50 = vector.load %arg5[%c2, %c0_18] : memref<6x384xf32, #tpu.memory_space<vmem>>, vector<4x256xf32>
    %51 = vector.extract_strided_slice %6 {offsets = [6, 0], sizes = [1, 256], strides = [1, 1]} : vector<9x256xf32> to vector<1x256xf32>
    %52 = vector.shape_cast %51 : vector<1x256xf32> to vector<256xf32>
    %53 = vector.shape_cast %52 : vector<256xf32> to vector<1x256xf32>
    %54 = vector.broadcast %53 : vector<1x256xf32> to vector<4x256xf32>
    %55 = arith.mulf %50, %54 : vector<4x256xf32>
    %56 = arith.addf %49, %55 : vector<4x256xf32>
    %c2_19 = arith.constant 2 : index
    %c64_20 = arith.constant 64 : index
    %57 = vector.load %arg5[%c2_19, %c64_20] : memref<6x384xf32, #tpu.memory_space<vmem>>, vector<4x256xf32>
    %58 = vector.extract_strided_slice %6 {offsets = [7, 0], sizes = [1, 256], strides = [1, 1]} : vector<9x256xf32> to vector<1x256xf32>
    %59 = vector.shape_cast %58 : vector<1x256xf32> to vector<256xf32>
    %60 = vector.shape_cast %59 : vector<256xf32> to vector<1x256xf32>
    %61 = vector.broadcast %60 : vector<1x256xf32> to vector<4x256xf32>
    %62 = arith.mulf %57, %61 : vector<4x256xf32>
    %63 = arith.addf %56, %62 : vector<4x256xf32>
    %c2_21 = arith.constant 2 : index
    %c128_22 = arith.constant 128 : index
    %64 = vector.load %arg5[%c2_21, %c128_22] : memref<6x384xf32, #tpu.memory_space<vmem>>, vector<4x256xf32>
    %65 = vector.extract_strided_slice %6 {offsets = [8, 0], sizes = [1, 256], strides = [1, 1]} : vector<9x256xf32> to vector<1x256xf32>
    %66 = vector.shape_cast %65 : vector<1x256xf32> to vector<256xf32>
    %67 = vector.shape_cast %66 : vector<256xf32> to vector<1x256xf32>
    %68 = vector.broadcast %67 : vector<1x256xf32> to vector<4x256xf32>
    %69 = arith.mulf %64, %68 : vector<4x256xf32>
    %70 = arith.addf %63, %69 : vector<4x256xf32>
    %c0_23 = arith.constant 0 : index
    %c0_24 = arith.constant 0 : index
    %71 = vector.load %arg3[%c0_23, %c0_24] : memref<1x256xf32, #tpu.memory_space<vmem>>, vector<1x256xf32>
    %72 = vector.broadcast %71 : vector<1x256xf32> to vector<4x256xf32>
    %73 = arith.addf %70, %72 : vector<4x256xf32>
    %cst_25 = arith.constant 0.000000e+00 : f32
    %cst_26 = arith.constant 6.000000e+00 : f32
    %74 = vector.broadcast %cst_25 : f32 to vector<4x256xf32>
    %75 = arith.maximumf %74, %73 : vector<4x256xf32>
    %76 = vector.broadcast %cst_26 : f32 to vector<4x256xf32>
    %77 = arith.minimumf %76, %75 : vector<4x256xf32>
    %78 = arith.truncf %77 : vector<4x256xf32> to vector<4x256xbf16>
    %c0_27 = arith.constant 0 : index
    %c0_28 = arith.constant 0 : index
    %c0_29 = arith.constant 0 : index
    %79 = vector.load %arg4[%c0_27, %c0_28, %c0_29] : memref<1x4x256xbf16, #tpu.memory_space<vmem>>, vector<1x4x256xbf16>
    %80 = vector.shape_cast %79 : vector<1x4x256xbf16> to vector<4x256xbf16>
    %81 = vector.shape_cast %78 : vector<4x256xbf16> to vector<1x4x256xbf16>
    tpu.vector_store %arg4[%c0_27, %c0_28, %c0_29], %81 {strides = array<i32>} : memref<1x4x256xbf16, #tpu.memory_space<vmem>>, vector<1x4x256xbf16>,
    return
  }
  func.func @transform_0(%arg0: i32) -> (i32, i32, i32) {
    %c0_i32 = arith.constant 0 : i32
    %c0_i32_0 = arith.constant 0 : i32
    %c0_i32_1 = arith.constant 0 : i32
    return %arg0, %c0_i32, %c0_i32_0 : i32, i32, i32
  }
  func.func @transform_1(%arg0: i32) -> (i32, i32) {
    %c0_i32 = arith.constant 0 : i32
    %c0_i32_0 = arith.constant 0 : i32
    %c0_i32_1 = arith.constant 0 : i32
    return %c0_i32, %c0_i32_0 : i32, i32
  }
  func.func @transform_2(%arg0: i32) -> (i32, i32) {
    %c0_i32 = arith.constant 0 : i32
    %c0_i32_0 = arith.constant 0 : i32
    %c0_i32_1 = arith.constant 0 : i32
    return %c0_i32, %c0_i32_0 : i32, i32
  }
  func.func @transform_3(%arg0: i32) -> (i32, i32, i32) {
    %c0_i32 = arith.constant 0 : i32
    %c0_i32_0 = arith.constant 0 : i32
    %c0_i32_1 = arith.constant 0 : i32
    return %arg0, %c0_i32, %c0_i32_0 : i32, i32, i32
  }
}

module attributes {stable_mosaic.version = 11 : i64} {
  func.func @_dw_s2_kernel(%arg0: i32, %arg1: memref<5x2x5x64xbf16, #tpu.memory_space<vmem>>, %arg2: memref<9x32xf32, #tpu.memory_space<vmem>>, %arg3: memref<1x32xf32, #tpu.memory_space<vmem>>, %arg4: memref<1x4x4x32xbf16, #tpu.memory_space<vmem>>) attributes {dimension_semantics = [#tpu.dimension_semantics<parallel>], iteration_bounds = array<i64: 2>, scalar_prefetch = 0 : i64, scratch_operands = 0 : i64, tpu.core_type = #tpu.core_type<tc>, window_params = [{transform_indices = @transform_0, window_bounds = array<i64: 5, 2, 5, 64>}, {pipeline_mode = #tpu.pipeline_mode<synchronous>, transform_indices = @transform_1, window_bounds = array<i64: 9, 32>}, {pipeline_mode = #tpu.pipeline_mode<synchronous>, transform_indices = @transform_2, window_bounds = array<i64: 1, 32>}, {transform_indices = @transform_3, window_bounds = array<i64: 1, 4, 4, 32>}]} {
    %c0 = arith.constant 0 : index
    %c0_0 = arith.constant 0 : index
    %0 = vector.load %arg2[%c0, %c0_0] : memref<9x32xf32, #tpu.memory_space<vmem>>, vector<9x32xf32>
    %cst = arith.constant 0.000000e+00 : f32
    %1 = vector.broadcast %cst : f32 to vector<4x4x32xf32>
    %c0_1 = arith.constant 0 : index
    %c0_2 = arith.constant 0 : index
    %c0_3 = arith.constant 0 : index
    %c0_4 = arith.constant 0 : index
    %2 = vector.load %arg1[%c0_1, %c0_2, %c0_3, %c0_4] : memref<5x2x5x64xbf16, #tpu.memory_space<vmem>>, vector<4x1x4x32xbf16>
    %3 = vector.shape_cast %2 : vector<4x1x4x32xbf16> to vector<4x4x32xbf16>
    %4 = arith.extf %3 : vector<4x4x32xbf16> to vector<4x4x32xf32>
    %5 = vector.extract_strided_slice %0 {offsets = [0, 0], sizes = [1, 32], strides = [1, 1]} : vector<9x32xf32> to vector<1x32xf32>
    %6 = vector.shape_cast %5 : vector<1x32xf32> to vector<32xf32>
    %7 = vector.shape_cast %6 : vector<32xf32> to vector<1x1x32xf32>
    %8 = vector.broadcast %7 : vector<1x1x32xf32> to vector<4x4x32xf32>
    %9 = arith.mulf %4, %8 : vector<4x4x32xf32>
    %10 = arith.addf %1, %9 : vector<4x4x32xf32>
    %c0_5 = arith.constant 0 : index
    %c0_6 = arith.constant 0 : index
    %c0_7 = arith.constant 0 : index
    %c32 = arith.constant 32 : index
    %11 = vector.load %arg1[%c0_5, %c0_6, %c0_7, %c32] : memref<5x2x5x64xbf16, #tpu.memory_space<vmem>>, vector<4x1x4x32xbf16>
    %12 = vector.shape_cast %11 : vector<4x1x4x32xbf16> to vector<4x4x32xbf16>
    %13 = arith.extf %12 : vector<4x4x32xbf16> to vector<4x4x32xf32>
    %14 = vector.extract_strided_slice %0 {offsets = [1, 0], sizes = [1, 32], strides = [1, 1]} : vector<9x32xf32> to vector<1x32xf32>
    %15 = vector.shape_cast %14 : vector<1x32xf32> to vector<32xf32>
    %16 = vector.shape_cast %15 : vector<32xf32> to vector<1x1x32xf32>
    %17 = vector.broadcast %16 : vector<1x1x32xf32> to vector<4x4x32xf32>
    %18 = arith.mulf %13, %17 : vector<4x4x32xf32>
    %19 = arith.addf %10, %18 : vector<4x4x32xf32>
    %c0_8 = arith.constant 0 : index
    %c0_9 = arith.constant 0 : index
    %c1 = arith.constant 1 : index
    %c0_10 = arith.constant 0 : index
    %20 = vector.load %arg1[%c0_8, %c0_9, %c1, %c0_10] : memref<5x2x5x64xbf16, #tpu.memory_space<vmem>>, vector<4x1x4x32xbf16>
    %21 = vector.shape_cast %20 : vector<4x1x4x32xbf16> to vector<4x4x32xbf16>
    %22 = arith.extf %21 : vector<4x4x32xbf16> to vector<4x4x32xf32>
    %23 = vector.extract_strided_slice %0 {offsets = [2, 0], sizes = [1, 32], strides = [1, 1]} : vector<9x32xf32> to vector<1x32xf32>
    %24 = vector.shape_cast %23 : vector<1x32xf32> to vector<32xf32>
    %25 = vector.shape_cast %24 : vector<32xf32> to vector<1x1x32xf32>
    %26 = vector.broadcast %25 : vector<1x1x32xf32> to vector<4x4x32xf32>
    %27 = arith.mulf %22, %26 : vector<4x4x32xf32>
    %28 = arith.addf %19, %27 : vector<4x4x32xf32>
    %c0_11 = arith.constant 0 : index
    %c1_12 = arith.constant 1 : index
    %c0_13 = arith.constant 0 : index
    %c0_14 = arith.constant 0 : index
    %29 = vector.load %arg1[%c0_11, %c1_12, %c0_13, %c0_14] : memref<5x2x5x64xbf16, #tpu.memory_space<vmem>>, vector<4x1x4x32xbf16>
    %30 = vector.shape_cast %29 : vector<4x1x4x32xbf16> to vector<4x4x32xbf16>
    %31 = arith.extf %30 : vector<4x4x32xbf16> to vector<4x4x32xf32>
    %32 = vector.extract_strided_slice %0 {offsets = [3, 0], sizes = [1, 32], strides = [1, 1]} : vector<9x32xf32> to vector<1x32xf32>
    %33 = vector.shape_cast %32 : vector<1x32xf32> to vector<32xf32>
    %34 = vector.shape_cast %33 : vector<32xf32> to vector<1x1x32xf32>
    %35 = vector.broadcast %34 : vector<1x1x32xf32> to vector<4x4x32xf32>
    %36 = arith.mulf %31, %35 : vector<4x4x32xf32>
    %37 = arith.addf %28, %36 : vector<4x4x32xf32>
    %c0_15 = arith.constant 0 : index
    %c1_16 = arith.constant 1 : index
    %c0_17 = arith.constant 0 : index
    %c32_18 = arith.constant 32 : index
    %38 = vector.load %arg1[%c0_15, %c1_16, %c0_17, %c32_18] : memref<5x2x5x64xbf16, #tpu.memory_space<vmem>>, vector<4x1x4x32xbf16>
    %39 = vector.shape_cast %38 : vector<4x1x4x32xbf16> to vector<4x4x32xbf16>
    %40 = arith.extf %39 : vector<4x4x32xbf16> to vector<4x4x32xf32>
    %41 = vector.extract_strided_slice %0 {offsets = [4, 0], sizes = [1, 32], strides = [1, 1]} : vector<9x32xf32> to vector<1x32xf32>
    %42 = vector.shape_cast %41 : vector<1x32xf32> to vector<32xf32>
    %43 = vector.shape_cast %42 : vector<32xf32> to vector<1x1x32xf32>
    %44 = vector.broadcast %43 : vector<1x1x32xf32> to vector<4x4x32xf32>
    %45 = arith.mulf %40, %44 : vector<4x4x32xf32>
    %46 = arith.addf %37, %45 : vector<4x4x32xf32>
    %c0_19 = arith.constant 0 : index
    %c1_20 = arith.constant 1 : index
    %c1_21 = arith.constant 1 : index
    %c0_22 = arith.constant 0 : index
    %47 = vector.load %arg1[%c0_19, %c1_20, %c1_21, %c0_22] : memref<5x2x5x64xbf16, #tpu.memory_space<vmem>>, vector<4x1x4x32xbf16>
    %48 = vector.shape_cast %47 : vector<4x1x4x32xbf16> to vector<4x4x32xbf16>
    %49 = arith.extf %48 : vector<4x4x32xbf16> to vector<4x4x32xf32>
    %50 = vector.extract_strided_slice %0 {offsets = [5, 0], sizes = [1, 32], strides = [1, 1]} : vector<9x32xf32> to vector<1x32xf32>
    %51 = vector.shape_cast %50 : vector<1x32xf32> to vector<32xf32>
    %52 = vector.shape_cast %51 : vector<32xf32> to vector<1x1x32xf32>
    %53 = vector.broadcast %52 : vector<1x1x32xf32> to vector<4x4x32xf32>
    %54 = arith.mulf %49, %53 : vector<4x4x32xf32>
    %55 = arith.addf %46, %54 : vector<4x4x32xf32>
    %c1_23 = arith.constant 1 : index
    %c0_24 = arith.constant 0 : index
    %c0_25 = arith.constant 0 : index
    %c0_26 = arith.constant 0 : index
    %56 = vector.load %arg1[%c1_23, %c0_24, %c0_25, %c0_26] : memref<5x2x5x64xbf16, #tpu.memory_space<vmem>>, vector<4x1x4x32xbf16>
    %57 = vector.shape_cast %56 : vector<4x1x4x32xbf16> to vector<4x4x32xbf16>
    %58 = arith.extf %57 : vector<4x4x32xbf16> to vector<4x4x32xf32>
    %59 = vector.extract_strided_slice %0 {offsets = [6, 0], sizes = [1, 32], strides = [1, 1]} : vector<9x32xf32> to vector<1x32xf32>
    %60 = vector.shape_cast %59 : vector<1x32xf32> to vector<32xf32>
    %61 = vector.shape_cast %60 : vector<32xf32> to vector<1x1x32xf32>
    %62 = vector.broadcast %61 : vector<1x1x32xf32> to vector<4x4x32xf32>
    %63 = arith.mulf %58, %62 : vector<4x4x32xf32>
    %64 = arith.addf %55, %63 : vector<4x4x32xf32>
    %c1_27 = arith.constant 1 : index
    %c0_28 = arith.constant 0 : index
    %c0_29 = arith.constant 0 : index
    %c32_30 = arith.constant 32 : index
    %65 = vector.load %arg1[%c1_27, %c0_28, %c0_29, %c32_30] : memref<5x2x5x64xbf16, #tpu.memory_space<vmem>>, vector<4x1x4x32xbf16>
    %66 = vector.shape_cast %65 : vector<4x1x4x32xbf16> to vector<4x4x32xbf16>
    %67 = arith.extf %66 : vector<4x4x32xbf16> to vector<4x4x32xf32>
    %68 = vector.extract_strided_slice %0 {offsets = [7, 0], sizes = [1, 32], strides = [1, 1]} : vector<9x32xf32> to vector<1x32xf32>
    %69 = vector.shape_cast %68 : vector<1x32xf32> to vector<32xf32>
    %70 = vector.shape_cast %69 : vector<32xf32> to vector<1x1x32xf32>
    %71 = vector.broadcast %70 : vector<1x1x32xf32> to vector<4x4x32xf32>
    %72 = arith.mulf %67, %71 : vector<4x4x32xf32>
    %73 = arith.addf %64, %72 : vector<4x4x32xf32>
    %c1_31 = arith.constant 1 : index
    %c0_32 = arith.constant 0 : index
    %c1_33 = arith.constant 1 : index
    %c0_34 = arith.constant 0 : index
    %74 = vector.load %arg1[%c1_31, %c0_32, %c1_33, %c0_34] : memref<5x2x5x64xbf16, #tpu.memory_space<vmem>>, vector<4x1x4x32xbf16>
    %75 = vector.shape_cast %74 : vector<4x1x4x32xbf16> to vector<4x4x32xbf16>
    %76 = arith.extf %75 : vector<4x4x32xbf16> to vector<4x4x32xf32>
    %77 = vector.extract_strided_slice %0 {offsets = [8, 0], sizes = [1, 32], strides = [1, 1]} : vector<9x32xf32> to vector<1x32xf32>
    %78 = vector.shape_cast %77 : vector<1x32xf32> to vector<32xf32>
    %79 = vector.shape_cast %78 : vector<32xf32> to vector<1x1x32xf32>
    %80 = vector.broadcast %79 : vector<1x1x32xf32> to vector<4x4x32xf32>
    %81 = arith.mulf %76, %80 : vector<4x4x32xf32>
    %82 = arith.addf %73, %81 : vector<4x4x32xf32>
    %c0_35 = arith.constant 0 : index
    %c0_36 = arith.constant 0 : index
    %83 = vector.load %arg3[%c0_35, %c0_36] : memref<1x32xf32, #tpu.memory_space<vmem>>, vector<1x32xf32>
    %84 = vector.shape_cast %83 : vector<1x32xf32> to vector<1x1x32xf32>
    %85 = vector.broadcast %84 : vector<1x1x32xf32> to vector<4x4x32xf32>
    %86 = arith.addf %82, %85 : vector<4x4x32xf32>
    %cst_37 = arith.constant 0.000000e+00 : f32
    %cst_38 = arith.constant 6.000000e+00 : f32
    %87 = vector.broadcast %cst_37 : f32 to vector<4x4x32xf32>
    %88 = arith.maximumf %87, %86 : vector<4x4x32xf32>
    %89 = vector.broadcast %cst_38 : f32 to vector<4x4x32xf32>
    %90 = arith.minimumf %89, %88 : vector<4x4x32xf32>
    %91 = arith.truncf %90 : vector<4x4x32xf32> to vector<4x4x32xbf16>
    %c0_39 = arith.constant 0 : index
    %c0_40 = arith.constant 0 : index
    %c0_41 = arith.constant 0 : index
    %c0_42 = arith.constant 0 : index
    %92 = vector.load %arg4[%c0_39, %c0_40, %c0_41, %c0_42] : memref<1x4x4x32xbf16, #tpu.memory_space<vmem>>, vector<1x4x4x32xbf16>
    %93 = vector.shape_cast %92 : vector<1x4x4x32xbf16> to vector<4x4x32xbf16>
    %94 = vector.shape_cast %91 : vector<4x4x32xbf16> to vector<1x4x4x32xbf16>
    tpu.vector_store %arg4[%c0_39, %c0_40, %c0_41, %c0_42], %94 {strides = array<i32>} : memref<1x4x4x32xbf16, #tpu.memory_space<vmem>>, vector<1x4x4x32xbf16>,
    return
  }
  func.func @transform_0(%arg0: i32) -> (i32, i32, i32, i32) {
    %c0_i32 = arith.constant 0 : i32
    %c0_i32_0 = arith.constant 0 : i32
    %c0_i32_1 = arith.constant 0 : i32
    %c0_i32_2 = arith.constant 0 : i32
    return %arg0, %c0_i32, %c0_i32_0, %c0_i32_1 : i32, i32, i32, i32
  }
  func.func @transform_1(%arg0: i32) -> (i32, i32) {
    %c0_i32 = arith.constant 0 : i32
    %c0_i32_0 = arith.constant 0 : i32
    %c0_i32_1 = arith.constant 0 : i32
    return %c0_i32, %c0_i32_0 : i32, i32
  }
  func.func @transform_2(%arg0: i32) -> (i32, i32) {
    %c0_i32 = arith.constant 0 : i32
    %c0_i32_0 = arith.constant 0 : i32
    %c0_i32_1 = arith.constant 0 : i32
    return %c0_i32, %c0_i32_0 : i32, i32
  }
  func.func @transform_3(%arg0: i32) -> (i32, i32, i32, i32) {
    %c0_i32 = arith.constant 0 : i32
    %c0_i32_0 = arith.constant 0 : i32
    %c0_i32_1 = arith.constant 0 : i32
    %c0_i32_2 = arith.constant 0 : i32
    return %arg0, %c0_i32, %c0_i32_0, %c0_i32_1 : i32, i32, i32, i32
  }
}

module attributes {stable_mosaic.version = 11 : i64} {
  func.func @_matmul_bias_act_kernel(%arg0: i32, %arg1: i32, %arg2: memref<32x32xbf16, #tpu.memory_space<vmem>>, %arg3: memref<32x64xbf16, #tpu.memory_space<vmem>>, %arg4: memref<1x64xf32, #tpu.memory_space<vmem>>, %arg5: memref<32x64xbf16, #tpu.memory_space<vmem>>) attributes {dimension_semantics = [#tpu.dimension_semantics<parallel>, #tpu.dimension_semantics<parallel>], iteration_bounds = array<i64: 1, 1>, scalar_prefetch = 0 : i64, scratch_operands = 0 : i64, tpu.core_type = #tpu.core_type<tc>, window_params = [{transform_indices = @transform_0, window_bounds = array<i64: 32, 32>}, {transform_indices = @transform_1, window_bounds = array<i64: 32, 64>}, {transform_indices = @transform_2, window_bounds = array<i64: 1, 64>}, {transform_indices = @transform_3, window_bounds = array<i64: 32, 64>}]} {
    %c0 = arith.constant 0 : index
    %c0_0 = arith.constant 0 : index
    %0 = vector.load %arg2[%c0, %c0_0] : memref<32x32xbf16, #tpu.memory_space<vmem>>, vector<32x32xbf16>
    %c0_1 = arith.constant 0 : index
    %c0_2 = arith.constant 0 : index
    %1 = vector.load %arg3[%c0_1, %c0_2] : memref<32x64xbf16, #tpu.memory_space<vmem>>, vector<32x64xbf16>
    %cst = arith.constant dense<0.000000e+00> : vector<32x64xf32>
    %2 = tpu.matmul %0, %1, %cst {dimension_numbers = #tpu.dot_dimension_numbers<[1], [0], [0], [1], [0, 0, 1, 1], [], []>} : vector<32x32xbf16>, vector<32x64xbf16>, vector<32x64xf32> -> vector<32x64xf32>
    %c0_3 = arith.constant 0 : index
    %c0_4 = arith.constant 0 : index
    %3 = vector.load %arg4[%c0_3, %c0_4] : memref<1x64xf32, #tpu.memory_space<vmem>>, vector<1x64xf32>
    %4 = vector.broadcast %3 : vector<1x64xf32> to vector<32x64xf32>
    %5 = arith.addf %2, %4 : vector<32x64xf32>
    %6 = arith.truncf %5 : vector<32x64xf32> to vector<32x64xbf16>
    %c0_5 = arith.constant 0 : index
    %c0_6 = arith.constant 0 : index
    %7 = vector.load %arg5[%c0_5, %c0_6] : memref<32x64xbf16, #tpu.memory_space<vmem>>, vector<32x64xbf16>
    tpu.vector_store %arg5[%c0_5, %c0_6], %6 {strides = array<i32>} : memref<32x64xbf16, #tpu.memory_space<vmem>>, vector<32x64xbf16>,
    return
  }
  func.func @transform_0(%arg0: i32, %arg1: i32) -> (i32, i32) {
    %c0_i32 = arith.constant 0 : i32
    %c0_i32_0 = arith.constant 0 : i32
    return %arg0, %c0_i32 : i32, i32
  }
  func.func @transform_1(%arg0: i32, %arg1: i32) -> (i32, i32) {
    %c0_i32 = arith.constant 0 : i32
    %c0_i32_0 = arith.constant 0 : i32
    return %c0_i32, %arg1 : i32, i32
  }
  func.func @transform_2(%arg0: i32, %arg1: i32) -> (i32, i32) {
    %c0_i32 = arith.constant 0 : i32
    %c0_i32_0 = arith.constant 0 : i32
    return %c0_i32, %arg1 : i32, i32
  }
  func.func @transform_3(%arg0: i32, %arg1: i32) -> (i32, i32) {
    %c0_i32 = arith.constant 0 : i32
    return %arg0, %arg1 : i32, i32
  }
}

module attributes {stable_mosaic.version = 11 : i64} {
  func.func @_matmul_bias_res_kernel(%arg0: i32, %arg1: i32, %arg2: memref<32x64xbf16, #tpu.memory_space<vmem>>, %arg3: memref<64x64xbf16, #tpu.memory_space<vmem>>, %arg4: memref<1x64xf32, #tpu.memory_space<vmem>>, %arg5: memref<32x64xbf16, #tpu.memory_space<vmem>>, %arg6: memref<32x64xbf16, #tpu.memory_space<vmem>>) attributes {dimension_semantics = [#tpu.dimension_semantics<parallel>, #tpu.dimension_semantics<parallel>], iteration_bounds = array<i64: 1, 1>, scalar_prefetch = 0 : i64, scratch_operands = 0 : i64, tpu.core_type = #tpu.core_type<tc>, window_params = [{transform_indices = @transform_0, window_bounds = array<i64: 32, 64>}, {transform_indices = @transform_1, window_bounds = array<i64: 64, 64>}, {transform_indices = @transform_2, window_bounds = array<i64: 1, 64>}, {transform_indices = @transform_3, window_bounds = array<i64: 32, 64>}, {transform_indices = @transform_4, window_bounds = array<i64: 32, 64>}]} {
    %c0 = arith.constant 0 : index
    %c0_0 = arith.constant 0 : index
    %0 = vector.load %arg2[%c0, %c0_0] : memref<32x64xbf16, #tpu.memory_space<vmem>>, vector<32x64xbf16>
    %c0_1 = arith.constant 0 : index
    %c0_2 = arith.constant 0 : index
    %1 = vector.load %arg3[%c0_1, %c0_2] : memref<64x64xbf16, #tpu.memory_space<vmem>>, vector<64x64xbf16>
    %cst = arith.constant dense<0.000000e+00> : vector<32x64xf32>
    %2 = tpu.matmul %0, %1, %cst {dimension_numbers = #tpu.dot_dimension_numbers<[1], [0], [0], [1], [0, 0, 1, 1], [], []>} : vector<32x64xbf16>, vector<64x64xbf16>, vector<32x64xf32> -> vector<32x64xf32>
    %c0_3 = arith.constant 0 : index
    %c0_4 = arith.constant 0 : index
    %3 = vector.load %arg4[%c0_3, %c0_4] : memref<1x64xf32, #tpu.memory_space<vmem>>, vector<1x64xf32>
    %4 = vector.broadcast %3 : vector<1x64xf32> to vector<32x64xf32>
    %5 = arith.addf %2, %4 : vector<32x64xf32>
    %c0_5 = arith.constant 0 : index
    %c0_6 = arith.constant 0 : index
    %6 = vector.load %arg5[%c0_5, %c0_6] : memref<32x64xbf16, #tpu.memory_space<vmem>>, vector<32x64xbf16>
    %7 = arith.extf %6 : vector<32x64xbf16> to vector<32x64xf32>
    %8 = arith.addf %5, %7 : vector<32x64xf32>
    %9 = arith.truncf %8 : vector<32x64xf32> to vector<32x64xbf16>
    %c0_7 = arith.constant 0 : index
    %c0_8 = arith.constant 0 : index
    %10 = vector.load %arg6[%c0_7, %c0_8] : memref<32x64xbf16, #tpu.memory_space<vmem>>, vector<32x64xbf16>
    tpu.vector_store %arg6[%c0_7, %c0_8], %9 {strides = array<i32>} : memref<32x64xbf16, #tpu.memory_space<vmem>>, vector<32x64xbf16>,
    return
  }
  func.func @transform_0(%arg0: i32, %arg1: i32) -> (i32, i32) {
    %c0_i32 = arith.constant 0 : i32
    %c0_i32_0 = arith.constant 0 : i32
    return %arg0, %c0_i32 : i32, i32
  }
  func.func @transform_1(%arg0: i32, %arg1: i32) -> (i32, i32) {
    %c0_i32 = arith.constant 0 : i32
    %c0_i32_0 = arith.constant 0 : i32
    return %c0_i32, %arg1 : i32, i32
  }
  func.func @transform_2(%arg0: i32, %arg1: i32) -> (i32, i32) {
    %c0_i32 = arith.constant 0 : i32
    %c0_i32_0 = arith.constant 0 : i32
    return %c0_i32, %arg1 : i32, i32
  }
  func.func @transform_3(%arg0: i32, %arg1: i32) -> (i32, i32) {
    %c0_i32 = arith.constant 0 : i32
    return %arg0, %arg1 : i32, i32
  }
  func.func @transform_4(%arg0: i32, %arg1: i32) -> (i32, i32) {
    %c0_i32 = arith.constant 0 : i32
    return %arg0, %arg1 : i32, i32
  }
}

module attributes {stable_mosaic.version = 11 : i64} {
  func.func @_matmul_bias_act_kernel(%arg0: i32, %arg1: i32, %arg2: memref<32x64xbf16, #tpu.memory_space<vmem>>, %arg3: memref<64x384xbf16, #tpu.memory_space<vmem>>, %arg4: memref<1x384xf32, #tpu.memory_space<vmem>>, %arg5: memref<32x384xbf16, #tpu.memory_space<vmem>>) attributes {dimension_semantics = [#tpu.dimension_semantics<parallel>, #tpu.dimension_semantics<parallel>], iteration_bounds = array<i64: 1, 1>, scalar_prefetch = 0 : i64, scratch_operands = 0 : i64, tpu.core_type = #tpu.core_type<tc>, window_params = [{transform_indices = @transform_0, window_bounds = array<i64: 32, 64>}, {transform_indices = @transform_1, window_bounds = array<i64: 64, 384>}, {transform_indices = @transform_2, window_bounds = array<i64: 1, 384>}, {transform_indices = @transform_3, window_bounds = array<i64: 32, 384>}]} {
    %c0 = arith.constant 0 : index
    %c0_0 = arith.constant 0 : index
    %0 = vector.load %arg2[%c0, %c0_0] : memref<32x64xbf16, #tpu.memory_space<vmem>>, vector<32x64xbf16>
    %c0_1 = arith.constant 0 : index
    %c0_2 = arith.constant 0 : index
    %1 = vector.load %arg3[%c0_1, %c0_2] : memref<64x384xbf16, #tpu.memory_space<vmem>>, vector<64x384xbf16>
    %cst = arith.constant dense<0.000000e+00> : vector<32x384xf32>
    %2 = tpu.matmul %0, %1, %cst {dimension_numbers = #tpu.dot_dimension_numbers<[1], [0], [0], [1], [0, 0, 1, 1], [], []>} : vector<32x64xbf16>, vector<64x384xbf16>, vector<32x384xf32> -> vector<32x384xf32>
    %c0_3 = arith.constant 0 : index
    %c0_4 = arith.constant 0 : index
    %3 = vector.load %arg4[%c0_3, %c0_4] : memref<1x384xf32, #tpu.memory_space<vmem>>, vector<1x384xf32>
    %4 = vector.broadcast %3 : vector<1x384xf32> to vector<32x384xf32>
    %5 = arith.addf %2, %4 : vector<32x384xf32>
    %cst_5 = arith.constant 0.000000e+00 : f32
    %cst_6 = arith.constant 6.000000e+00 : f32
    %6 = vector.broadcast %cst_5 : f32 to vector<32x384xf32>
    %7 = arith.maximumf %6, %5 : vector<32x384xf32>
    %8 = vector.broadcast %cst_6 : f32 to vector<32x384xf32>
    %9 = arith.minimumf %8, %7 : vector<32x384xf32>
    %10 = arith.truncf %9 : vector<32x384xf32> to vector<32x384xbf16>
    %c0_7 = arith.constant 0 : index
    %c0_8 = arith.constant 0 : index
    %11 = vector.load %arg5[%c0_7, %c0_8] : memref<32x384xbf16, #tpu.memory_space<vmem>>, vector<32x384xbf16>
    tpu.vector_store %arg5[%c0_7, %c0_8], %10 {strides = array<i32>} : memref<32x384xbf16, #tpu.memory_space<vmem>>, vector<32x384xbf16>,
    return
  }
  func.func @transform_0(%arg0: i32, %arg1: i32) -> (i32, i32) {
    %c0_i32 = arith.constant 0 : i32
    %c0_i32_0 = arith.constant 0 : i32
    return %arg0, %c0_i32 : i32, i32
  }
  func.func @transform_1(%arg0: i32, %arg1: i32) -> (i32, i32) {
    %c0_i32 = arith.constant 0 : i32
    %c0_i32_0 = arith.constant 0 : i32
    return %c0_i32, %arg1 : i32, i32
  }
  func.func @transform_2(%arg0: i32, %arg1: i32) -> (i32, i32) {
    %c0_i32 = arith.constant 0 : i32
    %c0_i32_0 = arith.constant 0 : i32
    return %c0_i32, %arg1 : i32, i32
  }
  func.func @transform_3(%arg0: i32, %arg1: i32) -> (i32, i32) {
    %c0_i32 = arith.constant 0 : i32
    return %arg0, %arg1 : i32, i32
  }
}

module attributes {stable_mosaic.version = 11 : i64} {
  func.func @_dw_s2_kernel(%arg0: i32, %arg1: memref<3x2x3x768xbf16, #tpu.memory_space<vmem>>, %arg2: memref<9x384xf32, #tpu.memory_space<vmem>>, %arg3: memref<1x384xf32, #tpu.memory_space<vmem>>, %arg4: memref<1x2x2x384xbf16, #tpu.memory_space<vmem>>) attributes {dimension_semantics = [#tpu.dimension_semantics<parallel>], iteration_bounds = array<i64: 2>, scalar_prefetch = 0 : i64, scratch_operands = 0 : i64, tpu.core_type = #tpu.core_type<tc>, window_params = [{transform_indices = @transform_0, window_bounds = array<i64: 3, 2, 3, 768>}, {pipeline_mode = #tpu.pipeline_mode<synchronous>, transform_indices = @transform_1, window_bounds = array<i64: 9, 384>}, {pipeline_mode = #tpu.pipeline_mode<synchronous>, transform_indices = @transform_2, window_bounds = array<i64: 1, 384>}, {transform_indices = @transform_3, window_bounds = array<i64: 1, 2, 2, 384>}]} {
    %c0 = arith.constant 0 : index
    %c0_0 = arith.constant 0 : index
    %0 = vector.load %arg2[%c0, %c0_0] : memref<9x384xf32, #tpu.memory_space<vmem>>, vector<9x384xf32>
    %cst = arith.constant 0.000000e+00 : f32
    %1 = vector.broadcast %cst : f32 to vector<2x2x384xf32>
    %c0_1 = arith.constant 0 : index
    %c0_2 = arith.constant 0 : index
    %c0_3 = arith.constant 0 : index
    %c0_4 = arith.constant 0 : index
    %2 = vector.load %arg1[%c0_1, %c0_2, %c0_3, %c0_4] : memref<3x2x3x768xbf16, #tpu.memory_space<vmem>>, vector<2x1x2x384xbf16>
    %3 = vector.shape_cast %2 : vector<2x1x2x384xbf16> to vector<2x2x384xbf16>
    %4 = arith.extf %3 : vector<2x2x384xbf16> to vector<2x2x384xf32>
    %5 = vector.extract_strided_slice %0 {offsets = [0, 0], sizes = [1, 384], strides = [1, 1]} : vector<9x384xf32> to vector<1x384xf32>
    %6 = vector.shape_cast %5 : vector<1x384xf32> to vector<384xf32>
    %7 = vector.shape_cast %6 : vector<384xf32> to vector<1x1x384xf32>
    %8 = vector.broadcast %7 : vector<1x1x384xf32> to vector<2x2x384xf32>
    %9 = arith.mulf %4, %8 : vector<2x2x384xf32>
    %10 = arith.addf %1, %9 : vector<2x2x384xf32>
    %c0_5 = arith.constant 0 : index
    %c0_6 = arith.constant 0 : index
    %c0_7 = arith.constant 0 : index
    %c384 = arith.constant 384 : index
    %11 = vector.load %arg1[%c0_5, %c0_6, %c0_7, %c384] : memref<3x2x3x768xbf16, #tpu.memory_space<vmem>>, vector<2x1x2x384xbf16>
    %12 = vector.shape_cast %11 : vector<2x1x2x384xbf16> to vector<2x2x384xbf16>
    %13 = arith.extf %12 : vector<2x2x384xbf16> to vector<2x2x384xf32>
    %14 = vector.extract_strided_slice %0 {offsets = [1, 0], sizes = [1, 384], strides = [1, 1]} : vector<9x384xf32> to vector<1x384xf32>
    %15 = vector.shape_cast %14 : vector<1x384xf32> to vector<384xf32>
    %16 = vector.shape_cast %15 : vector<384xf32> to vector<1x1x384xf32>
    %17 = vector.broadcast %16 : vector<1x1x384xf32> to vector<2x2x384xf32>
    %18 = arith.mulf %13, %17 : vector<2x2x384xf32>
    %19 = arith.addf %10, %18 : vector<2x2x384xf32>
    %c0_8 = arith.constant 0 : index
    %c0_9 = arith.constant 0 : index
    %c1 = arith.constant 1 : index
    %c0_10 = arith.constant 0 : index
    %20 = vector.load %arg1[%c0_8, %c0_9, %c1, %c0_10] : memref<3x2x3x768xbf16, #tpu.memory_space<vmem>>, vector<2x1x2x384xbf16>
    %21 = vector.shape_cast %20 : vector<2x1x2x384xbf16> to vector<2x2x384xbf16>
    %22 = arith.extf %21 : vector<2x2x384xbf16> to vector<2x2x384xf32>
    %23 = vector.extract_strided_slice %0 {offsets = [2, 0], sizes = [1, 384], strides = [1, 1]} : vector<9x384xf32> to vector<1x384xf32>
    %24 = vector.shape_cast %23 : vector<1x384xf32> to vector<384xf32>
    %25 = vector.shape_cast %24 : vector<384xf32> to vector<1x1x384xf32>
    %26 = vector.broadcast %25 : vector<1x1x384xf32> to vector<2x2x384xf32>
    %27 = arith.mulf %22, %26 : vector<2x2x384xf32>
    %28 = arith.addf %19, %27 : vector<2x2x384xf32>
    %c0_11 = arith.constant 0 : index
    %c1_12 = arith.constant 1 : index
    %c0_13 = arith.constant 0 : index
    %c0_14 = arith.constant 0 : index
    %29 = vector.load %arg1[%c0_11, %c1_12, %c0_13, %c0_14] : memref<3x2x3x768xbf16, #tpu.memory_space<vmem>>, vector<2x1x2x384xbf16>
    %30 = vector.shape_cast %29 : vector<2x1x2x384xbf16> to vector<2x2x384xbf16>
    %31 = arith.extf %30 : vector<2x2x384xbf16> to vector<2x2x384xf32>
    %32 = vector.extract_strided_slice %0 {offsets = [3, 0], sizes = [1, 384], strides = [1, 1]} : vector<9x384xf32> to vector<1x384xf32>
    %33 = vector.shape_cast %32 : vector<1x384xf32> to vector<384xf32>
    %34 = vector.shape_cast %33 : vector<384xf32> to vector<1x1x384xf32>
    %35 = vector.broadcast %34 : vector<1x1x384xf32> to vector<2x2x384xf32>
    %36 = arith.mulf %31, %35 : vector<2x2x384xf32>
    %37 = arith.addf %28, %36 : vector<2x2x384xf32>
    %c0_15 = arith.constant 0 : index
    %c1_16 = arith.constant 1 : index
    %c0_17 = arith.constant 0 : index
    %c384_18 = arith.constant 384 : index
    %38 = vector.load %arg1[%c0_15, %c1_16, %c0_17, %c384_18] : memref<3x2x3x768xbf16, #tpu.memory_space<vmem>>, vector<2x1x2x384xbf16>
    %39 = vector.shape_cast %38 : vector<2x1x2x384xbf16> to vector<2x2x384xbf16>
    %40 = arith.extf %39 : vector<2x2x384xbf16> to vector<2x2x384xf32>
    %41 = vector.extract_strided_slice %0 {offsets = [4, 0], sizes = [1, 384], strides = [1, 1]} : vector<9x384xf32> to vector<1x384xf32>
    %42 = vector.shape_cast %41 : vector<1x384xf32> to vector<384xf32>
    %43 = vector.shape_cast %42 : vector<384xf32> to vector<1x1x384xf32>
    %44 = vector.broadcast %43 : vector<1x1x384xf32> to vector<2x2x384xf32>
    %45 = arith.mulf %40, %44 : vector<2x2x384xf32>
    %46 = arith.addf %37, %45 : vector<2x2x384xf32>
    %c0_19 = arith.constant 0 : index
    %c1_20 = arith.constant 1 : index
    %c1_21 = arith.constant 1 : index
    %c0_22 = arith.constant 0 : index
    %47 = vector.load %arg1[%c0_19, %c1_20, %c1_21, %c0_22] : memref<3x2x3x768xbf16, #tpu.memory_space<vmem>>, vector<2x1x2x384xbf16>
    %48 = vector.shape_cast %47 : vector<2x1x2x384xbf16> to vector<2x2x384xbf16>
    %49 = arith.extf %48 : vector<2x2x384xbf16> to vector<2x2x384xf32>
    %50 = vector.extract_strided_slice %0 {offsets = [5, 0], sizes = [1, 384], strides = [1, 1]} : vector<9x384xf32> to vector<1x384xf32>
    %51 = vector.shape_cast %50 : vector<1x384xf32> to vector<384xf32>
    %52 = vector.shape_cast %51 : vector<384xf32> to vector<1x1x384xf32>
    %53 = vector.broadcast %52 : vector<1x1x384xf32> to vector<2x2x384xf32>
    %54 = arith.mulf %49, %53 : vector<2x2x384xf32>
    %55 = arith.addf %46, %54 : vector<2x2x384xf32>
    %c1_23 = arith.constant 1 : index
    %c0_24 = arith.constant 0 : index
    %c0_25 = arith.constant 0 : index
    %c0_26 = arith.constant 0 : index
    %56 = vector.load %arg1[%c1_23, %c0_24, %c0_25, %c0_26] : memref<3x2x3x768xbf16, #tpu.memory_space<vmem>>, vector<2x1x2x384xbf16>
    %57 = vector.shape_cast %56 : vector<2x1x2x384xbf16> to vector<2x2x384xbf16>
    %58 = arith.extf %57 : vector<2x2x384xbf16> to vector<2x2x384xf32>
    %59 = vector.extract_strided_slice %0 {offsets = [6, 0], sizes = [1, 384], strides = [1, 1]} : vector<9x384xf32> to vector<1x384xf32>
    %60 = vector.shape_cast %59 : vector<1x384xf32> to vector<384xf32>
    %61 = vector.shape_cast %60 : vector<384xf32> to vector<1x1x384xf32>
    %62 = vector.broadcast %61 : vector<1x1x384xf32> to vector<2x2x384xf32>
    %63 = arith.mulf %58, %62 : vector<2x2x384xf32>
    %64 = arith.addf %55, %63 : vector<2x2x384xf32>
    %c1_27 = arith.constant 1 : index
    %c0_28 = arith.constant 0 : index
    %c0_29 = arith.constant 0 : index
    %c384_30 = arith.constant 384 : index
    %65 = vector.load %arg1[%c1_27, %c0_28, %c0_29, %c384_30] : memref<3x2x3x768xbf16, #tpu.memory_space<vmem>>, vector<2x1x2x384xbf16>
    %66 = vector.shape_cast %65 : vector<2x1x2x384xbf16> to vector<2x2x384xbf16>
    %67 = arith.extf %66 : vector<2x2x384xbf16> to vector<2x2x384xf32>
    %68 = vector.extract_strided_slice %0 {offsets = [7, 0], sizes = [1, 384], strides = [1, 1]} : vector<9x384xf32> to vector<1x384xf32>
    %69 = vector.shape_cast %68 : vector<1x384xf32> to vector<384xf32>
    %70 = vector.shape_cast %69 : vector<384xf32> to vector<1x1x384xf32>
    %71 = vector.broadcast %70 : vector<1x1x384xf32> to vector<2x2x384xf32>
    %72 = arith.mulf %67, %71 : vector<2x2x384xf32>
    %73 = arith.addf %64, %72 : vector<2x2x384xf32>
    %c1_31 = arith.constant 1 : index
    %c0_32 = arith.constant 0 : index
    %c1_33 = arith.constant 1 : index
    %c0_34 = arith.constant 0 : index
    %74 = vector.load %arg1[%c1_31, %c0_32, %c1_33, %c0_34] : memref<3x2x3x768xbf16, #tpu.memory_space<vmem>>, vector<2x1x2x384xbf16>
    %75 = vector.shape_cast %74 : vector<2x1x2x384xbf16> to vector<2x2x384xbf16>
    %76 = arith.extf %75 : vector<2x2x384xbf16> to vector<2x2x384xf32>
    %77 = vector.extract_strided_slice %0 {offsets = [8, 0], sizes = [1, 384], strides = [1, 1]} : vector<9x384xf32> to vector<1x384xf32>
    %78 = vector.shape_cast %77 : vector<1x384xf32> to vector<384xf32>
    %79 = vector.shape_cast %78 : vector<384xf32> to vector<1x1x384xf32>
    %80 = vector.broadcast %79 : vector<1x1x384xf32> to vector<2x2x384xf32>
    %81 = arith.mulf %76, %80 : vector<2x2x384xf32>
    %82 = arith.addf %73, %81 : vector<2x2x384xf32>
    %c0_35 = arith.constant 0 : index
    %c0_36 = arith.constant 0 : index
    %83 = vector.load %arg3[%c0_35, %c0_36] : memref<1x384xf32, #tpu.memory_space<vmem>>, vector<1x384xf32>
    %84 = vector.shape_cast %83 : vector<1x384xf32> to vector<1x1x384xf32>
    %85 = vector.broadcast %84 : vector<1x1x384xf32> to vector<2x2x384xf32>
    %86 = arith.addf %82, %85 : vector<2x2x384xf32>
    %cst_37 = arith.constant 0.000000e+00 : f32
    %cst_38 = arith.constant 6.000000e+00 : f32
    %87 = vector.broadcast %cst_37 : f32 to vector<2x2x384xf32>
    %88 = arith.maximumf %87, %86 : vector<2x2x384xf32>
    %89 = vector.broadcast %cst_38 : f32 to vector<2x2x384xf32>
    %90 = arith.minimumf %89, %88 : vector<2x2x384xf32>
    %91 = arith.truncf %90 : vector<2x2x384xf32> to vector<2x2x384xbf16>
    %c0_39 = arith.constant 0 : index
    %c0_40 = arith.constant 0 : index
    %c0_41 = arith.constant 0 : index
    %c0_42 = arith.constant 0 : index
    %92 = vector.load %arg4[%c0_39, %c0_40, %c0_41, %c0_42] : memref<1x2x2x384xbf16, #tpu.memory_space<vmem>>, vector<1x2x2x384xbf16>
    %93 = vector.shape_cast %92 : vector<1x2x2x384xbf16> to vector<2x2x384xbf16>
    %94 = vector.shape_cast %91 : vector<2x2x384xbf16> to vector<1x2x2x384xbf16>
    tpu.vector_store %arg4[%c0_39, %c0_40, %c0_41, %c0_42], %94 {strides = array<i32>} : memref<1x2x2x384xbf16, #tpu.memory_space<vmem>>, vector<1x2x2x384xbf16>,
    return
  }
  func.func @transform_0(%arg0: i32) -> (i32, i32, i32, i32) {
    %c0_i32 = arith.constant 0 : i32
    %c0_i32_0 = arith.constant 0 : i32
    %c0_i32_1 = arith.constant 0 : i32
    %c0_i32_2 = arith.constant 0 : i32
    return %arg0, %c0_i32, %c0_i32_0, %c0_i32_1 : i32, i32, i32, i32
  }
  func.func @transform_1(%arg0: i32) -> (i32, i32) {
    %c0_i32 = arith.constant 0 : i32
    %c0_i32_0 = arith.constant 0 : i32
    %c0_i32_1 = arith.constant 0 : i32
    return %c0_i32, %c0_i32_0 : i32, i32
  }
  func.func @transform_2(%arg0: i32) -> (i32, i32) {
    %c0_i32 = arith.constant 0 : i32
    %c0_i32_0 = arith.constant 0 : i32
    %c0_i32_1 = arith.constant 0 : i32
    return %c0_i32, %c0_i32_0 : i32, i32
  }
  func.func @transform_3(%arg0: i32) -> (i32, i32, i32, i32) {
    %c0_i32 = arith.constant 0 : i32
    %c0_i32_0 = arith.constant 0 : i32
    %c0_i32_1 = arith.constant 0 : i32
    %c0_i32_2 = arith.constant 0 : i32
    return %arg0, %c0_i32, %c0_i32_0, %c0_i32_1 : i32, i32, i32, i32
  }
}

module attributes {stable_mosaic.version = 11 : i64} {
  func.func @_matmul_bias_act_kernel(%arg0: i32, %arg1: i32, %arg2: memref<8x128xbf16, #tpu.memory_space<vmem>>, %arg3: memref<128x384xbf16, #tpu.memory_space<vmem>>, %arg4: memref<1x384xf32, #tpu.memory_space<vmem>>, %arg5: memref<8x384xbf16, #tpu.memory_space<vmem>>) attributes {dimension_semantics = [#tpu.dimension_semantics<parallel>, #tpu.dimension_semantics<parallel>], iteration_bounds = array<i64: 1, 2>, scalar_prefetch = 0 : i64, scratch_operands = 0 : i64, tpu.core_type = #tpu.core_type<tc>, window_params = [{transform_indices = @transform_0, window_bounds = array<i64: 8, 128>}, {transform_indices = @transform_1, window_bounds = array<i64: 128, 384>}, {transform_indices = @transform_2, window_bounds = array<i64: 1, 384>}, {transform_indices = @transform_3, window_bounds = array<i64: 8, 384>}]} {
    %c0 = arith.constant 0 : index
    %c0_0 = arith.constant 0 : index
    %0 = vector.load %arg2[%c0, %c0_0] : memref<8x128xbf16, #tpu.memory_space<vmem>>, vector<8x128xbf16>
    %c0_1 = arith.constant 0 : index
    %c0_2 = arith.constant 0 : index
    %1 = vector.load %arg3[%c0_1, %c0_2] : memref<128x384xbf16, #tpu.memory_space<vmem>>, vector<128x384xbf16>
    %cst = arith.constant dense<0.000000e+00> : vector<8x384xf32>
    %2 = tpu.matmul %0, %1, %cst {dimension_numbers = #tpu.dot_dimension_numbers<[1], [0], [0], [1], [0, 0, 1, 1], [], []>} : vector<8x128xbf16>, vector<128x384xbf16>, vector<8x384xf32> -> vector<8x384xf32>
    %c0_3 = arith.constant 0 : index
    %c0_4 = arith.constant 0 : index
    %3 = vector.load %arg4[%c0_3, %c0_4] : memref<1x384xf32, #tpu.memory_space<vmem>>, vector<1x384xf32>
    %4 = vector.broadcast %3 : vector<1x384xf32> to vector<8x384xf32>
    %5 = arith.addf %2, %4 : vector<8x384xf32>
    %cst_5 = arith.constant 0.000000e+00 : f32
    %cst_6 = arith.constant 6.000000e+00 : f32
    %6 = vector.broadcast %cst_5 : f32 to vector<8x384xf32>
    %7 = arith.maximumf %6, %5 : vector<8x384xf32>
    %8 = vector.broadcast %cst_6 : f32 to vector<8x384xf32>
    %9 = arith.minimumf %8, %7 : vector<8x384xf32>
    %10 = arith.truncf %9 : vector<8x384xf32> to vector<8x384xbf16>
    %c0_7 = arith.constant 0 : index
    %c0_8 = arith.constant 0 : index
    %11 = vector.load %arg5[%c0_7, %c0_8] : memref<8x384xbf16, #tpu.memory_space<vmem>>, vector<8x384xbf16>
    tpu.vector_store %arg5[%c0_7, %c0_8], %10 {strides = array<i32>} : memref<8x384xbf16, #tpu.memory_space<vmem>>, vector<8x384xbf16>,
    return
  }
  func.func @transform_0(%arg0: i32, %arg1: i32) -> (i32, i32) {
    %c0_i32 = arith.constant 0 : i32
    %c0_i32_0 = arith.constant 0 : i32
    return %arg0, %c0_i32 : i32, i32
  }
  func.func @transform_1(%arg0: i32, %arg1: i32) -> (i32, i32) {
    %c0_i32 = arith.constant 0 : i32
    %c0_i32_0 = arith.constant 0 : i32
    return %c0_i32, %arg1 : i32, i32
  }
  func.func @transform_2(%arg0: i32, %arg1: i32) -> (i32, i32) {
    %c0_i32 = arith.constant 0 : i32
    %c0_i32_0 = arith.constant 0 : i32
    return %c0_i32, %arg1 : i32, i32
  }
  func.func @transform_3(%arg0: i32, %arg1: i32) -> (i32, i32) {
    %c0_i32 = arith.constant 0 : i32
    return %arg0, %arg1 : i32, i32
  }
}

module attributes {stable_mosaic.version = 11 : i64} {
  func.func @_matmul_bias_act_kernel(%arg0: i32, %arg1: i32, %arg2: memref<8x384xbf16, #tpu.memory_space<vmem>>, %arg3: memref<384x128xbf16, #tpu.memory_space<vmem>>, %arg4: memref<1x128xf32, #tpu.memory_space<vmem>>, %arg5: memref<8x128xbf16, #tpu.memory_space<vmem>>) attributes {dimension_semantics = [#tpu.dimension_semantics<parallel>, #tpu.dimension_semantics<parallel>], iteration_bounds = array<i64: 1, 1>, scalar_prefetch = 0 : i64, scratch_operands = 0 : i64, tpu.core_type = #tpu.core_type<tc>, window_params = [{transform_indices = @transform_0, window_bounds = array<i64: 8, 384>}, {transform_indices = @transform_1, window_bounds = array<i64: 384, 128>}, {transform_indices = @transform_2, window_bounds = array<i64: 1, 128>}, {transform_indices = @transform_3, window_bounds = array<i64: 8, 128>}]} {
    %c0 = arith.constant 0 : index
    %c0_0 = arith.constant 0 : index
    %0 = vector.load %arg2[%c0, %c0_0] : memref<8x384xbf16, #tpu.memory_space<vmem>>, vector<8x384xbf16>
    %c0_1 = arith.constant 0 : index
    %c0_2 = arith.constant 0 : index
    %1 = vector.load %arg3[%c0_1, %c0_2] : memref<384x128xbf16, #tpu.memory_space<vmem>>, vector<384x128xbf16>
    %cst = arith.constant dense<0.000000e+00> : vector<8x128xf32>
    %2 = tpu.matmul %0, %1, %cst {dimension_numbers = #tpu.dot_dimension_numbers<[1], [0], [0], [1], [0, 0, 1, 1], [], []>} : vector<8x384xbf16>, vector<384x128xbf16>, vector<8x128xf32> -> vector<8x128xf32>
    %c0_3 = arith.constant 0 : index
    %c0_4 = arith.constant 0 : index
    %3 = vector.load %arg4[%c0_3, %c0_4] : memref<1x128xf32, #tpu.memory_space<vmem>>, vector<1x128xf32>
    %4 = vector.broadcast %3 : vector<1x128xf32> to vector<8x128xf32>
    %5 = arith.addf %2, %4 : vector<8x128xf32>
    %6 = arith.truncf %5 : vector<8x128xf32> to vector<8x128xbf16>
    %c0_5 = arith.constant 0 : index
    %c0_6 = arith.constant 0 : index
    %7 = vector.load %arg5[%c0_5, %c0_6] : memref<8x128xbf16, #tpu.memory_space<vmem>>, vector<8x128xbf16>
    tpu.vector_store %arg5[%c0_5, %c0_6], %6 {strides = array<i32>} : memref<8x128xbf16, #tpu.memory_space<vmem>>, vector<8x128xbf16>,
    return
  }
  func.func @transform_0(%arg0: i32, %arg1: i32) -> (i32, i32) {
    %c0_i32 = arith.constant 0 : i32
    %c0_i32_0 = arith.constant 0 : i32
    return %arg0, %c0_i32 : i32, i32
  }
  func.func @transform_1(%arg0: i32, %arg1: i32) -> (i32, i32) {
    %c0_i32 = arith.constant 0 : i32
    %c0_i32_0 = arith.constant 0 : i32
    return %c0_i32, %arg1 : i32, i32
  }
  func.func @transform_2(%arg0: i32, %arg1: i32) -> (i32, i32) {
    %c0_i32 = arith.constant 0 : i32
    %c0_i32_0 = arith.constant 0 : i32
    return %c0_i32, %arg1 : i32, i32
  }
  func.func @transform_3(%arg0: i32, %arg1: i32) -> (i32, i32) {
    %c0_i32 = arith.constant 0 : i32
    return %arg0, %arg1 : i32, i32
  }
}

module attributes {stable_mosaic.version = 11 : i64} {
  func.func @_matmul_bias_res_kernel(%arg0: i32, %arg1: i32, %arg2: memref<8x768xbf16, #tpu.memory_space<vmem>>, %arg3: memref<768x128xbf16, #tpu.memory_space<vmem>>, %arg4: memref<1x128xf32, #tpu.memory_space<vmem>>, %arg5: memref<8x128xbf16, #tpu.memory_space<vmem>>, %arg6: memref<8x128xbf16, #tpu.memory_space<vmem>>) attributes {dimension_semantics = [#tpu.dimension_semantics<parallel>, #tpu.dimension_semantics<parallel>], iteration_bounds = array<i64: 1, 1>, scalar_prefetch = 0 : i64, scratch_operands = 0 : i64, tpu.core_type = #tpu.core_type<tc>, window_params = [{transform_indices = @transform_0, window_bounds = array<i64: 8, 768>}, {transform_indices = @transform_1, window_bounds = array<i64: 768, 128>}, {transform_indices = @transform_2, window_bounds = array<i64: 1, 128>}, {transform_indices = @transform_3, window_bounds = array<i64: 8, 128>}, {transform_indices = @transform_4, window_bounds = array<i64: 8, 128>}]} {
    %c0 = arith.constant 0 : index
    %c0_0 = arith.constant 0 : index
    %0 = vector.load %arg2[%c0, %c0_0] : memref<8x768xbf16, #tpu.memory_space<vmem>>, vector<8x768xbf16>
    %c0_1 = arith.constant 0 : index
    %c0_2 = arith.constant 0 : index
    %1 = vector.load %arg3[%c0_1, %c0_2] : memref<768x128xbf16, #tpu.memory_space<vmem>>, vector<768x128xbf16>
    %cst = arith.constant dense<0.000000e+00> : vector<8x128xf32>
    %2 = tpu.matmul %0, %1, %cst {dimension_numbers = #tpu.dot_dimension_numbers<[1], [0], [0], [1], [0, 0, 1, 1], [], []>} : vector<8x768xbf16>, vector<768x128xbf16>, vector<8x128xf32> -> vector<8x128xf32>
    %c0_3 = arith.constant 0 : index
    %c0_4 = arith.constant 0 : index
    %3 = vector.load %arg4[%c0_3, %c0_4] : memref<1x128xf32, #tpu.memory_space<vmem>>, vector<1x128xf32>
    %4 = vector.broadcast %3 : vector<1x128xf32> to vector<8x128xf32>
    %5 = arith.addf %2, %4 : vector<8x128xf32>
    %c0_5 = arith.constant 0 : index
    %c0_6 = arith.constant 0 : index
    %6 = vector.load %arg5[%c0_5, %c0_6] : memref<8x128xbf16, #tpu.memory_space<vmem>>, vector<8x128xbf16>
    %7 = arith.extf %6 : vector<8x128xbf16> to vector<8x128xf32>
    %8 = arith.addf %5, %7 : vector<8x128xf32>
    %9 = arith.truncf %8 : vector<8x128xf32> to vector<8x128xbf16>
    %c0_7 = arith.constant 0 : index
    %c0_8 = arith.constant 0 : index
    %10 = vector.load %arg6[%c0_7, %c0_8] : memref<8x128xbf16, #tpu.memory_space<vmem>>, vector<8x128xbf16>
    tpu.vector_store %arg6[%c0_7, %c0_8], %9 {strides = array<i32>} : memref<8x128xbf16, #tpu.memory_space<vmem>>, vector<8x128xbf16>,
    return
  }
  func.func @transform_0(%arg0: i32, %arg1: i32) -> (i32, i32) {
    %c0_i32 = arith.constant 0 : i32
    %c0_i32_0 = arith.constant 0 : i32
    return %arg0, %c0_i32 : i32, i32
  }
  func.func @transform_1(%arg0: i32, %arg1: i32) -> (i32, i32) {
    %c0_i32 = arith.constant 0 : i32
    %c0_i32_0 = arith.constant 0 : i32
    return %c0_i32, %arg1 : i32, i32
  }
  func.func @transform_2(%arg0: i32, %arg1: i32) -> (i32, i32) {
    %c0_i32 = arith.constant 0 : i32
    %c0_i32_0 = arith.constant 0 : i32
    return %c0_i32, %arg1 : i32, i32
  }
  func.func @transform_3(%arg0: i32, %arg1: i32) -> (i32, i32) {
    %c0_i32 = arith.constant 0 : i32
    return %arg0, %arg1 : i32, i32
  }
  func.func @transform_4(%arg0: i32, %arg1: i32) -> (i32, i32) {
    %c0_i32 = arith.constant 0 : i32
    return %arg0, %arg1 : i32, i32
  }
}

module attributes {stable_mosaic.version = 11 : i64} {
  func.func @_dw_s1_kernel(%arg0: i32, %arg1: memref<1x2x1536xbf16, #tpu.memory_space<vmem>>, %arg2: memref<9x1536xf32, #tpu.memory_space<vmem>>, %arg3: memref<1x1536xf32, #tpu.memory_space<vmem>>, %arg4: memref<1x2x1536xbf16, #tpu.memory_space<vmem>>, %arg5: memref<4x3072xf32, #tpu.memory_space<vmem>>) attributes {dimension_semantics = [#tpu.dimension_semantics<parallel>], iteration_bounds = array<i64: 2>, scalar_prefetch = 0 : i64, scratch_operands = 1 : i64, tpu.core_type = #tpu.core_type<tc>, window_params = [{transform_indices = @transform_0, window_bounds = array<i64: 1, 2, 1536>}, {pipeline_mode = #tpu.pipeline_mode<synchronous>, transform_indices = @transform_1, window_bounds = array<i64: 9, 1536>}, {pipeline_mode = #tpu.pipeline_mode<synchronous>, transform_indices = @transform_2, window_bounds = array<i64: 1, 1536>}, {transform_indices = @transform_3, window_bounds = array<i64: 1, 2, 1536>}]} {
    %cst = arith.constant 0.000000e+00 : f32
    %0 = vector.broadcast %cst : f32 to vector<4x3072xf32>
    %c0 = arith.constant 0 : index
    %c0_0 = arith.constant 0 : index
    %1 = vector.load %arg5[%c0, %c0_0] : memref<4x3072xf32, #tpu.memory_space<vmem>>, vector<4x3072xf32>
    tpu.vector_store %arg5[%c0, %c0_0], %0 {strides = array<i32>} : memref<4x3072xf32, #tpu.memory_space<vmem>>, vector<4x3072xf32>,
    %c0_1 = arith.constant 0 : index
    %c0_2 = arith.constant 0 : index
    %c0_3 = arith.constant 0 : index
    %2 = vector.load %arg1[%c0_1, %c0_2, %c0_3] : memref<1x2x1536xbf16, #tpu.memory_space<vmem>>, vector<1x2x1536xbf16>
    %3 = vector.shape_cast %2 : vector<1x2x1536xbf16> to vector<2x1536xbf16>
    %4 = arith.extf %3 : vector<2x1536xbf16> to vector<2x1536xf32>
    %c1 = arith.constant 1 : index
    %c768 = arith.constant 768 : index
    %5 = vector.load %arg5[%c1, %c768] : memref<4x3072xf32, #tpu.memory_space<vmem>>, vector<2x1536xf32>
    tpu.vector_store %arg5[%c1, %c768], %4 {strides = array<i32>} : memref<4x3072xf32, #tpu.memory_space<vmem>>, vector<2x1536xf32>,
    %c0_4 = arith.constant 0 : index
    %c0_5 = arith.constant 0 : index
    %6 = vector.load %arg2[%c0_4, %c0_5] : memref<9x1536xf32, #tpu.memory_space<vmem>>, vector<9x1536xf32>
    %cst_6 = arith.constant 0.000000e+00 : f32
    %7 = vector.broadcast %cst_6 : f32 to vector<2x1536xf32>
    %c0_7 = arith.constant 0 : index
    %c0_8 = arith.constant 0 : index
    %8 = vector.load %arg5[%c0_7, %c0_8] : memref<4x3072xf32, #tpu.memory_space<vmem>>, vector<2x1536xf32>
    %9 = vector.extract_strided_slice %6 {offsets = [0, 0], sizes = [1, 1536], strides = [1, 1]} : vector<9x1536xf32> to vector<1x1536xf32>
    %10 = vector.shape_cast %9 : vector<1x1536xf32> to vector<1536xf32>
    %11 = vector.shape_cast %10 : vector<1536xf32> to vector<1x1536xf32>
    %12 = vector.broadcast %11 : vector<1x1536xf32> to vector<2x1536xf32>
    %13 = arith.mulf %8, %12 : vector<2x1536xf32>
    %14 = arith.addf %7, %13 : vector<2x1536xf32>
    %c0_9 = arith.constant 0 : index
    %c768_10 = arith.constant 768 : index
    %15 = vector.load %arg5[%c0_9, %c768_10] : memref<4x3072xf32, #tpu.memory_space<vmem>>, vector<2x1536xf32>
    %16 = vector.extract_strided_slice %6 {offsets = [1, 0], sizes = [1, 1536], strides = [1, 1]} : vector<9x1536xf32> to vector<1x1536xf32>
    %17 = vector.shape_cast %16 : vector<1x1536xf32> to vector<1536xf32>
    %18 = vector.shape_cast %17 : vector<1536xf32> to vector<1x1536xf32>
    %19 = vector.broadcast %18 : vector<1x1536xf32> to vector<2x1536xf32>
    %20 = arith.mulf %15, %19 : vector<2x1536xf32>
    %21 = arith.addf %14, %20 : vector<2x1536xf32>
    %c0_11 = arith.constant 0 : index
    %c1536 = arith.constant 1536 : index
    %22 = vector.load %arg5[%c0_11, %c1536] : memref<4x3072xf32, #tpu.memory_space<vmem>>, vector<2x1536xf32>
    %23 = vector.extract_strided_slice %6 {offsets = [2, 0], sizes = [1, 1536], strides = [1, 1]} : vector<9x1536xf32> to vector<1x1536xf32>
    %24 = vector.shape_cast %23 : vector<1x1536xf32> to vector<1536xf32>
    %25 = vector.shape_cast %24 : vector<1536xf32> to vector<1x1536xf32>
    %26 = vector.broadcast %25 : vector<1x1536xf32> to vector<2x1536xf32>
    %27 = arith.mulf %22, %26 : vector<2x1536xf32>
    %28 = arith.addf %21, %27 : vector<2x1536xf32>
    %c1_12 = arith.constant 1 : index
    %c0_13 = arith.constant 0 : index
    %29 = vector.load %arg5[%c1_12, %c0_13] : memref<4x3072xf32, #tpu.memory_space<vmem>>, vector<2x1536xf32>
    %30 = vector.extract_strided_slice %6 {offsets = [3, 0], sizes = [1, 1536], strides = [1, 1]} : vector<9x1536xf32> to vector<1x1536xf32>
    %31 = vector.shape_cast %30 : vector<1x1536xf32> to vector<1536xf32>
    %32 = vector.shape_cast %31 : vector<1536xf32> to vector<1x1536xf32>
    %33 = vector.broadcast %32 : vector<1x1536xf32> to vector<2x1536xf32>
    %34 = arith.mulf %29, %33 : vector<2x1536xf32>
    %35 = arith.addf %28, %34 : vector<2x1536xf32>
    %c1_14 = arith.constant 1 : index
    %c768_15 = arith.constant 768 : index
    %36 = vector.load %arg5[%c1_14, %c768_15] : memref<4x3072xf32, #tpu.memory_space<vmem>>, vector<2x1536xf32>
    %37 = vector.extract_strided_slice %6 {offsets = [4, 0], sizes = [1, 1536], strides = [1, 1]} : vector<9x1536xf32> to vector<1x1536xf32>
    %38 = vector.shape_cast %37 : vector<1x1536xf32> to vector<1536xf32>
    %39 = vector.shape_cast %38 : vector<1536xf32> to vector<1x1536xf32>
    %40 = vector.broadcast %39 : vector<1x1536xf32> to vector<2x1536xf32>
    %41 = arith.mulf %36, %40 : vector<2x1536xf32>
    %42 = arith.addf %35, %41 : vector<2x1536xf32>
    %c1_16 = arith.constant 1 : index
    %c1536_17 = arith.constant 1536 : index
    %43 = vector.load %arg5[%c1_16, %c1536_17] : memref<4x3072xf32, #tpu.memory_space<vmem>>, vector<2x1536xf32>
    %44 = vector.extract_strided_slice %6 {offsets = [5, 0], sizes = [1, 1536], strides = [1, 1]} : vector<9x1536xf32> to vector<1x1536xf32>
    %45 = vector.shape_cast %44 : vector<1x1536xf32> to vector<1536xf32>
    %46 = vector.shape_cast %45 : vector<1536xf32> to vector<1x1536xf32>
    %47 = vector.broadcast %46 : vector<1x1536xf32> to vector<2x1536xf32>
    %48 = arith.mulf %43, %47 : vector<2x1536xf32>
    %49 = arith.addf %42, %48 : vector<2x1536xf32>
    %c2 = arith.constant 2 : index
    %c0_18 = arith.constant 0 : index
    %50 = vector.load %arg5[%c2, %c0_18] : memref<4x3072xf32, #tpu.memory_space<vmem>>, vector<2x1536xf32>
    %51 = vector.extract_strided_slice %6 {offsets = [6, 0], sizes = [1, 1536], strides = [1, 1]} : vector<9x1536xf32> to vector<1x1536xf32>
    %52 = vector.shape_cast %51 : vector<1x1536xf32> to vector<1536xf32>
    %53 = vector.shape_cast %52 : vector<1536xf32> to vector<1x1536xf32>
    %54 = vector.broadcast %53 : vector<1x1536xf32> to vector<2x1536xf32>
    %55 = arith.mulf %50, %54 : vector<2x1536xf32>
    %56 = arith.addf %49, %55 : vector<2x1536xf32>
    %c2_19 = arith.constant 2 : index
    %c768_20 = arith.constant 768 : index
    %57 = vector.load %arg5[%c2_19, %c768_20] : memref<4x3072xf32, #tpu.memory_space<vmem>>, vector<2x1536xf32>
    %58 = vector.extract_strided_slice %6 {offsets = [7, 0], sizes = [1, 1536], strides = [1, 1]} : vector<9x1536xf32> to vector<1x1536xf32>
    %59 = vector.shape_cast %58 : vector<1x1536xf32> to vector<1536xf32>
    %60 = vector.shape_cast %59 : vector<1536xf32> to vector<1x1536xf32>
    %61 = vector.broadcast %60 : vector<1x1536xf32> to vector<2x1536xf32>
    %62 = arith.mulf %57, %61 : vector<2x1536xf32>
    %63 = arith.addf %56, %62 : vector<2x1536xf32>
    %c2_21 = arith.constant 2 : index
    %c1536_22 = arith.constant 1536 : index
    %64 = vector.load %arg5[%c2_21, %c1536_22] : memref<4x3072xf32, #tpu.memory_space<vmem>>, vector<2x1536xf32>
    %65 = vector.extract_strided_slice %6 {offsets = [8, 0], sizes = [1, 1536], strides = [1, 1]} : vector<9x1536xf32> to vector<1x1536xf32>
    %66 = vector.shape_cast %65 : vector<1x1536xf32> to vector<1536xf32>
    %67 = vector.shape_cast %66 : vector<1536xf32> to vector<1x1536xf32>
    %68 = vector.broadcast %67 : vector<1x1536xf32> to vector<2x1536xf32>
    %69 = arith.mulf %64, %68 : vector<2x1536xf32>
    %70 = arith.addf %63, %69 : vector<2x1536xf32>
    %c0_23 = arith.constant 0 : index
    %c0_24 = arith.constant 0 : index
    %71 = vector.load %arg3[%c0_23, %c0_24] : memref<1x1536xf32, #tpu.memory_space<vmem>>, vector<1x1536xf32>
    %72 = vector.broadcast %71 : vector<1x1536xf32> to vector<2x1536xf32>
    %73 = arith.addf %70, %72 : vector<2x1536xf32>
    %cst_25 = arith.constant 0.000000e+00 : f32
    %cst_26 = arith.constant 6.000000e+00 : f32
    %74 = vector.broadcast %cst_25 : f32 to vector<2x1536xf32>
    %75 = arith.maximumf %74, %73 : vector<2x1536xf32>
    %76 = vector.broadcast %cst_26 : f32 to vector<2x1536xf32>
    %77 = arith.minimumf %76, %75 : vector<2x1536xf32>
    %78 = arith.truncf %77 : vector<2x1536xf32> to vector<2x1536xbf16>
    %c0_27 = arith.constant 0 : index
    %c0_28 = arith.constant 0 : index
    %c0_29 = arith.constant 0 : index
    %79 = vector.load %arg4[%c0_27, %c0_28, %c0_29] : memref<1x2x1536xbf16, #tpu.memory_space<vmem>>, vector<1x2x1536xbf16>
    %80 = vector.shape_cast %79 : vector<1x2x1536xbf16> to vector<2x1536xbf16>
    %81 = vector.shape_cast %78 : vector<2x1536xbf16> to vector<1x2x1536xbf16>
    tpu.vector_store %arg4[%c0_27, %c0_28, %c0_29], %81 {strides = array<i32>} : memref<1x2x1536xbf16, #tpu.memory_space<vmem>>, vector<1x2x1536xbf16>,
    return
  }
  func.func @transform_0(%arg0: i32) -> (i32, i32, i32) {
    %c0_i32 = arith.constant 0 : i32
    %c0_i32_0 = arith.constant 0 : i32
    %c0_i32_1 = arith.constant 0 : i32
    return %arg0, %c0_i32, %c0_i32_0 : i32, i32, i32
  }
  func.func @transform_1(%arg0: i32) -> (i32, i32) {
    %c0_i32 = arith.constant 0 : i32
    %c0_i32_0 = arith.constant 0 : i32
    %c0_i32_1 = arith.constant 0 : i32
    return %c0_i32, %c0_i32_0 : i32, i32
  }
  func.func @transform_2(%arg0: i32) -> (i32, i32) {
    %c0_i32 = arith.constant 0 : i32
    %c0_i32_0 = arith.constant 0 : i32
    %c0_i32_1 = arith.constant 0 : i32
    return %c0_i32, %c0_i32_0 : i32, i32
  }
  func.func @transform_3(%arg0: i32) -> (i32, i32, i32) {
    %c0_i32 = arith.constant 0 : i32
    %c0_i32_0 = arith.constant 0 : i32
    %c0_i32_1 = arith.constant 0 : i32
    return %arg0, %c0_i32, %c0_i32_0 : i32, i32, i32
  }
}

module attributes {stable_mosaic.version = 11 : i64} {
  func.func @_matmul_bias_act_kernel(%arg0: i32, %arg1: i32, %arg2: memref<2x128xbf16, #tpu.memory_space<vmem>>, %arg3: memref<128x384xbf16, #tpu.memory_space<vmem>>, %arg4: memref<1x384xf32, #tpu.memory_space<vmem>>, %arg5: memref<2x384xbf16, #tpu.memory_space<vmem>>) attributes {dimension_semantics = [#tpu.dimension_semantics<parallel>, #tpu.dimension_semantics<parallel>], iteration_bounds = array<i64: 1, 2>, scalar_prefetch = 0 : i64, scratch_operands = 0 : i64, tpu.core_type = #tpu.core_type<tc>, window_params = [{transform_indices = @transform_0, window_bounds = array<i64: 2, 128>}, {transform_indices = @transform_1, window_bounds = array<i64: 128, 384>}, {transform_indices = @transform_2, window_bounds = array<i64: 1, 384>}, {transform_indices = @transform_3, window_bounds = array<i64: 2, 384>}]} {
    %c0 = arith.constant 0 : index
    %c0_0 = arith.constant 0 : index
    %0 = vector.load %arg2[%c0, %c0_0] : memref<2x128xbf16, #tpu.memory_space<vmem>>, vector<2x128xbf16>
    %c0_1 = arith.constant 0 : index
    %c0_2 = arith.constant 0 : index
    %1 = vector.load %arg3[%c0_1, %c0_2] : memref<128x384xbf16, #tpu.memory_space<vmem>>, vector<128x384xbf16>
    %cst = arith.constant dense<0.000000e+00> : vector<2x384xf32>
    %2 = tpu.matmul %0, %1, %cst {dimension_numbers = #tpu.dot_dimension_numbers<[1], [0], [0], [1], [0, 0, 1, 1], [], []>} : vector<2x128xbf16>, vector<128x384xbf16>, vector<2x384xf32> -> vector<2x384xf32>
    %c0_3 = arith.constant 0 : index
    %c0_4 = arith.constant 0 : index
    %3 = vector.load %arg4[%c0_3, %c0_4] : memref<1x384xf32, #tpu.memory_space<vmem>>, vector<1x384xf32>
    %4 = vector.broadcast %3 : vector<1x384xf32> to vector<2x384xf32>
    %5 = arith.addf %2, %4 : vector<2x384xf32>
    %cst_5 = arith.constant 0.000000e+00 : f32
    %cst_6 = arith.constant 6.000000e+00 : f32
    %6 = vector.broadcast %cst_5 : f32 to vector<2x384xf32>
    %7 = arith.maximumf %6, %5 : vector<2x384xf32>
    %8 = vector.broadcast %cst_6 : f32 to vector<2x384xf32>
    %9 = arith.minimumf %8, %7 : vector<2x384xf32>
    %10 = arith.truncf %9 : vector<2x384xf32> to vector<2x384xbf16>
    %c0_7 = arith.constant 0 : index
    %c0_8 = arith.constant 0 : index
    %11 = vector.load %arg5[%c0_7, %c0_8] : memref<2x384xbf16, #tpu.memory_space<vmem>>, vector<2x384xbf16>
    tpu.vector_store %arg5[%c0_7, %c0_8], %10 {strides = array<i32>} : memref<2x384xbf16, #tpu.memory_space<vmem>>, vector<2x384xbf16>,
    return
  }
  func.func @transform_0(%arg0: i32, %arg1: i32) -> (i32, i32) {
    %c0_i32 = arith.constant 0 : i32
    %c0_i32_0 = arith.constant 0 : i32
    return %arg0, %c0_i32 : i32, i32
  }
  func.func @transform_1(%arg0: i32, %arg1: i32) -> (i32, i32) {
    %c0_i32 = arith.constant 0 : i32
    %c0_i32_0 = arith.constant 0 : i32
    return %c0_i32, %arg1 : i32, i32
  }
  func.func @transform_2(%arg0: i32, %arg1: i32) -> (i32, i32) {
    %c0_i32 = arith.constant 0 : i32
    %c0_i32_0 = arith.constant 0 : i32
    return %c0_i32, %arg1 : i32, i32
  }
  func.func @transform_3(%arg0: i32, %arg1: i32) -> (i32, i32) {
    %c0_i32 = arith.constant 0 : i32
    return %arg0, %arg1 : i32, i32
  }
}

module attributes {stable_mosaic.version = 11 : i64} {
  func.func @_dw_s2_kernel(%arg0: i32, %arg1: memref<2x2x2x1536xbf16, #tpu.memory_space<vmem>>, %arg2: memref<9x768xf32, #tpu.memory_space<vmem>>, %arg3: memref<1x768xf32, #tpu.memory_space<vmem>>, %arg4: memref<1x1x1x768xbf16, #tpu.memory_space<vmem>>) attributes {dimension_semantics = [#tpu.dimension_semantics<parallel>], iteration_bounds = array<i64: 2>, scalar_prefetch = 0 : i64, scratch_operands = 0 : i64, tpu.core_type = #tpu.core_type<tc>, window_params = [{transform_indices = @transform_0, window_bounds = array<i64: 2, 2, 2, 1536>}, {pipeline_mode = #tpu.pipeline_mode<synchronous>, transform_indices = @transform_1, window_bounds = array<i64: 9, 768>}, {pipeline_mode = #tpu.pipeline_mode<synchronous>, transform_indices = @transform_2, window_bounds = array<i64: 1, 768>}, {transform_indices = @transform_3, window_bounds = array<i64: 1, 1, 1, 768>}]} {
    %c0 = arith.constant 0 : index
    %c0_0 = arith.constant 0 : index
    %0 = vector.load %arg2[%c0, %c0_0] : memref<9x768xf32, #tpu.memory_space<vmem>>, vector<9x768xf32>
    %cst = arith.constant 0.000000e+00 : f32
    %1 = vector.broadcast %cst : f32 to vector<1x1x768xf32>
    %c0_1 = arith.constant 0 : index
    %c0_2 = arith.constant 0 : index
    %c0_3 = arith.constant 0 : index
    %c0_4 = arith.constant 0 : index
    %2 = vector.load %arg1[%c0_1, %c0_2, %c0_3, %c0_4] : memref<2x2x2x1536xbf16, #tpu.memory_space<vmem>>, vector<1x1x1x768xbf16>
    %3 = vector.shape_cast %2 : vector<1x1x1x768xbf16> to vector<1x1x768xbf16>
    %4 = arith.extf %3 : vector<1x1x768xbf16> to vector<1x1x768xf32>
    %5 = vector.extract_strided_slice %0 {offsets = [0, 0], sizes = [1, 768], strides = [1, 1]} : vector<9x768xf32> to vector<1x768xf32>
    %6 = vector.shape_cast %5 : vector<1x768xf32> to vector<768xf32>
    %7 = vector.shape_cast %6 : vector<768xf32> to vector<1x1x768xf32>
    %8 = arith.mulf %4, %7 : vector<1x1x768xf32>
    %9 = arith.addf %1, %8 : vector<1x1x768xf32>
    %c0_5 = arith.constant 0 : index
    %c0_6 = arith.constant 0 : index
    %c0_7 = arith.constant 0 : index
    %c768 = arith.constant 768 : index
    %10 = vector.load %arg1[%c0_5, %c0_6, %c0_7, %c768] : memref<2x2x2x1536xbf16, #tpu.memory_space<vmem>>, vector<1x1x1x768xbf16>
    %11 = vector.shape_cast %10 : vector<1x1x1x768xbf16> to vector<1x1x768xbf16>
    %12 = arith.extf %11 : vector<1x1x768xbf16> to vector<1x1x768xf32>
    %13 = vector.extract_strided_slice %0 {offsets = [1, 0], sizes = [1, 768], strides = [1, 1]} : vector<9x768xf32> to vector<1x768xf32>
    %14 = vector.shape_cast %13 : vector<1x768xf32> to vector<768xf32>
    %15 = vector.shape_cast %14 : vector<768xf32> to vector<1x1x768xf32>
    %16 = arith.mulf %12, %15 : vector<1x1x768xf32>
    %17 = arith.addf %9, %16 : vector<1x1x768xf32>
    %c0_8 = arith.constant 0 : index
    %c0_9 = arith.constant 0 : index
    %c1 = arith.constant 1 : index
    %c0_10 = arith.constant 0 : index
    %18 = vector.load %arg1[%c0_8, %c0_9, %c1, %c0_10] : memref<2x2x2x1536xbf16, #tpu.memory_space<vmem>>, vector<1x1x1x768xbf16>
    %19 = vector.shape_cast %18 : vector<1x1x1x768xbf16> to vector<1x1x768xbf16>
    %20 = arith.extf %19 : vector<1x1x768xbf16> to vector<1x1x768xf32>
    %21 = vector.extract_strided_slice %0 {offsets = [2, 0], sizes = [1, 768], strides = [1, 1]} : vector<9x768xf32> to vector<1x768xf32>
    %22 = vector.shape_cast %21 : vector<1x768xf32> to vector<768xf32>
    %23 = vector.shape_cast %22 : vector<768xf32> to vector<1x1x768xf32>
    %24 = arith.mulf %20, %23 : vector<1x1x768xf32>
    %25 = arith.addf %17, %24 : vector<1x1x768xf32>
    %c0_11 = arith.constant 0 : index
    %c1_12 = arith.constant 1 : index
    %c0_13 = arith.constant 0 : index
    %c0_14 = arith.constant 0 : index
    %26 = vector.load %arg1[%c0_11, %c1_12, %c0_13, %c0_14] : memref<2x2x2x1536xbf16, #tpu.memory_space<vmem>>, vector<1x1x1x768xbf16>
    %27 = vector.shape_cast %26 : vector<1x1x1x768xbf16> to vector<1x1x768xbf16>
    %28 = arith.extf %27 : vector<1x1x768xbf16> to vector<1x1x768xf32>
    %29 = vector.extract_strided_slice %0 {offsets = [3, 0], sizes = [1, 768], strides = [1, 1]} : vector<9x768xf32> to vector<1x768xf32>
    %30 = vector.shape_cast %29 : vector<1x768xf32> to vector<768xf32>
    %31 = vector.shape_cast %30 : vector<768xf32> to vector<1x1x768xf32>
    %32 = arith.mulf %28, %31 : vector<1x1x768xf32>
    %33 = arith.addf %25, %32 : vector<1x1x768xf32>
    %c0_15 = arith.constant 0 : index
    %c1_16 = arith.constant 1 : index
    %c0_17 = arith.constant 0 : index
    %c768_18 = arith.constant 768 : index
    %34 = vector.load %arg1[%c0_15, %c1_16, %c0_17, %c768_18] : memref<2x2x2x1536xbf16, #tpu.memory_space<vmem>>, vector<1x1x1x768xbf16>
    %35 = vector.shape_cast %34 : vector<1x1x1x768xbf16> to vector<1x1x768xbf16>
    %36 = arith.extf %35 : vector<1x1x768xbf16> to vector<1x1x768xf32>
    %37 = vector.extract_strided_slice %0 {offsets = [4, 0], sizes = [1, 768], strides = [1, 1]} : vector<9x768xf32> to vector<1x768xf32>
    %38 = vector.shape_cast %37 : vector<1x768xf32> to vector<768xf32>
    %39 = vector.shape_cast %38 : vector<768xf32> to vector<1x1x768xf32>
    %40 = arith.mulf %36, %39 : vector<1x1x768xf32>
    %41 = arith.addf %33, %40 : vector<1x1x768xf32>
    %c0_19 = arith.constant 0 : index
    %c1_20 = arith.constant 1 : index
    %c1_21 = arith.constant 1 : index
    %c0_22 = arith.constant 0 : index
    %42 = vector.load %arg1[%c0_19, %c1_20, %c1_21, %c0_22] : memref<2x2x2x1536xbf16, #tpu.memory_space<vmem>>, vector<1x1x1x768xbf16>
    %43 = vector.shape_cast %42 : vector<1x1x1x768xbf16> to vector<1x1x768xbf16>
    %44 = arith.extf %43 : vector<1x1x768xbf16> to vector<1x1x768xf32>
    %45 = vector.extract_strided_slice %0 {offsets = [5, 0], sizes = [1, 768], strides = [1, 1]} : vector<9x768xf32> to vector<1x768xf32>
    %46 = vector.shape_cast %45 : vector<1x768xf32> to vector<768xf32>
    %47 = vector.shape_cast %46 : vector<768xf32> to vector<1x1x768xf32>
    %48 = arith.mulf %44, %47 : vector<1x1x768xf32>
    %49 = arith.addf %41, %48 : vector<1x1x768xf32>
    %c1_23 = arith.constant 1 : index
    %c0_24 = arith.constant 0 : index
    %c0_25 = arith.constant 0 : index
    %c0_26 = arith.constant 0 : index
    %50 = vector.load %arg1[%c1_23, %c0_24, %c0_25, %c0_26] : memref<2x2x2x1536xbf16, #tpu.memory_space<vmem>>, vector<1x1x1x768xbf16>
    %51 = vector.shape_cast %50 : vector<1x1x1x768xbf16> to vector<1x1x768xbf16>
    %52 = arith.extf %51 : vector<1x1x768xbf16> to vector<1x1x768xf32>
    %53 = vector.extract_strided_slice %0 {offsets = [6, 0], sizes = [1, 768], strides = [1, 1]} : vector<9x768xf32> to vector<1x768xf32>
    %54 = vector.shape_cast %53 : vector<1x768xf32> to vector<768xf32>
    %55 = vector.shape_cast %54 : vector<768xf32> to vector<1x1x768xf32>
    %56 = arith.mulf %52, %55 : vector<1x1x768xf32>
    %57 = arith.addf %49, %56 : vector<1x1x768xf32>
    %c1_27 = arith.constant 1 : index
    %c0_28 = arith.constant 0 : index
    %c0_29 = arith.constant 0 : index
    %c768_30 = arith.constant 768 : index
    %58 = vector.load %arg1[%c1_27, %c0_28, %c0_29, %c768_30] : memref<2x2x2x1536xbf16, #tpu.memory_space<vmem>>, vector<1x1x1x768xbf16>
    %59 = vector.shape_cast %58 : vector<1x1x1x768xbf16> to vector<1x1x768xbf16>
    %60 = arith.extf %59 : vector<1x1x768xbf16> to vector<1x1x768xf32>
    %61 = vector.extract_strided_slice %0 {offsets = [7, 0], sizes = [1, 768], strides = [1, 1]} : vector<9x768xf32> to vector<1x768xf32>
    %62 = vector.shape_cast %61 : vector<1x768xf32> to vector<768xf32>
    %63 = vector.shape_cast %62 : vector<768xf32> to vector<1x1x768xf32>
    %64 = arith.mulf %60, %63 : vector<1x1x768xf32>
    %65 = arith.addf %57, %64 : vector<1x1x768xf32>
    %c1_31 = arith.constant 1 : index
    %c0_32 = arith.constant 0 : index
    %c1_33 = arith.constant 1 : index
    %c0_34 = arith.constant 0 : index
    %66 = vector.load %arg1[%c1_31, %c0_32, %c1_33, %c0_34] : memref<2x2x2x1536xbf16, #tpu.memory_space<vmem>>, vector<1x1x1x768xbf16>
    %67 = vector.shape_cast %66 : vector<1x1x1x768xbf16> to vector<1x1x768xbf16>
    %68 = arith.extf %67 : vector<1x1x768xbf16> to vector<1x1x768xf32>
    %69 = vector.extract_strided_slice %0 {offsets = [8, 0], sizes = [1, 768], strides = [1, 1]} : vector<9x768xf32> to vector<1x768xf32>
    %70 = vector.shape_cast %69 : vector<1x768xf32> to vector<768xf32>
    %71 = vector.shape_cast %70 : vector<768xf32> to vector<1x1x768xf32>
    %72 = arith.mulf %68, %71 : vector<1x1x768xf32>
    %73 = arith.addf %65, %72 : vector<1x1x768xf32>
    %c0_35 = arith.constant 0 : index
    %c0_36 = arith.constant 0 : index
    %74 = vector.load %arg3[%c0_35, %c0_36] : memref<1x768xf32, #tpu.memory_space<vmem>>, vector<1x768xf32>
    %75 = vector.shape_cast %74 : vector<1x768xf32> to vector<1x1x768xf32>
    %76 = arith.addf %73, %75 : vector<1x1x768xf32>
    %cst_37 = arith.constant 0.000000e+00 : f32
    %cst_38 = arith.constant 6.000000e+00 : f32
    %77 = vector.broadcast %cst_37 : f32 to vector<1x1x768xf32>
    %78 = arith.maximumf %77, %76 : vector<1x1x768xf32>
    %79 = vector.broadcast %cst_38 : f32 to vector<1x1x768xf32>
    %80 = arith.minimumf %79, %78 : vector<1x1x768xf32>
    %81 = arith.truncf %80 : vector<1x1x768xf32> to vector<1x1x768xbf16>
    %c0_39 = arith.constant 0 : index
    %c0_40 = arith.constant 0 : index
    %c0_41 = arith.constant 0 : index
    %c0_42 = arith.constant 0 : index
    %82 = vector.load %arg4[%c0_39, %c0_40, %c0_41, %c0_42] : memref<1x1x1x768xbf16, #tpu.memory_space<vmem>>, vector<1x1x1x768xbf16>
    %83 = vector.shape_cast %82 : vector<1x1x1x768xbf16> to vector<1x1x768xbf16>
    %84 = vector.shape_cast %81 : vector<1x1x768xbf16> to vector<1x1x1x768xbf16>
    tpu.vector_store %arg4[%c0_39, %c0_40, %c0_41, %c0_42], %84 {strides = array<i32>} : memref<1x1x1x768xbf16, #tpu.memory_space<vmem>>, vector<1x1x1x768xbf16>,
    return
  }
  func.func @transform_0(%arg0: i32) -> (i32, i32, i32, i32) {
    %c0_i32 = arith.constant 0 : i32
    %c0_i32_0 = arith.constant 0 : i32
    %c0_i32_1 = arith.constant 0 : i32
    %c0_i32_2 = arith.constant 0 : i32
    return %arg0, %c0_i32, %c0_i32_0, %c0_i32_1 : i32, i32, i32, i32
  }
  func.func @transform_1(%arg0: i32) -> (i32, i32) {
    %c0_i32 = arith.constant 0 : i32
    %c0_i32_0 = arith.constant 0 : i32
    %c0_i32_1 = arith.constant 0 : i32
    return %c0_i32, %c0_i32_0 : i32, i32
  }
  func.func @transform_2(%arg0: i32) -> (i32, i32) {
    %c0_i32 = arith.constant 0 : i32
    %c0_i32_0 = arith.constant 0 : i32
    %c0_i32_1 = arith.constant 0 : i32
    return %c0_i32, %c0_i32_0 : i32, i32
  }
  func.func @transform_3(%arg0: i32) -> (i32, i32, i32, i32) {
    %c0_i32 = arith.constant 0 : i32
    %c0_i32_0 = arith.constant 0 : i32
    %c0_i32_1 = arith.constant 0 : i32
    %c0_i32_2 = arith.constant 0 : i32
    return %arg0, %c0_i32, %c0_i32_0, %c0_i32_1 : i32, i32, i32, i32
  }
}

module attributes {stable_mosaic.version = 11 : i64} {
  func.func @_matmul_bias_act_kernel(%arg0: i32, %arg1: i32, %arg2: memref<2x768xbf16, #tpu.memory_space<vmem>>, %arg3: memref<768x128xbf16, #tpu.memory_space<vmem>>, %arg4: memref<1x128xf32, #tpu.memory_space<vmem>>, %arg5: memref<2x128xbf16, #tpu.memory_space<vmem>>) attributes {dimension_semantics = [#tpu.dimension_semantics<parallel>, #tpu.dimension_semantics<parallel>], iteration_bounds = array<i64: 1, 1>, scalar_prefetch = 0 : i64, scratch_operands = 0 : i64, tpu.core_type = #tpu.core_type<tc>, window_params = [{transform_indices = @transform_0, window_bounds = array<i64: 2, 768>}, {transform_indices = @transform_1, window_bounds = array<i64: 768, 128>}, {transform_indices = @transform_2, window_bounds = array<i64: 1, 128>}, {transform_indices = @transform_3, window_bounds = array<i64: 2, 128>}]} {
    %c0 = arith.constant 0 : index
    %c0_0 = arith.constant 0 : index
    %0 = vector.load %arg2[%c0, %c0_0] : memref<2x768xbf16, #tpu.memory_space<vmem>>, vector<2x768xbf16>
    %c0_1 = arith.constant 0 : index
    %c0_2 = arith.constant 0 : index
    %1 = vector.load %arg3[%c0_1, %c0_2] : memref<768x128xbf16, #tpu.memory_space<vmem>>, vector<768x128xbf16>
    %cst = arith.constant dense<0.000000e+00> : vector<2x128xf32>
    %2 = tpu.matmul %0, %1, %cst {dimension_numbers = #tpu.dot_dimension_numbers<[1], [0], [0], [1], [0, 0, 1, 1], [], []>} : vector<2x768xbf16>, vector<768x128xbf16>, vector<2x128xf32> -> vector<2x128xf32>
    %c0_3 = arith.constant 0 : index
    %c0_4 = arith.constant 0 : index
    %3 = vector.load %arg4[%c0_3, %c0_4] : memref<1x128xf32, #tpu.memory_space<vmem>>, vector<1x128xf32>
    %4 = vector.broadcast %3 : vector<1x128xf32> to vector<2x128xf32>
    %5 = arith.addf %2, %4 : vector<2x128xf32>
    %6 = arith.truncf %5 : vector<2x128xf32> to vector<2x128xbf16>
    %c0_5 = arith.constant 0 : index
    %c0_6 = arith.constant 0 : index
    %7 = vector.load %arg5[%c0_5, %c0_6] : memref<2x128xbf16, #tpu.memory_space<vmem>>, vector<2x128xbf16>
    tpu.vector_store %arg5[%c0_5, %c0_6], %6 {strides = array<i32>} : memref<2x128xbf16, #tpu.memory_space<vmem>>, vector<2x128xbf16>,
    return
  }
  func.func @transform_0(%arg0: i32, %arg1: i32) -> (i32, i32) {
    %c0_i32 = arith.constant 0 : i32
    %c0_i32_0 = arith.constant 0 : i32
    return %arg0, %c0_i32 : i32, i32
  }
  func.func @transform_1(%arg0: i32, %arg1: i32) -> (i32, i32) {
    %c0_i32 = arith.constant 0 : i32
    %c0_i32_0 = arith.constant 0 : i32
    return %c0_i32, %arg1 : i32, i32
  }
  func.func @transform_2(%arg0: i32, %arg1: i32) -> (i32, i32) {
    %c0_i32 = arith.constant 0 : i32
    %c0_i32_0 = arith.constant 0 : i32
    return %c0_i32, %arg1 : i32, i32
  }
  func.func @transform_3(%arg0: i32, %arg1: i32) -> (i32, i32) {
    %c0_i32 = arith.constant 0 : i32
    return %arg0, %arg1 : i32, i32
  }
}

module attributes {stable_mosaic.version = 11 : i64} {
  func.func @_dw_s1_kernel(%arg0: i32, %arg1: memref<1x1x768xbf16, #tpu.memory_space<vmem>>, %arg2: memref<9x768xf32, #tpu.memory_space<vmem>>, %arg3: memref<1x768xf32, #tpu.memory_space<vmem>>, %arg4: memref<1x1x768xbf16, #tpu.memory_space<vmem>>, %arg5: memref<3x2304xf32, #tpu.memory_space<vmem>>) attributes {dimension_semantics = [#tpu.dimension_semantics<parallel>], iteration_bounds = array<i64: 2>, scalar_prefetch = 0 : i64, scratch_operands = 1 : i64, tpu.core_type = #tpu.core_type<tc>, window_params = [{transform_indices = @transform_0, window_bounds = array<i64: 1, 1, 768>}, {pipeline_mode = #tpu.pipeline_mode<synchronous>, transform_indices = @transform_1, window_bounds = array<i64: 9, 768>}, {pipeline_mode = #tpu.pipeline_mode<synchronous>, transform_indices = @transform_2, window_bounds = array<i64: 1, 768>}, {transform_indices = @transform_3, window_bounds = array<i64: 1, 1, 768>}]} {
    %cst = arith.constant 0.000000e+00 : f32
    %0 = vector.broadcast %cst : f32 to vector<3x2304xf32>
    %c0 = arith.constant 0 : index
    %c0_0 = arith.constant 0 : index
    %1 = vector.load %arg5[%c0, %c0_0] : memref<3x2304xf32, #tpu.memory_space<vmem>>, vector<3x2304xf32>
    tpu.vector_store %arg5[%c0, %c0_0], %0 {strides = array<i32>} : memref<3x2304xf32, #tpu.memory_space<vmem>>, vector<3x2304xf32>,
    %c0_1 = arith.constant 0 : index
    %c0_2 = arith.constant 0 : index
    %c0_3 = arith.constant 0 : index
    %2 = vector.load %arg1[%c0_1, %c0_2, %c0_3] : memref<1x1x768xbf16, #tpu.memory_space<vmem>>, vector<1x1x768xbf16>
    %3 = vector.shape_cast %2 : vector<1x1x768xbf16> to vector<1x768xbf16>
    %4 = arith.extf %3 : vector<1x768xbf16> to vector<1x768xf32>
    %c1 = arith.constant 1 : index
    %c768 = arith.constant 768 : index
    %5 = vector.load %arg5[%c1, %c768] : memref<3x2304xf32, #tpu.memory_space<vmem>>, vector<1x768xf32>
    tpu.vector_store %arg5[%c1, %c768], %4 {strides = array<i32>} : memref<3x2304xf32, #tpu.memory_space<vmem>>, vector<1x768xf32>,
    %c0_4 = arith.constant 0 : index
    %c0_5 = arith.constant 0 : index
    %6 = vector.load %arg2[%c0_4, %c0_5] : memref<9x768xf32, #tpu.memory_space<vmem>>, vector<9x768xf32>
    %cst_6 = arith.constant 0.000000e+00 : f32
    %7 = vector.broadcast %cst_6 : f32 to vector<1x768xf32>
    %c0_7 = arith.constant 0 : index
    %c0_8 = arith.constant 0 : index
    %8 = vector.load %arg5[%c0_7, %c0_8] : memref<3x2304xf32, #tpu.memory_space<vmem>>, vector<1x768xf32>
    %9 = vector.extract_strided_slice %6 {offsets = [0, 0], sizes = [1, 768], strides = [1, 1]} : vector<9x768xf32> to vector<1x768xf32>
    %10 = vector.shape_cast %9 : vector<1x768xf32> to vector<768xf32>
    %11 = vector.shape_cast %10 : vector<768xf32> to vector<1x768xf32>
    %12 = arith.mulf %8, %11 : vector<1x768xf32>
    %13 = arith.addf %7, %12 : vector<1x768xf32>
    %c0_9 = arith.constant 0 : index
    %c768_10 = arith.constant 768 : index
    %14 = vector.load %arg5[%c0_9, %c768_10] : memref<3x2304xf32, #tpu.memory_space<vmem>>, vector<1x768xf32>
    %15 = vector.extract_strided_slice %6 {offsets = [1, 0], sizes = [1, 768], strides = [1, 1]} : vector<9x768xf32> to vector<1x768xf32>
    %16 = vector.shape_cast %15 : vector<1x768xf32> to vector<768xf32>
    %17 = vector.shape_cast %16 : vector<768xf32> to vector<1x768xf32>
    %18 = arith.mulf %14, %17 : vector<1x768xf32>
    %19 = arith.addf %13, %18 : vector<1x768xf32>
    %c0_11 = arith.constant 0 : index
    %c1536 = arith.constant 1536 : index
    %20 = vector.load %arg5[%c0_11, %c1536] : memref<3x2304xf32, #tpu.memory_space<vmem>>, vector<1x768xf32>
    %21 = vector.extract_strided_slice %6 {offsets = [2, 0], sizes = [1, 768], strides = [1, 1]} : vector<9x768xf32> to vector<1x768xf32>
    %22 = vector.shape_cast %21 : vector<1x768xf32> to vector<768xf32>
    %23 = vector.shape_cast %22 : vector<768xf32> to vector<1x768xf32>
    %24 = arith.mulf %20, %23 : vector<1x768xf32>
    %25 = arith.addf %19, %24 : vector<1x768xf32>
    %c1_12 = arith.constant 1 : index
    %c0_13 = arith.constant 0 : index
    %26 = vector.load %arg5[%c1_12, %c0_13] : memref<3x2304xf32, #tpu.memory_space<vmem>>, vector<1x768xf32>
    %27 = vector.extract_strided_slice %6 {offsets = [3, 0], sizes = [1, 768], strides = [1, 1]} : vector<9x768xf32> to vector<1x768xf32>
    %28 = vector.shape_cast %27 : vector<1x768xf32> to vector<768xf32>
    %29 = vector.shape_cast %28 : vector<768xf32> to vector<1x768xf32>
    %30 = arith.mulf %26, %29 : vector<1x768xf32>
    %31 = arith.addf %25, %30 : vector<1x768xf32>
    %c1_14 = arith.constant 1 : index
    %c768_15 = arith.constant 768 : index
    %32 = vector.load %arg5[%c1_14, %c768_15] : memref<3x2304xf32, #tpu.memory_space<vmem>>, vector<1x768xf32>
    %33 = vector.extract_strided_slice %6 {offsets = [4, 0], sizes = [1, 768], strides = [1, 1]} : vector<9x768xf32> to vector<1x768xf32>
    %34 = vector.shape_cast %33 : vector<1x768xf32> to vector<768xf32>
    %35 = vector.shape_cast %34 : vector<768xf32> to vector<1x768xf32>
    %36 = arith.mulf %32, %35 : vector<1x768xf32>
    %37 = arith.addf %31, %36 : vector<1x768xf32>
    %c1_16 = arith.constant 1 : index
    %c1536_17 = arith.constant 1536 : index
    %38 = vector.load %arg5[%c1_16, %c1536_17] : memref<3x2304xf32, #tpu.memory_space<vmem>>, vector<1x768xf32>
    %39 = vector.extract_strided_slice %6 {offsets = [5, 0], sizes = [1, 768], strides = [1, 1]} : vector<9x768xf32> to vector<1x768xf32>
    %40 = vector.shape_cast %39 : vector<1x768xf32> to vector<768xf32>
    %41 = vector.shape_cast %40 : vector<768xf32> to vector<1x768xf32>
    %42 = arith.mulf %38, %41 : vector<1x768xf32>
    %43 = arith.addf %37, %42 : vector<1x768xf32>
    %c2 = arith.constant 2 : index
    %c0_18 = arith.constant 0 : index
    %44 = vector.load %arg5[%c2, %c0_18] : memref<3x2304xf32, #tpu.memory_space<vmem>>, vector<1x768xf32>
    %45 = vector.extract_strided_slice %6 {offsets = [6, 0], sizes = [1, 768], strides = [1, 1]} : vector<9x768xf32> to vector<1x768xf32>
    %46 = vector.shape_cast %45 : vector<1x768xf32> to vector<768xf32>
    %47 = vector.shape_cast %46 : vector<768xf32> to vector<1x768xf32>
    %48 = arith.mulf %44, %47 : vector<1x768xf32>
    %49 = arith.addf %43, %48 : vector<1x768xf32>
    %c2_19 = arith.constant 2 : index
    %c768_20 = arith.constant 768 : index
    %50 = vector.load %arg5[%c2_19, %c768_20] : memref<3x2304xf32, #tpu.memory_space<vmem>>, vector<1x768xf32>
    %51 = vector.extract_strided_slice %6 {offsets = [7, 0], sizes = [1, 768], strides = [1, 1]} : vector<9x768xf32> to vector<1x768xf32>
    %52 = vector.shape_cast %51 : vector<1x768xf32> to vector<768xf32>
    %53 = vector.shape_cast %52 : vector<768xf32> to vector<1x768xf32>
    %54 = arith.mulf %50, %53 : vector<1x768xf32>
    %55 = arith.addf %49, %54 : vector<1x768xf32>
    %c2_21 = arith.constant 2 : index
    %c1536_22 = arith.constant 1536 : index
    %56 = vector.load %arg5[%c2_21, %c1536_22] : memref<3x2304xf32, #tpu.memory_space<vmem>>, vector<1x768xf32>
    %57 = vector.extract_strided_slice %6 {offsets = [8, 0], sizes = [1, 768], strides = [1, 1]} : vector<9x768xf32> to vector<1x768xf32>
    %58 = vector.shape_cast %57 : vector<1x768xf32> to vector<768xf32>
    %59 = vector.shape_cast %58 : vector<768xf32> to vector<1x768xf32>
    %60 = arith.mulf %56, %59 : vector<1x768xf32>
    %61 = arith.addf %55, %60 : vector<1x768xf32>
    %c0_23 = arith.constant 0 : index
    %c0_24 = arith.constant 0 : index
    %62 = vector.load %arg3[%c0_23, %c0_24] : memref<1x768xf32, #tpu.memory_space<vmem>>, vector<1x768xf32>
    %63 = arith.addf %61, %62 : vector<1x768xf32>
    %cst_25 = arith.constant 0.000000e+00 : f32
    %cst_26 = arith.constant 6.000000e+00 : f32
    %64 = vector.broadcast %cst_25 : f32 to vector<1x768xf32>
    %65 = arith.maximumf %64, %63 : vector<1x768xf32>
    %66 = vector.broadcast %cst_26 : f32 to vector<1x768xf32>
    %67 = arith.minimumf %66, %65 : vector<1x768xf32>
    %68 = arith.truncf %67 : vector<1x768xf32> to vector<1x768xbf16>
    %c0_27 = arith.constant 0 : index
    %c0_28 = arith.constant 0 : index
    %c0_29 = arith.constant 0 : index
    %69 = vector.load %arg4[%c0_27, %c0_28, %c0_29] : memref<1x1x768xbf16, #tpu.memory_space<vmem>>, vector<1x1x768xbf16>
    %70 = vector.shape_cast %69 : vector<1x1x768xbf16> to vector<1x768xbf16>
    %71 = vector.shape_cast %68 : vector<1x768xbf16> to vector<1x1x768xbf16>
    tpu.vector_store %arg4[%c0_27, %c0_28, %c0_29], %71 {strides = array<i32>} : memref<1x1x768xbf16, #tpu.memory_space<vmem>>, vector<1x1x768xbf16>,
    return
  }
  func.func @transform_0(%arg0: i32) -> (i32, i32, i32) {
    %c0_i32 = arith.constant 0 : i32
    %c0_i32_0 = arith.constant 0 : i32
    %c0_i32_1 = arith.constant 0 : i32
    return %arg0, %c0_i32, %c0_i32_0 : i32, i32, i32
  }
  func.func @transform_1(%arg0: i32) -> (i32, i32) {
    %c0_i32 = arith.constant 0 : i32
    %c0_i32_0 = arith.constant 0 : i32
    %c0_i32_1 = arith.constant 0 : i32
    return %c0_i32, %c0_i32_0 : i32, i32
  }
  func.func @transform_2(%arg0: i32) -> (i32, i32) {
    %c0_i32 = arith.constant 0 : i32
    %c0_i32_0 = arith.constant 0 : i32
    %c0_i32_1 = arith.constant 0 : i32
    return %c0_i32, %c0_i32_0 : i32, i32
  }
  func.func @transform_3(%arg0: i32) -> (i32, i32, i32) {
    %c0_i32 = arith.constant 0 : i32
    %c0_i32_0 = arith.constant 0 : i32
    %c0_i32_1 = arith.constant 0 : i32
    return %arg0, %c0_i32, %c0_i32_0 : i32, i32, i32
  }
}

module attributes {stable_mosaic.version = 11 : i64} {
  func.func @_matmul_bias_res_kernel(%arg0: i32, %arg1: i32, %arg2: memref<2x768xbf16, #tpu.memory_space<vmem>>, %arg3: memref<768x128xbf16, #tpu.memory_space<vmem>>, %arg4: memref<1x128xf32, #tpu.memory_space<vmem>>, %arg5: memref<2x128xbf16, #tpu.memory_space<vmem>>, %arg6: memref<2x128xbf16, #tpu.memory_space<vmem>>) attributes {dimension_semantics = [#tpu.dimension_semantics<parallel>, #tpu.dimension_semantics<parallel>], iteration_bounds = array<i64: 1, 1>, scalar_prefetch = 0 : i64, scratch_operands = 0 : i64, tpu.core_type = #tpu.core_type<tc>, window_params = [{transform_indices = @transform_0, window_bounds = array<i64: 2, 768>}, {transform_indices = @transform_1, window_bounds = array<i64: 768, 128>}, {transform_indices = @transform_2, window_bounds = array<i64: 1, 128>}, {transform_indices = @transform_3, window_bounds = array<i64: 2, 128>}, {transform_indices = @transform_4, window_bounds = array<i64: 2, 128>}]} {
    %c0 = arith.constant 0 : index
    %c0_0 = arith.constant 0 : index
    %0 = vector.load %arg2[%c0, %c0_0] : memref<2x768xbf16, #tpu.memory_space<vmem>>, vector<2x768xbf16>
    %c0_1 = arith.constant 0 : index
    %c0_2 = arith.constant 0 : index
    %1 = vector.load %arg3[%c0_1, %c0_2] : memref<768x128xbf16, #tpu.memory_space<vmem>>, vector<768x128xbf16>
    %cst = arith.constant dense<0.000000e+00> : vector<2x128xf32>
    %2 = tpu.matmul %0, %1, %cst {dimension_numbers = #tpu.dot_dimension_numbers<[1], [0], [0], [1], [0, 0, 1, 1], [], []>} : vector<2x768xbf16>, vector<768x128xbf16>, vector<2x128xf32> -> vector<2x128xf32>
    %c0_3 = arith.constant 0 : index
    %c0_4 = arith.constant 0 : index
    %3 = vector.load %arg4[%c0_3, %c0_4] : memref<1x128xf32, #tpu.memory_space<vmem>>, vector<1x128xf32>
    %4 = vector.broadcast %3 : vector<1x128xf32> to vector<2x128xf32>
    %5 = arith.addf %2, %4 : vector<2x128xf32>
    %c0_5 = arith.constant 0 : index
    %c0_6 = arith.constant 0 : index
    %6 = vector.load %arg5[%c0_5, %c0_6] : memref<2x128xbf16, #tpu.memory_space<vmem>>, vector<2x128xbf16>
    %7 = arith.extf %6 : vector<2x128xbf16> to vector<2x128xf32>
    %8 = arith.addf %5, %7 : vector<2x128xf32>
    %9 = arith.truncf %8 : vector<2x128xf32> to vector<2x128xbf16>
    %c0_7 = arith.constant 0 : index
    %c0_8 = arith.constant 0 : index
    %10 = vector.load %arg6[%c0_7, %c0_8] : memref<2x128xbf16, #tpu.memory_space<vmem>>, vector<2x128xbf16>
    tpu.vector_store %arg6[%c0_7, %c0_8], %9 {strides = array<i32>} : memref<2x128xbf16, #tpu.memory_space<vmem>>, vector<2x128xbf16>,
    return
  }
  func.func @transform_0(%arg0: i32, %arg1: i32) -> (i32, i32) {
    %c0_i32 = arith.constant 0 : i32
    %c0_i32_0 = arith.constant 0 : i32
    return %arg0, %c0_i32 : i32, i32
  }
  func.func @transform_1(%arg0: i32, %arg1: i32) -> (i32, i32) {
    %c0_i32 = arith.constant 0 : i32
    %c0_i32_0 = arith.constant 0 : i32
    return %c0_i32, %arg1 : i32, i32
  }
  func.func @transform_2(%arg0: i32, %arg1: i32) -> (i32, i32) {
    %c0_i32 = arith.constant 0 : i32
    %c0_i32_0 = arith.constant 0 : i32
    return %c0_i32, %arg1 : i32, i32
  }
  func.func @transform_3(%arg0: i32, %arg1: i32) -> (i32, i32) {
    %c0_i32 = arith.constant 0 : i32
    return %arg0, %arg1 : i32, i32
  }
  func.func @transform_4(%arg0: i32, %arg1: i32) -> (i32, i32) {
    %c0_i32 = arith.constant 0 : i32
    return %arg0, %arg1 : i32, i32
  }
}

module attributes {stable_mosaic.version = 11 : i64} {
  func.func @_se_fc_kernel(%arg0: memref<2x512xf32, #tpu.memory_space<vmem>>, %arg1: memref<512x32xbf16, #tpu.memory_space<vmem>>, %arg2: memref<1x32xf32, #tpu.memory_space<vmem>>, %arg3: memref<32x512xbf16, #tpu.memory_space<vmem>>, %arg4: memref<1x512xf32, #tpu.memory_space<vmem>>, %arg5: memref<512x128xbf16, #tpu.memory_space<vmem>>, %arg6: memref<1x128xf32, #tpu.memory_space<vmem>>, %arg7: memref<2x128xf32, #tpu.memory_space<vmem>>) attributes {dimension_semantics = [], scalar_prefetch = 0 : i64, scratch_operands = 0 : i64, tpu.core_type = #tpu.core_type<tc>} {
    %c0 = arith.constant 0 : index
    %c0_0 = arith.constant 0 : index
    %0 = vector.load %arg0[%c0, %c0_0] : memref<2x512xf32, #tpu.memory_space<vmem>>, vector<2x512xf32>
    %1 = arith.truncf %0 : vector<2x512xf32> to vector<2x512xbf16>
    %c0_1 = arith.constant 0 : index
    %c0_2 = arith.constant 0 : index
    %2 = vector.load %arg1[%c0_1, %c0_2] : memref<512x32xbf16, #tpu.memory_space<vmem>>, vector<512x32xbf16>
    %cst = arith.constant dense<0.000000e+00> : vector<2x32xf32>
    %3 = tpu.matmul %1, %2, %cst {dimension_numbers = #tpu.dot_dimension_numbers<[1], [0], [0], [1], [0, 0, 1, 1], [], []>} : vector<2x512xbf16>, vector<512x32xbf16>, vector<2x32xf32> -> vector<2x32xf32>
    %c0_3 = arith.constant 0 : index
    %c0_4 = arith.constant 0 : index
    %4 = vector.load %arg2[%c0_3, %c0_4] : memref<1x32xf32, #tpu.memory_space<vmem>>, vector<1x32xf32>
    %5 = vector.broadcast %4 : vector<1x32xf32> to vector<2x32xf32>
    %6 = arith.addf %3, %5 : vector<2x32xf32>
    %cst_5 = arith.constant 0.000000e+00 : f32
    %7 = vector.broadcast %cst_5 : f32 to vector<2x32xf32>
    %8 = arith.maximumf %6, %7 : vector<2x32xf32>
    %9 = arith.truncf %8 : vector<2x32xf32> to vector<2x32xbf16>
    %c0_6 = arith.constant 0 : index
    %c0_7 = arith.constant 0 : index
    %10 = vector.load %arg3[%c0_6, %c0_7] : memref<32x512xbf16, #tpu.memory_space<vmem>>, vector<32x512xbf16>
    %cst_8 = arith.constant dense<0.000000e+00> : vector<2x512xf32>
    %11 = tpu.matmul %9, %10, %cst_8 {dimension_numbers = #tpu.dot_dimension_numbers<[1], [0], [0], [1], [0, 0, 1, 1], [], []>} : vector<2x32xbf16>, vector<32x512xbf16>, vector<2x512xf32> -> vector<2x512xf32>
    %c0_9 = arith.constant 0 : index
    %c0_10 = arith.constant 0 : index
    %12 = vector.load %arg4[%c0_9, %c0_10] : memref<1x512xf32, #tpu.memory_space<vmem>>, vector<1x512xf32>
    %13 = vector.broadcast %12 : vector<1x512xf32> to vector<2x512xf32>
    %14 = arith.addf %11, %13 : vector<2x512xf32>
    %cst_11 = arith.constant 0.000000e+00 : f32
    %15 = vector.broadcast %cst_11 : f32 to vector<2x512xf32>
    %16 = arith.subf %15, %14 : vector<2x512xf32>
    %17 = math.exp %16 : vector<2x512xf32>
    %cst_12 = arith.constant 1.000000e+00 : f32
    %18 = vector.broadcast %cst_12 : f32 to vector<2x512xf32>
    %19 = arith.addf %18, %17 : vector<2x512xf32>
    %cst_13 = arith.constant 1.000000e+00 : f32
    %20 = vector.broadcast %cst_13 : f32 to vector<2x512xf32>
    %21 = arith.divf %20, %19 : vector<2x512xf32>
    %22 = arith.mulf %0, %21 : vector<2x512xf32>
    %23 = arith.truncf %22 : vector<2x512xf32> to vector<2x512xbf16>
    %c0_14 = arith.constant 0 : index
    %c0_15 = arith.constant 0 : index
    %24 = vector.load %arg5[%c0_14, %c0_15] : memref<512x128xbf16, #tpu.memory_space<vmem>>, vector<512x128xbf16>
    %cst_16 = arith.constant dense<0.000000e+00> : vector<2x128xf32>
    %25 = tpu.matmul %23, %24, %cst_16 {dimension_numbers = #tpu.dot_dimension_numbers<[1], [0], [0], [1], [0, 0, 1, 1], [], []>} : vector<2x512xbf16>, vector<512x128xbf16>, vector<2x128xf32> -> vector<2x128xf32>
    %c0_17 = arith.constant 0 : index
    %c0_18 = arith.constant 0 : index
    %26 = vector.load %arg6[%c0_17, %c0_18] : memref<1x128xf32, #tpu.memory_space<vmem>>, vector<1x128xf32>
    %27 = vector.broadcast %26 : vector<1x128xf32> to vector<2x128xf32>
    %28 = arith.addf %25, %27 : vector<2x128xf32>
    %c0_19 = arith.constant 0 : index
    %c0_20 = arith.constant 0 : index
    %29 = vector.load %arg7[%c0_19, %c0_20] : memref<2x128xf32, #tpu.memory_space<vmem>>, vector<2x128xf32>
    tpu.vector_store %arg7[%c0_19, %c0_20], %28 {strides = array<i32>} : memref<2x128xf32, #tpu.memory_space<vmem>>, vector<2x128xf32>,
    return
  }
}

module attributes {stable_mosaic.version = 11 : i64} {
  func.func @_convlast_pool_kernel(%arg0: i32, %arg1: memref<1x1x128xbf16, #tpu.memory_space<vmem>>, %arg2: memref<128x512xbf16, #tpu.memory_space<vmem>>, %arg3: memref<1x512xf32, #tpu.memory_space<vmem>>, %arg4: memref<1x1x512xf32, #tpu.memory_space<vmem>>) attributes {dimension_semantics = [#tpu.dimension_semantics<parallel>], iteration_bounds = array<i64: 2>, scalar_prefetch = 0 : i64, scratch_operands = 0 : i64, tpu.core_type = #tpu.core_type<tc>, window_params = [{transform_indices = @transform_0, window_bounds = array<i64: 1, 1, 128>}, {pipeline_mode = #tpu.pipeline_mode<synchronous>, transform_indices = @transform_1, window_bounds = array<i64: 128, 512>}, {pipeline_mode = #tpu.pipeline_mode<synchronous>, transform_indices = @transform_2, window_bounds = array<i64: 1, 512>}, {transform_indices = @transform_3, window_bounds = array<i64: 1, 1, 512>}]} {
    %c0 = arith.constant 0 : index
    %c0_0 = arith.constant 0 : index
    %c0_1 = arith.constant 0 : index
    %0 = vector.load %arg1[%c0, %c0_0, %c0_1] : memref<1x1x128xbf16, #tpu.memory_space<vmem>>, vector<1x1x128xbf16>
    %1 = vector.shape_cast %0 : vector<1x1x128xbf16> to vector<1x128xbf16>
    %c0_2 = arith.constant 0 : index
    %c0_3 = arith.constant 0 : index
    %2 = vector.load %arg2[%c0_2, %c0_3] : memref<128x512xbf16, #tpu.memory_space<vmem>>, vector<128x512xbf16>
    %cst = arith.constant dense<0.000000e+00> : vector<1x512xf32>
    %3 = tpu.matmul %1, %2, %cst {dimension_numbers = #tpu.dot_dimension_numbers<[1], [0], [0], [1], [0, 0, 1, 1], [], []>} : vector<1x128xbf16>, vector<128x512xbf16>, vector<1x512xf32> -> vector<1x512xf32>
    %c0_4 = arith.constant 0 : index
    %c0_5 = arith.constant 0 : index
    %4 = vector.load %arg3[%c0_4, %c0_5] : memref<1x512xf32, #tpu.memory_space<vmem>>, vector<1x512xf32>
    %5 = arith.addf %3, %4 : vector<1x512xf32>
    %cst_6 = arith.constant 0.000000e+00 : f32
    %cst_7 = arith.constant 6.000000e+00 : f32
    %6 = vector.broadcast %cst_6 : f32 to vector<1x512xf32>
    %7 = arith.maximumf %6, %5 : vector<1x512xf32>
    %8 = vector.broadcast %cst_7 : f32 to vector<1x512xf32>
    %9 = arith.minimumf %8, %7 : vector<1x512xf32>
    %cst_8 = arith.constant dense<0.000000e+00> : vector<512xf32>
    %10 = vector.multi_reduction <add>, %9, %cst_8 [0] : vector<1x512xf32> to vector<512xf32>
    %11 = vector.shape_cast %10 : vector<512xf32> to vector<1x512xf32>
    %cst_9 = arith.constant 1.000000e+00 : f32
    %12 = vector.broadcast %cst_9 : f32 to vector<1x512xf32>
    %13 = arith.divf %11, %12 : vector<1x512xf32>
    %c0_10 = arith.constant 0 : index
    %c0_11 = arith.constant 0 : index
    %c0_12 = arith.constant 0 : index
    %14 = vector.load %arg4[%c0_10, %c0_11, %c0_12] : memref<1x1x512xf32, #tpu.memory_space<vmem>>, vector<1x1x512xf32>
    %15 = vector.shape_cast %14 : vector<1x1x512xf32> to vector<1x512xf32>
    %16 = vector.shape_cast %13 : vector<1x512xf32> to vector<1x1x512xf32>
    tpu.vector_store %arg4[%c0_10, %c0_11, %c0_12], %16 {strides = array<i32>} : memref<1x1x512xf32, #tpu.memory_space<vmem>>, vector<1x1x512xf32>,
    return
  }
  func.func @transform_0(%arg0: i32) -> (i32, i32, i32) {
    %c0_i32 = arith.constant 0 : i32
    %c0_i32_0 = arith.constant 0 : i32
    %c0_i32_1 = arith.constant 0 : i32
    return %arg0, %c0_i32, %c0_i32_0 : i32, i32, i32
  }
  func.func @transform_1(%arg0: i32) -> (i32, i32) {
    %c0_i32 = arith.constant 0 : i32
    %c0_i32_0 = arith.constant 0 : i32
    %c0_i32_1 = arith.constant 0 : i32
    return %c0_i32, %c0_i32_0 : i32, i32
  }
  func.func @transform_2(%arg0: i32) -> (i32, i32) {
    %c0_i32 = arith.constant 0 : i32
    %c0_i32_0 = arith.constant 0 : i32
    %c0_i32_1 = arith.constant 0 : i32
    return %c0_i32, %c0_i32_0 : i32, i32
  }
  func.func @transform_3(%arg0: i32) -> (i32, i32, i32) {
    %c0_i32 = arith.constant 0 : i32
    %c0_i32_0 = arith.constant 0 : i32
    %c0_i32_1 = arith.constant 0 : i32
    return %arg0, %c0_i32, %c0_i32_0 : i32, i32, i32
  }
}

</mosaic_0001>

<bundles_post_ra>
// kernel: tile.47
= control target key start
LH: loop header
LB: loop body
LE: loop exit
PB: predicated region body
PF: predicated region fallthrough
CT: control target
= control target key end

     0   :  { %vm32_vm0 = vcmask 1047556   ;;  %s50_s6 = smov 3  ;;  %s149_s15 = smov 96   ;;  %vm3_vm1 = vcmask 261120   ;;  %vm36_vm2 = vcmask 1048320   ;;  %vm65_vm3 = vcmask 785920   ;;  %s285_s0 = inlined_call_operand.vmem [shape: f32[9,8,32], index: 0, kind: input, shape index: {}]   ;;  %s286_s1 = inlined_call_operand.vmem [shape: f32[9,256], index: 1, kind: output, shape index: {}]  }
   0x1   :  { %v125_v0 = vld [vmem:[%s285_s0 + $0x3] ss:$8 sm:$0xf]   ;;  %v127_v4 = vld [vmem:[%s285_s0 + $0x7] ss:$8 sm:$0xf]  }
   0x2   :  { %v126_v1 = vld [vmem:[%s285_s0 + $0x3] ss:$8 sm:$0xf0]   ;;  %v128_v5 = vld [vmem:[%s285_s0 + $0x7] ss:$8 sm:$0xf0]  }
   0x3   :  { %v33_v2 = vsel %vm32_vm0, %v126_v1, %v125_v0  ;;  %v130_v3 = vld [vmem:[%s285_s0 + $0x43] ss:$4 sm:%s50_s6]   ;;  %v132_v6 = vld [vmem:[%s285_s0 + $0x2] ss:$8 sm:$0xf]   ;;  %v43_v7 = vsel %vm32_vm0, %v128_v5, %v127_v4  ;;  %s79_s26 = smov 3 }
   0x4   :  { %34 = vrot.lane.b32.xlu0 %v33_v2, %s149_s15  ;;  %52 = vrot.lane.b32.xlu1 %v130_v3, %s149_s15  ;;  %v133_v8 = vld [vmem:[%s285_s0 + $0x2] ss:$8 sm:$0xf0]   ;;  %v134_v9 = vld [vmem:[%s285_s0 + $0x6] ss:$8 sm:$0xf]  }
   0x5   :  { %v62_v10 = vsel %vm32_vm0, %v133_v8, %v132_v6  ;;  %v135_v11 = vld [vmem:[%s285_s0 + $0x6] ss:$8 sm:$0xf0]   ;;  %s150_s27 = smov 64   ;;  %s23_s9 = smov 3  ;;  %vm94_vm4 = vcmask 523520  }
   0x6   :  { %v139_v12 = vld [vmem:[%s285_s0 + $0x1] ss:$8 sm:$0xf]   ;;  %v141_v14 = vld [vmem:[%s285_s0 + $0x5] ss:$8 sm:$0xf]   ;;  %v72_v15 = vsel %vm32_vm0, %v135_v11, %v134_v9 }
   0x7   :  { %v140_v13 = vld [vmem:[%s285_s0 + $0x1] ss:$8 sm:$0xf0]   ;;  %v137_v16 = vld [vmem:[%s285_s0 + $0x42] ss:$4 sm:%s79_s26]   ;;  %s151_s6 = smov 32  }
   0x8   :  { %44 = vrot.lane.b32.xlu0 %v43_v7, %s149_s15  ;;  %63 = vrot.lane.b32.xlu1 %v62_v10, %s150_s27  ;;  %v142_v17 = vld [vmem:[%s285_s0 + $0x5] ss:$8 sm:$0xf0]   ;;  %v2_v19 = vld [vmem:[%s285_s0] ss:$4 sm:$0xff]   ;;  %v91_v21 = vsel %vm32_vm0, %v140_v13, %v139_v12 }
   0x9   :  { %v123_v18 = vld [vmem:[%s285_s0 + $0x40] ss:$4 sm:%s23_s9]   ;;  %4 = vst.msk [vmem:[%s286_s1] ss:$8 sm:$0x3] %vm3_vm1, %v2_v19   ;;  %v101_v22 = vsel %vm32_vm0, %v142_v17, %v141_v14 }
   0xa   :  { %v118_v20 = vld [vmem:[%s285_s0 + $0x20] ss:$4 sm:$0xff]   ;;  %124 = vst.msk [vmem:[%s286_s1 + $0x10] ss:$8 sm:$0x3] %vm3_vm1, %v123_v18  }
   0xb   :  { %115 = vst.msk [vmem:[%s286_s1 - $0xf] ss:$8 sm:$0xc] %vm3_vm1, %v2_v19   ;;  %116 = vst.msk [vmem:[%s286_s1 - $0x1e] ss:$8 sm:$0x30] %vm3_vm1, %v2_v19  }
   0xc   :  { %117 = vst.msk [vmem:[%s286_s1 - $0x2d] ss:$8 sm:$0xc0] %vm3_vm1, %v2_v19   ;;  %119 = vst.msk [vmem:[%s286_s1 + $0x4] ss:$8 sm:$0x3] %vm3_vm1, %v118_v20   ;;  %73 = vrot.lane.b32.xlu0 %v72_v15, %s150_s27  ;;  %81 = vrot.lane.b32.xlu1 %v137_v16, %s150_s27 }
   0xd   :  { %120 = vst.msk [vmem:[%s286_s1 - $0xb] ss:$8 sm:$0xc] %vm3_vm1, %v118_v20   ;;  %121 = vst.msk [vmem:[%s286_s1 - $0x1a] ss:$8 sm:$0x30] %vm3_vm1, %v118_v20  }
   0xe   :  { %122 = vst.msk [vmem:[%s286_s1 - $0x29] ss:$8 sm:$0xc0] %vm3_vm1, %v118_v20   ;;  %s108_s27 = smov 3 }
   0xf   :  { %v144_v23 = vld [vmem:[%s285_s0 + $0x41] ss:$4 sm:%s108_s27]  }
  0x10   :  { %92 = vrot.lane.b32.xlu0 %v91_v21, %s151_s6  ;;  %102 = vrot.lane.b32.xlu1 %v101_v22, %s151_s6 }
  0x14   :  { %110 = vrot.lane.b32.xlu0 %v144_v23, %s151_s6 }
  0x76   :  { %v35_v24 = vpop.permute.xlu0 %34   ;;  %v53_v25 = vpop.permute.xlu1 %52  }
  0x77   :  { %131 = vst.msk [vmem:[%s286_s1 + $0x10] ss:$8 sm:$0x3] %vm36_vm2, %v53_v25   ;;  %37 = vst.msk [vmem:[%s286_s1] sm:$0xff] %vm36_vm2, %v35_v24  }
  0x7a   :  { %v45_v26 = vpop.permute.xlu0 %44   ;;  %v64_v27 = vpop.permute.xlu1 %63  }
  0x7b   :  { %66 = vst.msk [vmem:[%s286_s1] sm:$0xff] %vm65_vm3, %v64_v27  }
  0x7c   :  { %129 = vst.msk [vmem:[%s286_s1 + $0x8] sm:$0xff] %vm36_vm2, %v45_v26  }
  0x7e   :  { %v74_v28 = vpop.permute.xlu0 %73   ;;  %v82_v29 = vpop.permute.xlu1 %81  }
  0x7f   :  { %136 = vst.msk [vmem:[%s286_s1 + $0x8] sm:$0xff] %vm65_vm3, %v74_v28   ;;  %138 = vst.msk [vmem:[%s286_s1 + $0x10] ss:$8 sm:$0x3] %vm65_vm3, %v82_v29  }
  0x82   :  { %v93_v30 = vpop.permute.xlu0 %92   ;;  %v103_v31 = vpop.permute.xlu1 %102  }
  0x83   :  { %95 = vst.msk [vmem:[%s286_s1] sm:$0xff] %vm94_vm4, %v93_v30   ;;  %143 = vst.msk [vmem:[%s286_s1 + $0x8] sm:$0xff] %vm94_vm4, %v103_v31  }
  0x86   :  { %v111_v32 = vpop.permute.xlu0 %110  }
  0x87   :  { %145 = vst.msk [vmem:[%s286_s1 + $0x10] ss:$8 sm:$0x3] %vm94_vm4, %v111_v32  }

// kernel: mobilefacenet_forward.45
= control target key start
LH: loop header
LB: loop body
LE: loop exit
PB: predicated region body
PF: predicated region fallthrough
CT: control target
= control target key end

     0   :  { %s715_s12 = smov 0   ;;  %s924_s0 = inlined_call_operand.vmem [shape: bf16[2,8,256], index: 0, kind: input, shape index: {}]   ;;  %s925_s1 = inlined_call_operand.vmem [shape: f32[9,256], index: 1, kind: input, shape index: {}]   ;;  %s926_s2 = inlined_call_operand.vmem [shape: f32[1,256], index: 2, kind: input, shape index: {}]   ;;  %s927_s3 = inlined_call_operand.vmem [shape: bf16[2,8,256], index: 3, kind: output, shape index: {}]  }
   0x1 LB: > { %s649_s13 = sadd.s32 4294967295, %s689_s12   ;;  %p653_p0 = scmp.ge.s32.totalorder %s689_s12, 1  ;;  %s689_s12 = sphi %s715_s12, %s13_s12  }
   0x2   : > { %p137_p1 = scmp.lt.s32.totalorder %s689_s12, 3 }
   0x4   : > { %p138_p2 = pnand %p653_p0, %p137_p1 }
   0x5   : > { %v211_v0 = vlaneseq (!%p138_p2)  ;;  %p161_p3 = scmp.lt.s32.totalorder (!%p138_p2), %s649_s13, 1  ;;  %vm173_vm0 = vcmask (!%p138_p2), 523264   ;;  %v691_v2 = vmov (!%p138_p2), 0.0   ;;  %vm177_vm1 = vcmask (!%p138_p2), 517120   ;;  %v727_v3 = vld [vmem:[%s925_s1 + $0x8] sm:$0xff] (!%p138_p2)  ;;  %v732_v4 = vld [vmem:[%s925_s1] sm:$0xff] (!%p138_p2) }
   0x6   : > { %141 = sbr.rel (%p138_p2) target bundleno = 313 (0x139), region = 32  ;;  %171 = vst [vmem:[#allocation2] sm:$0xff] (!%p138_p2), %v691_v2  ;;  %172 = vst [vmem:[#allocation2 + $0x8] sm:$0xff] (!%p138_p2), %v691_v2  ;;  %s692_s22 = smov (!%p138_p2), 32   ;;  %v658_v32 = vld [vmem:[%s925_s1 + $0x10] ss:$0 sm:$0xff] (!%p138_p2) }
   0x7   : > { %v212_v1 = vshrl.u32 (!%p138_p2), %v211_v0, 7  ;;  %174 = vst.msk [vmem:[#allocation2 + $0x10] sm:$0xff] (!%p138_p2), %vm173_vm0, %v691_v2  ;;  %175 = vst [vmem:[#allocation2 + $0x18] sm:$0x3] (!%p138_p2), %v691_v2  ;;  %s693_s23 = smov (!%p138_p2), 64   ;;  %vm195_vm2 = vcmask (!%p138_p2), 1047809  }
   0x8   : > { %176 = vst [vmem:[#allocation2 + $0x20] sm:$0x3] (!%p138_p2), %v691_v2  ;;  %178 = vst.msk [vmem:[#allocation2 + $0x28] sm:$0x3] (!%p138_p2), %vm177_vm1, %v691_v2  ;;  %v659_v36 = vld [vmem:[%s925_s1 + $0x18] ss:$0 sm:$0xff] (!%p138_p2) }
   0x9   : > { %v736_v5 = vsub.s32 (!%p138_p2), 1, %v212_v1  ;;  %v263_v6 = vsub.s32 (!%p138_p2), 2, %v212_v1  ;;  %v303_v7 = vsub.s32 (!%p138_p2), 3, %v212_v1  ;;  %v332_v14 = vsub.s32 (!%p138_p2), 4, %v212_v1  ;;  %s694_s28 = smov (!%p138_p2), 96  }
   0xa   : > { %v438_v18 = vsub.s32 (!%p138_p2), 6, %v212_v1  ;;  %v383_v21 = vsub.s32 (!%p138_p2), 5, %v212_v1  ;;  %v467_v26 = vsub.s32 (!%p138_p2), 7, %v212_v1  ;;  %v769_v31 = vsub.s32 (!%p138_p2), 0, %v212_v1 }
   0xb   : > { %v231_v8 = vrot.slane (!%p138_p2), %v727_v3, %v736_v5  ;;  %v227_v9 = vrot.slane (!%p138_p2), %v732_v4, %v736_v5  ;;  %v264_v11 = vrot.slane (!%p138_p2), %v732_v4, %v263_v6  ;;  %v304_v15 = vrot.slane (!%p138_p2), %v732_v4, %v303_v7 }
   0xc   : > { %v333_v20 = vrot.slane (!%p138_p2), %v732_v4, %v332_v14  ;;  %v308_v22 = vrot.slane (!%p138_p2), %v727_v3, %v303_v7  ;;  %v439_v23 = vrot.slane (!%p138_p2), %v732_v4, %v438_v18  ;;  %v268_v24 = vrot.slane (!%p138_p2), %v727_v3, %v263_v6 }
   0xd   : > { %s929_s13 = smov (!%p161_p3, %s649_s13), 1  ;;  %236 = vrot.lane.b32.xlu1 %v231_v8, %s692_s22  ;;  %234 = vrot.lane.b32.xlu0 %v227_v9, %s692_s22  ;;  %v384_v25 = vrot.slane %v732_v4, %v383_v21  ;;  %v337_v27 = vrot.slane %v727_v3, %v332_v14  ;;  %v468_v28 = vrot.slane %v732_v4, %v467_v26  ;;  %vm198_vm3 = vcmask 261121  }
   0xe   : > { %s663_s18 = sshll.u32 %s929_s13, 3  ;;  %v765_v29 = vrot.slane %v727_v3, %v438_v18  ;;  %v388_v30 = vrot.slane %v727_v3, %v383_v21  ;;  %v214_v33 = vrot.slane %v732_v4, %v769_v31  ;;  %v472_v34 = vrot.slane %v727_v3, %v467_v26 }
   0xf   : > { %s165_s21 = scalar_lea.vmem %s924_s0, %s663_s18  ;;  %v218_v35 = vrot.slane %v727_v3, %v769_v31  ;;  %vm200_vm4 = vcmask 1040640   ;;  %vm203_vm5 = vcmask 253952   ;;  %vm190_vm6 = vcmask 261120   ;;  %s170_s6 = scalar_lea.vmem %s927_s3, %s663_s18 }
  0x10   : > { %v179_v10 = vld [vmem:[%s165_s21] sm:$0xff]  ;;  %vm317_vm7 = vcmask 1046528   ;;  %vm452_vm8 = vcmask 1045504   ;;  %vm254_vm9 = vcmask 785408  }
  0x11   : > { %v180_v12 = vunpack.c.l.bf16 %v179_v10  ;;  %v181_v13 = vunpack.c.h.bf16 %v179_v10  ;;  %271 = vrot.lane.b32.xlu1 %v264_v11, %s693_s23 }
  0x13   : > { %v184_v16 = vrot.slane %v180_v12, 7  ;;  %v185_v17 = vrot.slane %v181_v13, 7 }
  0x15   : > { %v678_v19 = vpack.i.bf16 %v185_v17, %v184_v16  ;;  %340 = vrot.lane.b32.xlu1 %v333_v20, %s692_s22 }
  0x17   : > { %679 = vrot.lane.b32.xlu0 %v678_v19, %s692_s22 }
  0x19   : > { %391 = vrot.lane.b32.xlu1 %v384_v25, %s693_s23 }
  0x1b   : > { %273 = vrot.lane.b32.xlu0 %v268_v24, %s693_s23 }
  0x1d   : > { %475 = vrot.lane.b32.xlu1 %v468_v28, %s692_s22 }
  0x1f   : > { %342 = vrot.lane.b32.xlu0 %v337_v27, %s692_s22 }
  0x21   : > { %526 = vrot.lane.b32.xlu1 %v658_v32, %s693_s23 }
  0x23   : > { %393 = vrot.lane.b32.xlu0 %v388_v30, %s693_s23 }
  0x27   : > { %477 = vrot.lane.b32.xlu0 %v472_v34, %s692_s22 }
  0x2b   : > { %528 = vrot.lane.b32.xlu0 %v659_v36, %s693_s23 }
  0x7f   : > { %v235_v37 = vpop.permute.xlu0 %234  ;;  %v237_v42 = vpop.permute.xlu1 %236 }
  0x80   : > { %v238_v13 = vsel %vm190_vm6, %v235_v37, %v237_v42 }
  0x83   : > { %v272_v43 = vpop.permute.xlu1 %271 }
  0x87   : > { %v341_v55 = vpop.permute.xlu1 %340 }
  0x89   : > { %v680_v38 = vpop.permute.xlu0 %679 }
  0x8a   : > { %v682_v39 = vunpack.i.h.bf16 %v680_v38  ;;  %v681_v40 = vunpack.i.l.bf16 %v680_v38 }
  0x8b   : > { %v392_v2 = vpop.permute.xlu1 %391 }
  0x8c   : > { %199 = vst.msk [vmem:[#allocation2 + $0x10] sm:$0xfe] %vm198_vm3, %v682_v39  ;;  %v191_v41 = vsel %vm190_vm6, %v681_v40, %v682_v39 }
  0x8d   : > { %204 = vst.msk [vmem:[#allocation2 + $0x28] sm:$0x1] %vm203_vm5, %v682_v39  ;;  %197 = vst [vmem:[#allocation2 + $0x8] sm:$0xfe] %v191_v41  ;;  %v274_v50 = vpop.permute.xlu0 %273 }
  0x8e   : > { %196 = vst.msk [vmem:[#allocation2] sm:$0xfe] %vm195_vm2, %v681_v40  ;;  %202 = vst [vmem:[#allocation2 + $0x20] sm:$0x1] %v191_v41  ;;  %v275_v1 = vsel %vm173_vm0, %v272_v43, %v274_v50 }
  0x8f   : > { %201 = vst.msk [vmem:[#allocation2 + $0x18] sm:$0x1] %vm200_vm4, %v681_v40  ;;  %v476_v28 = vpop.permute.xlu1 %475 }
  0x91   : > { %v343_v58 = vpop.permute.xlu0 %342 }
  0x93   : > { %v223_v62 = vld [vmem:[#allocation2 + $0x10] sm:$0xff] }
  0x94   : > { %v792_v48 = vld [vmem:[#allocation2 + $0x8] sm:$0xfe]  ;;  %v281_v8 = vmul.f32 %v274_v50, %v223_v62  ;;  %v244_v14 = vmul.f32 %v237_v42, %v223_v62  ;;  %v328_v20 = vld [vmem:[#allocation2 + $0x10] sm:$0xfe]  ;;  %v329_v24 = vld [vmem:[#allocation2 + $0x28] sm:$0x1] }
  0x95   : > { %v297_v44 = vld [vmem:[#allocation2] sm:$0xfe]  ;;  %v794_v49 = vld [vmem:[#allocation2 + $0x20] sm:$0x1]  ;;  %v799_v52 = vmul.f32 %v308_v22, %v792_v48  ;;  %v810_v61 = vld [vmem:[#allocation2 + $0x8] sm:$0xfc]  ;;  %v394_v12 = vpop.permute.xlu0 %393  ;;  %v350_v40 = vmul.f32 %v343_v58, %v328_v20  ;;  %v353_v41 = vmul.f32 %v343_v58, %v329_v24 }
  0x96   : > { %v299_v45 = vld [vmem:[#allocation2 + $0x18] sm:$0x1]  ;;  %v788_v46 = vmul.f32 %v304_v15, %v297_v44  ;;  %v796_v51 = vld [vmem:[#allocation2] sm:$0xfc]  ;;  %v802_v53 = vmul.f32 %v308_v22, %v794_v49  ;;  %v812_v63 = vld [vmem:[#allocation2 + $0x20] sm:$0x3]  ;;  %v445_v6 = vmul.f32 %v765_v29, %v810_v61  ;;  %v399_v9 = vmul.f32 %v392_v2, %v297_v44 }
  0x97   : > { %v790_v47 = vmul.f32 %v304_v15, %v299_v45  ;;  %v804_v54 = vld [vmem:[#allocation2 + $0x18] sm:$0x3]  ;;  %v807_v56 = vmul.f32 %v439_v23, %v796_v51  ;;  %v209_v57 = vld [vmem:[#allocation2] sm:$0xff]  ;;  %v210_v7 = vld [vmem:[#allocation2 + $0x8] sm:$0xff]  ;;  %v402_v10 = vmul.f32 %v392_v2, %v299_v45  ;;  %v447_v11 = vmul.f32 %v765_v29, %v812_v63 }
  0x98   : > { %v446_v59 = vmul.f32 %v439_v23, %v804_v54  ;;  %v279_v60 = vmul.f32 %v272_v43, %v209_v57  ;;  %v242_v0 = vmul.f32 %v235_v37, %v209_v57  ;;  %v344_v15 = vsel %vm190_vm6, %v341_v55, %v343_v58 }
  0x99   : > { %v318_v16 = vrot.slane %v788_v46, 1  ;;  %v348_v17 = vmul.f32 %v341_v55, %v297_v44  ;;  %v351_v18 = vmul.f32 %v341_v55, %v299_v45  ;;  %v280_v19 = vmul.f32 %v275_v1, %v210_v7  ;;  %v478_v3 = vpop.permute.xlu0 %477 }
  0x9a   : > { %285 = vrot.lane.b32.xlu0 %v279_v60, %s693_s23  ;;  %248 = vrot.lane.b32.xlu1 %v242_v0, %s694_s28  ;;  %v319_v21 = vrot.slane %v790_v47, 1  ;;  %v411_v22 = vrot.slane %v399_v9, 1  ;;  %v412_v23 = vrot.slane %v402_v10, 1  ;;  %v401_v25 = vmul.f32 %v394_v12, %v328_v20 }
  0x9b   : > { %v321_v26 = vrot.slane %v799_v52, 1  ;;  %v322_v27 = vrot.slane %v802_v53, 1  ;;  %v404_v29 = vmul.f32 %v394_v12, %v329_v24  ;;  %v243_v30 = vmul.f32 %v238_v13, %v210_v7 }
  0x9c   : > { %v453_v32 = vrot.slane %v807_v56, 2  ;;  %v454_v34 = vrot.slane %v446_v59, 2  ;;  %v456_v36 = vrot.slane %v445_v6, 2  ;;  %v457_v37 = vrot.slane %v447_v11, 2  ;;  %v527_v59 = vpop.permute.xlu1 %526 }
  0x9d   : > { %v360_v38 = vrot.slane %v348_v17, 1  ;;  %v361_v39 = vrot.slane %v351_v18, 1  ;;  %v349_v42 = vmul.f32 %v344_v15, %v792_v48  ;;  %v352_v43 = vmul.f32 %v344_v15, %v794_v49  ;;  %v464_v17 = vld [vmem:[#allocation2 + $0x28] sm:$0x3] }
  0x9e   : > { %289 = vrot.lane.b32.xlu0 %v281_v8, %s693_s23  ;;  %252 = vrot.lane.b32.xlu1 %v244_v14, %s694_s28  ;;  %v483_v44 = vmul.f32 %v476_v28, %v796_v51  ;;  %v417_v45 = vrot.slane %v401_v25, 1  ;;  %v418_v46 = vrot.slane %v404_v29, 1  ;;  %v413_v47 = vsel %vm317_vm7, %v411_v22, %v412_v23 }
  0x9f   : > { %v839_v50 = vmul.f32 %v214_v33, %v209_v57  ;;  %v844_v52 = vmul.f32 %v218_v35, %v210_v7  ;;  %v847_v53 = vsel %vm317_vm7, %v318_v16, %v319_v21  ;;  %v850_v55 = vsel %vm317_vm7, %v321_v26, %v322_v27 }
  0xa0   : > { %v853_v56 = vsel %vm452_vm8, %v453_v32, %v454_v34  ;;  %v856_v58 = vsel %vm452_vm8, %v456_v36, %v457_v37  ;;  %v366_v4 = vrot.slane %v350_v40, 1  ;;  %v367_v33 = vrot.slane %v353_v41, 1 }
  0xa1   : > { %v486_v57 = vmul.f32 %v476_v28, %v804_v54  ;;  %v362_v35 = vsel %vm317_vm7, %v360_v38, %v361_v39  ;;  %v395_v60 = vsel %vm173_vm0, %v392_v2, %v394_v12  ;;  %v363_v62 = vrot.slane %v349_v42, 1  ;;  %v463_v12 = vld [vmem:[#allocation2 + $0x10] sm:$0xfc] }
  0xa2   : > { %250 = vrot.lane.b32.xlu0 %v243_v30, %s694_s28  ;;  %287 = vrot.lane.b32.xlu1 %v280_v19, %s693_s23  ;;  %v364_v0 = vrot.slane %v352_v43, 1  ;;  %v495_v1 = vrot.slane %v483_v44, 2  ;;  %v534_v6 = vmul.f32 %v527_v59, %v796_v51  ;;  %v537_v7 = vmul.f32 %v527_v59, %v804_v54  ;;  %v529_v54 = vpop.permute.xlu0 %528 }
  0xa3   : > { %v479_v8 = vsel %vm190_vm6, %v476_v28, %v478_v3  ;;  %v419_v9 = vsel %vm317_vm7, %v417_v45, %v418_v46  ;;  %v496_v10 = vrot.slane %v486_v57, 2  ;;  %v400_v11 = vmul.f32 %v395_v60, %v792_v48 }
  0xa4   : > { %v403_v13 = vmul.f32 %v395_v60, %v794_v49  ;;  %v368_v2 = vsel %vm317_vm7, %v366_v4, %v367_v33  ;;  %v484_v51 = vmul.f32 %v479_v8, %v810_v61  ;;  %v485_v14 = vmul.f32 %v478_v3, %v463_v12 }
  0xa5   : > { %v546_v15 = vrot.slane %v534_v6, 2  ;;  %v547_v16 = vrot.slane %v537_v7, 2  ;;  %v487_v18 = vmul.f32 %v479_v8, %v812_v63  ;;  %v365_v48 = vsel %vm317_vm7, %v363_v62, %v364_v0 }
  0xa6   : > { %420 = vrot.lane.b32.xlu0 %v413_v47, %s693_s23  ;;  %369 = vrot.lane.b32.xlu1 %v362_v35, %s694_s28  ;;  %v414_v19 = vrot.slane %v400_v11, 1  ;;  %v415_v49 = vrot.slane %v403_v13, 1  ;;  %v488_v20 = vmul.f32 %v478_v3, %v464_v17  ;;  %v497_v21 = vsel %vm452_vm8, %v495_v1, %v496_v10 }
  0xa7   : > { %v530_v22 = vsel %vm173_vm0, %v527_v59, %v529_v54  ;;  %v498_v23 = vrot.slane %v484_v51, 2  ;;  %v501_v24 = vrot.slane %v485_v14, 2  ;;  %v499_v25 = vrot.slane %v487_v18, 2 }
  0xa8   : > { %v536_v26 = vmul.f32 %v529_v54, %v463_v12  ;;  %v539_v27 = vmul.f32 %v529_v54, %v464_v17  ;;  %v548_v28 = vsel %vm452_vm8, %v546_v15, %v547_v16  ;;  %v502_v29 = vrot.slane %v488_v20, 2 }
  0xa9   : > { %v535_v30 = vmul.f32 %v530_v22, %v810_v61  ;;  %v538_v32 = vmul.f32 %v530_v22, %v812_v63  ;;  %v416_v34 = vsel %vm317_vm7, %v414_v19, %v415_v49  ;;  %v500_v38 = vsel %vm452_vm8, %v498_v23, %v499_v25  ;;  %v567_v49 = vld [vmem:[%s926_s2] sm:$0x3] }
  0xaa   : > { %424 = vrot.lane.b32.xlu0 %v419_v9, %s693_s23  ;;  %373 = vrot.lane.b32.xlu1 %v368_v2, %s694_s28  ;;  %v552_v36 = vrot.slane %v536_v26, 2  ;;  %v553_v37 = vrot.slane %v539_v27, 2  ;;  %v503_v41 = vsel %vm452_vm8, %v501_v24, %v502_v29  ;;  %v572_v23 = vrot.slane %v567_v49, %v769_v31 }
  0xab   : > { %v549_v39 = vrot.slane %v535_v30, 2  ;;  %v550_v40 = vrot.slane %v538_v32, 2  ;;  %v576_v25 = vrot.slane %v567_v49, %v736_v5 }
  0xac   : > { %v554_v61 = vsel %vm452_vm8, %v552_v36, %v553_v37 }
  0xad   : > { %v551_v63 = vsel %vm452_vm8, %v549_v39, %v550_v40 }
  0xae   : > { %371 = vrot.lane.b32.xlu0 %v365_v48, %s694_s28  ;;  %504 = vrot.lane.b32.xlu1 %v497_v21, %s694_s28 }
  0xb2   : > { %555 = vrot.lane.b32.xlu0 %v548_v28, %s693_s23  ;;  %422 = vrot.lane.b32.xlu1 %v416_v34, %s693_s23 }
  0xb6   : > { %506 = vrot.lane.b32.xlu0 %v500_v38, %s694_s28  ;;  %508 = vrot.lane.b32.xlu1 %v503_v41, %s694_s28 }
  0xba   : > { %559 = vrot.lane.b32.xlu0 %v554_v61, %s693_s23  ;;  %557 = vrot.lane.b32.xlu1 %v551_v63, %s693_s23 }
 0x10c   : > { %v286_v42 = vpop.permute.xlu0 %285  ;;  %v249_v43 = vpop.permute.xlu1 %248 }
 0x110   : > { %v290_v44 = vpop.permute.xlu0 %289  ;;  %v253_v45 = vpop.permute.xlu1 %252 }
 0x114   : > { %v251_v46 = vpop.permute.xlu0 %250  ;;  %v288_v47 = vpop.permute.xlu1 %287 }
 0x115   : > { %v255_v4 = vsel %vm254_vm9, %v249_v43, %v251_v46  ;;  %v256_v33 = vsel %vm254_vm9, %v251_v46, %v253_v45  ;;  %v291_v3 = vsel %vm173_vm0, %v286_v42, %v288_v47  ;;  %v292_v35 = vsel %vm173_vm0, %v288_v47, %v290_v44 }
 0x116   : > { %v259_v57 = vadd.f32 %v255_v4, %v839_v50  ;;  %v260_v59 = vadd.f32 %v256_v33, %v844_v52 }
 0x118   : > { %v295_v60 = vadd.f32 %v291_v3, %v259_v57  ;;  %v296_v62 = vadd.f32 %v292_v35, %v260_v59  ;;  %v421_v0 = vpop.permute.xlu0 %420  ;;  %v370_v1 = vpop.permute.xlu1 %369 }
 0x11a   : > { %v326_v6 = vadd.f32 %v847_v53, %v295_v60  ;;  %v327_v7 = vadd.f32 %v850_v55, %v296_v62 }
 0x11c   : > { %v425_v8 = vpop.permute.xlu0 %424  ;;  %v374_v9 = vpop.permute.xlu1 %373 }
 0x120   : > { %v372_v10 = vpop.permute.xlu0 %371  ;;  %v505_v11 = vpop.permute.xlu1 %504 }
 0x121   : > { %v375_v50 = vsel %vm254_vm9, %v370_v1, %v372_v10  ;;  %v376_v52 = vsel %vm254_vm9, %v372_v10, %v374_v9 }
 0x122   : > { %v379_v2 = vadd.f32 %v375_v50, %v326_v6  ;;  %v380_v12 = vadd.f32 %v376_v52, %v327_v7 }
 0x124   : > { %v556_v13 = vpop.permute.xlu0 %555  ;;  %v423_v51 = vpop.permute.xlu1 %422 }
 0x125   : > { %v426_v14 = vsel %vm173_vm0, %v421_v0, %v423_v51  ;;  %v427_v54 = vsel %vm173_vm0, %v423_v51, %v425_v8 }
 0x126   : > { %v430_v15 = vadd.f32 %v426_v14, %v379_v2  ;;  %v431_v53 = vadd.f32 %v427_v54, %v380_v12 }
 0x128   : > { %v507_v16 = vpop.permute.xlu0 %506  ;;  %v509_v55 = vpop.permute.xlu1 %508  ;;  %v461_v17 = vadd.f32 %v853_v56, %v430_v15  ;;  %v462_v18 = vadd.f32 %v856_v58, %v431_v53 }
 0x129   : > { %v510_v48 = vsel %vm254_vm9, %v505_v11, %v507_v16  ;;  %v511_v19 = vsel %vm254_vm9, %v507_v16, %v509_v55 }
 0x12a   : > { %v514_v21 = vadd.f32 %v510_v48, %v461_v17  ;;  %v515_v22 = vadd.f32 %v511_v19, %v462_v18 }
 0x12c   : > { %v560_v20 = vpop.permute.xlu0 %559  ;;  %v558_v24 = vpop.permute.xlu1 %557 }
 0x12d   : > { %v561_v56 = vsel %vm173_vm0, %v556_v13, %v558_v24  ;;  %v562_v58 = vsel %vm173_vm0, %v558_v24, %v560_v20 }
 0x12e   : > { %v565_v26 = vadd.f32 %v561_v56, %v514_v21  ;;  %v566_v27 = vadd.f32 %v562_v58, %v515_v22 }
 0x130   : > { %v579_v28 = vadd.f32 %v572_v23, %v565_v26  ;;  %v580_v29 = vadd.f32 %v576_v25, %v566_v27 }
 0x132   : > { %v581_v30 = vmax.f32 %v579_v28, 0.0  ;;  %v582_v32 = vmax.f32 %v580_v29, 0.0 }
 0x134   : > { %v583_v34 = vmin.f32 %v581_v30, 6.0  ;;  %v584_v36 = vmin.f32 %v582_v32, 6.0 }
 0x136   : > { %v665_v31 = vpack.c.bf16 %v584_v36, %v583_v34 }
 0x138   : > { %593 = vst [vmem:[%s170_s6] sm:$0xff] %v665_v31 }
 0x139 PF: > { %s13_s12 = sadd.s32 1, %s689_s12  }
 0x13a   : > { %p10_p4 = scmp.ge.s32.totalorder %s13_s12, 4  }
 0x13c   :  { %12 = sbr.rel (!%p10_p4) target bundleno = 1 (0x1), region = 62 }

// kernel: mobilefacenet_forward.44
= control target key start
LH: loop header
LB: loop body
LE: loop exit
PB: predicated region body
PF: predicated region fallthrough
CT: control target
= control target key end

     0   :  { %vm94_vm0 = vcmask 261120   ;;  %vm312_vm1 = vcmask 257024   ;;  %s571_s1 = inlined_call_operand.vmem [shape: bf16[32,32], index: 1, kind: input, shape index: {}]   ;;  %s572_s0 = inlined_call_operand.vmem [shape: bf16[128,32], index: 0, kind: input, shape index: {}]   ;;  %s573_s2 = inlined_call_operand.vmem [shape: f32[1,32], index: 2, kind: input, shape index: {}]   ;;  %s574_s3 = inlined_call_operand.vmem [shape: bf16[128,32], index: 3, kind: output, shape index: {}]  }
   0x1   :  { %v418_v0 = vld [vmem:[%s571_s1] sm:$0xff]   ;;  %v419_v1 = vld [vmem:[%s571_s1 + $0x8] sm:$0xff]   ;;  %v424_v6 = vld [vmem:[%s572_s0 + $0x10] sm:$0xff]  }
   0x2   :  { %394 = vmatprep.subr.bf16.mxu0 %v418_v0  ;;  %414 = vmatprep.subr.bf16.mxu1 %v418_v0  ;;  %v420_v2 = vld [vmem:[%s572_s0] sm:$0xff]   ;;  %v422_v4 = vld [vmem:[%s572_s0 + $0x8] sm:$0xff]   ;;  %v425_v7 = vld [vmem:[%s572_s0 + $0x30] sm:$0xff]  }
   0x3   :  { %395 = vmatpush3.bf16.msra.mxu0 %v418_v0  ;;  %416 = vmatpush3.bf16.msra.mxu1 %v418_v0  ;;  %v421_v3 = vld [vmem:[%s572_s0 + $0x20] sm:$0xff]   ;;  %v423_v5 = vld [vmem:[%s572_s0 + $0x28] sm:$0xff]   ;;  %v426_v8 = vld [vmem:[%s572_s0 + $0x18] sm:$0xff]  }
   0x4   :  { %396 = vmatprep.subr.bf16.mxu0 %v419_v1  ;;  %415 = vmatprep.subr.bf16.mxu1 %v419_v1  ;;  %v427_v9 = vld [vmem:[%s572_s0 + $0x38] sm:$0xff]   ;;  %v489_v10 = vld [vmem:[%s573_s2] ss:$0 sm:$0xff] }
   0x5   :  { %398 = vmatprep.mubr.msk.bf16.mxu0 %vm94_vm0, %v420_v2  ;;  %406 = vmatprep.mubr.msk.bf16.mxu1 %vm94_vm0, %v421_v3 }
   0x7   :  { %397 = vmatpush3.bf16.msra.mxu0 %v419_v1  ;;  %417 = vmatpush3.bf16.msra.mxu1 %v419_v1 }
   0xa   :  { %399 = vmatmul.mubr.msk.bf16.vlgmr.msra.gmra.mrb[0].mxu0 %vm94_vm0, %v422_v4  ;;  %407 = vmatmul.mubr.msk.bf16.vlgmr.msra.gmra.mrb[0].mxu1 %vm94_vm0, %v423_v5 }
   0xb   :  { %402 = vmatprep.mubr.msk.bf16.mxu0 %vm94_vm0, %v424_v6  ;;  %410 = vmatprep.mubr.msk.bf16.mxu1 %vm94_vm0, %v425_v7 }
  0x12   :  { %403 = vmatmul.mubr.msk.bf16.gmra.mrb[4].mxu0 %vm94_vm0, %v426_v8  ;;  %411 = vmatmul.mubr.msk.bf16.gmra.mrb[4].mxu1 %vm94_vm0, %v427_v9 }
  0xdd   :  { %v400_v11 = vpop.f32.mrb[0].mxu0  ;;  %v408_v12 = vpop.f32.mrb[0].mxu1 }
  0xde   :  { %v162_v13 = vadd.f32 %v400_v11, %v489_v10  ;;  %v194_v14 = vadd.f32 %v408_v12, %v489_v10  ;;  %v153_v15 = vpop.f32.mrb[1].mxu0  ;;  %v185_v16 = vpop.f32.mrb[1].mxu1 }
  0xdf   :  { %v154_v17 = vadd.f32 %v489_v10, %v153_v15  ;;  %v186_v18 = vadd.f32 %v489_v10, %v185_v16  ;;  %v401_v19 = vpop.f32.mrb[2].mxu0  ;;  %v409_v20 = vpop.f32.mrb[2].mxu1 }
  0xe0   :  { %v218_v21 = vmax.f32 %v162_v13, 0.0  ;;  %v226_v22 = vmax.f32 %v194_v14, 0.0  ;;  %v165_v23 = vadd.f32 %v401_v19, %v489_v10  ;;  %v197_v24 = vadd.f32 %v409_v20, %v489_v10  ;;  %v156_v25 = vpop.f32.mrb[3].mxu0  ;;  %v188_v26 = vpop.f32.mrb[3].mxu1 }
  0xe1   :  { %v216_v27 = vmax.f32 %v154_v17, 0.0  ;;  %v224_v28 = vmax.f32 %v186_v18, 0.0  ;;  %v157_v29 = vadd.f32 %v489_v10, %v156_v25  ;;  %v189_v30 = vadd.f32 %v489_v10, %v188_v26 }
  0xe2   :  { %v234_v31 = vmin.f32 %v218_v21, 6.0  ;;  %v242_v32 = vmin.f32 %v226_v22, 6.0  ;;  %v219_v33 = vmax.f32 %v165_v23, 0.0  ;;  %v227_v34 = vmax.f32 %v197_v24, 0.0 }
  0xe3   :  { %v232_v35 = vmin.f32 %v216_v27, 6.0  ;;  %v240_v36 = vmin.f32 %v224_v28, 6.0  ;;  %v217_v37 = vmax.f32 %v157_v29, 0.0  ;;  %v225_v38 = vmax.f32 %v189_v30, 0.0 }
  0xe4   :  { %v370_v39 = vpack.c.bf16 %v234_v31, %v234_v31  ;;  %v378_v40 = vpack.c.bf16 %v242_v32, %v242_v32  ;;  %v235_v41 = vmin.f32 %v219_v33, 6.0  ;;  %v243_v42 = vmin.f32 %v227_v34, 6.0 }
  0xe5   :  { %v368_v43 = vpack.c.bf16 %v232_v35, %v232_v35  ;;  %v376_v44 = vpack.c.bf16 %v240_v36, %v240_v36  ;;  %v233_v45 = vmin.f32 %v217_v37, 6.0  ;;  %v241_v46 = vmin.f32 %v225_v38, 6.0  ;;  %v404_v47 = vpop.f32.mrb[4].mxu0  ;;  %v412_v48 = vpop.f32.mrb[4].mxu1 }
  0xe6   :  { %315 = vst.msk [vmem:[%s574_s3 + $0x8] sm:$0xf] %vm312_vm1, %v370_v39  ;;  %323 = vst.msk [vmem:[%s574_s3 + $0x28] sm:$0xf] %vm312_vm1, %v378_v40  ;;  %v371_v49 = vpack.c.bf16 %v235_v41, %v235_v41  ;;  %v379_v50 = vpack.c.bf16 %v243_v42, %v243_v42  ;;  %v178_v51 = vadd.f32 %v404_v47, %v489_v10  ;;  %v169_v53 = vpop.f32.mrb[5].mxu0  ;;  %v201_v54 = vpop.f32.mrb[5].mxu1 }
  0xe7   :  { %v210_v52 = vadd.f32 %v412_v48, %v489_v10  ;;  %313 = vst.msk [vmem:[%s574_s3] sm:$0xf] %vm312_vm1, %v368_v43  ;;  %321 = vst.msk [vmem:[%s574_s3 + $0x20] sm:$0xf] %vm312_vm1, %v376_v44  ;;  %v369_v55 = vpack.c.bf16 %v233_v45, %v233_v45  ;;  %v377_v56 = vpack.c.bf16 %v241_v46, %v241_v46  ;;  %v405_v59 = vpop.f32.mrb[6].mxu0  ;;  %v413_v60 = vpop.f32.mrb[6].mxu1 }
  0xe8   :  { %v170_v57 = vadd.f32 %v489_v10, %v169_v53  ;;  %v202_v58 = vadd.f32 %v489_v10, %v201_v54  ;;  %316 = vst.msk [vmem:[%s574_s3 + $0xc] sm:$0xf] %vm312_vm1, %v371_v49  ;;  %324 = vst.msk [vmem:[%s574_s3 + $0x2c] sm:$0xf] %vm312_vm1, %v379_v50  ;;  %v222_v61 = vmax.f32 %v178_v51, 0.0  ;;  %v181_v63 = vadd.f32 %v405_v59, %v489_v10  ;;  %v172_v1 = vpop.f32.mrb[7].mxu0 }
  0xe9   :  { %v230_v62 = vmax.f32 %v210_v52, 0.0  ;;  %v213_v0 = vadd.f32 %v413_v60, %v489_v10  ;;  %v204_v2 = vpop.f32.mrb[7].mxu1  ;;  %314 = vst.msk [vmem:[%s574_s3 + $0x4] sm:$0xf] %vm312_vm1, %v369_v55  ;;  %322 = vst.msk [vmem:[%s574_s3 + $0x24] sm:$0xf] %vm312_vm1, %v377_v56  ;;  %v173_v5 = vadd.f32 %v489_v10, %v172_v1 }
  0xea   :  { %v220_v3 = vmax.f32 %v170_v57, 0.0  ;;  %v228_v4 = vmax.f32 %v202_v58, 0.0  ;;  %v205_v6 = vadd.f32 %v489_v10, %v204_v2  ;;  %v238_v7 = vmin.f32 %v222_v61, 6.0 }
  0xeb   :  { %v246_v8 = vmin.f32 %v230_v62, 6.0  ;;  %v223_v9 = vmax.f32 %v181_v63, 0.0  ;;  %v231_v11 = vmax.f32 %v213_v0, 0.0  ;;  %v221_v14 = vmax.f32 %v173_v5, 0.0 }
  0xec   :  { %v236_v12 = vmin.f32 %v220_v3, 6.0  ;;  %v244_v13 = vmin.f32 %v228_v4, 6.0  ;;  %v229_v15 = vmax.f32 %v205_v6, 0.0  ;;  %v374_v16 = vpack.c.bf16 %v238_v7, %v238_v7 }
  0xed   :  { %v382_v17 = vpack.c.bf16 %v246_v8, %v246_v8  ;;  %v239_v18 = vmin.f32 %v223_v9, 6.0  ;;  %v247_v19 = vmin.f32 %v231_v11, 6.0  ;;  %v237_v22 = vmin.f32 %v221_v14, 6.0 }
  0xee   :  { %v372_v20 = vpack.c.bf16 %v236_v12, %v236_v12  ;;  %v380_v21 = vpack.c.bf16 %v244_v13, %v244_v13  ;;  %v245_v23 = vmin.f32 %v229_v15, 6.0  ;;  %319 = vst.msk [vmem:[%s574_s3 + $0x18] sm:$0xf] %vm312_vm1, %v374_v16 }
  0xef   :  { %327 = vst.msk [vmem:[%s574_s3 + $0x38] sm:$0xf] %vm312_vm1, %v382_v17  ;;  %v375_v10 = vpack.c.bf16 %v239_v18, %v239_v18  ;;  %v383_v24 = vpack.c.bf16 %v247_v19, %v247_v19  ;;  %v373_v25 = vpack.c.bf16 %v237_v22, %v237_v22 }
  0xf0   :  { %317 = vst.msk [vmem:[%s574_s3 + $0x10] sm:$0xf] %vm312_vm1, %v372_v20  ;;  %325 = vst.msk [vmem:[%s574_s3 + $0x30] sm:$0xf] %vm312_vm1, %v380_v21  ;;  %v381_v26 = vpack.c.bf16 %v245_v23, %v245_v23 }
  0xf1   :  { %320 = vst.msk [vmem:[%s574_s3 + $0x1c] sm:$0xf] %vm312_vm1, %v375_v10  ;;  %328 = vst.msk [vmem:[%s574_s3 + $0x3c] sm:$0xf] %vm312_vm1, %v383_v24 }
  0xf2   :  { %318 = vst.msk [vmem:[%s574_s3 + $0x14] sm:$0xf] %vm312_vm1, %v373_v25  ;;  %326 = vst.msk [vmem:[%s574_s3 + $0x34] sm:$0xf] %vm312_vm1, %v381_v26 }

// kernel: tile.51
= control target key start
LH: loop header
LB: loop body
LE: loop exit
PB: predicated region body
PF: predicated region fallthrough
CT: control target
= control target key end

     0   :  { %s74_s24 = smov 3  ;;  %s80_s25 = smov 3  ;;  %vm47_vm0 = vcmask 523264   ;;  %vm101_vm1 = vcmask 1047556   ;;  %vm105_vm2 = vcmask 1048064   ;;  %s237_s0 = inlined_call_operand.vmem [shape: f32[9,4,64], index: 0, kind: input, shape index: {}]   ;;  %s238_s1 = inlined_call_operand.vmem [shape: f32[9,256], index: 1, kind: output, shape index: {}]  }
   0x1   :  { %v134_v0 = vld [vmem:[%s237_s0 + $0x1c] sm:$0xf]  ;;  %v135_v1 = vld [vmem:[%s237_s0 + $0x18] sm:$0xf]  ;;  %v136_v2 = vld [vmem:[%s237_s0 + $0x14] sm:$0xf] }
   0x2   :  { %13 = vst [vmem:[#allocation0 + $0x38] sm:$0xf] %v134_v0  ;;  %18 = vst [vmem:[#allocation0 + $0x30] sm:$0xf] %v135_v1  ;;  %v137_v3 = vld [vmem:[%s237_s0 + $0x10] sm:$0xf] }
   0x3   :  { %23 = vst [vmem:[#allocation0 + $0x28] sm:$0xf] %v136_v2  ;;  %v138_v4 = vld [vmem:[%s237_s0 + $0xc] sm:$0xf]  ;;  %v139_v5 = vld [vmem:[%s237_s0 + $0x8] sm:$0xf] }
   0x4   :  { %28 = vst [vmem:[#allocation0 + $0x20] sm:$0xf] %v137_v3  ;;  %33 = vst [vmem:[#allocation0 + $0x18] sm:$0xf] %v138_v4  ;;  %v140_v6 = vld [vmem:[%s237_s0 + $0x4] sm:$0xf] }
   0x5   :  { %38 = vst [vmem:[#allocation0 + $0x10] sm:$0xf] %v139_v5  ;;  %v43_v7 = vld [vmem:[%s237_s0] sm:$0xf]  ;;  %42 = vst [vmem:[#allocation0 + $0x8] sm:$0xf] %v140_v6 }
   0x6   :  { %44 = vst [vmem:[#allocation0] sm:$0xf] %v43_v7  ;;  %v133_v8 = vld [vmem:[%s237_s0 + $0x20] sm:$0xf]  ;;  %s56_s0 = smov 3  ;;  %s62_s26 = smov 3 }
   0x7   :  { %8 = vst [vmem:[#allocation0 + $0x40] sm:$0xf] %v133_v8  ;;  %s68_s27 = smov 3  ;;  %s45_s28 = smov 3 }
   0x8   :  { %s50_s29 = smov 3  ;;  %s86_s30 = smov 3 }
   0x9   :  { %v81_v10 = vld [vmem:[#allocation0 + $0x30] ss:$2 sm:%s80_s25]   ;;  %s119_s12 = smov 3  ;;  %s92_s13 = smov 3 }
   0xa   :  { %v75_v9 = vld [vmem:[#allocation0 + $0x28] ss:$2 sm:%s74_s24]   ;;  %146 = vst.msk [vmem:[%s238_s1 + $0x6] ss:$8 sm:$0x3] %vm47_vm0, %v81_v10   ;;  %s152_s18 = smov 64  }
   0xb   :  { %v63_v12 = vld [vmem:[#allocation0 + $0x18] ss:$2 sm:%s62_s26]   ;;  %145 = vst.msk [vmem:[%s238_s1 + $0x5] ss:$8 sm:$0x3] %vm47_vm0, %v75_v9  }
   0xc   :  { %v57_v11 = vld [vmem:[#allocation0 + $0x10] ss:$2 sm:%s56_s0]   ;;  %v69_v13 = vld [vmem:[#allocation0 + $0x20] ss:$2 sm:%s68_s27]  }
   0xd   :  { %v46_v14 = vld [vmem:[#allocation0] ss:$2 sm:%s45_s28]   ;;  %142 = vst.msk [vmem:[%s238_s1 + $0x2] ss:$8 sm:$0x3] %vm47_vm0, %v57_v11  }
   0xe   :  { %v51_v15 = vld [vmem:[#allocation0 + $0x8] ss:$2 sm:%s50_s29]   ;;  %143 = vst.msk [vmem:[%s238_s1 + $0x3] ss:$8 sm:$0x3] %vm47_vm0, %v63_v12  }
   0xf   :  { %144 = vst.msk [vmem:[%s238_s1 + $0x4] ss:$8 sm:$0x3] %vm47_vm0, %v69_v13   ;;  %48 = vst.msk [vmem:[%s238_s1] ss:$8 sm:$0x3] %vm47_vm0, %v46_v14  }
  0x10   :  { %141 = vst.msk [vmem:[%s238_s1 + $0x1] ss:$8 sm:$0x3] %vm47_vm0, %v51_v15   ;;  %v98_v16 = vld [vmem:[#allocation0 + $0x1] ss:$8 sm:$0xf]  }
  0x11   :  { %v100_v17 = vld [vmem:[#allocation0 + $0x1] ss:$8 sm:$0xf0]   ;;  %v108_v19 = vld [vmem:[#allocation0 + $0x3] ss:$8 sm:$0xf]  }
  0x12   :  { %v102_v18 = vsel %vm101_vm1, %v100_v17, %v98_v16  ;;  %v110_v20 = vld [vmem:[#allocation0 + $0x3] ss:$8 sm:$0xf0]   ;;  %v87_v22 = vld [vmem:[#allocation0 + $0x38] ss:$2 sm:%s86_s30]  }
  0x13   :  { %103 = vrot.lane.b32.xlu0 %v102_v18, %s152_s18  ;;  %v120_v21 = vld [vmem:[#allocation0 + $0x41] ss:$2 sm:%s119_s12]   ;;  %v93_v23 = vld [vmem:[#allocation0 + $0x40] ss:$2 sm:%s92_s13]   ;;  %v112_v24 = vsel %vm101_vm1, %v110_v20, %v108_v19 }
  0x14   :  { %121 = vrot.lane.b32.xlu1 %v120_v21, %s152_s18  ;;  %147 = vst.msk [vmem:[%s238_s1 + $0x7] ss:$8 sm:$0x3] %vm47_vm0, %v87_v22   ;;  %148 = vst.msk [vmem:[%s238_s1 + $0x10] ss:$8 sm:$0x3] %vm47_vm0, %v93_v23  }
  0x17   :  { %113 = vrot.lane.b32.xlu0 %v112_v24, %s152_s18 }
  0x85   :  { %v104_v25 = vpop.permute.xlu0 %103  }
  0x86   :  { %106 = vst.msk [vmem:[%s238_s1] sm:$0xff] %vm105_vm2, %v104_v25   ;;  %v122_v26 = vpop.permute.xlu1 %121  }
  0x87   :  { %150 = vst.msk [vmem:[%s238_s1 + $0x10] ss:$8 sm:$0x3] %vm105_vm2, %v122_v26  }
  0x89   :  { %v114_v27 = vpop.permute.xlu0 %113  }
  0x8a   :  { %149 = vst.msk [vmem:[%s238_s1 + $0x8] sm:$0xff] %vm105_vm2, %v114_v27  }

// kernel: mobilefacenet_forward.47
= control target key start
LH: loop header
LB: loop body
LE: loop exit
PB: predicated region body
PF: predicated region fallthrough
CT: control target
= control target key end

     0   :  { %vm52_vm0 = vcmask 261120   ;;  %vm124_vm1 = vcmask 519168   ;;  %s211_s1 = inlined_call_operand.vmem [shape: bf16[32,64], index: 1, kind: input, shape index: {}]   ;;  %s212_s0 = inlined_call_operand.vmem [shape: bf16[32,32], index: 0, kind: input, shape index: {}]   ;;  %s213_s2 = inlined_call_operand.vmem [shape: f32[1,64], index: 2, kind: input, shape index: {}]   ;;  %s214_s3 = inlined_call_operand.vmem [shape: bf16[32,64], index: 3, kind: output, shape index: {}]  }
   0x1   :  { %v160_v0 = vld [vmem:[%s211_s1] sm:$0xff]   ;;  %v161_v1 = vld [vmem:[%s211_s1 + $0x8] sm:$0xff]  }
   0x2   :  { %152 = vmatprep.subr.bf16.mxu0 %v160_v0  ;;  %v162_v2 = vld [vmem:[%s212_s0] sm:$0xff]   ;;  %v163_v3 = vld [vmem:[%s212_s0 + $0x8] sm:$0xff]  }
   0x3   :  { %153 = vmatpush3.bf16.msra.mxu0 %v160_v0  ;;  %156 = vmatprep.mubr.msk.bf16.mxu0 %vm52_vm0, %v162_v2  ;;  %v133_v4 = vld [vmem:[%s213_s2] ss:$0 sm:$0xff] }
   0x4   :  { %154 = vmatprep.subr.bf16.mxu0 %v161_v1 }
   0x7   :  { %155 = vmatpush3.bf16.msra.mxu0 %v161_v1 }
   0xa   :  { %157 = vmatmul.mubr.msk.bf16.vlgmr.msra.gmra.mrb[0].mxu0 %vm52_vm0, %v163_v3 }
  0xdd   :  { %v158_v5 = vpop.f32.mrb[0].mxu0 }
  0xde   :  { %v102_v6 = vadd.f32 %v158_v5, %v133_v4  ;;  %v93_v7 = vpop.f32.mrb[1].mxu0 }
  0xdf   :  { %v94_v8 = vadd.f32 %v133_v4, %v93_v7  ;;  %v159_v9 = vpop.f32.mrb[2].mxu0 }
  0xe0   :  { %v146_v10 = vpack.c.bf16 %v102_v6, %v102_v6  ;;  %v105_v11 = vadd.f32 %v159_v9, %v133_v4  ;;  %v96_v12 = vpop.f32.mrb[3].mxu0 }
  0xe1   :  { %v144_v13 = vpack.c.bf16 %v94_v8, %v94_v8  ;;  %v97_v14 = vadd.f32 %v133_v4, %v96_v12 }
  0xe2   :  { %127 = vst.msk [vmem:[%s214_s3 + $0x8] sm:$0xf] %vm124_vm1, %v146_v10  ;;  %v147_v15 = vpack.c.bf16 %v105_v11, %v105_v11 }
  0xe3   :  { %125 = vst.msk [vmem:[%s214_s3] sm:$0xf] %vm124_vm1, %v144_v13  ;;  %v145_v16 = vpack.c.bf16 %v97_v14, %v97_v14 }
  0xe4   :  { %128 = vst.msk [vmem:[%s214_s3 + $0xc] sm:$0xf] %vm124_vm1, %v147_v15 }
  0xe5   :  { %126 = vst.msk [vmem:[%s214_s3 + $0x4] sm:$0xf] %vm124_vm1, %v145_v16 }

// kernel: mobilefacenet_forward.48
= control target key start
LH: loop header
LB: loop body
LE: loop exit
PB: predicated region body
PF: predicated region fallthrough
CT: control target
= control target key end

     0   :  { %s566_s12 = smov 0   ;;  %s657_s0 = inlined_call_operand.vmem [shape: bf16[2,4,256], index: 0, kind: input, shape index: {}]   ;;  %s658_s1 = inlined_call_operand.vmem [shape: f32[9,256], index: 1, kind: input, shape index: {}]   ;;  %s659_s2 = inlined_call_operand.vmem [shape: f32[1,256], index: 2, kind: input, shape index: {}]   ;;  %s660_s3 = inlined_call_operand.vmem [shape: bf16[2,4,256], index: 3, kind: output, shape index: {}]  }
   0x1 LB: > { %s504_s13 = sadd.s32 4294967295, %s542_s12   ;;  %p508_p0 = scmp.ge.s32.totalorder %s542_s12, 1  ;;  %s542_s12 = sphi %s566_s12, %s13_s12  }
   0x2   : > { %p137_p1 = scmp.lt.s32.totalorder %s542_s12, 3 }
   0x4   : > { %p138_p2 = pnand %p508_p0, %p137_p1 }
   0x5   : > { %p161_p3 = scmp.lt.s32.totalorder (!%p138_p2), %s504_s13, 1  ;;  %v200_v0 = vlaneseq (!%p138_p2)  ;;  %v544_v1 = vmov (!%p138_p2), 0.0   ;;  %v579_v3 = vld [vmem:[%s658_s1 + $0x8] sm:$0xff] (!%p138_p2)  ;;  %v194_v10 = vld [vmem:[%s658_s1] sm:$0xff] (!%p138_p2)  ;;  %s545_s22 = smov (!%p138_p2), 64   ;;  %vm184_vm0 = vcmask (!%p138_p2), 523264  }
   0x6   : > { %141 = sbr.rel (%p138_p2) target bundleno = 298 (0x12a), region = 32  ;;  %171 = vst [vmem:[#allocation2] sm:$0x3f] (!%p138_p2), %v544_v1  ;;  %172 = vst [vmem:[#allocation2 + $0x8] sm:$0x3f] (!%p138_p2), %v544_v1  ;;  %vm189_vm1 = vcmask (!%p138_p2), 1044993  }
   0x7   : > { %173 = vst [vmem:[#allocation2 + $0x10] sm:$0x3f] (!%p138_p2), %v544_v1  ;;  %v201_v2 = vshrl.u32 (!%p138_p2), %v200_v0, 7  ;;  %vm192_vm2 = vcmask (!%p138_p2), 520193  }
   0x9   : > { %v582_v4 = vsub.s32 (!%p138_p2), 1, %v201_v2  ;;  %v284_v5 = vsub.s32 (!%p138_p2), 4, %v201_v2  ;;  %v251_v6 = vsub.s32 (!%p138_p2), 2, %v201_v2  ;;  %v362_v13 = vsub.s32 (!%p138_p2), 7, %v201_v2 }
   0xa   : > { %v596_v14 = vsub.s32 (!%p138_p2), 0, %v201_v2  ;;  %v265_v15 = vsub.s32 (!%p138_p2), 3, %v201_v2  ;;  %v323_v18 = vsub.s32 (!%p138_p2), 5, %v201_v2  ;;  %v343_v21 = vsub.s32 (!%p138_p2), 6, %v201_v2 }
   0xb   : > { %v220_v8 = vrot.slane (!%p138_p2), %v579_v3, %v582_v4  ;;  %v256_v11 = vrot.slane (!%p138_p2), %v579_v3, %v251_v6  ;;  %v285_v12 = vrot.slane (!%p138_p2), %v194_v10, %v284_v5  ;;  %v363_v24 = vrot.slane (!%p138_p2), %v194_v10, %v362_v13 }
   0xc   : > { %v203_v19 = vrot.slane (!%p138_p2), %v194_v10, %v596_v14  ;;  %v266_v20 = vrot.slane (!%p138_p2), %v194_v10, %v265_v15  ;;  %v328_v23 = vrot.slane (!%p138_p2), %v579_v3, %v323_v18  ;;  %v344_v25 = vrot.slane (!%p138_p2), %v194_v10, %v343_v21 }
   0xd   : > { %s662_s13 = smov (!%p161_p3, %s504_s13), 1  ;;  %225 = vrot.lane.b32.xlu1 %v220_v8, %s545_s22  ;;  %v216_v27 = vrot.slane %v194_v10, %v582_v4  ;;  %v252_v28 = vrot.slane %v194_v10, %v251_v6  ;;  %v207_v29 = vrot.slane %v579_v3, %v596_v14  ;;  %v324_v30 = vrot.slane %v194_v10, %v323_v18 }
   0xe   : > { %s519_s16 = sshll.u32 %s662_s13, 2  ;;  %v270_v31 = vrot.slane %v579_v3, %v265_v15  ;;  %v348_v32 = vrot.slane %v579_v3, %v343_v21  ;;  %v289_v33 = vrot.slane %v579_v3, %v284_v5  ;;  %v367_v34 = vrot.slane %v579_v3, %v362_v13 }
   0xf   : > { %s165_s19 = scalar_lea.vmem %s657_s0, %s519_s16  ;;  %s170_s4 = scalar_lea.vmem %s660_s3, %s519_s16 }
  0x10   : > { %v174_v7 = vld [vmem:[%s165_s19] sm:$0xf] }
  0x11   : > { %v175_v9 = vunpack.c.l.bf16 %v174_v7  ;;  %292 = vrot.lane.b32.xlu1 %v285_v12, %s545_s22 }
  0x13   : > { %v177_v16 = vcombine.high %v175_v9, %v175_v9  ;;  %v178_v17 = vrot.slane %v175_v9, 7 }
  0x15   : > { %v179_v22 = vrot.slane %v177_v16, 7  ;;  %370 = vrot.lane.b32.xlu1 %v363_v24, %s545_s22 }
  0x17   : > { %v531_v26 = vpack.i.bf16 %v179_v22, %v178_v17 }
  0x19   : > { %532 = vrot.lane.b32.xlu0 %v531_v26, %s545_s22 }
  0x1d   : > { %223 = vrot.lane.b32.xlu0 %v216_v27, %s545_s22 }
  0x21   : > { %294 = vrot.lane.b32.xlu0 %v289_v33, %s545_s22 }
  0x25   : > { %372 = vrot.lane.b32.xlu0 %v367_v34, %s545_s22 }
  0x7f   : > { %v226_v39 = vpop.permute.xlu1 %225 }
  0x83   : > { %v293_v45 = vpop.permute.xlu1 %292 }
  0x87   : > { %v371_v1 = vpop.permute.xlu1 %370 }
  0x8b   : > { %v533_v35 = vpop.permute.xlu0 %532 }
  0x8c   : > { %v535_v36 = vunpack.i.h.bf16 %v533_v35  ;;  %v534_v37 = vunpack.i.l.bf16 %v533_v35 }
  0x8e   : > { %193 = vst.msk [vmem:[#allocation2 + $0x10] sm:$0x1e] %vm192_vm2, %v535_v36  ;;  %v185_v38 = vsel %vm184_vm0, %v534_v37, %v535_v36  ;;  %v513_v36 = vld [vmem:[%s658_s1 + $0x10] ss:$0 sm:$0xff] }
  0x8f   : > { %190 = vst.msk [vmem:[#allocation2] sm:$0x1e] %vm189_vm1, %v534_v37  ;;  %191 = vst [vmem:[#allocation2 + $0x8] sm:$0x1e] %v185_v38  ;;  %v224_v40 = vpop.permute.xlu0 %223  ;;  %v514_v37 = vld [vmem:[%s658_s1 + $0x18] ss:$0 sm:$0xff] }
  0x90   : > { %v227_v42 = vsel %vm184_vm0, %v224_v40, %v226_v39 }
  0x93   : > { %v295_v41 = vpop.permute.xlu0 %294 }
  0x94   : > { %v296_v56 = vsel %vm184_vm0, %v293_v45, %v295_v41 }
  0x95   : > { %v212_v43 = vld [vmem:[#allocation2 + $0x10] sm:$0xf] }
  0x96   : > { %v198_v44 = vld [vmem:[#allocation2] sm:$0xf]  ;;  %v258_v47 = vmul.f32 %v256_v11, %v212_v43  ;;  %v199_v48 = vld [vmem:[#allocation2 + $0x8] sm:$0xf]  ;;  %v281_v51 = vld [vmem:[#allocation2 + $0x10] sm:$0x1e]  ;;  %v233_v61 = vmul.f32 %v226_v39, %v212_v43 }
  0x97   : > { %v261_v46 = vld [vmem:[#allocation2] sm:$0x1e]  ;;  %v208_v49 = vmul.f32 %v203_v19, %v198_v44  ;;  %v231_v50 = vmul.f32 %v224_v40, %v198_v44  ;;  %v232_v52 = vmul.f32 %v227_v42, %v199_v48  ;;  %v262_v55 = vld [vmem:[#allocation2 + $0x8] sm:$0x1e]  ;;  %v616_v58 = vmul.f32 %v328_v23, %v281_v51  ;;  %v373_v60 = vpop.permute.xlu0 %372  ;;  %v359_v15 = vld [vmem:[#allocation2 + $0x10] sm:$0x3c] }
  0x98   : > { %v271_v53 = vmul.f32 %v266_v20, %v261_v46  ;;  %v300_v54 = vmul.f32 %v293_v45, %v261_v46  ;;  %v339_v57 = vld [vmem:[#allocation2] sm:$0x3c]  ;;  %v301_v62 = vmul.f32 %v296_v56, %v262_v55  ;;  %v302_v0 = vmul.f32 %v295_v41, %v281_v51  ;;  %v340_v2 = vld [vmem:[#allocation2 + $0x8] sm:$0x3c] }
  0x99   : > { %v618_v59 = vmul.f32 %v344_v25, %v339_v57  ;;  %237 = vrot.lane.b32.xlu1 %v231_v50, %s545_s22  ;;  %239 = vrot.lane.b32.xlu0 %v232_v52, %s545_s22  ;;  %v257_v3 = vmul.f32 %v252_v28, %v199_v48  ;;  %v374_v5 = vsel %vm184_vm0, %v371_v1, %v373_v60  ;;  %v334_v42 = vrot.slane %v616_v58, 1 }
  0x9a   : > { %v306_v63 = vrot.slane %v300_v54, 1  ;;  %v209_v6 = vmul.f32 %v207_v29, %v199_v48  ;;  %v329_v7 = vmul.f32 %v324_v30, %v262_v55  ;;  %v272_v8 = vmul.f32 %v270_v31, %v262_v55 }
  0x9b   : > { %v307_v9 = vrot.slane %v301_v62, 1  ;;  %v378_v10 = vmul.f32 %v371_v1, %v339_v57  ;;  %v350_v11 = vmul.f32 %v348_v32, %v340_v2  ;;  %v308_v12 = vrot.slane %v302_v0, 1 }
  0x9c   : > { %v379_v13 = vmul.f32 %v374_v5, %v340_v2  ;;  %v380_v17 = vmul.f32 %v373_v60, %v359_v15  ;;  %v275_v25 = vrot.slane %v271_v53, 1  ;;  %v276_v33 = vrot.slane %v272_v8, 1 }
  0x9d   : > { %241 = vrot.lane.b32.xlu1 %v233_v61, %s545_s22  ;;  %309 = vrot.lane.b32.xlu0 %v306_v63, %s545_s22  ;;  %v384_v16 = vrot.slane %v378_v10, 2  ;;  %v333_v38 = vrot.slane %v329_v7, 1  ;;  %v353_v43 = vrot.slane %v618_v59, 2  ;;  %v408_v48 = vmul.f32 %v514_v37, %v359_v15 }
  0x9e   : > { %v385_v18 = vrot.slane %v379_v13, 2  ;;  %v386_v19 = vrot.slane %v380_v17, 2  ;;  %v354_v54 = vrot.slane %v350_v11, 2 }
  0x9f   : > { %v412_v61 = vrot.slane %v408_v48, 2 }
  0xa1   : > { %311 = vrot.lane.b32.xlu1 %v307_v9, %s545_s22  ;;  %313 = vrot.lane.b32.xlu0 %v308_v12, %s545_s22 }
  0xa5   : > { %387 = vrot.lane.b32.xlu1 %v384_v16, %s545_s22  ;;  %389 = vrot.lane.b32.xlu0 %v385_v18, %s545_s22 }
  0xa9   : > { %391 = vrot.lane.b32.xlu1 %v386_v19, %s545_s22 }
 0x10b   : > { %v238_v20 = vpop.permute.xlu1 %237  ;;  %v240_v21 = vpop.permute.xlu0 %239 }
 0x10c   : > { %v243_v22 = vsel %vm184_vm0, %v238_v20, %v240_v21 }
 0x10d   : > { %v247_v23 = vadd.f32 %v243_v22, %v208_v49  ;;  %v417_v49 = vld [vmem:[%s659_s2] sm:$0x3] }
 0x10e   : > { %v422_v56 = vrot.slane %v417_v49, %v596_v14  ;;  %v426_v63 = vrot.slane %v417_v49, %v582_v4 }
 0x10f   : > { %v242_v24 = vpop.permute.xlu1 %241  ;;  %v259_v26 = vadd.f32 %v257_v3, %v247_v23  ;;  %v310_v28 = vpop.permute.xlu0 %309 }
 0x110   : > { %v244_v27 = vsel %vm184_vm0, %v240_v21, %v242_v24 }
 0x111   : > { %v248_v29 = vadd.f32 %v244_v27, %v209_v6  ;;  %v279_v30 = vadd.f32 %v275_v25, %v259_v26 }
 0x113   : > { %v260_v31 = vadd.f32 %v258_v47, %v248_v29  ;;  %v312_v32 = vpop.permute.xlu1 %311  ;;  %v314_v35 = vpop.permute.xlu0 %313  ;;  %v407_v47 = vmul.f32 %v513_v36, %v340_v2 }
 0x114   : > { %v315_v34 = vsel %vm184_vm0, %v310_v28, %v312_v32  ;;  %v316_v41 = vsel %vm184_vm0, %v312_v32, %v314_v35 }
 0x115   : > { %v319_v39 = vadd.f32 %v315_v34, %v279_v30  ;;  %v280_v40 = vadd.f32 %v276_v33, %v260_v31  ;;  %v411_v55 = vrot.slane %v407_v47, 2 }
 0x117   : > { %v337_v44 = vadd.f32 %v333_v38, %v319_v39  ;;  %v320_v45 = vadd.f32 %v316_v41, %v280_v40  ;;  %v388_v46 = vpop.permute.xlu1 %387  ;;  %v390_v50 = vpop.permute.xlu0 %389 }
 0x118   : > { %v393_v53 = vsel %vm184_vm0, %v388_v46, %v390_v50 }
 0x119   : > { %v338_v51 = vadd.f32 %v334_v42, %v320_v45  ;;  %v357_v52 = vadd.f32 %v353_v43, %v337_v44 }
 0x11b   : > { %v397_v57 = vadd.f32 %v393_v53, %v357_v52  ;;  %v392_v58 = vpop.permute.xlu1 %391  ;;  %v358_v59 = vadd.f32 %v354_v54, %v338_v51 }
 0x11c   : > { %v394_v60 = vsel %vm184_vm0, %v390_v50, %v392_v58 }
 0x11d   : > { %v415_v62 = vadd.f32 %v411_v55, %v397_v57  ;;  %v398_v0 = vadd.f32 %v394_v60, %v358_v59 }
 0x11f   : > { %v429_v1 = vadd.f32 %v422_v56, %v415_v62  ;;  %v416_v2 = vadd.f32 %v412_v61, %v398_v0 }
 0x121   : > { %v431_v3 = vmax.f32 %v429_v1, 0.0  ;;  %v430_v5 = vadd.f32 %v426_v63, %v416_v2 }
 0x123   : > { %v432_v6 = vmax.f32 %v430_v5, 0.0  ;;  %v433_v7 = vmin.f32 %v431_v3, 6.0 }
 0x125   : > { %v434_v8 = vmin.f32 %v432_v6, 6.0 }
 0x127   : > { %v515_v14 = vpack.c.bf16 %v434_v8, %v433_v7 }
 0x129   : > { %516 = vst.sshfl [vmem:[%s170_s4] sm:$0x33 pattern:$0x76325410] %v515_v14 }
 0x12a PF: > { %s13_s12 = sadd.s32 1, %s542_s12  }
 0x12b   : > { %p10_p4 = scmp.ge.s32.totalorder %s13_s12, 4  }
 0x12d   :  { %12 = sbr.rel (!%p10_p4) target bundleno = 1 (0x1), region = 62 }

// kernel: mobilefacenet_forward.46
= control target key start
LH: loop header
LB: loop body
LE: loop exit
PB: predicated region body
PF: predicated region fallthrough
CT: control target
= control target key end

     0   :  { %s586_s12 = smov 0   ;;  %s759_s0 = inlined_call_operand.vmem [shape: bf16[10,2,5,64], index: 0, kind: input, shape index: {}]   ;;  %s760_s1 = inlined_call_operand.vmem [shape: f32[9,32], index: 1, kind: input, shape index: {}]   ;;  %s761_s2 = inlined_call_operand.vmem [shape: f32[1,32], index: 2, kind: input, shape index: {}]   ;;  %s762_s3 = inlined_call_operand.vmem [shape: bf16[2,4,4,32], index: 3, kind: output, shape index: {}]  }
   0x1 LB: > { %s592_s13 = sadd.s32 4294967295, %s562_s12   ;;  %p519_p0 = scmp.ge.s32.totalorder %s562_s12, 1  ;;  %s562_s12 = sphi %s586_s12, %s13_s12  }
   0x2   : > { %p139_p1 = scmp.lt.s32.totalorder %s562_s12, 3 }
   0x4   : > { %p140_p2 = pnand %p519_p0, %p139_p1 }
   0x5   : > { %v186_v0 = vlaneseq (!%p140_p2)  ;;  %v601_v2 = vld [vmem:[%s760_s1] sm:$0xff] (!%p140_p2)  ;;  %s564_s16 = smov (!%p140_p2), 32   ;;  %s164_s17 = smul.u32 (!%p140_p2), 5, %s592_s13  ;;  %vm455_vm0 = vcmask (!%p140_p2), 254976  }
   0x6   : > { %143 = sbr.rel (%p140_p2) target bundleno = 278 (0x116), region = 32  ;;  %s565_s22 = smov (!%p140_p2), 96  }
   0x7   : > { %v596_v1 = vshrl.u32 (!%p140_p2), %v186_v0, 7  ;;  %p165_p3 = scmp.lt.s32.totalorder (!%p140_p2), %s164_s17, 9  ;;  %p171_p4 = scmp.lt.s32.totalorder (!%p140_p2), %s592_s13, 1 }
   0x9   : > { %v200_v3 = vsub.s32 (!%p140_p2), 1, %v596_v1  ;;  %v285_v4 = vsub.s32 (!%p140_p2), 4, %v596_v1  ;;  %v370_v5 = vsub.s32 (!%p140_p2), 7, %v596_v1  ;;  %v240_v48 = vsub.s32 (!%p140_p2), 2, %v596_v1 }
   0xa   : > { %v188_v51 = vsub.s32 (!%p140_p2), 0, %v596_v1  ;;  %v273_v58 = vsub.s32 (!%p140_p2), 3, %v596_v1  ;;  %v325_v63 = vsub.s32 (!%p140_p2), 5, %v596_v1 }
   0xb   : > { %v201_v6 = vrot.slane (!%p140_p2), %v601_v2, %v200_v3  ;;  %v371_v7 = vrot.slane (!%p140_p2), %v601_v2, %v370_v5  ;;  %v286_v8 = vrot.slane (!%p140_p2), %v601_v2, %v285_v4  ;;  %v241_v53 = vrot.slane (!%p140_p2), %v601_v2, %v240_v48 }
   0xc   : > { %v189_v57 = vrot.slane (!%p140_p2), %v601_v2, %v188_v51 }
   0xd   : > { %203 = vrot.lane.b32.xlu0 %v201_v6, %s564_s16  ;;  %373 = vrot.lane.b32.xlu1 %v371_v7, %s564_s16  ;;  %s764_s17 = smov (!%p165_p3, %s164_s17), 9  ;;  %v274_v6 = vrot.slane %v601_v2, %v273_v58  ;;  %s766_s13 = smov (!%p171_p4, %s592_s13), 1 }
   0xe   : > { %s544_s18 = sshll.u32 %s764_s17, 3  ;;  %s545_s27 = sshll.u32 %s766_s13, 3 }
   0xf   : > { %s613_s21 = scalar_lea.vmem %s759_s0, %s544_s18  ;;  %s175_s30 = scalar_lea.vmem %s762_s3, %s545_s27 }
  0x10   : > { %v616_v9 = vld [vmem:[%s613_s21 + $0x8] sm:$0x3]  ;;  %v619_v10 = vld [vmem:[%s613_s21] sm:$0x3]  ;;  %v624_v13 = vld [vmem:[%s613_s21 + $0x18] sm:$0x3] }
  0x11   : > { %288 = vrot.lane.b32.xlu0 %v286_v8, %s564_s16  ;;  %v183_v11 = vunpack.c.l.bf16 %v616_v9  ;;  %v182_v12 = vunpack.c.l.bf16 %v619_v10  ;;  %v627_v14 = vld [vmem:[%s613_s21 + $0x10] sm:$0x3]  ;;  %v630_v16 = vld [vmem:[%s613_s21 + $0xc] sm:$0x3]  ;;  %v633_v17 = vld [vmem:[%s613_s21 + $0x4] sm:$0x3]  ;;  %v185_v20 = vunpack.c.l.bf16 %v624_v13 }
  0x12   : > { %v184_v21 = vunpack.c.l.bf16 %v627_v14  ;;  %v268_v22 = vunpack.c.l.bf16 %v630_v16  ;;  %v267_v23 = vunpack.c.l.bf16 %v633_v17  ;;  %v650_v27 = vld [vmem:[%s613_s21 + $0x1c] sm:$0x3]  ;;  %v653_v28 = vld [vmem:[%s613_s21 + $0x14] sm:$0x3]  ;;  %v662_v31 = vld [vmem:[%s613_s21 + $0x10] sm:$0x3] }
  0x13   : > { %v665_v32 = vld [vmem:[%s613_s21 + $0x8] sm:$0x3]  ;;  %v270_v33 = vunpack.c.l.bf16 %v650_v27  ;;  %v269_v34 = vunpack.c.l.bf16 %v653_v28  ;;  %v353_v35 = vunpack.c.l.bf16 %v662_v31  ;;  %v678_v40 = vld [vmem:[%s613_s21 + $0x20] sm:$0x3]  ;;  %v681_v41 = vld [vmem:[%s613_s21 + $0x18] sm:$0x3]  ;;  %v191_v4 = vmul.f32 %v189_v57, %v183_v11 }
  0x14   : > { %v352_v36 = vunpack.c.l.bf16 %v665_v32  ;;  %v355_v44 = vunpack.c.l.bf16 %v678_v40  ;;  %v354_v45 = vunpack.c.l.bf16 %v681_v41  ;;  %v231_v49 = vld [vmem:[%s613_s21 + $0x8] sm:$0x7]  ;;  %v230_v50 = vld [vmem:[%s613_s21] sm:$0x7]  ;;  %v233_v55 = vld [vmem:[%s613_s21 + $0x18] sm:$0x7]  ;;  %v190_v5 = vmul.f32 %v189_v57, %v182_v12 }
  0x15   : > { %v235_v52 = vunpack.c.l.bf16 %v231_v49  ;;  %v234_v54 = vunpack.c.l.bf16 %v230_v50  ;;  %v232_v56 = vld [vmem:[%s613_s21 + $0x10] sm:$0x7]  ;;  %v237_v60 = vunpack.c.l.bf16 %v233_v55  ;;  %v529_v0 = vld [vmem:[%s613_s21 + $0xc] sm:$0x7]  ;;  %v528_v3 = vld [vmem:[%s613_s21 + $0x4] sm:$0x7]  ;;  %v193_v9 = vmul.f32 %v189_v57, %v185_v20 }
  0x16   : > { %v236_v61 = vunpack.c.l.bf16 %v232_v56  ;;  %v192_v10 = vmul.f32 %v189_v57, %v184_v21  ;;  %v537_v50 = vld [vmem:[%s613_s21 + $0x10] sm:$0x7]  ;;  %v277_v16 = vmul.f32 %v274_v6, %v269_v34  ;;  %v540_v28 = vld [vmem:[%s760_s1 + $0x8] ss:$0 sm:$0xff]  ;;  %v541_v41 = vld [vmem:[%s761_s2] ss:$0 sm:$0xff] }
  0x17   : > { %v243_v59 = vmul.f32 %v241_v53, %v235_v52  ;;  %v242_v62 = vmul.f32 %v241_v53, %v234_v54  ;;  %v245_v8 = vmul.f32 %v241_v53, %v237_v60  ;;  %v278_v52 = vmul.f32 %v274_v6, %v270_v33 }
  0x18   : > { %v405_v57 = vunpack.c.l.bf16 %v537_v50 }
  0x19   : > { %v251_v7 = vrot.slane %v243_v59, 1 }
  0x7f   : > { %v204_v15 = vpop.permute.xlu0 %203  ;;  %v374_v37 = vpop.permute.xlu1 %373 }
  0x80   : > { %v207_v18 = vmul.f32 %v204_v15, %v183_v11  ;;  %v206_v19 = vmul.f32 %v204_v15, %v182_v12  ;;  %v209_v25 = vmul.f32 %v204_v15, %v185_v20  ;;  %v208_v26 = vmul.f32 %v204_v15, %v184_v21  ;;  %v536_v21 = vld [vmem:[%s613_s21 + $0x8] sm:$0x7] }
  0x81   : > { %v377_v42 = vmul.f32 %v374_v37, %v353_v35  ;;  %v376_v43 = vmul.f32 %v374_v37, %v352_v36  ;;  %v379_v46 = vmul.f32 %v374_v37, %v355_v44  ;;  %v378_v47 = vmul.f32 %v374_v37, %v354_v45 }
  0x82   : > { %216 = vrot.lane.b32.xlu0 %v207_v18, %s565_s22  ;;  %214 = vrot.lane.b32.xlu1 %v206_v19, %s565_s22  ;;  %v244_v15 = vmul.f32 %v241_v53, %v236_v61  ;;  %v250_v18 = vrot.slane %v242_v62, 1  ;;  %v320_v19 = vunpack.c.l.bf16 %v529_v0  ;;  %v358_v11 = vsub.s32 6, %v596_v1  ;;  %v538_v0 = vld [vmem:[%s613_s21 + $0x18] sm:$0x7] }
  0x83   : > { %v289_v24 = vpop.permute.xlu0 %288  ;;  %v404_v58 = vunpack.c.l.bf16 %v536_v21 }
  0x84   : > { %v292_v29 = vmul.f32 %v289_v24, %v268_v22  ;;  %v291_v30 = vmul.f32 %v289_v24, %v267_v23  ;;  %v294_v38 = vmul.f32 %v289_v24, %v270_v33  ;;  %v293_v39 = vmul.f32 %v289_v24, %v269_v34 }
  0x85   : > { %v326_v24 = vrot.slane %v601_v2, %v325_v63  ;;  %v359_v17 = vrot.slane %v601_v2, %v358_v11  ;;  %v539_v63 = vld [vmem:[%s613_s21 + $0x20] sm:$0x7] }
  0x86   : > { %220 = vrot.lane.b32.xlu0 %v209_v25, %s565_s22  ;;  %218 = vrot.lane.b32.xlu1 %v208_v26, %s565_s22  ;;  %v319_v25 = vunpack.c.l.bf16 %v528_v3  ;;  %v531_v26 = vld [vmem:[%s613_s21 + $0x1c] sm:$0x7] }
  0x87   : > { %v328_v49 = vmul.f32 %v326_v24, %v320_v19  ;;  %v361_v34 = vmul.f32 %v359_v17, %v353_v35  ;;  %v360_v62 = vmul.f32 %v359_v17, %v352_v36  ;;  %v363_v32 = vmul.f32 %v359_v17, %v355_v44 }
  0x88   : > { %v327_v14 = vmul.f32 %v326_v24, %v319_v25  ;;  %v407_v25 = vunpack.c.l.bf16 %v539_v63  ;;  %v362_v36 = vmul.f32 %v359_v17, %v354_v45 }
  0x89   : > { %v336_v61 = vrot.slane %v328_v49, 1 }
  0x8a   : > { %301 = vrot.lane.b32.xlu0 %v292_v29, %s565_s22  ;;  %299 = vrot.lane.b32.xlu1 %v291_v30, %s565_s22  ;;  %v530_v29 = vld [vmem:[%s613_s21 + $0x14] sm:$0x7]  ;;  %v335_v27 = vrot.slane %v327_v14, 1 }
  0x8b   : > { %v321_v13 = vunpack.c.l.bf16 %v530_v29 }
  0x8d   : > { %v329_v56 = vmul.f32 %v326_v24, %v321_v13 }
  0x8e   : > { %305 = vrot.lane.b32.xlu0 %v294_v38, %s565_s22  ;;  %303 = vrot.lane.b32.xlu1 %v293_v39, %s565_s22  ;;  %v276_v39 = vmul.f32 %v274_v6, %v268_v22 }
  0x92   : > { %386 = vrot.lane.b32.xlu0 %v377_v42, %s565_s22  ;;  %384 = vrot.lane.b32.xlu1 %v376_v43, %s565_s22  ;;  %v275_v42 = vmul.f32 %v274_v6, %v267_v23  ;;  %v253_v43 = vrot.slane %v245_v8, 1  ;;  %v337_v8 = vrot.slane %v329_v56, 1 }
  0x96   : > { %390 = vrot.lane.b32.xlu0 %v379_v46, %s565_s22  ;;  %388 = vrot.lane.b32.xlu1 %v378_v47, %s565_s22  ;;  %v252_v46 = vrot.slane %v244_v15, 1  ;;  %v322_v47 = vunpack.c.l.bf16 %v531_v26  ;;  %v413_v15 = vmul.f32 %v540_v28, %v405_v57  ;;  %v406_v26 = vunpack.c.l.bf16 %v538_v0 }
  0x98   : > { %v330_v55 = vmul.f32 %v326_v24, %v322_v47 }
  0xf4   : > { %v217_v30 = vpop.permute.xlu0 %216  ;;  %v215_v37 = vpop.permute.xlu1 %214 }
  0xf5   : > { %v227_v12 = vadd.f32 %v217_v30, %v191_v4  ;;  %v226_v38 = vadd.f32 %v215_v37, %v190_v5 }
  0xf7   : > { %v259_v48 = vadd.f32 %v251_v7, %v227_v12  ;;  %v258_v20 = vadd.f32 %v250_v18, %v226_v38  ;;  %v338_v7 = vrot.slane %v330_v55, 1  ;;  %v412_v18 = vmul.f32 %v540_v28, %v404_v58 }
  0xf8   : > { %v221_v51 = vpop.permute.xlu0 %220  ;;  %v219_v1 = vpop.permute.xlu1 %218 }
  0xf9   : > { %v229_v22 = vadd.f32 %v221_v51, %v193_v9  ;;  %v228_v23 = vadd.f32 %v219_v1, %v192_v10  ;;  %v280_v53 = vadd.f32 %v276_v39, %v259_v48  ;;  %v279_v54 = vadd.f32 %v275_v42, %v258_v20 }
  0xfa   : > { %v421_v10 = vrot.slane %v413_v15, 1  ;;  %v420_v11 = vrot.slane %v412_v18, 1  ;;  %v415_v39 = vmul.f32 %v540_v28, %v407_v25  ;;  %v414_v42 = vmul.f32 %v540_v28, %v406_v26 }
  0xfb   : > { %v261_v59 = vadd.f32 %v253_v43, %v229_v22  ;;  %v260_v60 = vadd.f32 %v252_v46, %v228_v23 }
  0xfc   : > { %v302_v33 = vpop.permute.xlu0 %301  ;;  %v300_v2 = vpop.permute.xlu1 %299  ;;  %v423_v20 = vrot.slane %v415_v39, 1  ;;  %v422_v49 = vrot.slane %v414_v42, 1 }
  0xfd   : > { %v312_v3 = vadd.f32 %v302_v33, %v280_v53  ;;  %v311_v4 = vadd.f32 %v300_v2, %v279_v54  ;;  %v282_v5 = vadd.f32 %v278_v52, %v261_v59  ;;  %v281_v6 = vadd.f32 %v277_v16, %v260_v60 }
  0xff   : > { %v344_v19 = vadd.f32 %v336_v61, %v312_v3  ;;  %v343_v24 = vadd.f32 %v335_v27, %v311_v4 }
 0x100   : > { %v306_v31 = vpop.permute.xlu0 %305  ;;  %v304_v35 = vpop.permute.xlu1 %303 }
 0x101   : > { %v314_v29 = vadd.f32 %v306_v31, %v282_v5  ;;  %v313_v30 = vadd.f32 %v304_v35, %v281_v6  ;;  %v365_v37 = vadd.f32 %v361_v34, %v344_v19  ;;  %v364_v9 = vadd.f32 %v360_v62, %v343_v24 }
 0x103   : > { %v346_v12 = vadd.f32 %v338_v7, %v314_v29  ;;  %v345_v38 = vadd.f32 %v337_v8, %v313_v30 }
 0x104   : > { %v387_v43 = vpop.permute.xlu0 %386  ;;  %v385_v46 = vpop.permute.xlu1 %384 }
 0x105   : > { %v397_v47 = vadd.f32 %v387_v43, %v365_v37  ;;  %v396_v40 = vadd.f32 %v385_v46, %v364_v9  ;;  %v367_v44 = vadd.f32 %v363_v32, %v346_v12  ;;  %v366_v13 = vadd.f32 %v362_v36, %v345_v38 }
 0x107   : > { %v429_v45 = vadd.f32 %v421_v10, %v397_v47  ;;  %v428_v48 = vadd.f32 %v420_v11, %v396_v40 }
 0x108   : > { %v391_v14 = vpop.permute.xlu0 %390  ;;  %v389_v50 = vpop.permute.xlu1 %388 }
 0x109   : > { %v440_v21 = vadd.f32 %v541_v41, %v429_v45  ;;  %v439_v51 = vadd.f32 %v541_v41, %v428_v48  ;;  %v399_v1 = vadd.f32 %v391_v14, %v367_v44  ;;  %v398_v52 = vadd.f32 %v389_v50, %v366_v13 }
 0x10b   : > { %v444_v16 = vmax.f32 %v440_v21, 0.0  ;;  %v443_v17 = vmax.f32 %v439_v51, 0.0  ;;  %v431_v22 = vadd.f32 %v423_v20, %v399_v1  ;;  %v430_v23 = vadd.f32 %v422_v49, %v398_v52 }
 0x10d   : > { %v448_v53 = vmin.f32 %v444_v16, 6.0  ;;  %v447_v54 = vmin.f32 %v443_v17, 6.0  ;;  %v442_v55 = vadd.f32 %v541_v41, %v431_v22  ;;  %v441_v56 = vadd.f32 %v541_v41, %v430_v23 }
 0x10f   : > { %v452_v57 = vpack.c.bf16 %v448_v53, %v448_v53  ;;  %v451_v58 = vpack.c.bf16 %v447_v54, %v447_v54  ;;  %v446_v59 = vmax.f32 %v442_v55, 0.0  ;;  %v445_v60 = vmax.f32 %v441_v56, 0.0 }
 0x111   : > { %457 = vst.msk [vmem:[%s175_s30 + $0x2] sm:$0x3] %vm455_vm0, %v452_v57  ;;  %456 = vst.msk [vmem:[%s175_s30] sm:$0x3] %vm455_vm0, %v451_v58  ;;  %v450_v61 = vmin.f32 %v446_v59, 6.0  ;;  %v449_v27 = vmin.f32 %v445_v60, 6.0 }
 0x113   : > { %v454_v28 = vpack.c.bf16 %v450_v61, %v450_v61  ;;  %v453_v33 = vpack.c.bf16 %v449_v27, %v449_v27 }
 0x115   : > { %459 = vst.msk [vmem:[%s175_s30 + $0x6] sm:$0x3] %vm455_vm0, %v454_v28  ;;  %458 = vst.msk [vmem:[%s175_s30 + $0x4] sm:$0x3] %vm455_vm0, %v453_v33 }
 0x116 PF: > { %s13_s12 = sadd.s32 1, %s562_s12  }
 0x117   : > { %p10_p5 = scmp.ge.s32.totalorder %s13_s12, 4  }
 0x119   :  { %12 = sbr.rel (!%p10_p5) target bundleno = 1 (0x1), region = 64 }

// kernel: mobilefacenet_forward.49
= control target key start
LH: loop header
LB: loop body
LE: loop exit
PB: predicated region body
PF: predicated region fallthrough
CT: control target
= control target key end

     0   :  { %vm71_vm0 = vcmask 523264   ;;  %vm155_vm1 = vcmask 519168   ;;  %s278_s1 = inlined_call_operand.vmem [shape: bf16[64,64], index: 1, kind: input, shape index: {}]   ;;  %s279_s0 = inlined_call_operand.vmem [shape: bf16[32,64], index: 0, kind: input, shape index: {}]   ;;  %s280_s3 = inlined_call_operand.vmem [shape: bf16[32,64], index: 3, kind: input, shape index: {}]   ;;  %s281_s2 = inlined_call_operand.vmem [shape: f32[1,64], index: 2, kind: input, shape index: {}]   ;;  %s282_s4 = inlined_call_operand.vmem [shape: bf16[32,64], index: 4, kind: output, shape index: {}]  }
   0x1   :  { %v208_v0 = vld [vmem:[%s278_s1] sm:$0xff]   ;;  %v209_v1 = vld [vmem:[%s278_s1 + $0x8] sm:$0xff]   ;;  %v210_v2 = vld [vmem:[%s278_s1 + $0x10] sm:$0xff]  }
   0x2   :  { %196 = vmatprep.subr.bf16.mxu0 %v208_v0  ;;  %v212_v3 = vld [vmem:[%s279_s0] sm:$0xff]   ;;  %v211_v4 = vld [vmem:[%s278_s1 + $0x18] sm:$0xff]   ;;  %v213_v5 = vld [vmem:[%s279_s0 + $0x8] sm:$0xff]  }
   0x3   :  { %197 = vmatpush3.bf16.msra.mxu0 %v208_v0  ;;  %204 = vmatprep.mubr.msk.bf16.mxu0 %vm71_vm0, %v212_v3  ;;  %v189_v6 = vld [vmem:[%s280_s3 + $0x8] sm:$0xff]   ;;  %v182_v7 = vld [vmem:[%s280_s3] sm:$0xff]  }
   0x4   :  { %198 = vmatprep.subr.bf16.mxu0 %v209_v1  ;;  %v164_v8 = vld [vmem:[%s281_s2] ss:$0 sm:$0xff]  ;;  %v187_v9 = vunpack.c.l.bf16 %v189_v6  ;;  %v183_v11 = vunpack.c.l.bf16 %v182_v7  ;;  %v188_v14 = vunpack.c.h.bf16 %v189_v6  ;;  %v184_v17 = vunpack.c.h.bf16 %v182_v7 }
   0x7   :  { %199 = vmatpush3.bf16.msra.mxu0 %v209_v1 }
   0x8   :  { %200 = vmatprep.subr.bf16.mxu0 %v210_v2 }
   0xb   :  { %201 = vmatpush3.bf16.msra.mxu0 %v210_v2 }
   0xc   :  { %202 = vmatprep.subr.bf16.mxu0 %v211_v4 }
   0xf   :  { %203 = vmatpush3.bf16.msra.mxu0 %v211_v4 }
  0x12   :  { %205 = vmatmul.mubr.msk.bf16.vlgmr.msra.gmra.mrb[0].mxu0 %vm71_vm0, %v213_v5 }
  0xe5   :  { %v206_v10 = vpop.f32.mrb[0].mxu0 }
  0xe6   :  { %v121_v12 = vadd.f32 %v206_v10, %v164_v8  ;;  %v112_v13 = vpop.f32.mrb[1].mxu0 }
  0xe7   :  { %v113_v15 = vadd.f32 %v164_v8, %v112_v13  ;;  %v207_v16 = vpop.f32.mrb[2].mxu0 }
  0xe8   :  { %v137_v18 = vadd.f32 %v187_v9, %v121_v12  ;;  %v124_v19 = vadd.f32 %v207_v16, %v164_v8  ;;  %v115_v20 = vpop.f32.mrb[3].mxu0 }
  0xe9   :  { %v135_v21 = vadd.f32 %v183_v11, %v113_v15  ;;  %v116_v22 = vadd.f32 %v164_v8, %v115_v20 }
  0xea   :  { %v179_v23 = vpack.c.bf16 %v137_v18, %v137_v18  ;;  %v138_v24 = vadd.f32 %v188_v14, %v124_v19 }
  0xeb   :  { %v177_v25 = vpack.c.bf16 %v135_v21, %v135_v21  ;;  %v136_v26 = vadd.f32 %v184_v17, %v116_v22 }
  0xec   :  { %158 = vst.msk [vmem:[%s282_s4 + $0x8] sm:$0xf] %vm155_vm1, %v179_v23  ;;  %v180_v27 = vpack.c.bf16 %v138_v24, %v138_v24 }
  0xed   :  { %156 = vst.msk [vmem:[%s282_s4] sm:$0xf] %vm155_vm1, %v177_v25  ;;  %v178_v28 = vpack.c.bf16 %v136_v26, %v136_v26 }
  0xee   :  { %159 = vst.msk [vmem:[%s282_s4 + $0xc] sm:$0xf] %vm155_vm1, %v180_v27 }
  0xef   :  { %157 = vst.msk [vmem:[%s282_s4 + $0x4] sm:$0xf] %vm155_vm1, %v178_v28 }

// kernel: mobilefacenet_forward.56
= control target key start
LH: loop header
LB: loop body
LE: loop exit
PB: predicated region body
PF: predicated region fallthrough
CT: control target
= control target key end

     0   :  { %v382_v1 = vmov 0   ;;  %vm126_vm0 = vcmask 523264   ;;  %v37_v15 = vlaneseq  ;;  %s472_s1 = inlined_call_operand.vmem [shape: bf16[64,384], index: 1, kind: input, shape index: {}]   ;;  %s473_s0 = inlined_call_operand.vmem [shape: bf16[32,64], index: 0, kind: input, shape index: {}]   ;;  %s474_s2 = inlined_call_operand.vmem [shape: f32[1,384], index: 2, kind: input, shape index: {}]   ;;  %s475_s3 = inlined_call_operand.vmem [shape: bf16[32,384], index: 3, kind: output, shape index: {}]  }
   0x1   :  { %v364_v0 = vld [vmem:[%s472_s1 + $0x4] ss:$12 sps:$4 sm:$0xff]   ;;  %165 = vmatprep.mubr.bf16.mxu0 %v382_v1  ;;  %v366_v2 = vld [vmem:[%s472_s1] ss:$12 sps:$4 sm:$0xff]   ;;  %v367_v3 = vld [vmem:[%s472_s1 + $0x1c] ss:$12 sps:$4 sm:$0xff]  }
   0x2   :  { %133 = vmatprep.subr.bf16.mxu0 %v364_v0  ;;  %v369_v4 = vld [vmem:[%s472_s1 + $0x18] ss:$12 sps:$4 sm:$0xff]   ;;  %v370_v5 = vld [vmem:[%s472_s1 + $0x8] ss:$12 sps:$4 sm:$0xff]   ;;  %v374_v7 = vld [vmem:[%s472_s1 + $0x20] ss:$12 sps:$4 sm:$0xff]  }
   0x3   :  { %134 = vmatpush1.bf16.msra.mxu0 %v366_v2  ;;  %v371_v6 = vld [vmem:[%s472_s1 + $0x34] ss:$12 sps:$4 sm:$0xff]   ;;  %351 = vmatprep.subr.bf16.mxu1 %v370_v5  ;;  %v373_v8 = vld [vmem:[%s472_s1 + $0x30] ss:$12 sps:$4 sm:$0xff]   ;;  %v375_v9 = vld [vmem:[%s472_s1 + $0x4c] ss:$12 sps:$4 sm:$0xff]  }
   0x4   :  { %135 = vmatprep.subr.bf16.mxu0 %v367_v3  ;;  %352 = vmatpush3.bf16.msra.mxu1 %v370_v5  ;;  %v378_v10 = vld [vmem:[%s472_s1 + $0x38] ss:$12 sps:$4 sm:$0xff]   ;;  %v377_v12 = vld [vmem:[%s472_s1 + $0x48] ss:$12 sps:$4 sm:$0xff]   ;;  %v380_v13 = vld [vmem:[%s472_s1 + $0x50] ss:$12 sps:$4 sm:$0xff]  }
   0x5   :  { %353 = vmatprep.subr.bf16.mxu1 %v374_v7  ;;  %v379_v11 = vld [vmem:[%s473_s0] sm:$0xff]   ;;  %v381_v14 = vld [vmem:[%s473_s0 + $0x8] sm:$0xff]   ;;  %v38_v16 = vshrl.u32 %v37_v15, 7 }
   0x6   :  { %359 = vmatprep.mubr.msk.bf16.mxu1 %vm126_vm0, %v379_v11  ;;  %v35_v18 = vld [vmem:[%s474_s2] sm:$0x7] }
   0x7   :  { %136 = vmatpush1.bf16.msra.mxu0 %v369_v4  ;;  %v39_v17 = vsub.s32 0, %v38_v16  ;;  %v43_v19 = vsub.s32 1, %v38_v16  ;;  %v47_v20 = vsub.s32 2, %v38_v16 }
   0x8   :  { %137 = vmatprep.subr.bf16.mxu0 %v371_v6  ;;  %354 = vmatpush3.bf16.msra.mxu1 %v374_v7 }
   0x9   :  { %355 = vmatprep.subr.bf16.mxu1 %v378_v10  ;;  %v40_v21 = vrot.slane %v35_v18, %v39_v17  ;;  %v44_v22 = vrot.slane %v35_v18, %v43_v19  ;;  %v48_v24 = vrot.slane %v35_v18, %v47_v20 }
   0xb   :  { %138 = vmatpush1.bf16.msra.mxu0 %v373_v8 }
   0xc   :  { %139 = vmatprep.subr.bf16.mxu0 %v375_v9  ;;  %356 = vmatpush3.bf16.msra.mxu1 %v378_v10 }
   0xd   :  { %357 = vmatprep.subr.bf16.mxu1 %v380_v13 }
   0xf   :  { %140 = vmatpush1.bf16.msra.mxu0 %v377_v12 }
  0x10   :  { %358 = vmatpush3.bf16.msra.mxu1 %v380_v13 }
  0x12   :  { %325 = vmatmul.mubr.msk.bf16.vlgmr.msra.gmra.mrb[0].mxu0 %vm126_vm0, %v379_v11 }
  0x13   :  { %175 = vmatprep.mubr.bf16.mxu0 %v382_v1  ;;  %360 = vmatmul.mubr.msk.bf16.vlgmr.msra.gmra.mrb[0].mxu1 %vm126_vm0, %v381_v14 }
  0x1a   :  { %326 = vmatmul.mubr.msk.bf16.gmra.mrb[4].mxu0 %vm126_vm0, %v381_v14 }
  0xe5   :  { %v167_v23 = vpop.f32.mrb[0].mxu0 }
  0xe6   :  { %v168_v25 = vadd.f32 %v167_v23, %v40_v21  ;;  %v169_v26 = vpop.f32.mrb[1].mxu0  ;;  %v361_v32 = vpop.f32.mrb[0].mxu1 }
  0xe7   :  { %v170_v27 = vadd.f32 %v169_v26, %v44_v22  ;;  %v171_v28 = vpop.f32.mrb[2].mxu0  ;;  %v229_v35 = vadd.f32 %v361_v32, %v48_v24  ;;  %v220_v36 = vpop.f32.mrb[1].mxu1 }
  0xe8   :  { %v235_v29 = vmax.f32 %v168_v25, 0.0  ;;  %v172_v30 = vadd.f32 %v171_v28, %v40_v21  ;;  %v173_v31 = vpop.f32.mrb[3].mxu0  ;;  %v221_v39 = vadd.f32 %v220_v36, %v48_v24  ;;  %v362_v40 = vpop.f32.mrb[2].mxu1 }
  0xe9   :  { %v236_v33 = vmax.f32 %v170_v27, 0.0  ;;  %v174_v34 = vadd.f32 %v173_v31, %v44_v22  ;;  %v243_v43 = vmax.f32 %v229_v35, 0.0  ;;  %v232_v44 = vadd.f32 %v362_v40, %v48_v24  ;;  %v223_v45 = vpop.f32.mrb[3].mxu1 }
  0xea   :  { %v247_v37 = vmin.f32 %v235_v29, 6.0  ;;  %v238_v38 = vmax.f32 %v172_v30, 0.0  ;;  %v237_v47 = vmax.f32 %v221_v39, 0.0  ;;  %v224_v48 = vadd.f32 %v223_v45, %v48_v24 }
  0xeb   :  { %v248_v41 = vmin.f32 %v236_v33, 6.0  ;;  %v239_v42 = vmax.f32 %v174_v34, 0.0  ;;  %v255_v51 = vmin.f32 %v243_v43, 6.0  ;;  %v246_v52 = vmax.f32 %v232_v44, 0.0 }
  0xec   :  { %v250_v46 = vmin.f32 %v238_v38, 6.0  ;;  %v249_v54 = vmin.f32 %v237_v47, 6.0  ;;  %v240_v56 = vmax.f32 %v224_v48, 0.0 }
  0xed   :  { %v337_v49 = vpack.c.bf16 %v248_v41, %v247_v37  ;;  %v251_v50 = vmin.f32 %v239_v42, 6.0  ;;  %v177_v53 = vpop.f32.mrb[4].mxu0  ;;  %v342_v59 = vpack.c.bf16 %v255_v51, %v255_v51  ;;  %v258_v60 = vmin.f32 %v246_v52, 6.0 }
  0xee   :  { %v178_v55 = vadd.f32 %v177_v53, %v40_v21  ;;  %v179_v57 = vpop.f32.mrb[5].mxu0  ;;  %v338_v63 = vpack.c.bf16 %v249_v54, %v249_v54  ;;  %v252_v1 = vmin.f32 %v240_v56, 6.0 }
  0xef   :  { %299 = vst [vmem:[%s475_s3] sm:$0xff] %v337_v49  ;;  %v339_v58 = vpack.c.bf16 %v251_v50, %v250_v46  ;;  %v180_v61 = vadd.f32 %v179_v57, %v44_v22  ;;  %v181_v62 = vpop.f32.mrb[6].mxu0  ;;  %304 = vst [vmem:[%s475_s3 + $0x20] sm:$0xf] %v342_v59  ;;  %v344_v4 = vpack.c.bf16 %v258_v60, %v258_v60 }
  0xf0   :  { %v241_v0 = vmax.f32 %v178_v55, 0.0  ;;  %v182_v2 = vadd.f32 %v181_v62, %v40_v21  ;;  %v183_v3 = vpop.f32.mrb[7].mxu0  ;;  %300 = vst [vmem:[%s475_s3 + $0x8] sm:$0xf] %v338_v63  ;;  %v340_v8 = vpack.c.bf16 %v252_v1, %v252_v1 }
  0xf1   :  { %301 = vst [vmem:[%s475_s3 + $0xc] sm:$0xff] %v339_v58  ;;  %v242_v5 = vmax.f32 %v180_v61, 0.0  ;;  %v184_v6 = vadd.f32 %v183_v3, %v44_v22  ;;  %306 = vst [vmem:[%s475_s3 + $0x2c] sm:$0xf] %v344_v4 }
  0xf2   :  { %v253_v7 = vmin.f32 %v241_v0, 6.0  ;;  %v244_v9 = vmax.f32 %v182_v2, 0.0  ;;  %302 = vst [vmem:[%s475_s3 + $0x14] sm:$0xf] %v340_v8 }
  0xf3   :  { %v254_v10 = vmin.f32 %v242_v5, 6.0  ;;  %v245_v11 = vmax.f32 %v184_v6, 0.0 }
  0xf4   :  { %v256_v12 = vmin.f32 %v244_v9, 6.0 }
  0xf5   :  { %v341_v13 = vpack.c.bf16 %v254_v10, %v253_v7  ;;  %v257_v14 = vmin.f32 %v245_v11, 6.0 }
  0xf7   :  { %303 = vst [vmem:[%s475_s3 + $0x18] sm:$0xff] %v341_v13  ;;  %v343_v15 = vpack.c.bf16 %v257_v14, %v256_v12 }
  0xf9   :  { %305 = vst [vmem:[%s475_s3 + $0x24] sm:$0xff] %v343_v15 }

// kernel: mobilefacenet_forward.57
= control target key start
LH: loop header
LB: loop body
LE: loop exit
PB: predicated region body
PF: predicated region fallthrough
CT: control target
= control target key end

     0   :  { %s741_s12 = smov 0   ;;  %s904_s0 = inlined_call_operand.vmem [shape: bf16[6,2,3,768], index: 0, kind: input, shape index: {}]   ;;  %s905_s1 = inlined_call_operand.vmem [shape: f32[9,384], index: 1, kind: input, shape index: {}]   ;;  %s906_s2 = inlined_call_operand.vmem [shape: f32[1,384], index: 2, kind: input, shape index: {}]   ;;  %s907_s3 = inlined_call_operand.vmem [shape: bf16[2,2,2,384], index: 3, kind: output, shape index: {}]  }
   0x1 LB: > { %s747_s13 = sadd.s32 4294967295, %s718_s12   ;;  %p666_p0 = scmp.ge.s32.totalorder %s718_s12, 1  ;;  %s718_s12 = sphi %s741_s12, %s13_s12  }
   0x2   : > { %p139_p1 = scmp.lt.s32.totalorder %s718_s12, 3 }
   0x4   : > { %p140_p2 = pnand %p666_p0, %p139_p1 }
   0x5   : > { %s163_s14 = smul.u32 (!%p140_p2), 3, %s747_s13  ;;  %v186_v0 = vlaneseq (!%p140_p2)  ;;  %v755_v1 = vld [vmem:[%s905_s1 + $0x18] ss:$0 sm:$0xff] (!%p140_p2)  ;;  %v760_v2 = vld [vmem:[%s905_s1 + $0x20] ss:$0 sm:$0xff] (!%p140_p2)  ;;  %v780_v8 = vld [vmem:[%s905_s1 + $0x8] sm:$0xff] (!%p140_p2) }
   0x6   : > { %143 = sbr.rel (%p140_p2) target bundleno = 72 (0x48), region = 32  ;;  %v765_v3 = vld [vmem:[%s905_s1 + $0x28] ss:$0 sm:$0xff] (!%p140_p2)  ;;  %v772_v5 = vld [vmem:[%s905_s1] sm:$0xff] (!%p140_p2)  ;;  %v483_v6 = vcombine.low (!%p140_p2), %v755_v1, %v760_v2  ;;  %v797_v13 = vld [vmem:[%s905_s1 + $0x10] sm:$0xff] (!%p140_p2)  ;;  %p170_p4 = scmp.lt.s32.totalorder (!%p140_p2), %s747_s13, 1 }
   0x7   : > { %p164_p3 = scmp.lt.s32.totalorder (!%p140_p2), %s163_s14, 5  ;;  %v767_v4 = vshrl.u32 (!%p140_p2), %v186_v0, 7  ;;  %v485_v7 = vrot.slane (!%p140_p2), %v765_v3, 7  ;;  %v720_v2 = vmov (!%p140_p2), 1966171168  }
   0x9   : > { %v783_v9 = vsub.s32 (!%p140_p2), 0, %v767_v4  ;;  %v786_v10 = vsub.s32 (!%p140_p2), 1, %v767_v4  ;;  %v789_v11 = vsub.s32 (!%p140_p2), 2, %v767_v4  ;;  %v792_v12 = vsub.s32 (!%p140_p2), 3, %v767_v4 }
   0xa   : > { %v800_v14 = vsub.s32 (!%p140_p2), 4, %v767_v4  ;;  %v803_v15 = vsub.s32 (!%p140_p2), 5, %v767_v4  ;;  %v806_v16 = vsub.s32 (!%p140_p2), 6, %v767_v4  ;;  %v809_v17 = vsub.s32 (!%p140_p2), 7, %v767_v4 }
   0xb   : > { %v189_v18 = vrot.slane (!%p140_p2), %v772_v5, %v783_v9  ;;  %v193_v19 = vrot.slane (!%p140_p2), %v780_v8, %v783_v9  ;;  %v197_v20 = vrot.slane (!%p140_p2), %v797_v13, %v783_v9  ;;  %v219_v21 = vrot.slane (!%p140_p2), %v772_v5, %v786_v10 }
   0xc   : > { %v223_v22 = vrot.slane (!%p140_p2), %v780_v8, %v786_v10  ;;  %v227_v23 = vrot.slane (!%p140_p2), %v797_v13, %v786_v10  ;;  %v249_v24 = vrot.slane (!%p140_p2), %v772_v5, %v789_v11  ;;  %v253_v25 = vrot.slane (!%p140_p2), %v780_v8, %v789_v11 }
   0xd   : > { %s909_s14 = smov (!%p164_p3, %s163_s14), 5  ;;  %v200_v26 = vcombine.low %v189_v18, %v193_v19  ;;  %v257_v27 = vrot.slane %v797_v13, %v789_v11  ;;  %v300_v28 = vrot.slane %v772_v5, %v792_v12  ;;  %v304_v29 = vrot.slane %v780_v8, %v792_v12  ;;  %s911_s13 = smov (!%p170_p4, %s747_s13), 1 }
   0xe   : > { %s701_s27 = smul.u32 24, %s909_s14  ;;  %v230_v33 = vcombine.low %v219_v21, %v223_v22  ;;  %v261_v34 = vcombine.low %v249_v24, %v253_v25  ;;  %v308_v35 = vrot.slane %v797_v13, %v792_v12  ;;  %v330_v36 = vrot.slane %v772_v5, %v800_v14 }
   0xf   : > { %v263_v21 = vrot.slane %v257_v27, 7  ;;  %s702_s6 = smul.u32 6, %s911_s13 }
  0x10   : > { %s830_s30 = scalar_lea.vmem %s904_s0, %s701_s27  ;;  %v262_v19 = vrot.slane %v261_v34, 7 }
  0x11   : > { %v180_v30 = vld [vmem:[%s830_s30] sm:$0x15]  ;;  %v181_v31 = vld [vmem:[%s830_s30 + $0x18] sm:$0x15]  ;;  %v210_v32 = vld [vmem:[%s830_s30 + $0x6] sm:$0x15]  ;;  %s173_s9 = scalar_lea.vmem %s907_s3, %s702_s6 }
  0x12   : > { %v182_v37 = vunpack.c.l.bf16 %v180_v30  ;;  %v183_v38 = vunpack.c.h.bf16 %v180_v30  ;;  %v184_v39 = vunpack.c.l.bf16 %v181_v31  ;;  %v185_v40 = vunpack.c.h.bf16 %v181_v31  ;;  %v211_v41 = vld [vmem:[%s830_s30 + $0x1e] sm:$0x15]  ;;  %v241_v47 = vld [vmem:[%s830_s30 + $0x18] sm:$0x3f]  ;;  %v672_v56 = vld [vmem:[%s830_s30 + $0xc] sm:$0x15] }
  0x13   : > { %v212_v42 = vunpack.c.l.bf16 %v210_v32  ;;  %v213_v43 = vunpack.c.h.bf16 %v210_v32  ;;  %v214_v44 = vunpack.c.l.bf16 %v211_v41  ;;  %v215_v45 = vunpack.c.h.bf16 %v211_v41  ;;  %v240_v46 = vld [vmem:[%s830_s30] sm:$0x3f]  ;;  %v674_v62 = vld [vmem:[%s830_s30 + $0x12] sm:$0x15] }
  0x14   : > { %v202_v48 = vmul.f32 %v200_v26, %v182_v37  ;;  %v203_v49 = vmul.f32 %v197_v20, %v183_v38  ;;  %v204_v50 = vmul.f32 %v200_v26, %v184_v39  ;;  %v205_v51 = vmul.f32 %v197_v20, %v185_v40  ;;  %v673_v61 = vld [vmem:[%s830_s30 + $0x24] sm:$0x15]  ;;  %v675_v37 = vld [vmem:[%s830_s30 + $0x2a] sm:$0x15] }
  0x15   : > { %v232_v52 = vmul.f32 %v230_v33, %v212_v42  ;;  %v233_v53 = vmul.f32 %v227_v23, %v213_v43  ;;  %v234_v54 = vmul.f32 %v230_v33, %v214_v44  ;;  %v235_v55 = vmul.f32 %v227_v23, %v215_v45  ;;  %v676_v44 = vld [vmem:[%s830_s30 + $0xc] sm:$0x3f] }
  0x16   : > { %v242_v57 = vunpack.c.l.bf16 %v240_v46  ;;  %v243_v58 = vunpack.c.h.bf16 %v240_v46  ;;  %v244_v59 = vunpack.c.l.bf16 %v241_v47  ;;  %v245_v60 = vunpack.c.h.bf16 %v241_v47 }
  0x17   : > { %v236_v63 = vadd.f32 %v232_v52, %v202_v48  ;;  %v237_v0 = vadd.f32 %v233_v53, %v203_v49  ;;  %v238_v12 = vadd.f32 %v234_v54, %v204_v50  ;;  %v239_v18 = vadd.f32 %v235_v55, %v205_v51  ;;  %v677_v52 = vld [vmem:[%s830_s30 + $0x24] sm:$0x3f] }
  0x18   : > { %v293_v22 = vunpack.c.l.bf16 %v672_v56  ;;  %v294_v20 = vunpack.c.h.bf16 %v672_v56  ;;  %v295_v24 = vunpack.c.l.bf16 %v673_v61  ;;  %v296_v25 = vunpack.c.h.bf16 %v673_v61 }
  0x19   : > { %v311_v23 = vcombine.low %v300_v28, %v304_v29  ;;  %v323_v26 = vunpack.c.l.bf16 %v674_v62  ;;  %v266_v30 = vmul.f32 %v262_v19, %v242_v57  ;;  %v267_v31 = vmul.f32 %v263_v21, %v243_v58 }
  0x1a   : > { %v268_v32 = vmul.f32 %v262_v19, %v244_v59  ;;  %v269_v33 = vmul.f32 %v263_v21, %v245_v60  ;;  %v314_v39 = vmul.f32 %v308_v35, %v294_v20  ;;  %v316_v41 = vmul.f32 %v308_v35, %v296_v25 }
  0x1b   : > { %v313_v38 = vmul.f32 %v311_v23, %v293_v22  ;;  %v315_v40 = vmul.f32 %v311_v23, %v295_v24  ;;  %v668_v42 = vrot.slane %v266_v30, 9  ;;  %v669_v34 = vrot.slane %v267_v31, 9  ;;  %v684_v24 = vld [vmem:[%s830_s30 + $0x1e] sm:$0x15]  ;;  %v685_v31 = vld [vmem:[%s830_s30 + $0x36] sm:$0x15] }
  0x1c   : > { %v670_v27 = vrot.slane %v268_v32, 9  ;;  %v671_v43 = vrot.slane %v269_v33, 9  ;;  %v324_v45 = vunpack.c.h.bf16 %v674_v62  ;;  %v325_v46 = vunpack.c.l.bf16 %v675_v37 }
  0x1d   : > { %v326_v47 = vunpack.c.h.bf16 %v675_v37  ;;  %v334_v28 = vrot.slane %v780_v8, %v800_v14  ;;  %v286_v29 = vadd.f32 %v668_v42, %v236_v63  ;;  %v287_v48 = vadd.f32 %v669_v34, %v237_v0  ;;  %v682_v63 = vld [vmem:[%s830_s30 + $0x18] sm:$0x15] }
  0x1e   : > { %v288_v49 = vadd.f32 %v670_v27, %v238_v12  ;;  %v289_v50 = vadd.f32 %v671_v43, %v239_v18  ;;  %v338_v35 = vrot.slane %v797_v13, %v800_v14  ;;  %v353_v53 = vunpack.c.l.bf16 %v676_v44  ;;  %v683_v18 = vld [vmem:[%s830_s30 + $0x30] sm:$0x15] }
  0x1f   : > { %v341_v51 = vcombine.low %v330_v36, %v334_v28  ;;  %v354_v54 = vunpack.c.h.bf16 %v676_v44  ;;  %v317_v55 = vadd.f32 %v313_v38, %v286_v29  ;;  %v318_v56 = vadd.f32 %v314_v39, %v287_v48  ;;  %v686_v28 = vld [vmem:[%s830_s30 + $0x18] sm:$0x3f] }
  0x20   : > { %v319_v57 = vadd.f32 %v315_v40, %v288_v49  ;;  %v320_v58 = vadd.f32 %v316_v41, %v289_v50  ;;  %v344_v60 = vmul.f32 %v338_v35, %v324_v45  ;;  %v346_v62 = vmul.f32 %v338_v35, %v326_v47 }
  0x21   : > { %v343_v59 = vmul.f32 %v341_v51, %v323_v26  ;;  %v345_v61 = vmul.f32 %v341_v51, %v325_v46  ;;  %v355_v0 = vunpack.c.l.bf16 %v677_v52  ;;  %v356_v12 = vunpack.c.h.bf16 %v677_v52 }
  0x22   : > { %v360_v14 = vrot.slane %v772_v5, %v803_v15  ;;  %v364_v36 = vrot.slane %v780_v8, %v803_v15  ;;  %v348_v21 = vadd.f32 %v344_v60, %v318_v56  ;;  %v350_v20 = vadd.f32 %v346_v62, %v320_v58 }
  0x23   : > { %v347_v19 = vadd.f32 %v343_v59, %v317_v55  ;;  %v349_v22 = vadd.f32 %v345_v61, %v319_v57  ;;  %v368_v25 = vrot.slane %v797_v13, %v803_v15  ;;  %v404_v26 = vunpack.c.l.bf16 %v682_v63  ;;  %v687_v61 = vld [vmem:[%s830_s30 + $0x30] sm:$0x3f] }
  0x24   : > { %v372_v23 = vcombine.low %v360_v14, %v364_v36  ;;  %v405_v30 = vunpack.c.h.bf16 %v682_v63  ;;  %v406_v32 = vunpack.c.l.bf16 %v683_v18  ;;  %v407_v33 = vunpack.c.h.bf16 %v683_v18 }
  0x25   : > { %v411_v37 = vrot.slane %v772_v5, %v806_v16  ;;  %v415_v38 = vrot.slane %v780_v8, %v806_v16  ;;  %v374_v40 = vrot.slane %v368_v25, 7  ;;  %v419_v41 = vrot.slane %v797_v13, %v806_v16 }
  0x26   : > { %v373_v39 = vrot.slane %v372_v23, 7  ;;  %v434_v42 = vunpack.c.l.bf16 %v684_v24  ;;  %v435_v34 = vunpack.c.h.bf16 %v684_v24  ;;  %v436_v27 = vunpack.c.l.bf16 %v685_v31 }
  0x27   : > { %v422_v15 = vcombine.low %v411_v37, %v415_v38  ;;  %v437_v43 = vunpack.c.h.bf16 %v685_v31  ;;  %v378_v45 = vmul.f32 %v374_v40, %v354_v54  ;;  %v380_v47 = vmul.f32 %v374_v40, %v356_v12 }
  0x28   : > { %v377_v44 = vmul.f32 %v373_v39, %v353_v53  ;;  %v379_v46 = vmul.f32 %v373_v39, %v355_v0  ;;  %v425_v48 = vmul.f32 %v419_v41, %v405_v30  ;;  %v427_v50 = vmul.f32 %v419_v41, %v407_v33 }
  0x29   : > { %v424_v29 = vmul.f32 %v422_v15, %v404_v26  ;;  %v426_v49 = vmul.f32 %v422_v15, %v406_v32  ;;  %v679_v51 = vrot.slane %v378_v45, 9  ;;  %v681_v55 = vrot.slane %v380_v47, 9 }
  0x2a   : > { %v678_v35 = vrot.slane %v377_v44, 9  ;;  %v680_v52 = vrot.slane %v379_v46, 9  ;;  %v441_v16 = vrot.slane %v772_v5, %v809_v17  ;;  %v445_v56 = vrot.slane %v780_v8, %v809_v17  ;;  %v512_v8 = vld [vmem:[%s906_s2] sm:$0x7] }
  0x2b   : > { %v449_v53 = vrot.slane %v797_v13, %v809_v17  ;;  %v464_v54 = vunpack.c.l.bf16 %v686_v28  ;;  %v398_v58 = vadd.f32 %v679_v51, %v348_v21  ;;  %v400_v60 = vadd.f32 %v681_v55, %v350_v20 }
  0x2c   : > { %v397_v57 = vadd.f32 %v678_v35, %v347_v19  ;;  %v399_v59 = vadd.f32 %v680_v52, %v349_v22  ;;  %v452_v62 = vcombine.low %v441_v16, %v445_v56  ;;  %v465_v12 = vunpack.c.h.bf16 %v686_v28 }
  0x2d   : > { %v455_v63 = vmul.f32 %v449_v53, %v435_v34  ;;  %v457_v0 = vmul.f32 %v449_v53, %v437_v43  ;;  %v429_v36 = vadd.f32 %v425_v48, %v398_v58  ;;  %v431_v5 = vadd.f32 %v427_v50, %v400_v60 }
  0x2e   : > { %v428_v14 = vadd.f32 %v424_v29, %v397_v57  ;;  %v430_v18 = vadd.f32 %v426_v49, %v399_v59  ;;  %v454_v24 = vmul.f32 %v452_v62, %v434_v42  ;;  %v456_v13 = vmul.f32 %v452_v62, %v436_v27 }
  0x2f   : > { %v466_v17 = vunpack.c.l.bf16 %v687_v61  ;;  %v467_v19 = vunpack.c.h.bf16 %v687_v61  ;;  %v459_v21 = vadd.f32 %v455_v63, %v429_v36  ;;  %v461_v22 = vadd.f32 %v457_v0, %v431_v5 }
  0x30   : > { %v484_v20 = vrot.slane %v483_v6, 7  ;;  %v489_v25 = vmul.f32 %v485_v7, %v465_v12  ;;  %v458_v23 = vadd.f32 %v454_v24, %v428_v14  ;;  %v460_v26 = vadd.f32 %v456_v13, %v430_v18 }
  0x31   : > { %v491_v30 = vmul.f32 %v485_v7, %v467_v19  ;;  %v517_v31 = vrot.slane %v512_v8, %v783_v9  ;;  %v521_v38 = vrot.slane %v512_v8, %v786_v10  ;;  %v525_v1 = vrot.slane %v512_v8, %v789_v11 }
  0x32   : > { %v488_v32 = vmul.f32 %v484_v20, %v464_v54  ;;  %v490_v33 = vmul.f32 %v484_v20, %v466_v17  ;;  %v692_v37 = vrot.slane %v489_v25, 9  ;;  %v561_v6 = vunpack.c.l.s4 %v720_v2 }
  0x33   : > { %v694_v39 = vrot.slane %v491_v30, 9  ;;  %v527_v15 = vcombine.low %v517_v31, %v521_v38 }
  0x34   : > { %v691_v40 = vrot.slane %v488_v32, 9  ;;  %v693_v41 = vrot.slane %v490_v33, 9  ;;  %v509_v42 = vadd.f32 %v692_v37, %v459_v21  ;;  %v562_v10 = vunpack.c.0.s8 %v561_v6 }
  0x35   : > { %v511_v3 = vadd.f32 %v694_v39, %v461_v22 }
  0x36   : > { %v508_v7 = vadd.f32 %v691_v40, %v458_v23  ;;  %v510_v34 = vadd.f32 %v693_v41, %v460_v26  ;;  %v530_v9 = vadd.f32 %v525_v1, %v509_v42  ;;  %v565_v35 = vsub.s32 %v562_v10, %v767_v4 }
  0x37   : > { %v532_v27 = vadd.f32 %v525_v1, %v511_v3 }
  0x38   : > { %v529_v43 = vadd.f32 %v527_v15, %v508_v7  ;;  %v531_v44 = vadd.f32 %v527_v15, %v510_v34  ;;  %v534_v45 = vmax.f32 %v530_v9, 0.0 }
  0x39   : > { %v536_v46 = vmax.f32 %v532_v27, 0.0 }
  0x3a   : > { %v533_v47 = vmax.f32 %v529_v43, 0.0  ;;  %v535_v11 = vmax.f32 %v531_v44, 0.0  ;;  %v538_v28 = vmin.f32 %v534_v45, 6.0 }
  0x3b   : > { %v540_v29 = vmin.f32 %v536_v46, 6.0 }
  0x3c   : > { %v537_v48 = vmin.f32 %v533_v47, 6.0  ;;  %v539_v49 = vmin.f32 %v535_v11, 6.0  ;;  %v549_v50 = vpack.c.bf16 %v538_v28, %v538_v28 }
  0x3d   : > { %v552_v51 = vpack.c.bf16 %v540_v29, %v540_v29 }
  0x3e   : > { %v543_v52 = vcombine.high %v537_v48, %v537_v48  ;;  %v544_v55 = vcombine.high %v539_v49, %v539_v49  ;;  %v573_v56 = vrot.slane %v549_v50, %v565_v35 }
  0x3f   : > { %v596_v54 = vrot.slane %v552_v51, %v565_v35 }
  0x40   : > { %v695_v16 = vpack.c.bf16 %v543_v52, %v537_v48  ;;  %v696_v53 = vpack.c.bf16 %v544_v55, %v539_v49 }
  0x42   : > { %v566_v57 = vrot.slane %v695_v16, %v565_v35  ;;  %v589_v58 = vrot.slane %v696_v53, %v565_v35 }
  0x44   : > { %v574_v59 = vcombine.low %v566_v57, %v573_v56  ;;  %v597_v60 = vcombine.low %v589_v58, %v596_v54 }
  0x46   : > { %697 = vst.sshfl [vmem:[%s173_s9] sm:$0x15 pattern:$0x73625140] %v574_v59 }
  0x47   : > { %698 = vst.sshfl [vmem:[%s173_s9 + $0x3] sm:$0x15 pattern:$0x73625140] %v597_v60 }
  0x48 PF: > { %s13_s12 = sadd.s32 1, %s718_s12  }
  0x49   : > { %p10_p5 = scmp.ge.s32.totalorder %s13_s12, 4  }
  0x4b   :  { %12 = sbr.rel (!%p10_p5) target bundleno = 1 (0x1), region = 64 }

// kernel: mobilefacenet_forward.59
= control target key start
LH: loop header
LB: loop body
LE: loop exit
PB: predicated region body
PF: predicated region fallthrough
CT: control target
= control target key end

     0   :  { %s958_s12 = smov 0   ;;  %s960_s13 = smov 0   ;;  %s1127_s0 = inlined_call_operand.vmem [shape: bf16[8,128], index: 0, kind: input, shape index: {}]   ;;  %s1128_s1 = inlined_call_operand.vmem [shape: bf16[128,768], index: 1, kind: input, shape index: {}]   ;;  %s1129_s2 = inlined_call_operand.vmem [shape: f32[1,768], index: 2, kind: input, shape index: {}]   ;;  %s1130_s3 = inlined_call_operand.vmem [shape: bf16[8,768], index: 3, kind: output, shape index: {}]  }
   0x1   :  { %s962_s14 = smov 0   ;;  %s964_s15 = smov 0  }
   0x2   :  { %s966_s16 = smov 0  }
   0x3 LB: > { %s22_s17 = sadd.s32 1, %s929_s15  ;;  %p65_p1 = scmp.ne.s32.totalorder %s921_s13, %s917_s12  ;;  %s933_s16 = sphi %s966_s16, %s13_s16   ;;  %s929_s15 = sphi %s964_s15, %s1134_s15   ;;  %s925_s14 = sphi %s962_s14, %s1133_s14   ;;  %s921_s13 = sphi %s960_s13, %s1132_s13   ;;  %s917_s12 = sphi %s958_s12, %s1131_s12  }
   0x4   : > { %p23_p0 = scmp.ge.s32.totalorder %s22_s17, 2  ;;  %p66_p2 = scmp.eq.s32.totalorder %s933_s16, 0 }
   0x5   : > { %s58_s19 = sadd.s32 1, %s921_s13  ;;  %p722_p5 = scmp.ge.s32.totalorder %s933_s16, 2 }
   0x6   : > { %s1136_s17 = smov (%p23_p0, %s22_s17), 0  ;;  %p67_p3 = por %p66_p2, %p65_p1 }
   0x7   : > { %s55_s18 = ssub.s32 %s929_s15, %s1136_s17  ;;  %152 = sbr.rel (%p722_p5) target bundleno = 37 (0x25), region = 20 }
   0x8   : > { %p56_p4 = scmp.eq.s32.totalorder %s55_s18, 0 }
   0xa   : > { %s993_s20 = scalar_select %p56_p4, %s921_s13, %s58_s19  }
   0xe   : > { %155 = sbr.rel (!%p67_p3) target bundleno = 37 (0x25), region = 24  ;;  %s157_s21 = sand.u32 (%p67_p3), 1, %s921_s13  }
   0xf   : > { %s786_s22 = smul.u32 (%p67_p3), 12, %s929_s15 }
  0x10   : > { %s818_s23 = smul.u32 (%p67_p3), 192, %s157_s21 }
  0x11   : > { %s1001_s26 = scalar_lea.vmem (%p67_p3), %s1128_s1, %s786_s22 }
  0x12   : > { %v177_v0 = vld [vmem:[%s1001_s26] sm:$0xff] (%p67_p3)  ;;  %v179_v1 = vld [vmem:[%s1001_s26 + $0x18] sm:$0xff] (%p67_p3)  ;;  %v181_v2 = vld [vmem:[%s1001_s26 + $0x30] sm:$0xff] (%p67_p3)  ;;  %s1006_s27 = scalar_lea.vmem (%p67_p3), [#allocation2], %s818_s23 }
  0x13   : > { %178 = vst [vmem:[%s1006_s27] sm:$0xff] (%p67_p3), %v177_v0  ;;  %180 = vst [vmem:[%s1006_s27 + $0xc] sm:$0xff] (%p67_p3), %v179_v1  ;;  %v183_v3 = vld [vmem:[%s1001_s26 + $0x48] sm:$0xff] (%p67_p3)  ;;  %v185_v4 = vld [vmem:[%s1001_s26 + $0x60] sm:$0xff] (%p67_p3) }
  0x14   : > { %182 = vst [vmem:[%s1006_s27 + $0x18] sm:$0xff] (%p67_p3), %v181_v2  ;;  %v187_v5 = vld [vmem:[%s1001_s26 + $0x78] sm:$0xff] (%p67_p3)  ;;  %184 = vst [vmem:[%s1006_s27 + $0x24] sm:$0xff] (%p67_p3), %v183_v3  ;;  %v189_v6 = vld [vmem:[%s1001_s26 + $0x90] sm:$0xff] (%p67_p3) }
  0x15   : > { %186 = vst [vmem:[%s1006_s27 + $0x30] sm:$0xff] %v185_v4  ;;  %188 = vst [vmem:[%s1006_s27 + $0x3c] sm:$0xff] %v187_v5  ;;  %v191_v7 = vld [vmem:[%s1001_s26 + $0xa8] sm:$0xff]  ;;  %v193_v8 = vld [vmem:[%s1001_s26 + $0xc0] sm:$0xff] }
  0x16   : > { %190 = vst [vmem:[%s1006_s27 + $0x48] sm:$0xff] %v189_v6  ;;  %192 = vst [vmem:[%s1006_s27 + $0x54] sm:$0xff] %v191_v7  ;;  %v195_v9 = vld [vmem:[%s1001_s26 + $0xd8] sm:$0xff]  ;;  %v197_v10 = vld [vmem:[%s1001_s26 + $0xf0] sm:$0xff] }
  0x17   : > { %194 = vst [vmem:[%s1006_s27 + $0x60] sm:$0xff] %v193_v8  ;;  %v199_v11 = vld [vmem:[%s1001_s26 + $0x108] sm:$0xff]  ;;  %196 = vst [vmem:[%s1006_s27 + $0x6c] sm:$0xff] %v195_v9  ;;  %v201_v12 = vld [vmem:[%s1001_s26 + $0x120] sm:$0xff] }
  0x18   : > { %198 = vst [vmem:[%s1006_s27 + $0x78] sm:$0xff] %v197_v10  ;;  %200 = vst [vmem:[%s1006_s27 + $0x84] sm:$0xff] %v199_v11  ;;  %v203_v13 = vld [vmem:[%s1001_s26 + $0x138] sm:$0xff]  ;;  %v205_v14 = vld [vmem:[%s1001_s26 + $0x150] sm:$0xff] }
  0x19   : > { %202 = vst [vmem:[%s1006_s27 + $0x90] sm:$0xff] %v201_v12  ;;  %204 = vst [vmem:[%s1006_s27 + $0x9c] sm:$0xff] %v203_v13  ;;  %v207_v15 = vld [vmem:[%s1001_s26 + $0x168] sm:$0xff]  ;;  %v726_v17 = vld [vmem:[%s1001_s26 + $0x20] sm:$0xf] }
  0x1a   : > { %206 = vst [vmem:[%s1006_s27 + $0xa8] sm:$0xff] %v205_v14  ;;  %v724_v16 = vld [vmem:[%s1001_s26 + $0x8] sm:$0xf]  ;;  %208 = vst [vmem:[%s1006_s27 + $0xb4] sm:$0xff] %v207_v15  ;;  %v728_v18 = vld [vmem:[%s1001_s26 + $0x38] sm:$0xf] }
  0x1b   : > { %725 = vst [vmem:[%s1006_s27 + $0x8] sm:$0xf] %v724_v16  ;;  %727 = vst [vmem:[%s1006_s27 + $0x14] sm:$0xf] %v726_v17  ;;  %v730_v19 = vld [vmem:[%s1001_s26 + $0x50] sm:$0xf] }
  0x1c   : > { %v732_v20 = vld [vmem:[%s1001_s26 + $0x68] sm:$0xf]  ;;  %729 = vst [vmem:[%s1006_s27 + $0x20] sm:$0xf] %v728_v18  ;;  %731 = vst [vmem:[%s1006_s27 + $0x2c] sm:$0xf] %v730_v19 }
  0x1d   : > { %733 = vst [vmem:[%s1006_s27 + $0x38] sm:$0xf] %v732_v20  ;;  %v734_v21 = vld [vmem:[%s1001_s26 + $0x80] sm:$0xf]  ;;  %v736_v22 = vld [vmem:[%s1001_s26 + $0x98] sm:$0xf] }
  0x1e   : > { %v738_v23 = vld [vmem:[%s1001_s26 + $0xb0] sm:$0xf]  ;;  %735 = vst [vmem:[%s1006_s27 + $0x44] sm:$0xf] %v734_v21  ;;  %737 = vst [vmem:[%s1006_s27 + $0x50] sm:$0xf] %v736_v22 }
  0x1f   : > { %739 = vst [vmem:[%s1006_s27 + $0x5c] sm:$0xf] %v738_v23  ;;  %v740_v24 = vld [vmem:[%s1001_s26 + $0xc8] sm:$0xf]  ;;  %v742_v25 = vld [vmem:[%s1001_s26 + $0xe0] sm:$0xf] }
  0x20   : > { %v744_v26 = vld [vmem:[%s1001_s26 + $0xf8] sm:$0xf]  ;;  %741 = vst [vmem:[%s1006_s27 + $0x68] sm:$0xf] %v740_v24  ;;  %743 = vst [vmem:[%s1006_s27 + $0x74] sm:$0xf] %v742_v25 }
  0x21   : > { %745 = vst [vmem:[%s1006_s27 + $0x80] sm:$0xf] %v744_v26  ;;  %v746_v27 = vld [vmem:[%s1001_s26 + $0x110] sm:$0xf]  ;;  %v748_v28 = vld [vmem:[%s1001_s26 + $0x128] sm:$0xf] }
  0x22   : > { %v750_v29 = vld [vmem:[%s1001_s26 + $0x140] sm:$0xf]  ;;  %747 = vst [vmem:[%s1006_s27 + $0x8c] sm:$0xf] %v746_v27  ;;  %749 = vst [vmem:[%s1006_s27 + $0x98] sm:$0xf] %v748_v28 }
  0x23   : > { %751 = vst [vmem:[%s1006_s27 + $0xa4] sm:$0xf] %v750_v29  ;;  %v752_v30 = vld [vmem:[%s1001_s26 + $0x158] sm:$0xf]  ;;  %v754_v31 = vld [vmem:[%s1001_s26 + $0x170] sm:$0xf] }
  0x24   : > { %753 = vst [vmem:[%s1006_s27 + $0xb0] sm:$0xf] %v752_v30  ;;  %755 = vst [vmem:[%s1006_s27 + $0xbc] sm:$0xf] %v754_v31 }
  0x25 PF: > { %p756_p6 = scmp.ge.s32.totalorder %s933_s16, 1  ;;  %p260_p7 = scmp.lt.s32.totalorder %s933_s16, 3 }
  0x27   : > { %p261_p8 = pnand %p756_p6, %p260_p7 }
  0x28   : > { %s267_s28 = sand.u32 (!%p261_p8), 1, %s917_s12   ;;  %v935_v32 = vmov (!%p261_p8), 0.0   ;;  %vm936_vm0 = vmmov (!%p261_p8), 0   ;;  %v937_v33 = vmov (!%p261_p8), 0   ;;  %v323_v58 = vld [vmem:[%s1127_s0] sm:$0xf] (!%p261_p8)  ;;  %v358_v59 = vlaneseq (!%p261_p8) }
  0x29   : > { %264 = sbr.rel (%p261_p8) target bundleno = 300 (0x12c), region = 54  ;;  %798 = vmatprep.subr.bf16.mxu1 (!%p261_p8), %v935_v32  ;;  %814 = vmatprep.mubr.msk.bf16.mxu1 (!%p261_p8), %vm936_vm0, %v935_v32 }
  0x2a   : > { %s819_s29 = smul.u32 (!%p261_p8), 192, %s267_s28  ;;  %533 = vmatprep.mubr.bf16.mxu0 (!%p261_p8), %v937_v33  ;;  %v359_v60 = vshrl.u32 (!%p261_p8), %v358_v59, 7 }
  0x2b   : > { %s307_s6 = smul.u32 (!%p261_p8), 3, %s925_s14 }
  0x2c   : > { %s1072_s30 = scalar_lea.vmem (!%p261_p8), [#allocation2], %s819_s29  ;;  %v368_v61 = vsub.s32 (!%p261_p8), 2, %v359_v60  ;;  %v360_v62 = vsub.s32 (!%p261_p8), 0, %v359_v60  ;;  %v364_v0 = vsub.s32 (!%p261_p8), 1, %v359_v60 }
  0x2d   : > { %v863_v34 = vld [vmem:[%s1072_s30 + $0x4] ss:$12 sps:$4 sm:$0xff] (!%p261_p8)   ;;  %v865_v35 = vld [vmem:[%s1072_s30 + $0x8] ss:$12 sps:$4 sm:$0xff] (!%p261_p8)   ;;  %v866_v36 = vld [vmem:[%s1072_s30] ss:$12 sps:$4 sm:$0xff] (!%p261_p8)  }
  0x2e   : > { %501 = vmatprep.subr.bf16.mxu0 (!%p261_p8), %v863_v34  ;;  %799 = vmatpush3.bf16.msra.mxu1 (!%p261_p8), %v865_v35  ;;  %v867_v37 = vld [vmem:[%s1072_s30 + $0x1c] ss:$12 sps:$4 sm:$0xff] (!%p261_p8)   ;;  %v869_v38 = vld [vmem:[%s1072_s30 + $0x20] ss:$12 sps:$4 sm:$0xff] (!%p261_p8)   ;;  %v870_v39 = vld [vmem:[%s1072_s30 + $0x18] ss:$12 sps:$4 sm:$0xff] (!%p261_p8)  }
  0x2f   : > { %502 = vmatpush1.bf16.msra.mxu0 (!%p261_p8), %v866_v36  ;;  %800 = vmatprep.subr.bf16.mxu1 (!%p261_p8), %v935_v32  ;;  %v871_v40 = vld [vmem:[%s1072_s30 + $0x34] ss:$12 sps:$4 sm:$0xff] (!%p261_p8)   ;;  %v873_v41 = vld [vmem:[%s1072_s30 + $0x38] ss:$12 sps:$4 sm:$0xff] (!%p261_p8)   ;;  %v874_v42 = vld [vmem:[%s1072_s30 + $0x30] ss:$12 sps:$4 sm:$0xff] (!%p261_p8)  }
  0x30   : > { %503 = vmatprep.subr.bf16.mxu0 %v867_v37  ;;  %v875_v43 = vld [vmem:[%s1072_s30 + $0x4c] ss:$12 sps:$4 sm:$0xff]   ;;  %v877_v44 = vld [vmem:[%s1072_s30 + $0x50] ss:$12 sps:$4 sm:$0xff]   ;;  %v878_v45 = vld [vmem:[%s1072_s30 + $0x48] ss:$12 sps:$4 sm:$0xff]  }
  0x31   : > { %v879_v46 = vld [vmem:[%s1072_s30 + $0x64] ss:$12 sps:$4 sm:$0xff]   ;;  %v881_v47 = vld [vmem:[%s1072_s30 + $0x68] ss:$12 sps:$4 sm:$0xff]   ;;  %v882_v48 = vld [vmem:[%s1072_s30 + $0x60] ss:$12 sps:$4 sm:$0xff]  }
  0x32   : > { %801 = vmatpush3.bf16.msra.mxu1 %v869_v38  ;;  %v883_v49 = vld [vmem:[%s1072_s30 + $0x7c] ss:$12 sps:$4 sm:$0xff]   ;;  %v885_v50 = vld [vmem:[%s1072_s30 + $0x80] ss:$12 sps:$4 sm:$0xff]   ;;  %v886_v51 = vld [vmem:[%s1072_s30 + $0x78] ss:$12 sps:$4 sm:$0xff]  }
  0x33   : > { %504 = vmatpush1.bf16.msra.mxu0 %v870_v39  ;;  %802 = vmatprep.subr.bf16.mxu1 %v935_v32  ;;  %v887_v52 = vld [vmem:[%s1072_s30 + $0x94] ss:$12 sps:$4 sm:$0xff]   ;;  %v889_v53 = vld [vmem:[%s1072_s30 + $0x98] ss:$12 sps:$4 sm:$0xff]   ;;  %v890_v54 = vld [vmem:[%s1072_s30 + $0x90] ss:$12 sps:$4 sm:$0xff]  }
  0x34   : > { %505 = vmatprep.subr.bf16.mxu0 %v871_v40  ;;  %v891_v55 = vld [vmem:[%s1072_s30 + $0xac] ss:$12 sps:$4 sm:$0xff]   ;;  %v893_v56 = vld [vmem:[%s1072_s30 + $0xb0] ss:$12 sps:$4 sm:$0xff]   ;;  %v894_v57 = vld [vmem:[%s1072_s30 + $0xa8] ss:$12 sps:$4 sm:$0xff]  }
  0x35   : > { %p308_p9 = scmp.lt.s32.totalorder %s307_s6, 5 }
  0x36   : > { %803 = vmatpush3.bf16.msra.mxu1 %v873_v41 }
  0x37   : > { %506 = vmatpush1.bf16.msra.mxu0 %v874_v42  ;;  %804 = vmatprep.subr.bf16.mxu1 %v935_v32  ;;  %s1138_s6 = smov (!%p308_p9, %s307_s6), 5 }
  0x38   : > { %507 = vmatprep.subr.bf16.mxu0 %v875_v43  ;;  %s310_s9 = scalar_lea.vmem %s1129_s2, %s1138_s6  ;;  %s757_s10 = sshll.u32 %s1138_s6, 2 }
  0x39   : > { %v356_v63 = vld [vmem:[%s310_s9] sm:$0x7]  ;;  %s320_s14 = scalar_lea.vmem %s1130_s3, %s757_s10 }
  0x3a   : > { %805 = vmatpush3.bf16.msra.mxu1 %v877_v44  ;;  %v369_v1 = vrot.slane %v356_v63, %v368_v61  ;;  %v361_v2 = vrot.slane %v356_v63, %v360_v62  ;;  %v365_v3 = vrot.slane %v356_v63, %v364_v0 }
  0x3b   : > { %508 = vmatpush1.bf16.msra.mxu0 %v878_v45  ;;  %806 = vmatprep.subr.bf16.mxu1 %v935_v32 }
  0x3c   : > { %509 = vmatprep.subr.bf16.mxu0 %v879_v46 }
  0x3e   : > { %807 = vmatpush3.bf16.msra.mxu1 %v881_v47 }
  0x3f   : > { %510 = vmatpush1.bf16.msra.mxu0 %v882_v48  ;;  %808 = vmatprep.subr.bf16.mxu1 %v935_v32 }
  0x40   : > { %511 = vmatprep.subr.bf16.mxu0 %v883_v49 }
  0x42   : > { %809 = vmatpush3.bf16.msra.mxu1 %v885_v50 }
  0x43   : > { %512 = vmatpush1.bf16.msra.mxu0 %v886_v51  ;;  %810 = vmatprep.subr.bf16.mxu1 %v935_v32 }
  0x44   : > { %513 = vmatprep.subr.bf16.mxu0 %v887_v52 }
  0x46   : > { %811 = vmatpush3.bf16.msra.mxu1 %v889_v53 }
  0x47   : > { %514 = vmatpush1.bf16.msra.mxu0 %v890_v54  ;;  %812 = vmatprep.subr.bf16.mxu1 %v935_v32 }
  0x48   : > { %515 = vmatprep.subr.bf16.mxu0 %v891_v55 }
  0x4a   : > { %813 = vmatpush3.bf16.msra.mxu1 %v893_v56 }
  0x4b   : > { %516 = vmatpush1.bf16.msra.mxu0 %v894_v57 }
  0x4d   : > { %815 = vmatmul.mubr.bf16.vlgmr.msra.gmra.mrb[0].mxu1 %v323_v58 }
  0x4e   : > { %534 = vmatmul.mubr.bf16.vlgmr.msra.gmra.mrb[0].mxu0 %v323_v58 }
 0x120   : > { %v576_v4 = vpop.f32.mrb[0].mxu1 }
 0x121   : > { %v577_v5 = vadd.f32 %v576_v4, %v369_v1  ;;  %v535_v6 = vpop.f32.mrb[0].mxu0  ;;  %v816_v7 = vpop.f32.mrb[1].mxu1 }
 0x122   : > { %v536_v8 = vadd.f32 %v535_v6, %v361_v2  ;;  %v537_v9 = vpop.f32.mrb[1].mxu0  ;;  %v579_v10 = vpop.f32.mrb[2].mxu1 }
 0x123   : > { %v584_v11 = vmax.f32 %v577_v5, 0.0  ;;  %v538_v12 = vadd.f32 %v537_v9, %v365_v3  ;;  %v539_v13 = vpop.f32.mrb[2].mxu0  ;;  %v817_v14 = vpop.f32.mrb[3].mxu1 }
 0x124   : > { %v582_v15 = vmax.f32 %v536_v8, 0.0  ;;  %v540_v16 = vpop.f32.mrb[3].mxu0 }
 0x125   : > { %v587_v17 = vmin.f32 %v584_v11, 6.0  ;;  %v583_v18 = vmax.f32 %v538_v12, 0.0 }
 0x126   : > { %v585_v19 = vmin.f32 %v582_v15, 6.0 }
 0x127   : > { %v586_v20 = vmin.f32 %v583_v18, 6.0  ;;  %v788_v21 = vpack.c.bf16 %v587_v17, %v587_v17 }
 0x129   : > { %v787_v22 = vpack.c.bf16 %v586_v20, %v585_v19  ;;  %602 = vst [vmem:[%s320_s14 + $0x8] sm:$0xf] %v788_v21 }
 0x12b   : > { %601 = vst [vmem:[%s320_s14] sm:$0xff] %v787_v22 }
 0x12c PF: > { %s13_s16 = sadd.s32 1, %s933_s16   ;;  %s1131_s12 = smov %s921_s13 }
 0x12d   : > { %p10_p10 = scmp.ge.s32.totalorder %s13_s16, 4   ;;  %s1132_s13 = smov %s993_s20 }
 0x12e   : > { %s1133_s14 = smov %s929_s15  ;;  %s1134_s15 = smov %s1136_s17 }
 0x12f   :  { %12 = sbr.rel (!%p10_p10) target bundleno = 3 (0x3), region = 105 }

// kernel: mobilefacenet_forward.58
= control target key start
LH: loop header
LB: loop body
LE: loop exit
PB: predicated region body
PF: predicated region fallthrough
CT: control target
= control target key end

     0   :  { %v421_v1 = vmov 0.0   ;;  %vm422_vm0 = vmmov 0   ;;  %s527_s1 = inlined_call_operand.vmem [shape: bf16[384,128], index: 1, kind: input, shape index: {}]   ;;  %s528_s0 = inlined_call_operand.vmem [shape: bf16[8,384], index: 0, kind: input, shape index: {}]   ;;  %s529_s2 = inlined_call_operand.vmem [shape: f32[1,128], index: 2, kind: input, shape index: {}]   ;;  %s530_s3 = inlined_call_operand.vmem [shape: bf16[8,128], index: 3, kind: output, shape index: {}]  }
   0x1   :  { %v394_v0 = vld [vmem:[%s527_s1 + $0x40] sm:$0xff]   ;;  %372 = vmatprep.subr.bf16.mxu1 %v421_v1  ;;  %388 = vmatprep.mubr.msk.bf16.mxu1 %vm422_vm0, %v421_v1  ;;  %v397_v4 = vld [vmem:[%s527_s1 + $0x48] sm:$0xff]   ;;  %v400_v7 = vld [vmem:[%s527_s1 + $0x50] sm:$0xff]  }
   0x2   :  { %v395_v2 = vld [vmem:[%s527_s1] sm:$0xff]   ;;  %341 = vmatprep.subr.bf16.mxu0 %v394_v0  ;;  %v398_v5 = vld [vmem:[%s527_s1 + $0x8] sm:$0xff]   ;;  %v401_v8 = vld [vmem:[%s527_s1 + $0x10] sm:$0xff]  }
   0x3   :  { %v396_v3 = vld [vmem:[%s527_s1 + $0x80] sm:$0xff]   ;;  %342 = vmatpush3.bf16.msra.mxu0 %v395_v2  ;;  %v399_v6 = vld [vmem:[%s527_s1 + $0x88] sm:$0xff]   ;;  %v402_v9 = vld [vmem:[%s527_s1 + $0x90] sm:$0xff]  }
   0x4   :  { %373 = vmatpush3.bf16.msra.mxu1 %v396_v3  ;;  %343 = vmatprep.subr.bf16.mxu0 %v397_v4  ;;  %v403_v10 = vld [vmem:[%s527_s1 + $0x58] sm:$0xff]   ;;  %v406_v13 = vld [vmem:[%s527_s1 + $0x60] sm:$0xff]   ;;  %v409_v16 = vld [vmem:[%s527_s1 + $0x68] sm:$0xff]  }
   0x5   :  { %374 = vmatprep.subr.bf16.mxu1 %v421_v1  ;;  %v404_v11 = vld [vmem:[%s527_s1 + $0x18] sm:$0xff]   ;;  %v407_v14 = vld [vmem:[%s527_s1 + $0x20] sm:$0xff]   ;;  %v410_v17 = vld [vmem:[%s527_s1 + $0x28] sm:$0xff]  }
   0x6   :  { %v405_v12 = vld [vmem:[%s527_s1 + $0x98] sm:$0xff]   ;;  %v408_v15 = vld [vmem:[%s527_s1 + $0xa0] sm:$0xff]   ;;  %v411_v18 = vld [vmem:[%s527_s1 + $0xa8] sm:$0xff]  }
   0x7   :  { %344 = vmatpush3.bf16.msra.mxu0 %v398_v5  ;;  %v412_v19 = vld [vmem:[%s527_s1 + $0x70] sm:$0xff]   ;;  %v15_v22 = vld [vmem:[%s528_s0] sm:$0xff]  ;;  %v415_v23 = vld [vmem:[%s527_s1 + $0x78] sm:$0xff]  }
   0x8   :  { %375 = vmatpush3.bf16.msra.mxu1 %v399_v6  ;;  %345 = vmatprep.subr.bf16.mxu0 %v400_v7  ;;  %v413_v20 = vld [vmem:[%s527_s1 + $0x30] sm:$0xff]   ;;  %v315_v24 = vcombine.high %v15_v22, %v15_v22  ;;  %v416_v25 = vld [vmem:[%s527_s1 + $0x38] sm:$0xff]   ;;  %v314_v27 = vcombine.low %v15_v22, %v15_v22  ;;  %v419_v28 = vld [vmem:[%s528_s0 + $0x8] ss:$0 sps:$4 sm:$0xff]  }
   0x9   :  { %376 = vmatprep.subr.bf16.mxu1 %v421_v1  ;;  %v414_v21 = vld [vmem:[%s527_s1 + $0xb0] sm:$0xff]   ;;  %v420_v26 = vld [vmem:[%s527_s1 + $0xb8] sm:$0xff]   ;;  %v313_v31 = vld [vmem:[%s529_s2] ss:$0 sm:$0xff] }
   0xa   :  { %259 = vmatprep.mubr.bf16.mxu0 %v315_v24 }
   0xb   :  { %346 = vmatpush3.bf16.msra.mxu0 %v401_v8 }
   0xc   :  { %377 = vmatpush3.bf16.msra.mxu1 %v402_v9  ;;  %347 = vmatprep.subr.bf16.mxu0 %v403_v10 }
   0xd   :  { %378 = vmatprep.subr.bf16.mxu1 %v421_v1 }
   0xf   :  { %348 = vmatpush3.bf16.msra.mxu0 %v404_v11 }
  0x10   :  { %379 = vmatpush3.bf16.msra.mxu1 %v405_v12  ;;  %349 = vmatprep.subr.bf16.mxu0 %v406_v13 }
  0x11   :  { %380 = vmatprep.subr.bf16.mxu1 %v421_v1 }
  0x13   :  { %350 = vmatpush3.bf16.msra.mxu0 %v407_v14 }
  0x14   :  { %381 = vmatpush3.bf16.msra.mxu1 %v408_v15  ;;  %351 = vmatprep.subr.bf16.mxu0 %v409_v16 }
  0x15   :  { %382 = vmatprep.subr.bf16.mxu1 %v421_v1 }
  0x17   :  { %352 = vmatpush3.bf16.msra.mxu0 %v410_v17 }
  0x18   :  { %383 = vmatpush3.bf16.msra.mxu1 %v411_v18  ;;  %353 = vmatprep.subr.bf16.mxu0 %v412_v19 }
  0x19   :  { %384 = vmatprep.subr.bf16.mxu1 %v421_v1 }
  0x1b   :  { %354 = vmatpush3.bf16.msra.mxu0 %v413_v20 }
  0x1c   :  { %385 = vmatpush3.bf16.msra.mxu1 %v414_v21  ;;  %355 = vmatprep.subr.bf16.mxu0 %v415_v23 }
  0x1d   :  { %386 = vmatprep.subr.bf16.mxu1 %v421_v1 }
  0x1f   :  { %356 = vmatpush3.bf16.msra.mxu0 %v416_v25 }
  0x20   :  { %387 = vmatpush3.bf16.msra.mxu1 %v420_v26 }
  0x22   :  { %260 = vmatmul.mubr.bf16.vlgmr.msra.gmra.mrb[0].mxu0 %v314_v27 }
  0x23   :  { %389 = vmatmul.mubr.bf16.vlgmr.msra.gmra.mrb[0].mxu1 %v419_v28 }
  0xf5   :  { %v357_v29 = vpop.f32.mrb[0].mxu0 }
  0xf6   :  { %v358_v30 = vpop.f32.mrb[1].mxu0  ;;  %v301_v32 = vpop.f32.mrb[0].mxu1 }
  0xf7   :  { %v359_v33 = vadd.f32 %v358_v30, %v357_v29  ;;  %v360_v34 = vpop.f32.mrb[2].mxu0  ;;  %v390_v35 = vpop.f32.mrb[1].mxu1 }
  0xf8   :  { %v361_v36 = vpop.f32.mrb[3].mxu0  ;;  %v304_v37 = vpop.f32.mrb[2].mxu1 }
  0xf9   :  { %v262_v38 = vadd.f32 %v359_v33, %v313_v31  ;;  %v391_v39 = vpop.f32.mrb[3].mxu1 }
  0xfb   :  { %v302_v40 = vadd.f32 %v301_v32, %v262_v38 }
  0xfd   :  { %v307_v41 = vpack.c.bf16 %v302_v40, %v302_v40 }
  0xff   :  { %308 = vst [vmem:[%s530_s3] sm:$0xf] %v307_v41 }

// kernel: mobilefacenet_forward.61
= control target key start
LH: loop header
LB: loop body
LE: loop exit
PB: predicated region body
PF: predicated region fallthrough
CT: control target
= control target key end

     0   :  { %s924_s1 = inlined_call_operand.vmem [shape: bf16[768,128], index: 1, kind: input, shape index: {}]   ;;  %s925_s0 = inlined_call_operand.vmem [shape: bf16[8,768], index: 0, kind: input, shape index: {}]   ;;  %s926_s2 = inlined_call_operand.vmem [shape: f32[1,128], index: 2, kind: input, shape index: {}]   ;;  %s927_s3 = inlined_call_operand.vmem [shape: bf16[8,128], index: 3, kind: input, shape index: {}]   ;;  %s928_s4 = inlined_call_operand.vmem [shape: bf16[8,128], index: 4, kind: output, shape index: {}]  }
   0x1   :  { %v683_v0 = vld [vmem:[%s924_s1 + $0x40] sm:$0xff]   ;;  %v687_v4 = vld [vmem:[%s924_s1 + $0x48] sm:$0xff]   ;;  %v691_v8 = vld [vmem:[%s924_s1 + $0x50] sm:$0xff]  }
   0x2   :  { %v684_v1 = vld [vmem:[%s924_s1] sm:$0xff]   ;;  %617 = vmatprep.subr.bf16.mxu0 %v683_v0  ;;  %v688_v5 = vld [vmem:[%s924_s1 + $0x8] sm:$0xff]   ;;  %v692_v9 = vld [vmem:[%s924_s1 + $0x10] sm:$0xff]  }
   0x3   :  { %v685_v2 = vld [vmem:[%s924_s1 + $0xc0] sm:$0xff]   ;;  %618 = vmatpush3.bf16.msra.mxu0 %v684_v1  ;;  %v689_v6 = vld [vmem:[%s924_s1 + $0xc8] sm:$0xff]   ;;  %v693_v10 = vld [vmem:[%s924_s1 + $0xd0] sm:$0xff]  }
   0x4   :  { %v686_v3 = vld [vmem:[%s924_s1 + $0x80] sm:$0xff]   ;;  %639 = vmatprep.subr.bf16.mxu1 %v685_v2  ;;  %619 = vmatprep.subr.bf16.mxu0 %v687_v4  ;;  %v690_v7 = vld [vmem:[%s924_s1 + $0x88] sm:$0xff]   ;;  %v694_v11 = vld [vmem:[%s924_s1 + $0x90] sm:$0xff]  }
   0x5   :  { %640 = vmatpush3.bf16.msra.mxu1 %v686_v3  ;;  %v695_v12 = vld [vmem:[%s924_s1 + $0x58] sm:$0xff]   ;;  %v699_v16 = vld [vmem:[%s924_s1 + $0x60] sm:$0xff]   ;;  %v703_v20 = vld [vmem:[%s924_s1 + $0x68] sm:$0xff]  }
   0x6   :  { %641 = vmatprep.subr.bf16.mxu1 %v689_v6  ;;  %v696_v13 = vld [vmem:[%s924_s1 + $0x18] sm:$0xff]   ;;  %v700_v17 = vld [vmem:[%s924_s1 + $0x20] sm:$0xff]   ;;  %v704_v21 = vld [vmem:[%s924_s1 + $0x28] sm:$0xff]  }
   0x7   :  { %620 = vmatpush3.bf16.msra.mxu0 %v688_v5  ;;  %v697_v14 = vld [vmem:[%s924_s1 + $0xd8] sm:$0xff]   ;;  %v701_v18 = vld [vmem:[%s924_s1 + $0xe0] sm:$0xff]   ;;  %v705_v22 = vld [vmem:[%s924_s1 + $0xe8] sm:$0xff]  }
   0x8   :  { %621 = vmatprep.subr.bf16.mxu0 %v691_v8  ;;  %v698_v15 = vld [vmem:[%s924_s1 + $0x98] sm:$0xff]   ;;  %v702_v19 = vld [vmem:[%s924_s1 + $0xa0] sm:$0xff]   ;;  %v706_v23 = vld [vmem:[%s924_s1 + $0xa8] sm:$0xff]  }
   0x9   :  { %642 = vmatpush3.bf16.msra.mxu1 %v690_v7  ;;  %v707_v24 = vld [vmem:[%s924_s1 + $0x70] sm:$0xff]   ;;  %v711_v28 = vld [vmem:[%s924_s1 + $0x78] sm:$0xff]   ;;  %v18_v31 = vld [vmem:[%s925_s0] sm:$0xff] }
   0xa   :  { %643 = vmatprep.subr.bf16.mxu1 %v693_v10  ;;  %v708_v25 = vld [vmem:[%s924_s1 + $0x30] sm:$0xff]   ;;  %v712_v29 = vld [vmem:[%s924_s1 + $0x38] sm:$0xff]   ;;  %v563_v32 = vcombine.low %v18_v31, %v18_v31  ;;  %v564_v33 = vcombine.high %v18_v31, %v18_v31  ;;  %v717_v35 = vld [vmem:[%s924_s1 + $0x140] sm:$0xff]  }
   0xb   :  { %622 = vmatpush3.bf16.msra.mxu0 %v692_v9  ;;  %v709_v26 = vld [vmem:[%s924_s1 + $0xf0] sm:$0xff]   ;;  %v713_v30 = vld [vmem:[%s924_s1 + $0xf8] sm:$0xff]   ;;  %v19_v36 = vld [vmem:[%s925_s0 + $0x8] sm:$0xff] }
   0xc   :  { %623 = vmatprep.subr.bf16.mxu0 %v695_v12  ;;  %v710_v27 = vld [vmem:[%s924_s1 + $0xb0] sm:$0xff]   ;;  %v716_v34 = vld [vmem:[%s924_s1 + $0xb8] sm:$0xff]   ;;  %465 = vmatprep.mubr.bf16.mxu0 %v564_v33  ;;  %v565_v37 = vcombine.low %v19_v36, %v19_v36  ;;  %v566_v38 = vcombine.high %v19_v36, %v19_v36  ;;  %v720_v39 = vld [vmem:[%s924_s1 + $0x100] sm:$0xff]  }
   0xd   :  { %644 = vmatpush3.bf16.msra.mxu1 %v694_v11  ;;  %v721_v40 = vld [vmem:[%s924_s1 + $0x148] sm:$0xff]   ;;  %v723_v42 = vld [vmem:[%s924_s1 + $0x150] sm:$0xff]   ;;  %v725_v44 = vld [vmem:[%s924_s1 + $0x158] sm:$0xff]  }
   0xe   :  { %645 = vmatprep.subr.bf16.mxu1 %v697_v14  ;;  %505 = vmatprep.mubr.bf16.mxu1 %v566_v38  ;;  %v722_v41 = vld [vmem:[%s924_s1 + $0x108] sm:$0xff]   ;;  %v724_v43 = vld [vmem:[%s924_s1 + $0x110] sm:$0xff]   ;;  %v726_v45 = vld [vmem:[%s924_s1 + $0x118] sm:$0xff]  }
   0xf   :  { %624 = vmatpush3.bf16.msra.mxu0 %v696_v13  ;;  %v727_v46 = vld [vmem:[%s924_s1 + $0x160] sm:$0xff]   ;;  %v20_v48 = vld [vmem:[%s925_s0 + $0x10] sm:$0xff]  ;;  %v729_v49 = vld [vmem:[%s924_s1 + $0x168] sm:$0xff]  }
  0x10   :  { %625 = vmatprep.subr.bf16.mxu0 %v699_v16  ;;  %v728_v47 = vld [vmem:[%s924_s1 + $0x120] sm:$0xff]   ;;  %v568_v50 = vcombine.high %v20_v48, %v20_v48  ;;  %v730_v51 = vld [vmem:[%s924_s1 + $0x128] sm:$0xff]   ;;  %v731_v52 = vld [vmem:[%s924_s1 + $0x170] sm:$0xff]   ;;  %v567_v56 = vcombine.low %v20_v48, %v20_v48 }
  0x11   :  { %646 = vmatpush3.bf16.msra.mxu1 %v698_v15  ;;  %v732_v53 = vld [vmem:[%s924_s1 + $0x130] sm:$0xff]   ;;  %v733_v54 = vld [vmem:[%s924_s1 + $0x178] sm:$0xff]   ;;  %v562_v58 = vld [vmem:[%s926_s2] ss:$0 sm:$0xff] }
  0x12   :  { %647 = vmatprep.subr.bf16.mxu1 %v701_v18  ;;  %v734_v55 = vld [vmem:[%s924_s1 + $0x138] sm:$0xff]   ;;  %v553_v6 = vld [vmem:[%s927_s3] sm:$0xf] }
  0x13   :  { %626 = vmatpush3.bf16.msra.mxu0 %v700_v17  ;;  %v554_v10 = vunpack.c.l.bf16 %v553_v6 }
  0x14   :  { %627 = vmatprep.subr.bf16.mxu0 %v703_v20 }
  0x15   :  { %648 = vmatpush3.bf16.msra.mxu1 %v702_v19 }
  0x16   :  { %649 = vmatprep.subr.bf16.mxu1 %v705_v22 }
  0x17   :  { %628 = vmatpush3.bf16.msra.mxu0 %v704_v21 }
  0x18   :  { %629 = vmatprep.subr.bf16.mxu0 %v707_v24 }
  0x19   :  { %650 = vmatpush3.bf16.msra.mxu1 %v706_v23 }
  0x1a   :  { %651 = vmatprep.subr.bf16.mxu1 %v709_v26 }
  0x1b   :  { %630 = vmatpush3.bf16.msra.mxu0 %v708_v25 }
  0x1c   :  { %631 = vmatprep.subr.bf16.mxu0 %v711_v28 }
  0x1d   :  { %652 = vmatpush3.bf16.msra.mxu1 %v710_v27 }
  0x1e   :  { %653 = vmatprep.subr.bf16.mxu1 %v713_v30 }
  0x1f   :  { %632 = vmatpush3.bf16.msra.mxu0 %v712_v29 }
  0x20   :  { %661 = vmatprep.subr.bf16.mxu0 %v717_v35 }
  0x21   :  { %654 = vmatpush3.bf16.msra.mxu1 %v716_v34 }
  0x22   :  { %466 = vmatmul.mubr.bf16.vlgmr.msra.gmra.mrb[0].mxu0 %v563_v32 }
  0x23   :  { %662 = vmatpush3.bf16.msra.mxu0 %v720_v39  ;;  %545 = vmatprep.mubr.bf16.mxu0 %v568_v50 }
  0x24   :  { %506 = vmatmul.mubr.bf16.vlgmr.msra.gmra.mrb[0].mxu1 %v565_v37  ;;  %663 = vmatprep.subr.bf16.mxu0 %v721_v40 }
  0x27   :  { %664 = vmatpush3.bf16.msra.mxu0 %v722_v41 }
  0x28   :  { %665 = vmatprep.subr.bf16.mxu0 %v723_v42 }
  0x2b   :  { %666 = vmatpush3.bf16.msra.mxu0 %v724_v43 }
  0x2c   :  { %667 = vmatprep.subr.bf16.mxu0 %v725_v44 }
  0x2f   :  { %668 = vmatpush3.bf16.msra.mxu0 %v726_v45 }
  0x30   :  { %669 = vmatprep.subr.bf16.mxu0 %v727_v46 }
  0x33   :  { %670 = vmatpush3.bf16.msra.mxu0 %v728_v47 }
  0x34   :  { %671 = vmatprep.subr.bf16.mxu0 %v729_v49 }
  0x37   :  { %672 = vmatpush3.bf16.msra.mxu0 %v730_v51 }
  0x38   :  { %673 = vmatprep.subr.bf16.mxu0 %v731_v52 }
  0x3b   :  { %674 = vmatpush3.bf16.msra.mxu0 %v732_v53 }
  0x3c   :  { %675 = vmatprep.subr.bf16.mxu0 %v733_v54 }
  0x3f   :  { %676 = vmatpush3.bf16.msra.mxu0 %v734_v55 }
  0x42   :  { %546 = vmatmul.mubr.bf16.vlgmr.msra.gmra.mrb[4].mxu0 %v567_v56 }
  0xf5   :  { %v633_v57 = vpop.f32.mrb[0].mxu0 }
  0xf6   :  { %v634_v59 = vpop.f32.mrb[1].mxu0 }
  0xf7   :  { %v635_v60 = vadd.f32 %v634_v59, %v633_v57  ;;  %v636_v61 = vpop.f32.mrb[2].mxu0  ;;  %v655_v62 = vpop.f32.mrb[0].mxu1 }
  0xf8   :  { %v637_v63 = vpop.f32.mrb[3].mxu0  ;;  %v656_v0 = vpop.f32.mrb[1].mxu1 }
  0xf9   :  { %v468_v1 = vadd.f32 %v635_v60, %v562_v58  ;;  %v657_v2 = vadd.f32 %v656_v0, %v655_v62  ;;  %v658_v3 = vpop.f32.mrb[2].mxu1 }
  0xfa   :  { %v659_v4 = vpop.f32.mrb[3].mxu1 }
  0xfb   :  { %v508_v5 = vadd.f32 %v657_v2, %v468_v1 }
 0x115   :  { %v677_v7 = vpop.f32.mrb[4].mxu0 }
 0x116   :  { %v678_v8 = vpop.f32.mrb[5].mxu0 }
 0x117   :  { %v679_v9 = vadd.f32 %v678_v8, %v677_v7  ;;  %v680_v11 = vpop.f32.mrb[6].mxu0 }
 0x118   :  { %v681_v12 = vpop.f32.mrb[7].mxu0 }
 0x119   :  { %v548_v13 = vadd.f32 %v679_v9, %v508_v5 }
 0x11b   :  { %v555_v14 = vadd.f32 %v554_v10, %v548_v13 }
 0x11d   :  { %v556_v15 = vpack.c.bf16 %v555_v14, %v555_v14 }
 0x11f   :  { %557 = vst [vmem:[%s928_s4] sm:$0xf] %v556_v15 }

// kernel: mobilefacenet_forward.80
= control target key start
LH: loop header
LB: loop body
LE: loop exit
PB: predicated region body
PF: predicated region fallthrough
CT: control target
= control target key end

     0   :  { %s959_s12 = smov 0   ;;  %s961_s13 = smov 0   ;;  %s1128_s0 = inlined_call_operand.vmem [shape: bf16[2,128], index: 0, kind: input, shape index: {}]   ;;  %s1129_s1 = inlined_call_operand.vmem [shape: bf16[128,768], index: 1, kind: input, shape index: {}]   ;;  %s1130_s2 = inlined_call_operand.vmem [shape: f32[1,768], index: 2, kind: input, shape index: {}]   ;;  %s1131_s3 = inlined_call_operand.vmem [shape: bf16[2,768], index: 3, kind: output, shape index: {}]  }
   0x1   :  { %s963_s14 = smov 0   ;;  %s965_s15 = smov 0  }
   0x2   :  { %s967_s16 = smov 0  }
   0x3 LB: > { %s22_s17 = sadd.s32 1, %s929_s15  ;;  %p65_p1 = scmp.ne.s32.totalorder %s921_s13, %s917_s12  ;;  %s933_s16 = sphi %s967_s16, %s13_s16   ;;  %s929_s15 = sphi %s965_s15, %s1135_s15   ;;  %s925_s14 = sphi %s963_s14, %s1134_s14   ;;  %s921_s13 = sphi %s961_s13, %s1133_s13   ;;  %s917_s12 = sphi %s959_s12, %s1132_s12  }
   0x4   : > { %p23_p0 = scmp.ge.s32.totalorder %s22_s17, 2  ;;  %p66_p2 = scmp.eq.s32.totalorder %s933_s16, 0 }
   0x5   : > { %s58_s19 = sadd.s32 1, %s921_s13  ;;  %p724_p5 = scmp.ge.s32.totalorder %s933_s16, 2 }
   0x6   : > { %s1137_s17 = smov (%p23_p0, %s22_s17), 0  ;;  %p67_p3 = por %p66_p2, %p65_p1 }
   0x7   : > { %s55_s18 = ssub.s32 %s929_s15, %s1137_s17  ;;  %151 = sbr.rel (%p724_p5) target bundleno = 37 (0x25), region = 20 }
   0x8   : > { %p56_p4 = scmp.eq.s32.totalorder %s55_s18, 0 }
   0xa   : > { %s994_s20 = scalar_select %p56_p4, %s921_s13, %s58_s19  }
   0xe   : > { %154 = sbr.rel (!%p67_p3) target bundleno = 37 (0x25), region = 24  ;;  %s156_s21 = sand.u32 (%p67_p3), 1, %s921_s13  }
   0xf   : > { %s787_s22 = smul.u32 (%p67_p3), 12, %s929_s15 }
  0x10   : > { %s817_s23 = smul.u32 (%p67_p3), 192, %s156_s21 }
  0x11   : > { %s1002_s26 = scalar_lea.vmem (%p67_p3), %s1129_s1, %s787_s22 }
  0x12   : > { %v176_v0 = vld [vmem:[%s1002_s26] sm:$0xff] (%p67_p3)  ;;  %v178_v1 = vld [vmem:[%s1002_s26 + $0x18] sm:$0xff] (%p67_p3)  ;;  %v180_v2 = vld [vmem:[%s1002_s26 + $0x30] sm:$0xff] (%p67_p3)  ;;  %s1007_s27 = scalar_lea.vmem (%p67_p3), [#allocation2], %s817_s23 }
  0x13   : > { %177 = vst [vmem:[%s1007_s27] sm:$0xff] (%p67_p3), %v176_v0  ;;  %179 = vst [vmem:[%s1007_s27 + $0xc] sm:$0xff] (%p67_p3), %v178_v1  ;;  %v182_v3 = vld [vmem:[%s1002_s26 + $0x48] sm:$0xff] (%p67_p3)  ;;  %v184_v4 = vld [vmem:[%s1002_s26 + $0x60] sm:$0xff] (%p67_p3) }
  0x14   : > { %181 = vst [vmem:[%s1007_s27 + $0x18] sm:$0xff] (%p67_p3), %v180_v2  ;;  %v186_v5 = vld [vmem:[%s1002_s26 + $0x78] sm:$0xff] (%p67_p3)  ;;  %183 = vst [vmem:[%s1007_s27 + $0x24] sm:$0xff] (%p67_p3), %v182_v3  ;;  %v188_v6 = vld [vmem:[%s1002_s26 + $0x90] sm:$0xff] (%p67_p3) }
  0x15   : > { %185 = vst [vmem:[%s1007_s27 + $0x30] sm:$0xff] %v184_v4  ;;  %187 = vst [vmem:[%s1007_s27 + $0x3c] sm:$0xff] %v186_v5  ;;  %v190_v7 = vld [vmem:[%s1002_s26 + $0xa8] sm:$0xff]  ;;  %v192_v8 = vld [vmem:[%s1002_s26 + $0xc0] sm:$0xff] }
  0x16   : > { %189 = vst [vmem:[%s1007_s27 + $0x48] sm:$0xff] %v188_v6  ;;  %191 = vst [vmem:[%s1007_s27 + $0x54] sm:$0xff] %v190_v7  ;;  %v194_v9 = vld [vmem:[%s1002_s26 + $0xd8] sm:$0xff]  ;;  %v196_v10 = vld [vmem:[%s1002_s26 + $0xf0] sm:$0xff] }
  0x17   : > { %193 = vst [vmem:[%s1007_s27 + $0x60] sm:$0xff] %v192_v8  ;;  %v198_v11 = vld [vmem:[%s1002_s26 + $0x108] sm:$0xff]  ;;  %195 = vst [vmem:[%s1007_s27 + $0x6c] sm:$0xff] %v194_v9  ;;  %v200_v12 = vld [vmem:[%s1002_s26 + $0x120] sm:$0xff] }
  0x18   : > { %197 = vst [vmem:[%s1007_s27 + $0x78] sm:$0xff] %v196_v10  ;;  %199 = vst [vmem:[%s1007_s27 + $0x84] sm:$0xff] %v198_v11  ;;  %v202_v13 = vld [vmem:[%s1002_s26 + $0x138] sm:$0xff]  ;;  %v204_v14 = vld [vmem:[%s1002_s26 + $0x150] sm:$0xff] }
  0x19   : > { %201 = vst [vmem:[%s1007_s27 + $0x90] sm:$0xff] %v200_v12  ;;  %203 = vst [vmem:[%s1007_s27 + $0x9c] sm:$0xff] %v202_v13  ;;  %v206_v15 = vld [vmem:[%s1002_s26 + $0x168] sm:$0xff]  ;;  %v728_v17 = vld [vmem:[%s1002_s26 + $0x20] sm:$0xf] }
  0x1a   : > { %205 = vst [vmem:[%s1007_s27 + $0xa8] sm:$0xff] %v204_v14  ;;  %v726_v16 = vld [vmem:[%s1002_s26 + $0x8] sm:$0xf]  ;;  %207 = vst [vmem:[%s1007_s27 + $0xb4] sm:$0xff] %v206_v15  ;;  %v730_v18 = vld [vmem:[%s1002_s26 + $0x38] sm:$0xf] }
  0x1b   : > { %727 = vst [vmem:[%s1007_s27 + $0x8] sm:$0xf] %v726_v16  ;;  %729 = vst [vmem:[%s1007_s27 + $0x14] sm:$0xf] %v728_v17  ;;  %v732_v19 = vld [vmem:[%s1002_s26 + $0x50] sm:$0xf] }
  0x1c   : > { %v734_v20 = vld [vmem:[%s1002_s26 + $0x68] sm:$0xf]  ;;  %731 = vst [vmem:[%s1007_s27 + $0x20] sm:$0xf] %v730_v18  ;;  %733 = vst [vmem:[%s1007_s27 + $0x2c] sm:$0xf] %v732_v19 }
  0x1d   : > { %735 = vst [vmem:[%s1007_s27 + $0x38] sm:$0xf] %v734_v20  ;;  %v736_v21 = vld [vmem:[%s1002_s26 + $0x80] sm:$0xf]  ;;  %v738_v22 = vld [vmem:[%s1002_s26 + $0x98] sm:$0xf] }
  0x1e   : > { %v740_v23 = vld [vmem:[%s1002_s26 + $0xb0] sm:$0xf]  ;;  %737 = vst [vmem:[%s1007_s27 + $0x44] sm:$0xf] %v736_v21  ;;  %739 = vst [vmem:[%s1007_s27 + $0x50] sm:$0xf] %v738_v22 }
  0x1f   : > { %741 = vst [vmem:[%s1007_s27 + $0x5c] sm:$0xf] %v740_v23  ;;  %v742_v24 = vld [vmem:[%s1002_s26 + $0xc8] sm:$0xf]  ;;  %v744_v25 = vld [vmem:[%s1002_s26 + $0xe0] sm:$0xf] }
  0x20   : > { %v746_v26 = vld [vmem:[%s1002_s26 + $0xf8] sm:$0xf]  ;;  %743 = vst [vmem:[%s1007_s27 + $0x68] sm:$0xf] %v742_v24  ;;  %745 = vst [vmem:[%s1007_s27 + $0x74] sm:$0xf] %v744_v25 }
  0x21   : > { %747 = vst [vmem:[%s1007_s27 + $0x80] sm:$0xf] %v746_v26  ;;  %v748_v27 = vld [vmem:[%s1002_s26 + $0x110] sm:$0xf]  ;;  %v750_v28 = vld [vmem:[%s1002_s26 + $0x128] sm:$0xf] }
  0x22   : > { %v752_v29 = vld [vmem:[%s1002_s26 + $0x140] sm:$0xf]  ;;  %749 = vst [vmem:[%s1007_s27 + $0x8c] sm:$0xf] %v748_v27  ;;  %751 = vst [vmem:[%s1007_s27 + $0x98] sm:$0xf] %v750_v28 }
  0x23   : > { %753 = vst [vmem:[%s1007_s27 + $0xa4] sm:$0xf] %v752_v29  ;;  %v754_v30 = vld [vmem:[%s1002_s26 + $0x158] sm:$0xf]  ;;  %v756_v31 = vld [vmem:[%s1002_s26 + $0x170] sm:$0xf] }
  0x24   : > { %755 = vst [vmem:[%s1007_s27 + $0xb0] sm:$0xf] %v754_v30  ;;  %757 = vst [vmem:[%s1007_s27 + $0xbc] sm:$0xf] %v756_v31 }
  0x25 PF: > { %p758_p6 = scmp.ge.s32.totalorder %s933_s16, 1  ;;  %p259_p7 = scmp.lt.s32.totalorder %s933_s16, 3 }
  0x27   : > { %p260_p8 = pnand %p758_p6, %p259_p7 }
  0x28   : > { %s266_s28 = sand.u32 (!%p260_p8), 1, %s917_s12   ;;  %v935_v32 = vmov (!%p260_p8), 0.0   ;;  %vm936_vm0 = vmmov (!%p260_p8), 0   ;;  %v937_v33 = vmov (!%p260_p8), 0   ;;  %v318_v58 = vld [vmem:[%s1128_s0] sm:$0x1] (!%p260_p8)  ;;  %v353_v59 = vlaneseq (!%p260_p8) }
  0x29   : > { %263 = sbr.rel (%p260_p8) target bundleno = 304 (0x130), region = 54  ;;  %797 = vmatprep.subr.bf16.mxu1 (!%p260_p8), %v935_v32  ;;  %813 = vmatprep.mubr.msk.bf16.mxu1 (!%p260_p8), %vm936_vm0, %v935_v32  ;;  %v938_v2 = vmov (!%p260_p8), 1966171168  }
  0x2a   : > { %s818_s29 = smul.u32 (!%p260_p8), 192, %s266_s28  ;;  %528 = vmatprep.mubr.bf16.mxu0 (!%p260_p8), %v937_v33  ;;  %v354_v60 = vshrl.u32 (!%p260_p8), %v353_v59, 7  ;;  %v591_v3 = vunpack.c.l.s4 (!%p260_p8), %v938_v2 }
  0x2b   : > { %s303_s6 = smul.u32 (!%p260_p8), 3, %s925_s14 }
  0x2c   : > { %s1073_s30 = scalar_lea.vmem (!%p260_p8), [#allocation2], %s818_s29  ;;  %v363_v61 = vsub.s32 (!%p260_p8), 2, %v354_v60  ;;  %v355_v63 = vsub.s32 (!%p260_p8), 0, %v354_v60  ;;  %v359_v0 = vsub.s32 (!%p260_p8), 1, %v354_v60  ;;  %v592_v8 = vunpack.c.0.s8 (!%p260_p8), %v591_v3 }
  0x2d   : > { %v863_v34 = vld [vmem:[%s1073_s30 + $0x4] ss:$12 sps:$4 sm:$0xff] (!%p260_p8)   ;;  %v865_v35 = vld [vmem:[%s1073_s30 + $0x8] ss:$12 sps:$4 sm:$0xff] (!%p260_p8)   ;;  %v866_v36 = vld [vmem:[%s1073_s30] ss:$12 sps:$4 sm:$0xff] (!%p260_p8)  }
  0x2e   : > { %496 = vmatprep.subr.bf16.mxu0 (!%p260_p8), %v863_v34  ;;  %798 = vmatpush3.bf16.msra.mxu1 (!%p260_p8), %v865_v35  ;;  %v867_v37 = vld [vmem:[%s1073_s30 + $0x1c] ss:$12 sps:$4 sm:$0xff] (!%p260_p8)   ;;  %v869_v38 = vld [vmem:[%s1073_s30 + $0x20] ss:$12 sps:$4 sm:$0xff] (!%p260_p8)   ;;  %v870_v39 = vld [vmem:[%s1073_s30 + $0x18] ss:$12 sps:$4 sm:$0xff] (!%p260_p8)   ;;  %v595_v21 = vsub.s32 (!%p260_p8), %v592_v8, %v354_v60 }
  0x2f   : > { %497 = vmatpush1.bf16.msra.mxu0 (!%p260_p8), %v866_v36  ;;  %799 = vmatprep.subr.bf16.mxu1 (!%p260_p8), %v935_v32  ;;  %v871_v40 = vld [vmem:[%s1073_s30 + $0x34] ss:$12 sps:$4 sm:$0xff] (!%p260_p8)   ;;  %v873_v41 = vld [vmem:[%s1073_s30 + $0x38] ss:$12 sps:$4 sm:$0xff] (!%p260_p8)   ;;  %v874_v42 = vld [vmem:[%s1073_s30 + $0x30] ss:$12 sps:$4 sm:$0xff] (!%p260_p8)  }
  0x30   : > { %498 = vmatprep.subr.bf16.mxu0 %v867_v37  ;;  %v875_v43 = vld [vmem:[%s1073_s30 + $0x4c] ss:$12 sps:$4 sm:$0xff]   ;;  %v877_v44 = vld [vmem:[%s1073_s30 + $0x50] ss:$12 sps:$4 sm:$0xff]   ;;  %v878_v45 = vld [vmem:[%s1073_s30 + $0x48] ss:$12 sps:$4 sm:$0xff]  }
  0x31   : > { %v879_v46 = vld [vmem:[%s1073_s30 + $0x64] ss:$12 sps:$4 sm:$0xff]   ;;  %v881_v47 = vld [vmem:[%s1073_s30 + $0x68] ss:$12 sps:$4 sm:$0xff]   ;;  %v882_v48 = vld [vmem:[%s1073_s30 + $0x60] ss:$12 sps:$4 sm:$0xff]  }
  0x32   : > { %800 = vmatpush3.bf16.msra.mxu1 %v869_v38  ;;  %v883_v49 = vld [vmem:[%s1073_s30 + $0x7c] ss:$12 sps:$4 sm:$0xff]   ;;  %v885_v50 = vld [vmem:[%s1073_s30 + $0x80] ss:$12 sps:$4 sm:$0xff]   ;;  %v886_v51 = vld [vmem:[%s1073_s30 + $0x78] ss:$12 sps:$4 sm:$0xff]  }
  0x33   : > { %499 = vmatpush1.bf16.msra.mxu0 %v870_v39  ;;  %801 = vmatprep.subr.bf16.mxu1 %v935_v32  ;;  %v887_v52 = vld [vmem:[%s1073_s30 + $0x94] ss:$12 sps:$4 sm:$0xff]   ;;  %v889_v53 = vld [vmem:[%s1073_s30 + $0x98] ss:$12 sps:$4 sm:$0xff]   ;;  %v890_v54 = vld [vmem:[%s1073_s30 + $0x90] ss:$12 sps:$4 sm:$0xff]  }
  0x34   : > { %500 = vmatprep.subr.bf16.mxu0 %v871_v40  ;;  %v891_v55 = vld [vmem:[%s1073_s30 + $0xac] ss:$12 sps:$4 sm:$0xff]   ;;  %v893_v56 = vld [vmem:[%s1073_s30 + $0xb0] ss:$12 sps:$4 sm:$0xff]   ;;  %v894_v57 = vld [vmem:[%s1073_s30 + $0xa8] ss:$12 sps:$4 sm:$0xff]  }
  0x35   : > { %p304_p9 = scmp.lt.s32.totalorder %s303_s6, 5 }
  0x36   : > { %802 = vmatpush3.bf16.msra.mxu1 %v873_v41 }
  0x37   : > { %501 = vmatpush1.bf16.msra.mxu0 %v874_v42  ;;  %803 = vmatprep.subr.bf16.mxu1 %v935_v32  ;;  %s1139_s6 = smov (!%p304_p9, %s303_s6), 5 }
  0x38   : > { %502 = vmatprep.subr.bf16.mxu0 %v875_v43  ;;  %s306_s9 = scalar_lea.vmem %s1130_s2, %s1139_s6  ;;  %s315_s12 = scalar_lea.vmem %s1131_s3, %s1139_s6 }
  0x39   : > { %v351_v62 = vld [vmem:[%s306_s9] sm:$0x7] }
  0x3a   : > { %804 = vmatpush3.bf16.msra.mxu1 %v877_v44  ;;  %v364_v1 = vrot.slane %v351_v62, %v363_v61  ;;  %v356_v4 = vrot.slane %v351_v62, %v355_v63  ;;  %v360_v5 = vrot.slane %v351_v62, %v359_v0 }
  0x3b   : > { %503 = vmatpush1.bf16.msra.mxu0 %v878_v45  ;;  %805 = vmatprep.subr.bf16.mxu1 %v935_v32 }
  0x3c   : > { %504 = vmatprep.subr.bf16.mxu0 %v879_v46 }
  0x3e   : > { %806 = vmatpush3.bf16.msra.mxu1 %v881_v47 }
  0x3f   : > { %505 = vmatpush1.bf16.msra.mxu0 %v882_v48  ;;  %807 = vmatprep.subr.bf16.mxu1 %v935_v32 }
  0x40   : > { %506 = vmatprep.subr.bf16.mxu0 %v883_v49 }
  0x42   : > { %808 = vmatpush3.bf16.msra.mxu1 %v885_v50 }
  0x43   : > { %507 = vmatpush1.bf16.msra.mxu0 %v886_v51  ;;  %809 = vmatprep.subr.bf16.mxu1 %v935_v32 }
  0x44   : > { %508 = vmatprep.subr.bf16.mxu0 %v887_v52 }
  0x46   : > { %810 = vmatpush3.bf16.msra.mxu1 %v889_v53 }
  0x47   : > { %509 = vmatpush1.bf16.msra.mxu0 %v890_v54  ;;  %811 = vmatprep.subr.bf16.mxu1 %v935_v32 }
  0x48   : > { %510 = vmatprep.subr.bf16.mxu0 %v891_v55 }
  0x4a   : > { %812 = vmatpush3.bf16.msra.mxu1 %v893_v56 }
  0x4b   : > { %511 = vmatpush1.bf16.msra.mxu0 %v894_v57 }
  0x4d   : > { %814 = vmatmul.mubr.bf16.vlgmr.msra.gmra.mrb[0].mxu1 %v318_v58 }
  0x4e   : > { %529 = vmatmul.mubr.bf16.vlgmr.msra.gmra.mrb[0].mxu0 %v318_v58 }
 0x120   : > { %v571_v6 = vpop.f32.mrb[0].mxu1 }
 0x121   : > { %v572_v7 = vadd.f32 %v571_v6, %v364_v1  ;;  %v530_v9 = vpop.f32.mrb[0].mxu0  ;;  %v815_v10 = vpop.f32.mrb[1].mxu1 }
 0x122   : > { %v531_v11 = vadd.f32 %v530_v9, %v356_v4  ;;  %v532_v12 = vpop.f32.mrb[1].mxu0  ;;  %v574_v13 = vpop.f32.mrb[2].mxu1 }
 0x123   : > { %v579_v14 = vmax.f32 %v572_v7, 0.0  ;;  %v533_v15 = vadd.f32 %v532_v12, %v360_v5  ;;  %v534_v16 = vpop.f32.mrb[2].mxu0  ;;  %v816_v17 = vpop.f32.mrb[3].mxu1 }
 0x124   : > { %v577_v18 = vmax.f32 %v531_v11, 0.0  ;;  %v535_v19 = vpop.f32.mrb[3].mxu0 }
 0x125   : > { %v582_v20 = vmin.f32 %v579_v14, 6.0  ;;  %v578_v22 = vmax.f32 %v533_v15, 0.0 }
 0x126   : > { %v580_v23 = vmin.f32 %v577_v18, 6.0 }
 0x127   : > { %v585_v24 = vpack.c.bf16 %v582_v20, %v582_v20  ;;  %v581_v25 = vmin.f32 %v578_v22, 6.0 }
 0x129   : > { %v603_v26 = vrot.slane %v585_v24, %v595_v21  ;;  %v783_v27 = vpack.c.bf16 %v581_v25, %v580_v23 }
 0x12b   : > { %v596_v28 = vrot.slane %v783_v27, %v595_v21 }
 0x12d   : > { %v604_v29 = vcombine.low %v596_v28, %v603_v26 }
 0x12f   : > { %784 = vst.sshfl [vmem:[%s315_s12] sm:$0x15 pattern:$0x73625140] %v604_v29 }
 0x130 PF: > { %s13_s16 = sadd.s32 1, %s933_s16   ;;  %s1132_s12 = smov %s921_s13 }
 0x131   : > { %p10_p10 = scmp.ge.s32.totalorder %s13_s16, 4   ;;  %s1133_s13 = smov %s994_s20 }
 0x132   : > { %s1134_s14 = smov %s929_s15  ;;  %s1135_s15 = smov %s1137_s17 }
 0x133   :  { %12 = sbr.rel (!%p10_p10) target bundleno = 3 (0x3), region = 105 }

// kernel: mobilefacenet_forward.60
= control target key start
LH: loop header
LB: loop body
LE: loop exit
PB: predicated region body
PF: predicated region fallthrough
CT: control target
= control target key end

     0   :  { %s1613_s12 = smov 0   ;;  %s2031_s0 = inlined_call_operand.vmem [shape: bf16[2,2,1536], index: 0, kind: input, shape index: {}]   ;;  %s2032_s1 = inlined_call_operand.vmem [shape: f32[9,1536], index: 1, kind: input, shape index: {}]   ;;  %s2033_s2 = inlined_call_operand.vmem [shape: f32[1,1536], index: 2, kind: input, shape index: {}]   ;;  %s2034_s3 = inlined_call_operand.vmem [shape: bf16[2,2,1536], index: 3, kind: output, shape index: {}]  }
   0x1 LB: > { %s1508_s13 = sadd.s32 4294967295, %s1588_s12   ;;  %p1512_p0 = scmp.ge.s32.totalorder %s1588_s12, 1  ;;  %s1588_s12 = sphi %s1613_s12, %s13_s12  }
   0x2   : > { %p136_p1 = scmp.lt.s32.totalorder %s1588_s12, 3 }
   0x4   : > { %p137_p2 = pnand %p1512_p0, %p136_p1 }
   0x5   : > { %p1621_p3 = scmp.lt.s32.totalorder (!%p137_p2), %s1508_s13, 1  ;;  %v190_v0 = vlaneseq (!%p137_p2)  ;;  %v1590_v1 = vmov (!%p137_p2), 0.0   ;;  %v1591_v2 = vmov (!%p137_p2), 1983009808   ;;  %v1634_v6 = vld [vmem:[%s2032_s1 + $0x20] sm:$0xff] (!%p137_p2)  ;;  %v1652_v11 = vld [vmem:[%s2032_s1 + $0x28] sm:$0xff] (!%p137_p2) }
   0x6   : > { %140 = sbr.rel (%p137_p2) target bundleno = 130 (0x82), region = 32  ;;  %169 = vst [vmem:[#allocation2 + $0x18] sm:$0xff] (!%p137_p2), %v1590_v1  ;;  %166 = vst [vmem:[#allocation2] sm:$0xff] (!%p137_p2), %v1590_v1  ;;  %v188_v3 = vunpack.c.l.s4 (!%p137_p2), %v1591_v2  ;;  %v1639_v7 = vld [vmem:[%s2032_s1 + $0xa0] ss:$0 sm:$0xff] (!%p137_p2)  ;;  %v1674_v18 = vld [vmem:[%s2032_s1 + $0x48] sm:$0xff] (!%p137_p2) }
   0x7   : > { %167 = vst [vmem:[#allocation2 + $0x8] sm:$0xff] (!%p137_p2), %v1590_v1  ;;  %168 = vst [vmem:[#allocation2 + $0x10] sm:$0xff] (!%p137_p2), %v1590_v1  ;;  %v1629_v4 = vshrl.u32 (!%p137_p2), %v190_v0, 7  ;;  %v1644_v8 = vld [vmem:[%s2032_s1 + $0xa8] ss:$0 sm:$0xff] (!%p137_p2)  ;;  %v1657_v12 = vld [vmem:[%s2032_s1 + $0x40] sm:$0xff] (!%p137_p2) }
   0x8   : > { %170 = vst [vmem:[#allocation2 + $0x20] sm:$0xff] (!%p137_p2), %v1590_v1  ;;  %171 = vst [vmem:[#allocation2 + $0x28] sm:$0xff] (!%p137_p2), %v1590_v1  ;;  %v189_v5 = vunpack.c.0.s8 (!%p137_p2), %v188_v3  ;;  %v1592_v9 = vmov (!%p137_p2), 1966171168   ;;  %v1204_v16 = vcombine.low (!%p137_p2), %v1639_v7, %v1644_v8  ;;  %v1679_v19 = vld [vmem:[%s2032_s1 + $0x50] sm:$0xff] (!%p137_p2)  ;;  %v1684_v20 = vld [vmem:[%s2032_s1 + $0x58] sm:$0xff] (!%p137_p2) }
   0x9   : > { %172 = vst [vmem:[#allocation2 + $0x30] sm:$0xff] (!%p137_p2), %v1590_v1  ;;  %173 = vst [vmem:[#allocation2 + $0x38] sm:$0xff] (!%p137_p2), %v1590_v1  ;;  %v1646_v10 = vunpack.c.l.s4 (!%p137_p2), %v1592_v9  ;;  %v1660_v13 = vsub.s32 (!%p137_p2), 0, %v1629_v4  ;;  %v1663_v14 = vsub.s32 (!%p137_p2), 1, %v1629_v4  ;;  %v1666_v15 = vsub.s32 (!%p137_p2), 2, %v1629_v4  ;;  %v1703_v24 = vld [vmem:[%s2032_s1 + $0x10] sm:$0xff] (!%p137_p2) }
   0xa   : > { %174 = vst [vmem:[#allocation2 + $0x40] sm:$0xff] (!%p137_p2), %v1590_v1  ;;  %175 = vst [vmem:[#allocation2 + $0x48] sm:$0xff] (!%p137_p2), %v1590_v1  ;;  %v192_v17 = vsub.s32 (!%p137_p2), %v189_v5, %v1629_v4  ;;  %v1687_v21 = vsub.s32 (!%p137_p2), 3, %v1629_v4  ;;  %v1690_v22 = vsub.s32 (!%p137_p2), 4, %v1629_v4  ;;  %v1693_v23 = vsub.s32 (!%p137_p2), 5, %v1629_v4  ;;  %v1708_v25 = vld [vmem:[%s2032_s1 + $0x18] sm:$0xff] (!%p137_p2) }
   0xb   : > { %176 = vst [vmem:[#allocation2 + $0x50] sm:$0xff] (!%p137_p2), %v1590_v1  ;;  %177 = vst [vmem:[#allocation2 + $0x58] sm:$0xff] (!%p137_p2), %v1590_v1  ;;  %v314_v26 = vrot.slane (!%p137_p2), %v1657_v12, %v1660_v13  ;;  %v318_v27 = vrot.slane (!%p137_p2), %v1674_v18, %v1660_v13  ;;  %v322_v28 = vrot.slane (!%p137_p2), %v1679_v19, %v1660_v13 }
   0xc   : > { %v326_v29 = vrot.slane (!%p137_p2), %v1684_v20, %v1660_v13  ;;  %v377_v32 = vrot.slane (!%p137_p2), %v1703_v24, %v1663_v14  ;;  %v381_v33 = vrot.slane (!%p137_p2), %v1708_v25, %v1663_v14  ;;  %v385_v34 = vrot.slane (!%p137_p2), %v1634_v6, %v1663_v14 }
   0xd   : > { %s2037_s13 = smov (!%p1621_p3, %s1508_s13), 1  ;;  %v389_v35 = vrot.slane %v1652_v11, %v1663_v14  ;;  %v1726_v39 = vcombine.low %v314_v26, %v318_v27  ;;  %v401_v41 = vrot.slane %v1657_v12, %v1663_v14  ;;  %v405_v42 = vrot.slane %v1674_v18, %v1663_v14 }
   0xe   : > { %s1570_s21 = smul.u32 12, %s2037_s13  ;;  %v344_v40 = vcombine.low %v322_v28, %v326_v29  ;;  %v409_v43 = vrot.slane %v1679_v19, %v1663_v14  ;;  %v413_v50 = vrot.slane %v1684_v20, %v1663_v14  ;;  %v1736_v51 = vcombine.low %v377_v32, %v381_v33 }
   0xf   : > { %v428_v58 = vcombine.low %v385_v34, %v389_v35  ;;  %v430_v59 = vcombine.low %v401_v41, %v405_v42  ;;  %v491_v63 = vrot.slane %v1657_v12, %v1666_v15  ;;  %v495_v1 = vrot.slane %v1674_v18, %v1666_v15 }
  0x10   : > { %s161_s7 = scalar_lea.vmem %s2031_s0, %s1570_s21  ;;  %v431_v62 = vcombine.low %v409_v43, %v413_v50  ;;  %v499_v2 = vrot.slane %v1679_v19, %v1666_v15  ;;  %v503_v3 = vrot.slane %v1684_v20, %v1666_v15  ;;  %v585_v26 = vrot.slane %v1674_v18, %v1687_v21  ;;  %s1907_s4 = scalar_lea.vmem %s2034_s3, %s1570_s21 }
  0x11   : > { %v178_v30 = vld [vmem:[%s161_s7] sm:$0xff]  ;;  %v179_v31 = vld [vmem:[%s161_s7 + $0x8] sm:$0xf]  ;;  %v589_v27 = vrot.slane %v1679_v19, %v1687_v21  ;;  %v593_v28 = vrot.slane %v1684_v20, %v1687_v21  ;;  %v520_v29 = vcombine.low %v491_v63, %v495_v1  ;;  %v702_v32 = vrot.slane %v1674_v18, %v1690_v22 }
  0x12   : > { %v180_v36 = vunpack.c.l.bf16 %v178_v30  ;;  %v181_v37 = vunpack.c.h.bf16 %v178_v30  ;;  %v182_v38 = vunpack.c.l.bf16 %v179_v31  ;;  %v454_v5 = vld [vmem:[#allocation2 + $0x50] sm:$0x33]  ;;  %v455_v9 = vld [vmem:[#allocation2 + $0x58] sm:$0x33]  ;;  %v521_v30 = vcombine.low %v499_v2, %v503_v3 }
  0x13   : > { %v698_v31 = vrot.slane %v1657_v12, %v1690_v22  ;;  %v611_v34 = vcombine.low %v589_v27, %v593_v28  ;;  %v706_v35 = vrot.slane %v1679_v19, %v1690_v22  ;;  %v818_v42 = vrot.slane %v1657_v12, %v1693_v23  ;;  %v781_v3 = vld [vmem:[#allocation2 + $0x50] sm:$0x66] }
  0x14   : > { %v193_v44 = vrot.slane %v180_v36, %v192_v17  ;;  %v208_v45 = vrot.slane %v181_v37, %v192_v17  ;;  %v186_v46 = vcombine.high %v180_v36, %v180_v36  ;;  %v201_v47 = vcombine.high %v181_v37, %v181_v37 }
  0x15   : > { %v223_v48 = vrot.slane %v182_v38, %v192_v17  ;;  %v216_v49 = vcombine.high %v182_v38, %v182_v38  ;;  %v710_v36 = vrot.slane %v1684_v20, %v1690_v22  ;;  %v532_v37 = vmul.f32 %v520_v29, %v454_v5 }
  0x16   : > { %v231_v52 = vrot.slane %v193_v44, 7  ;;  %v233_v53 = vrot.slane %v208_v45, 7  ;;  %v200_v54 = vrot.slane %v186_v46, %v192_v17  ;;  %v215_v55 = vrot.slane %v201_v47, %v192_v17 }
  0x17   : > { %v235_v56 = vrot.slane %v223_v48, 7  ;;  %v230_v57 = vrot.slane %v216_v49, %v192_v17  ;;  %v581_v17 = vrot.slane %v1657_v12, %v1687_v21  ;;  %v533_v38 = vmul.f32 %v521_v30, %v455_v9 }
  0x18   : > { %243 = vst [vmem:[#allocation2 + $0x18] sm:$0x66] %v231_v52  ;;  %245 = vst [vmem:[#allocation2 + $0x28] sm:$0x66] %v233_v53  ;;  %v232_v60 = vrot.slane %v200_v54, 7  ;;  %v234_v61 = vrot.slane %v215_v55, 7  ;;  %v727_v41 = vcombine.low %v698_v31, %v702_v32  ;;  %v728_v45 = vcombine.low %v706_v35, %v710_v36 }
  0x19   : > { %247 = vst [vmem:[#allocation2 + $0x38] sm:$0x66] %v235_v56  ;;  %v236_v0 = vrot.slane %v230_v57, 7  ;;  %v610_v33 = vcombine.low %v581_v17, %v585_v26  ;;  %v617_v44 = vrot.slane %v611_v34, 7  ;;  %v822_v46 = vrot.slane %v1674_v18, %v1693_v23 }
  0x1a   : > { %244 = vst [vmem:[#allocation2 + $0x20] sm:$0x66] %v232_v60  ;;  %246 = vst [vmem:[#allocation2 + $0x30] sm:$0x66] %v234_v61  ;;  %v733_v49 = vrot.slane %v727_v41, 7  ;;  %v826_v50 = vrot.slane %v1679_v19, %v1693_v23  ;;  %v830_v52 = vrot.slane %v1684_v20, %v1693_v23  ;;  %v1773_v53 = vsub.s32 6, %v1629_v4 }
  0x1b   : > { %248 = vst [vmem:[#allocation2 + $0x40] sm:$0x66] %v236_v0  ;;  %v616_v43 = vrot.slane %v610_v33, 7  ;;  %v734_v61 = vrot.slane %v728_v45, 7  ;;  %v847_v5 = vcombine.low %v818_v42, %v822_v46 }
  0x1c   : > { %v848_v9 = vcombine.low %v826_v50, %v830_v52  ;;  %v938_v36 = vrot.slane %v1657_v12, %v1773_v53  ;;  %v946_v46 = vrot.slane %v1679_v19, %v1773_v53 }
  0x1d   : > { %v853_v32 = vrot.slane %v847_v5, 7 }
  0x1e   : > { %v854_v35 = vrot.slane %v848_v9, 7 }
  0x1f   : > { %v278_v47 = vld [vmem:[#allocation2 + $0x28] sm:$0x33]  ;;  %v865_v42 = vmul.f32 %v853_v32, %v781_v3 }
  0x20   : > { %v1766_v48 = vld [vmem:[#allocation2 + $0x28] sm:$0x66]  ;;  %v356_v54 = vmul.f32 %v344_v40, %v278_v47  ;;  %v364_v55 = vld [vmem:[#allocation2 + $0x38] sm:$0x33]  ;;  %v1775_v56 = vmul.f32 %v428_v58, %v278_v47  ;;  %v950_v47 = vrot.slane %v1684_v20, %v1773_v53 }
  0x21   : > { %v629_v57 = vmul.f32 %v617_v44, %v1766_v48  ;;  %v661_v60 = vld [vmem:[#allocation2 + $0x38] sm:$0x66]  ;;  %v277_v63 = vld [vmem:[#allocation2 + $0x20] sm:$0x33]  ;;  %v442_v0 = vmul.f32 %v430_v59, %v364_v55  ;;  %v1529_v50 = vrot.slane %v865_v42, 9  ;;  %v1800_v55 = vsub.s32 7, %v1629_v4 }
  0x22   : > { %v1778_v1 = vld [vmem:[#allocation2 + $0x20] sm:$0x66]  ;;  %v745_v2 = vmul.f32 %v733_v49, %v661_v60  ;;  %v355_v17 = vmul.f32 %v1726_v39, %v277_v63  ;;  %v1782_v40 = vmul.f32 %v1736_v51, %v277_v63  ;;  %v782_v59 = vld [vmem:[#allocation2 + $0x58] sm:$0x66]  ;;  %v1553_v39 = vld [vmem:[%s2032_s1 + $0xb0] ss:$0 sm:$0xff] }
  0x23   : > { %v365_v26 = vld [vmem:[#allocation2 + $0x40] sm:$0x33]  ;;  %v628_v58 = vmul.f32 %v616_v43, %v1778_v1  ;;  %v1518_v27 = vrot.slane %v629_v57, 9  ;;  %v1554_v51 = vld [vmem:[%s2032_s1 + $0xb8] ss:$0 sm:$0xff]  ;;  %v942_v43 = vrot.slane %v1674_v18, %v1773_v53  ;;  %v866_v45 = vmul.f32 %v854_v35, %v782_v59 }
  0x24   : > { %v662_v28 = vld [vmem:[#allocation2 + $0x40] sm:$0x66]  ;;  %v443_v29 = vmul.f32 %v431_v62, %v365_v26  ;;  %v1523_v31 = vrot.slane %v745_v2, 9  ;;  %v448_v33 = vadd.f32 %v442_v0, %v355_v17  ;;  %v1205_v63 = vcombine.low %v1553_v39, %v1554_v51  ;;  %v1804_v0 = vld [vmem:[#allocation2 + $0x28] sm:$0xcc] }
  0x25   : > { %v746_v30 = vmul.f32 %v734_v61, %v662_v28  ;;  %v1517_v34 = vrot.slane %v628_v58, 9  ;;  %v967_v52 = vcombine.low %v938_v36, %v942_v43  ;;  %v1530_v57 = vrot.slane %v866_v45, 9  ;;  %v1802_v60 = vld [vmem:[#allocation2 + $0x20] sm:$0xcc]  ;;  %v1138_v58 = vld [vmem:[#allocation2 + $0x50] sm:$0xcc] }
  0x26   : > { %v449_v41 = vadd.f32 %v443_v29, %v356_v54  ;;  %v538_v44 = vadd.f32 %v532_v37, %v448_v33  ;;  %v968_v61 = vcombine.low %v946_v46, %v950_v47  ;;  %v1055_v3 = vrot.slane %v1657_v12, %v1800_v55  ;;  %v1018_v59 = vld [vmem:[#allocation2 + $0x38] sm:$0xcc]  ;;  %v1019_v35 = vld [vmem:[#allocation2 + $0x40] sm:$0xcc]  ;;  %v1832_v45 = vld [vmem:[%s2032_s1 + $0x8] sm:$0xff] }
  0x27   : > { %v1524_v62 = vrot.slane %v746_v30, 9  ;;  %v973_v2 = vrot.slane %v967_v52, 6  ;;  %v1063_v17 = vrot.slane %v1679_v19, %v1800_v55  ;;  %v1067_v26 = vrot.slane %v1684_v20, %v1800_v55  ;;  %v1139_v30 = vld [vmem:[#allocation2 + $0x58] sm:$0xcc] }
  0x28   : > { %v539_v49 = vadd.f32 %v533_v38, %v449_v41  ;;  %v658_v54 = vadd.f32 %v1517_v34, %v538_v44  ;;  %v1059_v38 = vrot.slane %v1674_v18, %v1800_v55  ;;  %v974_v9 = vrot.slane %v968_v61, 6  ;;  %v1255_v18 = vld [vmem:[%s2033_s2 + $0x8] sm:$0xf]  ;;  %v1827_v44 = vld [vmem:[%s2032_s1] sm:$0xff] }
  0x29   : > { %v1210_v12 = vrot.slane %v1204_v16, 6  ;;  %v1085_v32 = vcombine.low %v1063_v17, %v1067_v26  ;;  %v1211_v20 = vrot.slane %v1205_v63, 6  ;;  %v1293_v7 = vrot.slane %v1255_v18, %v1660_v13  ;;  %v1849_v17 = vld [vmem:[%s2032_s1 + $0x30] sm:$0xff] }
  0x2a   : > { %v659_v37 = vadd.f32 %v1518_v27, %v539_v49  ;;  %v775_v5 = vadd.f32 %v1523_v31, %v658_v54  ;;  %v985_v27 = vmul.f32 %v973_v2, %v1802_v60  ;;  %v1084_v29 = vcombine.low %v1055_v3, %v1059_v38 }
  0x2b   : > { %v986_v19 = vmul.f32 %v974_v9, %v1804_v0  ;;  %v1222_v39 = vmul.f32 %v1210_v12, %v1138_v58  ;;  %v1091_v41 = vrot.slane %v1085_v32, 6  ;;  %v1297_v43 = vrot.slane %v1255_v18, %v1663_v14  ;;  %v1856_v58 = vld [vmem:[%s2032_s1 + $0x38] sm:$0xff] }
  0x2c   : > { %v776_v28 = vadd.f32 %v1524_v62, %v659_v37  ;;  %v895_v31 = vadd.f32 %v1529_v50, %v775_v5  ;;  %v1535_v34 = vrot.slane %v985_v27, 10  ;;  %v1090_v36 = vrot.slane %v1084_v29, 6  ;;  %v274_v27 = vld [vmem:[#allocation2 + $0x8] sm:$0x33] }
  0x2d   : > { %v1536_v51 = vrot.slane %v986_v19, 10  ;;  %v1223_v62 = vmul.f32 %v1211_v20, %v1139_v30  ;;  %v1559_v42 = vrot.slane %v1222_v39, 10  ;;  %v1103_v47 = vmul.f32 %v1091_v41, %v1019_v35  ;;  %v276_v20 = vld [vmem:[#allocation2 + $0x18] sm:$0x33] }
  0x2e   : > { %v896_v33 = vadd.f32 %v1530_v57, %v776_v28  ;;  %v1015_v8 = vadd.f32 %v1535_v34, %v895_v31  ;;  %v1102_v16 = vmul.f32 %v1090_v36, %v1018_v59  ;;  %v1301_v50 = vrot.slane %v1255_v18, %v1666_v15  ;;  %v273_v28 = vld [vmem:[#allocation2] sm:$0x33] }
  0x2f   : > { %v1560_v49 = vrot.slane %v1223_v62, 10  ;;  %v1305_v54 = vrot.slane %v1255_v18, %v1687_v21  ;;  %v1310_v57 = vcombine.low %v1293_v7, %v1297_v43  ;;  %v1384_v61 = vunpack.c.0.s8 %v1646_v10  ;;  %v275_v18 = vld [vmem:[#allocation2 + $0x10] sm:$0x33] }
  0x30   : > { %v1016_v46 = vadd.f32 %v1536_v51, %v896_v33  ;;  %v1541_v52 = vrot.slane %v1102_v16, 10  ;;  %v1542_v63 = vrot.slane %v1103_v47, 10  ;;  %v282_v37 = vrot.slane %v1827_v44, %v1660_v13 }
  0x31   : > { %v286_v2 = vrot.slane %v1832_v45, %v1660_v13  ;;  %v290_v3 = vrot.slane %v1703_v24, %v1660_v13  ;;  %v1311_v5 = vcombine.low %v1301_v50, %v1305_v54  ;;  %v1844_v9 = vsub.s32 %v1384_v61, %v1629_v4 }
  0x32   : > { %v1132_v38 = vadd.f32 %v1541_v52, %v1015_v8  ;;  %v294_v10 = vrot.slane %v1708_v25, %v1660_v13  ;;  %v1133_v26 = vadd.f32 %v1542_v63, %v1016_v46  ;;  %v298_v4 = vrot.slane %v1634_v6, %v1660_v13  ;;  %v363_v46 = vld [vmem:[#allocation2 + $0x30] sm:$0x33] }
  0x33   : > { %v302_v29 = vrot.slane %v1652_v11, %v1660_v13  ;;  %v306_v30 = vrot.slane %v1849_v17, %v1660_v13  ;;  %v310_v31 = vrot.slane %v1856_v58, %v1660_v13  ;;  %v339_v19 = vcombine.low %v282_v37, %v286_v2 }
  0x34   : > { %v1252_v12 = vadd.f32 %v1559_v42, %v1132_v38  ;;  %v340_v59 = vcombine.low %v290_v3, %v294_v10  ;;  %v1253_v32 = vadd.f32 %v1560_v49, %v1133_v26  ;;  %v369_v34 = vrot.slane %v1827_v44, %v1663_v14  ;;  %v450_v26 = vld [vmem:[#allocation2 + $0x30] sm:$0x33] }
  0x35   : > { %v341_v33 = vcombine.low %v298_v4, %v302_v29  ;;  %v373_v35 = vrot.slane %v1832_v45, %v1663_v14  ;;  %v342_v39 = vcombine.low %v306_v30, %v310_v31  ;;  %v351_v51 = vmul.f32 %v339_v19, %v273_v28  ;;  %v451_v30 = vld [vmem:[#allocation2 + $0x38] sm:$0x33] }
  0x36   : > { %v1322_v36 = vadd.f32 %v1310_v57, %v1252_v12  ;;  %v352_v41 = vmul.f32 %v340_v59, %v274_v27  ;;  %v1323_v62 = vadd.f32 %v1311_v5, %v1253_v32  ;;  %v393_v8 = vrot.slane %v1849_v17, %v1663_v14  ;;  %v452_v12 = vld [vmem:[#allocation2 + $0x40] sm:$0x33]  ;;  %v453_v59 = vld [vmem:[#allocation2 + $0x48] sm:$0x33] }
  0x37   : > { %v353_v7 = vmul.f32 %v341_v33, %v275_v18  ;;  %v397_v16 = vrot.slane %v1856_v58, %v1663_v14  ;;  %v354_v43 = vmul.f32 %v342_v39, %v276_v20  ;;  %v426_v47 = vcombine.low %v369_v34, %v373_v35 }
  0x38   : > { %v1328_v42 = vmax.f32 %v1322_v36, 0.0  ;;  %v445_v49 = vadd.f32 %v1782_v40, %v352_v41  ;;  %v1329_v50 = vmax.f32 %v1323_v62, 0.0  ;;  %v459_v57 = vrot.slane %v1827_v44, %v1666_v15 }
  0x39   : > { %v429_v52 = vcombine.low %v393_v8, %v397_v16  ;;  %v446_v54 = vadd.f32 %v1775_v56, %v353_v7  ;;  %v438_v63 = vmul.f32 %v426_v47, %v276_v20  ;;  %v463_v37 = vrot.slane %v1832_v45, %v1666_v15 }
  0x3a   : > { %v1334_v61 = vmin.f32 %v1328_v42, 6.0  ;;  %v467_v2 = vrot.slane %v1703_v24, %v1666_v15  ;;  %v1335_v3 = vmin.f32 %v1329_v50, 6.0  ;;  %v471_v40 = vrot.slane %v1708_v25, %v1666_v15 }
  0x3b   : > { %v441_v38 = vmul.f32 %v429_v52, %v363_v46  ;;  %v475_v5 = vrot.slane %v1634_v6, %v1666_v15  ;;  %v444_v10 = vadd.f32 %v438_v63, %v351_v51  ;;  %v479_v28 = vrot.slane %v1652_v11, %v1666_v15 }
  0x3c   : > { %v1346_v56 = vcombine.high %v1334_v61, %v1334_v61  ;;  %v483_v27 = vrot.slane %v1849_v17, %v1666_v15  ;;  %v1347_v4 = vcombine.high %v1335_v3, %v1335_v3  ;;  %v487_v18 = vrot.slane %v1856_v58, %v1666_v15 }
  0x3d   : > { %v447_v29 = vadd.f32 %v441_v38, %v354_v43  ;;  %v516_v31 = vcombine.low %v459_v57, %v463_v37  ;;  %v517_v32 = vcombine.low %v467_v2, %v471_v40  ;;  %v518_v20 = vcombine.low %v475_v5, %v479_v28  ;;  %v541_v40 = vld [vmem:[#allocation2 + $0x8] sm:$0x66]  ;;  %v542_v5 = vld [vmem:[#allocation2 + $0x10] sm:$0x66] }
  0x3e   : > { %v1565_v19 = vpack.c.bf16 %v1346_v56, %v1334_v61  ;;  %v549_v33 = vrot.slane %v1827_v44, %v1687_v21  ;;  %v1566_v34 = vpack.c.bf16 %v1347_v4, %v1335_v3  ;;  %v519_v35 = vcombine.low %v483_v27, %v487_v18  ;;  %v543_v27 = vld [vmem:[#allocation2 + $0x18] sm:$0x66] }
  0x3f   : > { %v528_v36 = vmul.f32 %v516_v31, %v450_v26  ;;  %v553_v39 = vrot.slane %v1832_v45, %v1687_v21  ;;  %v529_v41 = vmul.f32 %v517_v32, %v451_v30  ;;  %v530_v62 = vmul.f32 %v518_v20, %v452_v12 }
  0x40   : > { %v1435_v51 = vrot.slane %v1565_v19, %v1844_v9  ;;  %v557_v7 = vrot.slane %v1703_v24, %v1687_v21  ;;  %v1442_v8 = vrot.slane %v1566_v34, %v1844_v9  ;;  %v531_v16 = vmul.f32 %v519_v35, %v453_v59 }
  0x41   : > { %v534_v42 = vadd.f32 %v528_v36, %v444_v10  ;;  %v561_v43 = vrot.slane %v1708_v25, %v1687_v21  ;;  %v535_v46 = vadd.f32 %v529_v41, %v445_v49  ;;  %v536_v47 = vadd.f32 %v530_v62, %v446_v54  ;;  %v540_v54 = vld [vmem:[#allocation2] sm:$0x66] }
  0x42   : > { %v565_v50 = vrot.slane %v1634_v6, %v1687_v21  ;;  %v569_v52 = vrot.slane %v1652_v11, %v1687_v21  ;;  %v1443_v57 = vcombine.low %v1435_v51, %v1442_v8  ;;  %v537_v61 = vadd.f32 %v531_v16, %v447_v29  ;;  %v660_v8 = vld [vmem:[#allocation2 + $0x30] sm:$0x66] }
  0x43   : > { %v573_v63 = vrot.slane %v1849_v17, %v1687_v21  ;;  %v577_v37 = vrot.slane %v1856_v58, %v1687_v21  ;;  %v606_v2 = vcombine.low %v549_v33, %v553_v39  ;;  %v607_v3 = vcombine.low %v557_v7, %v561_v43 }
  0x44   : > { %v608_v38 = vcombine.low %v565_v50, %v569_v52  ;;  %v666_v49 = vrot.slane %v1827_v44, %v1690_v22  ;;  %1567 = vst.sshfl [vmem:[%s1907_s4 + $0x8] sm:$0x55 pattern:$0x73625140] %v1443_v57  ;;  %v670_v10 = vrot.slane %v1832_v45, %v1690_v22  ;;  %v674_v26 = vrot.slane %v1703_v24, %v1690_v22 }
  0x45   : > { %v609_v56 = vcombine.low %v573_v63, %v577_v37  ;;  %v678_v28 = vrot.slane %v1708_v25, %v1690_v22  ;;  %v612_v4 = vrot.slane %v606_v2, 7  ;;  %v613_v29 = vrot.slane %v607_v3, 7 }
  0x46   : > { %v614_v30 = vrot.slane %v608_v38, 7  ;;  %v682_v12 = vrot.slane %v1634_v6, %v1690_v22  ;;  %v686_v31 = vrot.slane %v1652_v11, %v1690_v22  ;;  %v690_v19 = vrot.slane %v1849_v17, %v1690_v22 }
  0x47   : > { %v615_v18 = vrot.slane %v609_v56, 7  ;;  %v694_v59 = vrot.slane %v1856_v58, %v1690_v22  ;;  %v624_v32 = vmul.f32 %v612_v4, %v540_v54  ;;  %v625_v20 = vmul.f32 %v613_v29, %v541_v40 }
  0x48   : > { %v626_v33 = vmul.f32 %v614_v30, %v542_v5  ;;  %v723_v34 = vcombine.low %v666_v49, %v670_v10  ;;  %v724_v36 = vcombine.low %v674_v26, %v678_v28  ;;  %v725_v39 = vcombine.low %v682_v12, %v686_v31 }
  0x49   : > { %v627_v35 = vmul.f32 %v615_v18, %v543_v27  ;;  %v726_v51 = vcombine.low %v690_v19, %v694_v59  ;;  %v1513_v41 = vrot.slane %v624_v32, 9  ;;  %v1514_v62 = vrot.slane %v625_v20, 9  ;;  %v777_v32 = vld [vmem:[#allocation2 + $0x30] sm:$0x66]  ;;  %v778_v20 = vld [vmem:[#allocation2 + $0x38] sm:$0x66] }
  0x4a   : > { %v1515_v7 = vrot.slane %v626_v33, 9  ;;  %v729_v16 = vrot.slane %v723_v34, 7  ;;  %v730_v50 = vrot.slane %v724_v36, 7  ;;  %v731_v52 = vrot.slane %v725_v39, 7  ;;  %v779_v33 = vld [vmem:[#allocation2 + $0x40] sm:$0x66] }
  0x4b   : > { %v1516_v43 = vrot.slane %v627_v35, 9  ;;  %v732_v57 = vrot.slane %v726_v51, 7  ;;  %v654_v63 = vadd.f32 %v1513_v41, %v534_v42  ;;  %v655_v37 = vadd.f32 %v1514_v62, %v535_v46  ;;  %v780_v51 = vld [vmem:[#allocation2 + $0x48] sm:$0x66] }
  0x4c   : > { %v656_v2 = vadd.f32 %v1515_v7, %v536_v47  ;;  %v741_v3 = vmul.f32 %v729_v16, %v543_v27  ;;  %v742_v49 = vmul.f32 %v730_v50, %v1778_v1  ;;  %v743_v54 = vmul.f32 %v731_v52, %v1766_v48 }
  0x4d   : > { %v657_v38 = vadd.f32 %v1516_v43, %v537_v61  ;;  %v744_v40 = vmul.f32 %v732_v57, %v660_v8  ;;  %v786_v56 = vrot.slane %v1827_v44, %v1693_v23  ;;  %v790_v10 = vrot.slane %v1832_v45, %v1693_v23 }
  0x4e   : > { %v1519_v5 = vrot.slane %v741_v3, 9  ;;  %v794_v26 = vrot.slane %v1703_v24, %v1693_v23  ;;  %v1520_v42 = vrot.slane %v742_v49, 9  ;;  %v1521_v46 = vrot.slane %v743_v54, 9  ;;  %v898_v49 = vld [vmem:[#allocation2 + $0x8] sm:$0xcc] }
  0x4f   : > { %v1522_v47 = vrot.slane %v744_v40, 9  ;;  %v798_v61 = vrot.slane %v1708_v25, %v1693_v23  ;;  %v802_v48 = vrot.slane %v1634_v6, %v1693_v23  ;;  %v806_v28 = vrot.slane %v1652_v11, %v1693_v23  ;;  %v899_v54 = vld [vmem:[#allocation2 + $0x10] sm:$0xcc] }
  0x50   : > { %v771_v1 = vadd.f32 %v1519_v5, %v654_v63  ;;  %v810_v27 = vrot.slane %v1849_v17, %v1693_v23  ;;  %v772_v4 = vadd.f32 %v1520_v42, %v655_v37  ;;  %v773_v29 = vadd.f32 %v1521_v46, %v656_v2  ;;  %v900_v46 = vld [vmem:[#allocation2 + $0x18] sm:$0xcc] }
  0x51   : > { %v774_v30 = vadd.f32 %v1522_v47, %v657_v38  ;;  %v814_v12 = vrot.slane %v1856_v58, %v1693_v23  ;;  %v843_v18 = vcombine.low %v786_v56, %v790_v10  ;;  %v844_v31 = vcombine.low %v794_v26, %v798_v61  ;;  %v897_v38 = vld [vmem:[#allocation2] sm:$0xcc] }
  0x52   : > { %v845_v19 = vcombine.low %v802_v48, %v806_v28  ;;  %v906_v59 = vrot.slane %v1827_v44, %v1773_v53  ;;  %v910_v35 = vrot.slane %v1832_v45, %v1773_v53  ;;  %v914_v36 = vrot.slane %v1703_v24, %v1773_v53 }
  0x53   : > { %v846_v34 = vcombine.low %v810_v27, %v814_v12  ;;  %v918_v39 = vrot.slane %v1708_v25, %v1773_v53  ;;  %v849_v41 = vrot.slane %v843_v18, 7  ;;  %v850_v62 = vrot.slane %v844_v31, 7 }
  0x54   : > { %v851_v7 = vrot.slane %v845_v19, 7  ;;  %v922_v8 = vrot.slane %v1634_v6, %v1773_v53  ;;  %v926_v43 = vrot.slane %v1652_v11, %v1773_v53  ;;  %v930_v50 = vrot.slane %v1849_v17, %v1773_v53 }
  0x55   : > { %v852_v16 = vrot.slane %v846_v34, 7  ;;  %v934_v52 = vrot.slane %v1856_v58, %v1773_v53  ;;  %v861_v57 = vmul.f32 %v849_v41, %v777_v32  ;;  %v862_v63 = vmul.f32 %v850_v62, %v778_v20  ;;  %v1544_v32 = vld [vmem:[%s2032_s1 + $0x68] ss:$0 sm:$0xff] }
  0x56   : > { %v863_v37 = vmul.f32 %v851_v7, %v779_v33  ;;  %v963_v2 = vcombine.low %v906_v59, %v910_v35  ;;  %v964_v40 = vcombine.low %v914_v36, %v918_v39  ;;  %v965_v5 = vcombine.low %v922_v8, %v926_v43  ;;  %v1543_v59 = vld [vmem:[%s2032_s1 + $0x60] ss:$0 sm:$0xff]  ;;  %v1545_v36 = vld [vmem:[%s2032_s1 + $0x70] ss:$0 sm:$0xff] }
  0x57   : > { %v864_v3 = vmul.f32 %v852_v16, %v780_v51  ;;  %v966_v56 = vcombine.low %v930_v50, %v934_v52  ;;  %v1525_v10 = vrot.slane %v861_v57, 9  ;;  %v1526_v26 = vrot.slane %v862_v63, 9  ;;  %v1547_v51 = vld [vmem:[%s2032_s1 + $0x80] ss:$0 sm:$0xff] }
  0x58   : > { %v1527_v42 = vrot.slane %v863_v37, 9  ;;  %v969_v47 = vrot.slane %v963_v2, 6  ;;  %v970_v48 = vrot.slane %v964_v40, 6  ;;  %v971_v28 = vrot.slane %v965_v5, 6  ;;  %v1017_v40 = vld [vmem:[#allocation2 + $0x30] sm:$0xcc] }
  0x59   : > { %v1528_v61 = vrot.slane %v864_v3, 9  ;;  %v972_v27 = vrot.slane %v966_v56, 6  ;;  %v891_v12 = vadd.f32 %v1525_v10, %v771_v1  ;;  %v892_v18 = vadd.f32 %v1526_v26, %v772_v4  ;;  %v1546_v1 = vld [vmem:[%s2032_s1 + $0x78] ss:$0 sm:$0xff]  ;;  %v1135_v56 = vld [vmem:[#allocation2 + $0x38] sm:$0xcc] }
  0x5a   : > { %v893_v31 = vadd.f32 %v1527_v42, %v773_v29  ;;  %v981_v19 = vmul.f32 %v969_v47, %v897_v38  ;;  %v982_v33 = vmul.f32 %v970_v48, %v898_v49  ;;  %v983_v34 = vmul.f32 %v971_v28, %v899_v54  ;;  %v1137_v49 = vld [vmem:[#allocation2 + $0x48] sm:$0xcc] }
  0x5b   : > { %v894_v20 = vadd.f32 %v1528_v61, %v774_v30  ;;  %v984_v35 = vmul.f32 %v972_v27, %v900_v46  ;;  %v1023_v29 = vrot.slane %v1827_v44, %v1800_v55  ;;  %v1027_v39 = vrot.slane %v1832_v45, %v1800_v55  ;;  %v1548_v44 = vld [vmem:[%s2032_s1 + $0x88] ss:$0 sm:$0xff]  ;;  %v1549_v45 = vld [vmem:[%s2032_s1 + $0x90] ss:$0 sm:$0xff]  ;;  %v1136_v61 = vld [vmem:[#allocation2 + $0x40] sm:$0xcc] }
  0x5c   : > { %v1531_v4 = vrot.slane %v981_v19, 10  ;;  %v1031_v30 = vrot.slane %v1703_v24, %v1800_v55  ;;  %v1532_v41 = vrot.slane %v982_v33, 10  ;;  %v1533_v62 = vrot.slane %v983_v34, 10  ;;  %v1550_v24 = vld [vmem:[%s2032_s1 + $0x98] ss:$0 sm:$0xff] }
  0x5d   : > { %v1534_v7 = vrot.slane %v984_v35, 10  ;;  %v1035_v8 = vrot.slane %v1708_v25, %v1800_v55  ;;  %v1039_v43 = vrot.slane %v1634_v6, %v1800_v55  ;;  %v1043_v50 = vrot.slane %v1652_v11, %v1800_v55  ;;  %v1134_v6 = vld [vmem:[#allocation2 + $0x30] sm:$0xcc]  ;;  %v1254_v35 = vld [vmem:[%s2033_s2] sm:$0xff] }
  0x5e   : > { %v1011_v16 = vadd.f32 %v1531_v4, %v891_v12  ;;  %v1047_v25 = vrot.slane %v1849_v17, %v1800_v55  ;;  %v1012_v52 = vadd.f32 %v1532_v41, %v892_v18  ;;  %v1013_v57 = vadd.f32 %v1533_v62, %v893_v31 }
  0x5f   : > { %v1014_v63 = vadd.f32 %v1534_v7, %v894_v20  ;;  %v1051_v37 = vrot.slane %v1856_v58, %v1800_v55  ;;  %v1080_v2 = vcombine.low %v1023_v29, %v1027_v39  ;;  %v1081_v3 = vcombine.low %v1031_v30, %v1035_v8 }
  0x60   : > { %v1082_v38 = vcombine.low %v1039_v43, %v1043_v50  ;;  %v1200_v54 = vcombine.low %v1543_v59, %v1544_v32  ;;  %v1201_v10 = vcombine.low %v1545_v36, %v1546_v1  ;;  %v1202_v11 = vcombine.low %v1547_v51, %v1548_v44 }
  0x61   : > { %v1083_v5 = vcombine.low %v1047_v25, %v1051_v37  ;;  %v1203_v26 = vcombine.low %v1549_v45, %v1550_v24  ;;  %v1086_v42 = vrot.slane %v1080_v2, 6  ;;  %v1087_v17 = vrot.slane %v1081_v3, 6 }
  0x62   : > { %v1088_v47 = vrot.slane %v1082_v38, 6  ;;  %v1206_v48 = vrot.slane %v1200_v54, 6  ;;  %v1207_v27 = vrot.slane %v1201_v10, 6  ;;  %v1208_v58 = vrot.slane %v1202_v11, 6 }
  0x63   : > { %v1089_v28 = vrot.slane %v1083_v5, 6  ;;  %v1209_v12 = vrot.slane %v1203_v26, 6  ;;  %v1098_v18 = vmul.f32 %v1086_v42, %v900_v46  ;;  %v1099_v31 = vmul.f32 %v1087_v17, %v1802_v60 }
  0x64   : > { %v1100_v19 = vmul.f32 %v1088_v47, %v1804_v0  ;;  %v1218_v59 = vmul.f32 %v1206_v48, %v1134_v6  ;;  %v1219_v20 = vmul.f32 %v1207_v27, %v1135_v56  ;;  %v1220_v33 = vmul.f32 %v1208_v58, %v1136_v61 }
  0x65   : > { %v1101_v32 = vmul.f32 %v1089_v28, %v1017_v40  ;;  %v1221_v34 = vmul.f32 %v1209_v12, %v1137_v49  ;;  %v1537_v36 = vrot.slane %v1098_v18, 10  ;;  %v1538_v1 = vrot.slane %v1099_v31, 10 }
  0x66   : > { %v1539_v4 = vrot.slane %v1100_v19, 10  ;;  %v1555_v29 = vrot.slane %v1218_v59, 10  ;;  %v1556_v30 = vrot.slane %v1219_v20, 10  ;;  %v1557_v46 = vrot.slane %v1220_v33, 10 }
  0x67   : > { %v1540_v39 = vrot.slane %v1101_v32, 10  ;;  %v1558_v51 = vrot.slane %v1221_v34, 10  ;;  %v1128_v60 = vadd.f32 %v1537_v36, %v1011_v16  ;;  %v1129_v41 = vadd.f32 %v1538_v1, %v1012_v52 }
  0x68   : > { %v1130_v0 = vadd.f32 %v1539_v4, %v1013_v57  ;;  %v1261_v62 = vrot.slane %v1254_v35, %v1660_v13  ;;  %v1265_v8 = vrot.slane %v1254_v35, %v1663_v14  ;;  %v1269_v44 = vrot.slane %v1254_v35, %v1666_v15 }
  0x69   : > { %v1131_v7 = vadd.f32 %v1540_v39, %v1014_v63  ;;  %v1273_v45 = vrot.slane %v1254_v35, %v1687_v21  ;;  %v1248_v24 = vadd.f32 %v1555_v29, %v1128_v60  ;;  %v1249_v43 = vadd.f32 %v1556_v30, %v1129_v41 }
  0x6a   : > { %v1250_v50 = vadd.f32 %v1557_v46, %v1130_v0  ;;  %v1277_v25 = vrot.slane %v1254_v35, %v1690_v22  ;;  %v1281_v2 = vrot.slane %v1254_v35, %v1693_v23  ;;  %v1285_v16 = vrot.slane %v1254_v35, %v1773_v53 }
  0x6b   : > { %v1251_v37 = vadd.f32 %v1558_v51, %v1131_v7  ;;  %v1289_v52 = vrot.slane %v1254_v35, %v1800_v55  ;;  %v1306_v13 = vcombine.low %v1261_v62, %v1265_v8  ;;  %v1307_v57 = vcombine.low %v1269_v44, %v1273_v45 }
  0x6c   : > { %v1308_v63 = vcombine.low %v1277_v25, %v1281_v2 }
  0x6d   : > { %v1309_v14 = vcombine.low %v1285_v16, %v1289_v52  ;;  %v1318_v3 = vadd.f32 %v1306_v13, %v1248_v24  ;;  %v1319_v15 = vadd.f32 %v1307_v57, %v1249_v43 }
  0x6e   : > { %v1320_v38 = vadd.f32 %v1308_v63, %v1250_v50 }
  0x6f   : > { %v1321_v21 = vadd.f32 %v1309_v14, %v1251_v37  ;;  %v1324_v49 = vmax.f32 %v1318_v3, 0.0  ;;  %v1325_v54 = vmax.f32 %v1319_v15, 0.0 }
  0x70   : > { %v1326_v40 = vmax.f32 %v1320_v38, 0.0 }
  0x71   : > { %v1327_v5 = vmax.f32 %v1321_v21, 0.0  ;;  %v1330_v22 = vmin.f32 %v1324_v49, 6.0  ;;  %v1331_v6 = vmin.f32 %v1325_v54, 6.0 }
  0x72   : > { %v1332_v56 = vmin.f32 %v1326_v40, 6.0 }
  0x73   : > { %v1333_v23 = vmin.f32 %v1327_v5, 6.0  ;;  %v1342_v10 = vcombine.high %v1330_v22, %v1330_v22  ;;  %v1343_v53 = vcombine.high %v1331_v6, %v1331_v6 }
  0x74   : > { %v1344_v55 = vcombine.high %v1332_v56, %v1332_v56 }
  0x75   : > { %v1345_v11 = vcombine.high %v1333_v23, %v1333_v23  ;;  %v1561_v26 = vpack.c.bf16 %v1342_v10, %v1330_v22  ;;  %v1562_v42 = vpack.c.bf16 %v1343_v53, %v1331_v6 }
  0x76   : > { %v1563_v17 = vpack.c.bf16 %v1344_v55, %v1332_v56 }
  0x77   : > { %v1564_v47 = vpack.c.bf16 %v1345_v11, %v1333_v23  ;;  %v1388_v61 = vrot.slane %v1561_v26, %v1844_v9  ;;  %v1395_v48 = vrot.slane %v1562_v42, %v1844_v9 }
  0x78   : > { %v1402_v28 = vrot.slane %v1563_v17, %v1844_v9 }
  0x79   : > { %v1409_v27 = vrot.slane %v1564_v47, %v1844_v9  ;;  %v1410_v58 = vcombine.low %v1388_v61, %v1395_v48 }
  0x7b   : > { %v1411_v12 = vcombine.low %v1402_v28, %v1409_v27  ;;  %v1418_v18 = vrot.slane %v1410_v58, %v1844_v9 }
  0x7d   : > { %v1425_v31 = vrot.slane %v1411_v12, %v1844_v9 }
  0x7f   : > { %v1426_v19 = vcombine.low %v1418_v18, %v1425_v31 }
  0x81   : > { %1453 = vst [vmem:[%s1907_s4] sm:$0xff] %v1426_v19 }
  0x82 PF: > { %s13_s12 = sadd.s32 1, %s1588_s12  }
  0x83   : > { %p10_p4 = scmp.ge.s32.totalorder %s13_s12, 4  }
  0x85   :  { %12 = sbr.rel (!%p10_p4) target bundleno = 1 (0x1), region = 62 }

// kernel: mobilefacenet_forward.78
= control target key start
LH: loop header
LB: loop body
LE: loop exit
PB: predicated region body
PF: predicated region fallthrough
CT: control target
= control target key end

     0   :  { %s655_s12 = smov 0   ;;  %s764_s0 = inlined_call_operand.vmem [shape: bf16[4,2,2,1536], index: 0, kind: input, shape index: {}]   ;;  %s765_s1 = inlined_call_operand.vmem [shape: f32[9,768], index: 1, kind: input, shape index: {}]   ;;  %s766_s2 = inlined_call_operand.vmem [shape: f32[1,768], index: 2, kind: input, shape index: {}]   ;;  %s767_s3 = inlined_call_operand.vmem [shape: bf16[2,1,1,768], index: 3, kind: output, shape index: {}]  }
   0x1 LB: > { %s661_s13 = sadd.s32 4294967295, %s629_s12   ;;  %p576_p0 = scmp.ge.s32.totalorder %s629_s12, 1  ;;  %s629_s12 = sphi %s655_s12, %s13_s12  }
   0x2   : > { %p138_p1 = scmp.lt.s32.totalorder %s629_s12, 3 }
   0x4   : > { %p139_p2 = pnand %p576_p0, %p138_p1 }
   0x5   : > { %s577_s14 = sshll.u32 (!%p139_p2), %s661_s13, 1  ;;  %v197_v0 = vlaneseq (!%p139_p2)  ;;  %v631_v1 = vmov (!%p139_p2), 1983009808   ;;  %v611_v5 = vld [vmem:[%s765_s1] ss:$8 sps:$4 sm:$0xff] (!%p139_p2)   ;;  %vm493_vm0 = vcmask (!%p139_p2), 1040384  }
   0x6   : > { %142 = sbr.rel (%p139_p2) target bundleno = 60 (0x3c), region = 32  ;;  %p162_p3 = scmp.lt.s32.totalorder (!%p139_p2), %s577_s14, 3  ;;  %v195_v2 = vunpack.c.l.s4 (!%p139_p2), %v631_v1  ;;  %v613_v6 = vld [vmem:[%s765_s1 + $0x10] ss:$8 sps:$4 sm:$0xff] (!%p139_p2)   ;;  %v615_v8 = vld [vmem:[%s765_s1 + $0x20] ss:$8 sps:$4 sm:$0xff] (!%p139_p2)  }
   0x7   : > { %v666_v3 = vshrl.u32 (!%p139_p2), %v197_v0, 7  ;;  %v617_v9 = vld [vmem:[%s765_s1 + $0x4] ss:$8 sps:$4 sm:$0xff] (!%p139_p2)   ;;  %v618_v20 = vld [vmem:[%s765_s1 + $0x14] ss:$8 sps:$4 sm:$0xff] (!%p139_p2)   ;;  %vm496_vm1 = vcmask (!%p139_p2), 1041409  }
   0x8   : > { %v196_v4 = vunpack.c.0.s8 (!%p139_p2), %v195_v2  ;;  %v619_v21 = vld [vmem:[%s765_s1 + $0x24] ss:$8 sps:$4 sm:$0xff] (!%p139_p2)   ;;  %v620_v52 = vld [vmem:[%s765_s1 + $0x30] ss:$8 sps:$4 sm:$0x11] (!%p139_p2)   ;;  %vm500_vm5 = vcmask (!%p139_p2), 1042434  }
   0x9   : > { %v621_v58 = vld [vmem:[%s765_s1 + $0x40] ss:$8 sps:$4 sm:$0x11] (!%p139_p2)   ;;  %v622_v63 = vld [vmem:[%s765_s1 + $0x50] ss:$8 sps:$4 sm:$0x11] (!%p139_p2)  }
   0xa   : > { %v675_v7 = vsub.s32 (!%p139_p2), %v196_v4, %v666_v3  ;;  %vm494_vm2 = vsmask.f32 (!%p139_p2), 256  ;;  %vm497_vm4 = vsmask.f32 (!%p139_p2), 1280  ;;  %vm501_vm7 = vsmask.f32 (!%p139_p2), 2304 }
   0xb   : > { %vm724_vm3 = vmand (!%p139_p2), %vm493_vm0, %vm494_vm2  ;;  %p167_p4 = scmp.lt.s32.totalorder (!%p139_p2), %s661_s13, 1  ;;  %vm504_vm10 = vcmask (!%p139_p2), 1043459   ;;  %vm505_vm11 = vsmask.f32 (!%p139_p2), 3328  ;;  %vm508_vm14 = vcmask (!%p139_p2), 1044484   ;;  %vm512_vm2 = vcmask (!%p139_p2), 1045509  }
   0xc   : > { %v200_v11 = vrot.slane (!%p139_p2), %v611_v5, %v675_v7  ;;  %v207_v12 = vrot.slane (!%p139_p2), %v613_v6, %v675_v7  ;;  %v216_v13 = vrot.slane (!%p139_p2), %v615_v8, %v675_v7  ;;  %v277_v30 = vrot.slane (!%p139_p2), %v617_v9, %v675_v7  ;;  %vm729_vm6 = vmand (!%p139_p2), %vm496_vm1, %vm497_vm4 }
   0xd   : > { %s777_s14 = smov (!%p162_p3, %s577_s14), 3  ;;  %v284_v37 = vrot.slane %v618_v20, %v675_v7  ;;  %v293_v38 = vrot.slane %v619_v21, %v675_v7  ;;  %v351_v9 = vrot.slane %v620_v52, %v675_v7  ;;  %vm499_vm8 = vmor %vm729_vm6, %vm724_vm3  ;;  %s779_s13 = smov (!%p167_p4, %s661_s13), 1  ;;  %vm509_vm15 = vsmask.f32 4352 }
   0xe   : > { %s597_s15 = smul.u32 24, %s777_s14  ;;  %v208_v22 = vcombine.low %v200_v11, %v207_v12  ;;  %v579_v23 = vrot.slane %v216_v13, 9  ;;  %v236_v24 = vcombine.high %v200_v11, %v207_v12  ;;  %v237_v25 = vcombine.high %v216_v13, %v216_v13  ;;  %vm502_vm9 = vmand %vm500_vm5, %vm501_vm7 }
   0xf   : > { %v285_v46 = vcombine.low %v277_v30, %v284_v37  ;;  %v316_v2 = vcombine.high %v277_v30, %v284_v37  ;;  %v317_v4 = vcombine.high %v293_v38, %v293_v38  ;;  %vm742_vm12 = vmor %vm502_vm9, %vm499_vm8  ;;  %s598_s14 = smul.u32 6, %s779_s13  ;;  %vm513_vm3 = vsmask.f32 5376 }
  0x10   : > { %s683_s24 = scalar_lea.vmem %s764_s0, %s597_s15  ;;  %v578_v32 = vrot.slane %v208_v22, 9  ;;  %v238_v34 = vrot.slane %v236_v24, 7  ;;  %v239_v35 = vrot.slane %v237_v25, 7  ;;  %vm750_vm13 = vmand %vm504_vm10, %vm505_vm11 }
  0x11   : > { %v183_v10 = vld [vmem:[%s683_s24] sm:$0x3f]  ;;  %v223_v14 = vld [vmem:[%s683_s24 + $0x6] sm:$0x3f]  ;;  %v582_v15 = vld [vmem:[%s683_s24 + $0xc] sm:$0x3f]  ;;  %s170_s17 = scalar_lea.vmem %s767_s3, %s598_s14 }
  0x12   : > { %v184_v16 = vunpack.c.l.bf16 %v183_v10  ;;  %v185_v17 = vunpack.c.h.bf16 %v183_v10  ;;  %v224_v18 = vunpack.c.l.bf16 %v223_v14  ;;  %v225_v19 = vunpack.c.h.bf16 %v223_v14  ;;  %v583_v29 = vld [vmem:[%s683_s24 + $0x12] sm:$0x3f]  ;;  %v586_v47 = vld [vmem:[%s683_s24 + $0x18] sm:$0x3f]  ;;  %v587_v57 = vld [vmem:[%s683_s24 + $0x1e] sm:$0x3f] }
  0x13   : > { %v256_v27 = vunpack.c.l.bf16 %v582_v15  ;;  %v257_v28 = vunpack.c.h.bf16 %v582_v15  ;;  %v268_v36 = vunpack.c.h.bf16 %v583_v29  ;;  %v258_v41 = vrot.slane %v238_v34, 2  ;;  %vm507_vm0 = vmor %vm750_vm13, %vm742_vm12 }
  0x14   : > { %v220_v26 = vmul.f32 %v216_v13, %v185_v17  ;;  %v219_v31 = vmul.f32 %v208_v22, %v184_v16  ;;  %v233_v33 = vmul.f32 %v579_v23, %v225_v19  ;;  %v232_v39 = vmul.f32 %v578_v32, %v224_v18  ;;  %vm510_vm1 = vmand %vm508_vm14, %vm509_vm15 }
  0x15   : > { %v242_v40 = vmul.f32 %v238_v34, %v184_v16  ;;  %v267_v42 = vunpack.c.l.bf16 %v583_v29  ;;  %v243_v44 = vmul.f32 %v239_v35, %v185_v17  ;;  %v259_v45 = vrot.slane %v239_v35, 2  ;;  %vm511_vm4 = vmor %vm510_vm1, %vm507_vm0 }
  0x16   : > { %v235_v43 = vadd.f32 %v233_v33, %v220_v26  ;;  %v234_v48 = vadd.f32 %v232_v39, %v219_v31  ;;  %v262_v50 = vmul.f32 %v258_v41, %v256_v27  ;;  %v301_v51 = vmul.f32 %v293_v38, %v257_v28  ;;  %vm514_vm5 = vmand %vm512_vm2, %vm513_vm3 }
  0x17   : > { %v580_v49 = vrot.slane %v242_v40, 9  ;;  %v581_v53 = vrot.slane %v243_v44, 9  ;;  %v263_v54 = vmul.f32 %v259_v45, %v257_v28  ;;  %v297_v55 = vmul.f32 %v293_v38, %v268_v36  ;;  %v384_v38 = vld [vmem:[%s766_s2] sm:$0x3f]  ;;  %vm515_vm6 = vmor %vm514_vm5, %vm511_vm4 }
  0x18   : > { %v300_v56 = vmul.f32 %v285_v46, %v256_v27  ;;  %v296_v60 = vmul.f32 %v285_v46, %v267_v42  ;;  %v585_v61 = vrot.slane %v301_v51, 9  ;;  %v314_v62 = vunpack.c.l.bf16 %v586_v47 }
  0x19   : > { %v252_v59 = vadd.f32 %v580_v49, %v234_v48  ;;  %v253_v0 = vadd.f32 %v581_v53, %v235_v43  ;;  %v315_v1 = vunpack.c.h.bf16 %v586_v47  ;;  %v325_v8 = vunpack.c.l.bf16 %v587_v57 }
  0x1a   : > { %v584_v6 = vrot.slane %v300_v56, 9  ;;  %v320_v11 = vmul.f32 %v316_v2, %v314_v62  ;;  %v326_v12 = vunpack.c.h.bf16 %v587_v57  ;;  %v588_v13 = vrot.slane %v316_v2, 9 }
  0x1b   : > { %v264_v5 = vadd.f32 %v262_v50, %v252_v59  ;;  %v265_v10 = vadd.f32 %v263_v54, %v253_v0  ;;  %v589_v15 = vrot.slane %v317_v4, 9  ;;  %v358_v16 = vrot.slane %v621_v58, %v675_v7 }
  0x1c   : > { %v367_v17 = vrot.slane %v622_v63, %v675_v7  ;;  %v321_v19 = vmul.f32 %v317_v4, %v315_v1  ;;  %v333_v21 = vmul.f32 %v588_v13, %v325_v8  ;;  %v632_v26 = vmov 857870592  }
  0x1d   : > { %v298_v14 = vadd.f32 %v296_v60, %v264_v5  ;;  %v299_v18 = vadd.f32 %v297_v55, %v265_v10  ;;  %v359_v22 = vcombine.low %v351_v9, %v358_v16  ;;  %v334_v25 = vmul.f32 %v589_v15, %v326_v12 }
  0x1e   : > { %v369_v23 = vrot.slane %v367_v17, 7  ;;  %v387_v27 = vunpack.c.l.s4 %v632_v26  ;;  %v633_v28 = vmov 2003195204   ;;  %v634_v43 = vmov 1966171168  }
  0x1f   : > { %v310_v20 = vadd.f32 %v584_v6, %v298_v14  ;;  %v311_v24 = vadd.f32 %v585_v61, %v299_v18  ;;  %v394_v29 = vunpack.c.l.s4 %v633_v28  ;;  %v368_v31 = vrot.slane %v359_v22, 7  ;;  %v516_v17 = vld [vmem:[%s170_s17] sm:$0x3f] }
  0x20   : > { %v373_v32 = vmul.f32 %v369_v23, %v315_v1  ;;  %v388_v34 = vunpack.c.0.s8 %v387_v27  ;;  %v456_v44 = vunpack.c.l.s4 %v634_v43  ;;  %v412_v55 = vsub.s32 0, %v666_v3 }
  0x21   : > { %v322_v30 = vadd.f32 %v320_v11, %v310_v20  ;;  %v323_v33 = vadd.f32 %v321_v19, %v311_v24  ;;  %v395_v35 = vunpack.c.0.s8 %v394_v29  ;;  %v372_v36 = vmul.f32 %v368_v31, %v314_v62 }
  0x22   : > { %v591_v37 = vrot.slane %v373_v32, 9  ;;  %v391_v40 = vsub.s32 %v388_v34, %v666_v3  ;;  %v457_v53 = vunpack.c.0.s8 %v456_v44  ;;  %v416_v57 = vsub.s32 2, %v666_v3 }
  0x23   : > { %v335_v7 = vadd.f32 %v333_v21, %v322_v30  ;;  %v336_v39 = vadd.f32 %v334_v25, %v323_v33  ;;  %v398_v41 = vsub.s32 %v395_v35, %v666_v3  ;;  %v590_v42 = vrot.slane %v372_v36, 9 }
  0x24   : > { %v392_v47 = vrot.slane %v384_v38, %v391_v40  ;;  %v420_v58 = vsub.s32 4, %v666_v3  ;;  %v424_v59 = vsub.s32 6, %v666_v3  ;;  %v460_v63 = vsub.s32 %v457_v53, %v666_v3 }
  0x25   : > { %v383_v46 = vadd.f32 %v591_v37, %v336_v39  ;;  %v399_v48 = vrot.slane %v384_v38, %v398_v41  ;;  %v382_v50 = vadd.f32 %v590_v42, %v335_v7 }
  0x27   : > { %v403_v51 = vadd.f32 %v399_v48, %v383_v46  ;;  %v402_v52 = vadd.f32 %v392_v47, %v382_v50 }
  0x29   : > { %v405_v54 = vmax.f32 %v403_v51, 0.0  ;;  %v404_v56 = vmax.f32 %v402_v52, 0.0 }
  0x2b   : > { %v407_v60 = vmin.f32 %v405_v54, 6.0  ;;  %v406_v62 = vmin.f32 %v404_v56, 6.0 }
  0x2d   : > { %v429_v1 = vrot.slane %v407_v60, %v412_v55  ;;  %v433_v2 = vrot.slane %v407_v60, %v416_v57  ;;  %v413_v4 = vrot.slane %v406_v62, %v412_v55  ;;  %v417_v5 = vrot.slane %v406_v62, %v416_v57 }
  0x2e   : > { %v421_v6 = vrot.slane %v406_v62, %v420_v58  ;;  %v425_v8 = vrot.slane %v406_v62, %v424_v59 }
  0x2f   : > { %v594_v9 = vpack.c.bf16 %v433_v2, %v429_v1  ;;  %v592_v3 = vpack.c.bf16 %v417_v5, %v413_v4 }
  0x30   : > { %v593_v10 = vpack.c.bf16 %v425_v8, %v421_v6 }
  0x31   : > { %v475_v11 = vrot.slane %v594_v9, %v460_v63  ;;  %v461_v12 = vrot.slane %v592_v3, %v460_v63 }
  0x32   : > { %v468_v13 = vrot.slane %v593_v10, %v460_v63 }
  0x33   : > { %v490_v15 = vrot.slane %v475_v11, %v460_v63 }
  0x34   : > { %v476_v14 = vcombine.low %v461_v12, %v468_v13 }
  0x36   : > { %v483_v16 = vrot.slane %v476_v14, %v460_v63 }
  0x38   : > { %v491_v18 = vcombine.low %v483_v16, %v490_v15 }
  0x3a   : > { %v517_v19 = vsel %vm515_vm6, %v491_v18, %v516_v17 }
  0x3b   : > { %518 = vst [vmem:[%s170_s17] sm:$0x3f] %v517_v19 }
  0x3c PF: > { %s13_s12 = sadd.s32 1, %s629_s12  }
  0x3d   : > { %p10_p5 = scmp.ge.s32.totalorder %s13_s12, 4  }
  0x3f   :  { %12 = sbr.rel (!%p10_p5) target bundleno = 1 (0x1), region = 64 }

// kernel: mobilefacenet_forward.79
= control target key start
LH: loop header
LB: loop body
LE: loop exit
PB: predicated region body
PF: predicated region fallthrough
CT: control target
= control target key end

     0   :  { %v752_v21 = vmov 1966171168   ;;  %v124_v23 = vlaneseq  ;;  %s926_s1 = inlined_call_operand.vmem [shape: bf16[768,128], index: 1, kind: input, shape index: {}]   ;;  %s927_s0 = inlined_call_operand.vmem [shape: bf16[2,768], index: 0, kind: input, shape index: {}]   ;;  %s928_s2 = inlined_call_operand.vmem [shape: f32[1,128], index: 2, kind: input, shape index: {}]   ;;  %s929_s3 = inlined_call_operand.vmem [shape: bf16[2,128], index: 3, kind: output, shape index: {}]  }
   0x1   :  { %v703_v0 = vld [vmem:[%s926_s1 + $0x40] sm:$0xff]   ;;  %v707_v4 = vld [vmem:[%s926_s1 + $0x48] sm:$0xff]   ;;  %v711_v8 = vld [vmem:[%s926_s1 + $0x50] sm:$0xff]   ;;  %v122_v22 = vunpack.c.l.s4 %v752_v21 }
   0x2   :  { %v704_v1 = vld [vmem:[%s926_s1] sm:$0xff]   ;;  %636 = vmatprep.subr.bf16.mxu0 %v703_v0  ;;  %v708_v5 = vld [vmem:[%s926_s1 + $0x8] sm:$0xff]   ;;  %v712_v9 = vld [vmem:[%s926_s1 + $0x10] sm:$0xff]   ;;  %v125_v29 = vshrl.u32 %v124_v23, 7 }
   0x3   :  { %v705_v2 = vld [vmem:[%s926_s1 + $0xc0] sm:$0xff]   ;;  %637 = vmatpush3.bf16.msra.mxu0 %v704_v1  ;;  %v709_v6 = vld [vmem:[%s926_s1 + $0xc8] sm:$0xff]   ;;  %v713_v10 = vld [vmem:[%s926_s1 + $0xd0] sm:$0xff]   ;;  %v123_v28 = vunpack.c.0.s8 %v122_v22 }
   0x4   :  { %v706_v3 = vld [vmem:[%s926_s1 + $0x80] sm:$0xff]   ;;  %658 = vmatprep.subr.bf16.mxu1 %v705_v2  ;;  %638 = vmatprep.subr.bf16.mxu0 %v707_v4  ;;  %v710_v7 = vld [vmem:[%s926_s1 + $0x88] sm:$0xff]   ;;  %v714_v11 = vld [vmem:[%s926_s1 + $0x90] sm:$0xff]  }
   0x5   :  { %659 = vmatpush3.bf16.msra.mxu1 %v706_v3  ;;  %v715_v12 = vld [vmem:[%s926_s1 + $0x58] sm:$0xff]   ;;  %v719_v16 = vld [vmem:[%s926_s1 + $0x60] sm:$0xff]   ;;  %v723_v20 = vld [vmem:[%s926_s1 + $0x68] sm:$0xff]   ;;  %v126_v34 = vsub.s32 %v123_v28, %v125_v29 }
   0x6   :  { %660 = vmatprep.subr.bf16.mxu1 %v709_v6  ;;  %v716_v13 = vld [vmem:[%s926_s1 + $0x18] sm:$0xff]   ;;  %v720_v17 = vld [vmem:[%s926_s1 + $0x20] sm:$0xff]   ;;  %v724_v24 = vld [vmem:[%s926_s1 + $0x28] sm:$0xff]  }
   0x7   :  { %639 = vmatpush3.bf16.msra.mxu0 %v708_v5  ;;  %v717_v14 = vld [vmem:[%s926_s1 + $0xd8] sm:$0xff]   ;;  %v721_v18 = vld [vmem:[%s926_s1 + $0xe0] sm:$0xff]   ;;  %v725_v25 = vld [vmem:[%s926_s1 + $0xe8] sm:$0xff]  }
   0x8   :  { %640 = vmatprep.subr.bf16.mxu0 %v711_v8  ;;  %v718_v15 = vld [vmem:[%s926_s1 + $0x98] sm:$0xff]   ;;  %v722_v19 = vld [vmem:[%s926_s1 + $0xa0] sm:$0xff]   ;;  %v726_v26 = vld [vmem:[%s926_s1 + $0xa8] sm:$0xff]  }
   0x9   :  { %661 = vmatpush3.bf16.msra.mxu1 %v710_v7  ;;  %v727_v27 = vld [vmem:[%s926_s1 + $0x70] sm:$0xff]   ;;  %v731_v33 = vld [vmem:[%s926_s1 + $0x78] sm:$0xff]   ;;  %v15_v37 = vld [vmem:[%s927_s0] sm:$0x3f] }
   0xa   :  { %662 = vmatprep.subr.bf16.mxu1 %v713_v10  ;;  %v728_v30 = vld [vmem:[%s926_s1 + $0x30] sm:$0xff]   ;;  %v732_v35 = vld [vmem:[%s926_s1 + $0x38] sm:$0xff]   ;;  %v120_v38 = vcombine.high %v15_v37, %v15_v37  ;;  %v127_v39 = vrot.slane %v15_v37, %v126_v34  ;;  %v736_v41 = vld [vmem:[%s926_s1 + $0x140] sm:$0xff]  }
   0xb   :  { %641 = vmatpush3.bf16.msra.mxu0 %v712_v9  ;;  %v729_v31 = vld [vmem:[%s926_s1 + $0xf0] sm:$0xff]   ;;  %v733_v36 = vld [vmem:[%s926_s1 + $0xf8] sm:$0xff]   ;;  %v737_v46 = vld [vmem:[%s926_s1 + $0x100] sm:$0xff]  }
   0xc   :  { %642 = vmatprep.subr.bf16.mxu0 %v715_v12  ;;  %v730_v32 = vld [vmem:[%s926_s1 + $0xb0] sm:$0xff]   ;;  %v735_v40 = vld [vmem:[%s926_s1 + $0xb8] sm:$0xff]   ;;  %v135_v42 = vcombine.high %v127_v39, %v127_v39  ;;  %v143_v43 = vrot.slane %v127_v39, %v126_v34  ;;  %v134_v44 = vrot.slane %v120_v38, %v126_v34  ;;  %v738_v49 = vld [vmem:[%s926_s1 + $0x148] sm:$0xff]  }
   0xd   :  { %663 = vmatpush3.bf16.msra.mxu1 %v714_v11  ;;  %v739_v52 = vld [vmem:[%s926_s1 + $0x108] sm:$0xff]   ;;  %v740_v53 = vld [vmem:[%s926_s1 + $0x150] sm:$0xff]   ;;  %v742_v55 = vld [vmem:[%s926_s1 + $0x158] sm:$0xff]  }
   0xe   :  { %664 = vmatprep.subr.bf16.mxu1 %v717_v14  ;;  %v157_v45 = vrot.slane %v135_v42, %v126_v34  ;;  %v136_v47 = vcombine.high %v134_v44, %v134_v44  ;;  %v165_v48 = vcombine.high %v143_v43, %v143_v43  ;;  %v741_v54 = vld [vmem:[%s926_s1 + $0x110] sm:$0xff]   ;;  %v743_v56 = vld [vmem:[%s926_s1 + $0x118] sm:$0xff]   ;;  %v744_v57 = vld [vmem:[%s926_s1 + $0x160] sm:$0xff]   ;;  %v150_v1 = vrot.slane %v134_v44, %v126_v34 }
   0xf   :  { %643 = vmatpush3.bf16.msra.mxu0 %v716_v13  ;;  %v745_v58 = vld [vmem:[%s926_s1 + $0x120] sm:$0xff]   ;;  %v746_v59 = vld [vmem:[%s926_s1 + $0x168] sm:$0xff]   ;;  %v748_v61 = vld [vmem:[%s926_s1 + $0x170] sm:$0xff]  }
  0x10   :  { %644 = vmatprep.subr.bf16.mxu0 %v719_v16  ;;  %493 = vmatprep.mubr.bf16.mxu0 %v157_v45  ;;  %v166_v50 = vcombine.high %v157_v45, %v157_v45  ;;  %v164_v51 = vrot.slane %v136_v47, %v126_v34  ;;  %v747_v60 = vld [vmem:[%s926_s1 + $0x128] sm:$0xff]   ;;  %v749_v62 = vld [vmem:[%s926_s1 + $0x130] sm:$0xff]   ;;  %v750_v63 = vld [vmem:[%s926_s1 + $0x178] sm:$0xff]  }
  0x11   :  { %665 = vmatpush3.bf16.msra.mxu1 %v718_v15  ;;  %v751_v0 = vld [vmem:[%s926_s1 + $0x138] sm:$0xff]   ;;  %v587_v3 = vld [vmem:[%s928_s2] ss:$0 sm:$0xff] }
  0x12   :  { %666 = vmatprep.subr.bf16.mxu1 %v721_v18  ;;  %533 = vmatprep.mubr.bf16.mxu1 %v166_v50 }
  0x13   :  { %645 = vmatpush3.bf16.msra.mxu0 %v720_v17 }
  0x14   :  { %646 = vmatprep.subr.bf16.mxu0 %v723_v20 }
  0x15   :  { %667 = vmatpush3.bf16.msra.mxu1 %v722_v19 }
  0x16   :  { %668 = vmatprep.subr.bf16.mxu1 %v725_v25 }
  0x17   :  { %647 = vmatpush3.bf16.msra.mxu0 %v724_v24 }
  0x18   :  { %648 = vmatprep.subr.bf16.mxu0 %v727_v27 }
  0x19   :  { %669 = vmatpush3.bf16.msra.mxu1 %v726_v26 }
  0x1a   :  { %670 = vmatprep.subr.bf16.mxu1 %v729_v31 }
  0x1b   :  { %649 = vmatpush3.bf16.msra.mxu0 %v728_v30 }
  0x1c   :  { %650 = vmatprep.subr.bf16.mxu0 %v731_v33 }
  0x1d   :  { %671 = vmatpush3.bf16.msra.mxu1 %v730_v32 }
  0x1e   :  { %672 = vmatprep.subr.bf16.mxu1 %v733_v36 }
  0x1f   :  { %651 = vmatpush3.bf16.msra.mxu0 %v732_v35 }
  0x20   :  { %680 = vmatprep.subr.bf16.mxu0 %v736_v41 }
  0x21   :  { %673 = vmatpush3.bf16.msra.mxu1 %v735_v40 }
  0x22   :  { %494 = vmatmul.mubr.bf16.vlgmr.msra.gmra.mrb[0].mxu0 %v143_v43 }
  0x23   :  { %681 = vmatpush3.bf16.msra.mxu0 %v737_v46  ;;  %573 = vmatprep.mubr.bf16.mxu0 %v164_v51 }
  0x24   :  { %534 = vmatmul.mubr.bf16.vlgmr.msra.gmra.mrb[0].mxu1 %v165_v48  ;;  %682 = vmatprep.subr.bf16.mxu0 %v738_v49 }
  0x27   :  { %683 = vmatpush3.bf16.msra.mxu0 %v739_v52 }
  0x28   :  { %684 = vmatprep.subr.bf16.mxu0 %v740_v53 }
  0x2b   :  { %685 = vmatpush3.bf16.msra.mxu0 %v741_v54 }
  0x2c   :  { %686 = vmatprep.subr.bf16.mxu0 %v742_v55 }
  0x2f   :  { %687 = vmatpush3.bf16.msra.mxu0 %v743_v56 }
  0x30   :  { %688 = vmatprep.subr.bf16.mxu0 %v744_v57 }
  0x33   :  { %689 = vmatpush3.bf16.msra.mxu0 %v745_v58 }
  0x34   :  { %690 = vmatprep.subr.bf16.mxu0 %v746_v59 }
  0x37   :  { %691 = vmatpush3.bf16.msra.mxu0 %v747_v60 }
  0x38   :  { %692 = vmatprep.subr.bf16.mxu0 %v748_v61 }
  0x3b   :  { %693 = vmatpush3.bf16.msra.mxu0 %v749_v62 }
  0x3c   :  { %694 = vmatprep.subr.bf16.mxu0 %v750_v63 }
  0x3f   :  { %695 = vmatpush3.bf16.msra.mxu0 %v751_v0 }
  0x42   :  { %574 = vmatmul.mubr.bf16.vlgmr.msra.gmra.mrb[4].mxu0 %v150_v1 }
  0xf5   :  { %v652_v2 = vpop.f32.mrb[0].mxu0 }
  0xf6   :  { %v653_v4 = vpop.f32.mrb[1].mxu0 }
  0xf7   :  { %v654_v5 = vadd.f32 %v653_v4, %v652_v2  ;;  %v655_v6 = vpop.f32.mrb[2].mxu0  ;;  %v674_v7 = vpop.f32.mrb[0].mxu1 }
  0xf8   :  { %v656_v8 = vpop.f32.mrb[3].mxu0  ;;  %v675_v9 = vpop.f32.mrb[1].mxu1 }
  0xf9   :  { %v496_v10 = vadd.f32 %v654_v5, %v587_v3  ;;  %v676_v11 = vadd.f32 %v675_v9, %v674_v7  ;;  %v677_v12 = vpop.f32.mrb[2].mxu1 }
  0xfa   :  { %v678_v13 = vpop.f32.mrb[3].mxu1 }
  0xfb   :  { %v536_v14 = vadd.f32 %v676_v11, %v496_v10 }
 0x115   :  { %v696_v15 = vpop.f32.mrb[4].mxu0 }
 0x116   :  { %v697_v16 = vpop.f32.mrb[5].mxu0 }
 0x117   :  { %v698_v17 = vadd.f32 %v697_v16, %v696_v15  ;;  %v699_v18 = vpop.f32.mrb[6].mxu0 }
 0x118   :  { %v700_v19 = vpop.f32.mrb[7].mxu0 }
 0x119   :  { %v576_v20 = vadd.f32 %v698_v17, %v536_v14 }
 0x11b   :  { %v581_v21 = vpack.c.bf16 %v576_v20, %v576_v20 }
 0x11d   :  { %582 = vst [vmem:[%s929_s3] sm:$0x1] %v581_v21 }

// kernel: mobilefacenet_forward.81
= control target key start
LH: loop header
LB: loop body
LE: loop exit
PB: predicated region body
PF: predicated region fallthrough
CT: control target
= control target key end

     0   :  { %s657_s12 = smov 0   ;;  %s784_s0 = inlined_call_operand.vmem [shape: bf16[2,1,768], index: 0, kind: input, shape index: {}]   ;;  %s785_s1 = inlined_call_operand.vmem [shape: f32[9,768], index: 1, kind: input, shape index: {}]   ;;  %s786_s2 = inlined_call_operand.vmem [shape: f32[1,768], index: 2, kind: input, shape index: {}]   ;;  %s787_s3 = inlined_call_operand.vmem [shape: bf16[2,1,768], index: 3, kind: output, shape index: {}]  }
   0x1 LB: > { %s594_s13 = sadd.s32 4294967295, %s633_s12   ;;  %p598_p0 = scmp.ge.s32.totalorder %s633_s12, 1  ;;  %s633_s12 = sphi %s657_s12, %s13_s12  }
   0x2   : > { %p136_p1 = scmp.lt.s32.totalorder %s633_s12, 3 }
   0x4   : > { %p137_p2 = pnand %p598_p0, %p136_p1 }
   0x5   : > { %p665_p3 = scmp.lt.s32.totalorder (!%p137_p2), %s594_s13, 1  ;;  %v183_v0 = vlaneseq (!%p137_p2)  ;;  %v635_v1 = vmov (!%p137_p2), 0.0   ;;  %v636_v2 = vmov (!%p137_p2), 1966171168   ;;  %v615_v5 = vld [vmem:[%s785_s1] ss:$8 sps:$4 sm:$0xff] (!%p137_p2)  }
   0x6   : > { %140 = sbr.rel (%p137_p2) target bundleno = 64 (0x40), region = 32  ;;  %166 = vst [vmem:[#allocation2] sm:$0x77] (!%p137_p2), %v635_v1  ;;  %167 = vst [vmem:[#allocation2 + $0x8] sm:$0x77] (!%p137_p2), %v635_v1  ;;  %v181_v3 = vunpack.c.l.s4 (!%p137_p2), %v636_v2  ;;  %vm515_vm1 = vcmask (!%p137_p2), 1040384  }
   0x7   : > { %168 = vst [vmem:[#allocation2 + $0x10] sm:$0x77] (!%p137_p2), %v635_v1  ;;  %169 = vst [vmem:[#allocation2 + $0x18] sm:$0x77] (!%p137_p2), %v635_v1  ;;  %v673_v4 = vshrl.u32 (!%p137_p2), %v183_v0, 7  ;;  %vm706_vm0 = vcmp.lt.s32.totalorder (!%p137_p2), %v183_v0, 768 }
   0x8   : > { %170 = vst [vmem:[#allocation2 + $0x20] sm:$0x77] (!%p137_p2), %v635_v1  ;;  %171 = vst [vmem:[#allocation2 + $0x28] sm:$0x77] (!%p137_p2), %v635_v1  ;;  %v182_v6 = vunpack.c.0.s8 (!%p137_p2), %v181_v3  ;;  %v617_v7 = vld [vmem:[%s785_s1 + $0x10] ss:$8 sps:$4 sm:$0xff] (!%p137_p2)  }
   0x9   : > { %172 = vst [vmem:[#allocation2 + $0x30] sm:$0x77] (!%p137_p2), %v635_v1  ;;  %173 = vst [vmem:[#allocation2 + $0x38] sm:$0x77] (!%p137_p2), %v635_v1  ;;  %v619_v8 = vld [vmem:[%s785_s1 + $0x20] ss:$8 sps:$4 sm:$0xff] (!%p137_p2)  }
   0xa   : > { %174 = vst [vmem:[#allocation2 + $0x40] sm:$0x77] (!%p137_p2), %v635_v1  ;;  %v621_v9 = vld [vmem:[%s785_s1 + $0x4] ss:$8 sps:$4 sm:$0xff] (!%p137_p2)   ;;  %v622_v10 = vld [vmem:[%s785_s1 + $0x14] ss:$8 sps:$4 sm:$0xff] (!%p137_p2)   ;;  %v695_v12 = vsub.s32 (!%p137_p2), %v182_v6, %v673_v4 }
   0xb   : > { %v623_v11 = vld [vmem:[%s785_s1 + $0x24] ss:$8 sps:$4 sm:$0xff] (!%p137_p2)   ;;  %v624_v30 = vld [vmem:[%s785_s1 + $0x30] ss:$8 sps:$4 sm:$0x11] (!%p137_p2)   ;;  %vm518_vm3 = vcmask (!%p137_p2), 1041409  }
   0xc   : > { %v230_v14 = vrot.slane (!%p137_p2), %v615_v5, %v695_v12  ;;  %v237_v15 = vrot.slane (!%p137_p2), %v617_v7, %v695_v12  ;;  %v244_v16 = vrot.slane (!%p137_p2), %v619_v8, %v695_v12  ;;  %v308_v17 = vrot.slane (!%p137_p2), %v621_v9, %v695_v12  ;;  %v625_v38 = vld [vmem:[%s785_s1 + $0x40] ss:$8 sps:$4 sm:$0x11] (!%p137_p2)   ;;  %v626_v46 = vld [vmem:[%s785_s1 + $0x50] ss:$8 sps:$4 sm:$0x11] (!%p137_p2)  }
   0xd   : > { %s800_s13 = smov (!%p665_p3, %s594_s13), 1  ;;  %v315_v21 = vrot.slane %v622_v10, %v695_v12  ;;  %v322_v28 = vrot.slane %v623_v11, %v695_v12  ;;  %v393_v47 = vrot.slane %v624_v30, %v695_v12  ;;  %v400_v53 = vrot.slane %v625_v38, %v695_v12 }
   0xe   : > { %s604_s23 = smul.u32 6, %s800_s13  ;;  %v245_v22 = vcombine.low %v230_v14, %v237_v15  ;;  %v259_v23 = vrot.slane %v244_v16, %v695_v12  ;;  %v266_v24 = vcombine.high %v230_v14, %v237_v15  ;;  %v267_v25 = vcombine.high %v244_v16, %v244_v16  ;;  %v214_v31 = vld [vmem:[#allocation2] ss:$4 sm:$0x3f] }
   0xf   : > { %v323_v29 = vcombine.low %v308_v17, %v315_v21  ;;  %v265_v32 = vld [vmem:[#allocation2 + $0x18] ss:$4 sm:$0x3f]  ;;  %v337_v42 = vrot.slane %v322_v28, %v695_v12  ;;  %v344_v44 = vcombine.high %v308_v17, %v315_v21  ;;  %v345_v45 = vcombine.high %v322_v28, %v322_v28  ;;  %v293_v52 = vld [vmem:[#allocation2 + $0x1] ss:$4 sm:$0x3f] }
  0x10   : > { %s161_s30 = scalar_lea.vmem %s784_s0, %s604_s23  ;;  %v252_v33 = vrot.slane %v245_v22, %v695_v12  ;;  %v274_v34 = vrot.slane %v266_v24, %v695_v12  ;;  %v281_v35 = vrot.slane %v267_v25, %v695_v12  ;;  %v407_v58 = vrot.slane %v626_v46, %v695_v12  ;;  %v365_v7 = vld [vmem:[#allocation2 + $0x2] ss:$4 sm:$0x3f]  ;;  %s165_s16 = scalar_lea.vmem %s787_s3, %s604_s23 }
  0x11   : > { %v175_v13 = vld [vmem:[%s161_s30] sm:$0x3f]  ;;  %v330_v43 = vrot.slane %v323_v29, %v695_v12  ;;  %v359_v56 = vrot.slane %v345_v45, %v695_v12  ;;  %v352_v57 = vrot.slane %v344_v44, %v695_v12  ;;  %v408_v59 = vcombine.low %v393_v47, %v400_v53 }
  0x12   : > { %v176_v18 = vunpack.c.l.bf16 %v175_v13  ;;  %v177_v19 = vunpack.c.h.bf16 %v175_v13  ;;  %v287_v36 = vld [vmem:[#allocation2 + $0x30] ss:$4 sm:$0x3f]  ;;  %v260_v39 = vcombine.low %v252_v33, %v259_v23  ;;  %v282_v40 = vcombine.low %v274_v34, %v281_v35  ;;  %v343_v63 = vld [vmem:[#allocation2 + $0x31] ss:$4 sm:$0x3f] }
  0x13   : > { %v288_v41 = vcombine.high %v252_v33, %v259_v23  ;;  %v294_v51 = vcombine.high %v274_v34, %v281_v35  ;;  %v338_v54 = vcombine.low %v330_v43, %v337_v42  ;;  %v360_v62 = vcombine.low %v352_v57, %v359_v56  ;;  %v371_v11 = vld [vmem:[#allocation2 + $0x1a] ss:$4 sm:$0x3f] }
  0x14   : > { %v186_v26 = vrot.slane %v176_v18, %v695_v12  ;;  %v193_v27 = vrot.slane %v177_v19, %v695_v12  ;;  %v262_v48 = vmul.f32 %v260_v39, %v214_v31  ;;  %v284_v49 = vmul.f32 %v282_v40, %v265_v32  ;;  %v377_v16 = vld [vmem:[#allocation2 + $0x32] ss:$4 sm:$0x3f] }
  0x15   : > { %v290_v50 = vmul.f32 %v288_v41, %v287_v36  ;;  %v296_v61 = vmul.f32 %v294_v51, %v293_v52  ;;  %v366_v3 = vcombine.high %v330_v43, %v337_v42  ;;  %v415_v5 = vrot.slane %v408_v59, %v695_v12  ;;  %v427_v23 = vld [vmem:[%s786_s2] sm:$0x3f] }
  0x16   : > { %v194_v37 = vcombine.low %v186_v26, %v193_v27  ;;  %v285_v55 = vadd.f32 %v284_v49, %v262_v48  ;;  %v422_v6 = vrot.slane %v407_v58, %v695_v12  ;;  %v362_v9 = vmul.f32 %v360_v62, %v343_v63 }
  0x17   : > { %v372_v10 = vcombine.high %v352_v57, %v359_v56  ;;  %v368_v14 = vmul.f32 %v366_v3, %v365_v7  ;;  %vm516_vm2 = vsmask.f32 256  ;;  %vm519_vm4 = vsmask.f32 1280 }
  0x18   : > { %201 = vst.msk [vmem:[#allocation2 + $0x19] ss:$4 sm:$0x3f] %vm706_vm0, %v194_v37  ;;  %v291_v60 = vadd.f32 %v290_v50, %v285_v55  ;;  %v423_v15 = vcombine.low %v415_v5, %v422_v6  ;;  %vm738_vm5 = vmand %vm515_vm1, %vm516_vm2  ;;  %vm522_vm7 = vcmask 1042434   ;;  %vm523_vm8 = vsmask.f32 2304 }
  0x19   : > { %v374_v18 = vmul.f32 %v372_v10, %v371_v11  ;;  %vm742_vm6 = vmand %vm518_vm3, %vm519_vm4  ;;  %v434_v26 = vsub.s32 0, %v673_v4  ;;  %vm526_vm11 = vcmask 1043459   ;;  %vm527_vm12 = vsmask.f32 3328  ;;  %v538_v50 = vld [vmem:[%s165_s16] sm:$0x3f] }
  0x1a   : > { %v297_v1 = vadd.f32 %v296_v61, %v291_v60  ;;  %v425_v21 = vmul.f32 %v423_v15, %v377_v16  ;;  %vm521_vm9 = vmor %vm742_vm6, %vm738_vm5  ;;  %v438_v28 = vsub.s32 1, %v673_v4  ;;  %v442_v29 = vsub.s32 2, %v673_v4 }
  0x1b   : > { %vm524_vm10 = vmand %vm522_vm7, %vm523_vm8  ;;  %v446_v30 = vsub.s32 3, %v673_v4  ;;  %v450_v31 = vsub.s32 4, %v673_v4  ;;  %v454_v32 = vsub.s32 5, %v673_v4  ;;  %vm530_vm15 = vcmask 1044484  }
  0x1c   : > { %vm759_vm13 = vmor %vm524_vm10, %vm521_vm9  ;;  %vm531_vm0 = vsmask.f32 4352  ;;  %vm534_vm3 = vcmask 1045509   ;;  %vm535_vm4 = vsmask.f32 5376 }
  0x1d   : > { %vm763_vm14 = vmand %vm526_vm11, %vm527_vm12 }
  0x1e   : > { %vm529_vm1 = vmor %vm763_vm14, %vm759_vm13 }
  0x1f   : > { %v298_v0 = vld [vmem:[#allocation2 + $0x19] ss:$4 sm:$0x3f]  ;;  %vm532_vm2 = vmand %vm530_vm15, %vm531_vm0 }
  0x20   : > { %v340_v2 = vmul.f32 %v338_v54, %v298_v0  ;;  %vm533_vm5 = vmor %vm532_vm2, %vm529_vm1 }
  0x21   : > { %vm536_vm6 = vmand %vm534_vm3, %vm535_vm4 }
  0x22   : > { %v341_v8 = vadd.f32 %v340_v2, %v297_v1  ;;  %vm537_vm7 = vmor %vm536_vm6, %vm533_vm5 }
  0x24   : > { %v363_v13 = vadd.f32 %v362_v9, %v341_v8 }
  0x26   : > { %v369_v17 = vadd.f32 %v368_v14, %v363_v13 }
  0x28   : > { %v375_v20 = vadd.f32 %v374_v18, %v369_v17 }
  0x2a   : > { %v426_v24 = vadd.f32 %v425_v21, %v375_v20 }
  0x2c   : > { %v428_v25 = vadd.f32 %v427_v23, %v426_v24 }
  0x2e   : > { %v429_v27 = vmax.f32 %v428_v25, 0.0 }
  0x30   : > { %v430_v34 = vmin.f32 %v429_v27, 6.0 }
  0x32   : > { %v435_v36 = vrot.slane %v430_v34, %v434_v26  ;;  %v439_v37 = vrot.slane %v430_v34, %v438_v28  ;;  %v443_v38 = vrot.slane %v430_v34, %v442_v29  ;;  %v447_v39 = vrot.slane %v430_v34, %v446_v30 }
  0x33   : > { %v451_v40 = vrot.slane %v430_v34, %v450_v31  ;;  %v455_v41 = vrot.slane %v430_v34, %v454_v32 }
  0x34   : > { %v599_v4 = vpack.c.bf16 %v439_v37, %v435_v36  ;;  %v600_v42 = vpack.c.bf16 %v447_v39, %v443_v38 }
  0x35   : > { %v601_v43 = vpack.c.bf16 %v455_v41, %v451_v40 }
  0x36   : > { %v483_v44 = vrot.slane %v599_v4, %v695_v12  ;;  %v490_v45 = vrot.slane %v600_v42, %v695_v12 }
  0x37   : > { %v497_v46 = vrot.slane %v601_v43, %v695_v12 }
  0x38   : > { %v498_v47 = vcombine.low %v483_v44, %v490_v45 }
  0x39   : > { %v512_v49 = vrot.slane %v497_v46, %v695_v12 }
  0x3a   : > { %v505_v48 = vrot.slane %v498_v47, %v695_v12 }
  0x3c   : > { %v513_v51 = vcombine.low %v505_v48, %v512_v49 }
  0x3e   : > { %v539_v52 = vsel %vm537_vm7, %v513_v51, %v538_v50 }
  0x3f   : > { %540 = vst [vmem:[%s165_s16] sm:$0x3f] %v539_v52 }
  0x40 PF: > { %s13_s12 = sadd.s32 1, %s633_s12  }
  0x41   : > { %p10_p4 = scmp.ge.s32.totalorder %s13_s12, 4  }
  0x43   :  { %12 = sbr.rel (!%p10_p4) target bundleno = 1 (0x1), region = 70 }

// kernel: mobilefacenet_forward.82
= control target key start
LH: loop header
LB: loop body
LE: loop exit
PB: predicated region body
PF: predicated region fallthrough
CT: control target
= control target key end

     0   :  { %v758_v21 = vmov 1966171168   ;;  %v127_v23 = vlaneseq  ;;  %s940_s1 = inlined_call_operand.vmem [shape: bf16[768,128], index: 1, kind: input, shape index: {}]   ;;  %s941_s0 = inlined_call_operand.vmem [shape: bf16[2,768], index: 0, kind: input, shape index: {}]   ;;  %s942_s2 = inlined_call_operand.vmem [shape: f32[1,128], index: 2, kind: input, shape index: {}]   ;;  %s943_s3 = inlined_call_operand.vmem [shape: bf16[2,128], index: 3, kind: input, shape index: {}]   ;;  %s944_s4 = inlined_call_operand.vmem [shape: bf16[2,128], index: 4, kind: output, shape index: {}]  }
   0x1   :  { %v709_v0 = vld [vmem:[%s940_s1 + $0x40] sm:$0xff]   ;;  %v713_v4 = vld [vmem:[%s940_s1 + $0x48] sm:$0xff]   ;;  %v717_v8 = vld [vmem:[%s940_s1 + $0x50] sm:$0xff]   ;;  %v125_v22 = vunpack.c.l.s4 %v758_v21 }
   0x2   :  { %v710_v1 = vld [vmem:[%s940_s1] sm:$0xff]   ;;  %642 = vmatprep.subr.bf16.mxu0 %v709_v0  ;;  %v714_v5 = vld [vmem:[%s940_s1 + $0x8] sm:$0xff]   ;;  %v718_v9 = vld [vmem:[%s940_s1 + $0x10] sm:$0xff]   ;;  %v128_v29 = vshrl.u32 %v127_v23, 7 }
   0x3   :  { %v711_v2 = vld [vmem:[%s940_s1 + $0xc0] sm:$0xff]   ;;  %643 = vmatpush3.bf16.msra.mxu0 %v710_v1  ;;  %v715_v6 = vld [vmem:[%s940_s1 + $0xc8] sm:$0xff]   ;;  %v719_v10 = vld [vmem:[%s940_s1 + $0xd0] sm:$0xff]   ;;  %v126_v28 = vunpack.c.0.s8 %v125_v22 }
   0x4   :  { %v712_v3 = vld [vmem:[%s940_s1 + $0x80] sm:$0xff]   ;;  %664 = vmatprep.subr.bf16.mxu1 %v711_v2  ;;  %644 = vmatprep.subr.bf16.mxu0 %v713_v4  ;;  %v716_v7 = vld [vmem:[%s940_s1 + $0x88] sm:$0xff]   ;;  %v720_v11 = vld [vmem:[%s940_s1 + $0x90] sm:$0xff]  }
   0x5   :  { %665 = vmatpush3.bf16.msra.mxu1 %v712_v3  ;;  %v721_v12 = vld [vmem:[%s940_s1 + $0x58] sm:$0xff]   ;;  %v725_v16 = vld [vmem:[%s940_s1 + $0x60] sm:$0xff]   ;;  %v729_v20 = vld [vmem:[%s940_s1 + $0x68] sm:$0xff]   ;;  %v129_v34 = vsub.s32 %v126_v28, %v128_v29 }
   0x6   :  { %666 = vmatprep.subr.bf16.mxu1 %v715_v6  ;;  %v722_v13 = vld [vmem:[%s940_s1 + $0x18] sm:$0xff]   ;;  %v726_v17 = vld [vmem:[%s940_s1 + $0x20] sm:$0xff]   ;;  %v730_v24 = vld [vmem:[%s940_s1 + $0x28] sm:$0xff]  }
   0x7   :  { %645 = vmatpush3.bf16.msra.mxu0 %v714_v5  ;;  %v723_v14 = vld [vmem:[%s940_s1 + $0xd8] sm:$0xff]   ;;  %v727_v18 = vld [vmem:[%s940_s1 + $0xe0] sm:$0xff]   ;;  %v731_v25 = vld [vmem:[%s940_s1 + $0xe8] sm:$0xff]  }
   0x8   :  { %646 = vmatprep.subr.bf16.mxu0 %v717_v8  ;;  %v724_v15 = vld [vmem:[%s940_s1 + $0x98] sm:$0xff]   ;;  %v728_v19 = vld [vmem:[%s940_s1 + $0xa0] sm:$0xff]   ;;  %v732_v26 = vld [vmem:[%s940_s1 + $0xa8] sm:$0xff]  }
   0x9   :  { %667 = vmatpush3.bf16.msra.mxu1 %v716_v7  ;;  %v733_v27 = vld [vmem:[%s940_s1 + $0x70] sm:$0xff]   ;;  %v737_v33 = vld [vmem:[%s940_s1 + $0x78] sm:$0xff]   ;;  %v18_v37 = vld [vmem:[%s941_s0] sm:$0x3f] }
   0xa   :  { %668 = vmatprep.subr.bf16.mxu1 %v719_v10  ;;  %v734_v30 = vld [vmem:[%s940_s1 + $0x30] sm:$0xff]   ;;  %v738_v35 = vld [vmem:[%s940_s1 + $0x38] sm:$0xff]   ;;  %v123_v38 = vcombine.high %v18_v37, %v18_v37  ;;  %v130_v39 = vrot.slane %v18_v37, %v129_v34  ;;  %v742_v41 = vld [vmem:[%s940_s1 + $0x140] sm:$0xff]  }
   0xb   :  { %647 = vmatpush3.bf16.msra.mxu0 %v718_v9  ;;  %v735_v31 = vld [vmem:[%s940_s1 + $0xf0] sm:$0xff]   ;;  %v739_v36 = vld [vmem:[%s940_s1 + $0xf8] sm:$0xff]   ;;  %v743_v46 = vld [vmem:[%s940_s1 + $0x100] sm:$0xff]  }
   0xc   :  { %648 = vmatprep.subr.bf16.mxu0 %v721_v12  ;;  %v736_v32 = vld [vmem:[%s940_s1 + $0xb0] sm:$0xff]   ;;  %v741_v40 = vld [vmem:[%s940_s1 + $0xb8] sm:$0xff]   ;;  %v138_v42 = vcombine.high %v130_v39, %v130_v39  ;;  %v146_v43 = vrot.slane %v130_v39, %v129_v34  ;;  %v137_v44 = vrot.slane %v123_v38, %v129_v34  ;;  %v744_v49 = vld [vmem:[%s940_s1 + $0x148] sm:$0xff]  }
   0xd   :  { %669 = vmatpush3.bf16.msra.mxu1 %v720_v11  ;;  %v745_v52 = vld [vmem:[%s940_s1 + $0x108] sm:$0xff]   ;;  %v746_v53 = vld [vmem:[%s940_s1 + $0x150] sm:$0xff]   ;;  %v748_v55 = vld [vmem:[%s940_s1 + $0x158] sm:$0xff]  }
   0xe   :  { %670 = vmatprep.subr.bf16.mxu1 %v723_v14  ;;  %v160_v45 = vrot.slane %v138_v42, %v129_v34  ;;  %v139_v47 = vcombine.high %v137_v44, %v137_v44  ;;  %v168_v48 = vcombine.high %v146_v43, %v146_v43  ;;  %v747_v54 = vld [vmem:[%s940_s1 + $0x110] sm:$0xff]   ;;  %v749_v56 = vld [vmem:[%s940_s1 + $0x118] sm:$0xff]   ;;  %v750_v57 = vld [vmem:[%s940_s1 + $0x160] sm:$0xff]   ;;  %v153_v1 = vrot.slane %v137_v44, %v129_v34 }
   0xf   :  { %649 = vmatpush3.bf16.msra.mxu0 %v722_v13  ;;  %v751_v58 = vld [vmem:[%s940_s1 + $0x120] sm:$0xff]   ;;  %v752_v59 = vld [vmem:[%s940_s1 + $0x168] sm:$0xff]   ;;  %v754_v61 = vld [vmem:[%s940_s1 + $0x170] sm:$0xff]  }
  0x10   :  { %650 = vmatprep.subr.bf16.mxu0 %v725_v16  ;;  %496 = vmatprep.mubr.bf16.mxu0 %v160_v45  ;;  %v169_v50 = vcombine.high %v160_v45, %v160_v45  ;;  %v167_v51 = vrot.slane %v139_v47, %v129_v34  ;;  %v753_v60 = vld [vmem:[%s940_s1 + $0x128] sm:$0xff]   ;;  %v755_v62 = vld [vmem:[%s940_s1 + $0x130] sm:$0xff]   ;;  %v756_v63 = vld [vmem:[%s940_s1 + $0x178] sm:$0xff]  }
  0x11   :  { %671 = vmatpush3.bf16.msra.mxu1 %v724_v15  ;;  %v757_v0 = vld [vmem:[%s940_s1 + $0x138] sm:$0xff]   ;;  %v593_v3 = vld [vmem:[%s942_s2] ss:$0 sm:$0xff] }
  0x12   :  { %672 = vmatprep.subr.bf16.mxu1 %v727_v18  ;;  %536 = vmatprep.mubr.bf16.mxu1 %v169_v50  ;;  %v584_v15 = vld [vmem:[%s943_s3] sm:$0x1] }
  0x13   :  { %651 = vmatpush3.bf16.msra.mxu0 %v726_v17 }
  0x14   :  { %652 = vmatprep.subr.bf16.mxu0 %v729_v20 }
  0x15   :  { %673 = vmatpush3.bf16.msra.mxu1 %v728_v19  ;;  %v585_v19 = vunpack.c.l.bf16 %v584_v15 }
  0x16   :  { %674 = vmatprep.subr.bf16.mxu1 %v731_v25 }
  0x17   :  { %653 = vmatpush3.bf16.msra.mxu0 %v730_v24 }
  0x18   :  { %654 = vmatprep.subr.bf16.mxu0 %v733_v27 }
  0x19   :  { %675 = vmatpush3.bf16.msra.mxu1 %v732_v26 }
  0x1a   :  { %676 = vmatprep.subr.bf16.mxu1 %v735_v31 }
  0x1b   :  { %655 = vmatpush3.bf16.msra.mxu0 %v734_v30 }
  0x1c   :  { %656 = vmatprep.subr.bf16.mxu0 %v737_v33 }
  0x1d   :  { %677 = vmatpush3.bf16.msra.mxu1 %v736_v32 }
  0x1e   :  { %678 = vmatprep.subr.bf16.mxu1 %v739_v36 }
  0x1f   :  { %657 = vmatpush3.bf16.msra.mxu0 %v738_v35 }
  0x20   :  { %686 = vmatprep.subr.bf16.mxu0 %v742_v41 }
  0x21   :  { %679 = vmatpush3.bf16.msra.mxu1 %v741_v40 }
  0x22   :  { %497 = vmatmul.mubr.bf16.vlgmr.msra.gmra.mrb[0].mxu0 %v146_v43 }
  0x23   :  { %687 = vmatpush3.bf16.msra.mxu0 %v743_v46  ;;  %576 = vmatprep.mubr.bf16.mxu0 %v167_v51 }
  0x24   :  { %537 = vmatmul.mubr.bf16.vlgmr.msra.gmra.mrb[0].mxu1 %v168_v48  ;;  %688 = vmatprep.subr.bf16.mxu0 %v744_v49 }
  0x27   :  { %689 = vmatpush3.bf16.msra.mxu0 %v745_v52 }
  0x28   :  { %690 = vmatprep.subr.bf16.mxu0 %v746_v53 }
  0x2b   :  { %691 = vmatpush3.bf16.msra.mxu0 %v747_v54 }
  0x2c   :  { %692 = vmatprep.subr.bf16.mxu0 %v748_v55 }
  0x2f   :  { %693 = vmatpush3.bf16.msra.mxu0 %v749_v56 }
  0x30   :  { %694 = vmatprep.subr.bf16.mxu0 %v750_v57 }
  0x33   :  { %695 = vmatpush3.bf16.msra.mxu0 %v751_v58 }
  0x34   :  { %696 = vmatprep.subr.bf16.mxu0 %v752_v59 }
  0x37   :  { %697 = vmatpush3.bf16.msra.mxu0 %v753_v60 }
  0x38   :  { %698 = vmatprep.subr.bf16.mxu0 %v754_v61 }
  0x3b   :  { %699 = vmatpush3.bf16.msra.mxu0 %v755_v62 }
  0x3c   :  { %700 = vmatprep.subr.bf16.mxu0 %v756_v63 }
  0x3f   :  { %701 = vmatpush3.bf16.msra.mxu0 %v757_v0 }
  0x42   :  { %577 = vmatmul.mubr.bf16.vlgmr.msra.gmra.mrb[4].mxu0 %v153_v1 }
  0xf5   :  { %v658_v2 = vpop.f32.mrb[0].mxu0 }
  0xf6   :  { %v659_v4 = vpop.f32.mrb[1].mxu0 }
  0xf7   :  { %v660_v5 = vadd.f32 %v659_v4, %v658_v2  ;;  %v661_v6 = vpop.f32.mrb[2].mxu0  ;;  %v680_v7 = vpop.f32.mrb[0].mxu1 }
  0xf8   :  { %v662_v8 = vpop.f32.mrb[3].mxu0  ;;  %v681_v9 = vpop.f32.mrb[1].mxu1 }
  0xf9   :  { %v499_v10 = vadd.f32 %v660_v5, %v593_v3  ;;  %v682_v11 = vadd.f32 %v681_v9, %v680_v7  ;;  %v683_v12 = vpop.f32.mrb[2].mxu1 }
  0xfa   :  { %v684_v13 = vpop.f32.mrb[3].mxu1 }
  0xfb   :  { %v539_v14 = vadd.f32 %v682_v11, %v499_v10 }
 0x115   :  { %v702_v16 = vpop.f32.mrb[4].mxu0 }
 0x116   :  { %v703_v17 = vpop.f32.mrb[5].mxu0 }
 0x117   :  { %v704_v18 = vadd.f32 %v703_v17, %v702_v16  ;;  %v705_v20 = vpop.f32.mrb[6].mxu0 }
 0x118   :  { %v706_v21 = vpop.f32.mrb[7].mxu0 }
 0x119   :  { %v579_v22 = vadd.f32 %v704_v18, %v539_v14 }
 0x11b   :  { %v586_v23 = vadd.f32 %v585_v19, %v579_v22 }
 0x11d   :  { %v587_v24 = vpack.c.bf16 %v586_v23, %v586_v23 }
 0x11f   :  { %588 = vst [vmem:[%s944_s4] sm:$0x1] %v587_v24 }

// kernel: mobilefacenet_forward.87
= control target key start
LH: loop header
LB: loop body
LE: loop exit
PB: predicated region body
PF: predicated region fallthrough
CT: control target
= control target key end

     0   :  { %v34_v30 = vlaneseq  ;;  %v1271_v34 = vmov 1983009808   ;;  %s1575_s0 = inlined_call_operand.vmem [shape: f32[2,512], index: 0, kind: input, shape index: {}]   ;;  %s1576_s1 = inlined_call_operand.vmem [shape: bf16[512,32], index: 1, kind: input, shape index: {}]   ;;  %s1577_s2 = inlined_call_operand.vmem [shape: f32[1,32], index: 2, kind: input, shape index: {}]   ;;  %s1578_s3 = inlined_call_operand.vmem [shape: bf16[32,512], index: 3, kind: input, shape index: {}]   ;;  %s1579_s4 = inlined_call_operand.vmem [shape: f32[1,512], index: 4, kind: input, shape index: {}]   ;;  %s1580_s5 = inlined_call_operand.vmem [shape: bf16[512,128], index: 5, kind: input, shape index: {}]   ;;  %s1581_s6 = inlined_call_operand.vmem [shape: f32[1,128], index: 6, kind: input, shape index: {}]   ;;  %s1582_s7 = inlined_call_operand.hbm [shape: f32[2,128], index: 7, kind: output, shape index: {}]  }
   0x1   :  { %v1154_v0 = vld [vmem:[%s1576_s1 + $0x40] sm:$0xff]   ;;  %v1158_v4 = vld [vmem:[%s1576_s1 + $0x48] sm:$0xff]   ;;  %v1162_v8 = vld [vmem:[%s1576_s1 + $0x50] sm:$0xff]   ;;  %v32_v35 = vunpack.c.l.s4 %v1271_v34 }
   0x2   :  { %v1155_v1 = vld [vmem:[%s1576_s1 + $0xc0] sm:$0xff]   ;;  %1063 = vmatprep.subr.bf16.mxu0 %v1154_v0  ;;  %v1159_v5 = vld [vmem:[%s1576_s1 + $0xc8] sm:$0xff]   ;;  %v1163_v9 = vld [vmem:[%s1576_s1 + $0xd0] sm:$0xff]   ;;  %v1415_v36 = vshrl.u32 %v34_v30, 7 }
   0x3   :  { %v1156_v2 = vld [vmem:[%s1576_s1] sm:$0xff]   ;;  %1085 = vmatprep.subr.bf16.mxu1 %v1155_v1  ;;  %v1160_v6 = vld [vmem:[%s1576_s1 + $0x8] sm:$0xff]   ;;  %v1164_v10 = vld [vmem:[%s1576_s1 + $0x10] sm:$0xff]   ;;  %v33_v37 = vunpack.c.0.s8 %v32_v35 }
   0x4   :  { %v1157_v3 = vld [vmem:[%s1576_s1 + $0x80] sm:$0xff]   ;;  %1064 = vmatpush3.bf16.msra.mxu0 %v1156_v2  ;;  %v1161_v7 = vld [vmem:[%s1576_s1 + $0x88] sm:$0xff]   ;;  %v1165_v11 = vld [vmem:[%s1576_s1 + $0x90] sm:$0xff]  }
   0x5   :  { %1086 = vmatpush3.bf16.msra.mxu1 %v1157_v3  ;;  %1065 = vmatprep.subr.bf16.mxu0 %v1158_v4  ;;  %v1166_v12 = vld [vmem:[%s1576_s1 + $0x58] sm:$0xff]   ;;  %v1170_v16 = vld [vmem:[%s1576_s1 + $0x60] sm:$0xff]   ;;  %v1174_v20 = vld [vmem:[%s1576_s1 + $0x68] sm:$0xff]   ;;  %v1420_v39 = vsub.s32 %v33_v37, %v1415_v36 }
   0x6   :  { %1087 = vmatprep.subr.bf16.mxu1 %v1159_v5  ;;  %v1167_v13 = vld [vmem:[%s1576_s1 + $0xd8] sm:$0xff]   ;;  %v1171_v17 = vld [vmem:[%s1576_s1 + $0xe0] sm:$0xff]   ;;  %v1175_v21 = vld [vmem:[%s1576_s1 + $0xe8] sm:$0xff]  }
   0x7   :  { %v1168_v14 = vld [vmem:[%s1576_s1 + $0x18] sm:$0xff]   ;;  %v1172_v18 = vld [vmem:[%s1576_s1 + $0x20] sm:$0xff]   ;;  %v1176_v22 = vld [vmem:[%s1576_s1 + $0x28] sm:$0xff]  }
   0x8   :  { %1066 = vmatpush3.bf16.msra.mxu0 %v1160_v6  ;;  %v1169_v15 = vld [vmem:[%s1576_s1 + $0x98] sm:$0xff]   ;;  %v1173_v19 = vld [vmem:[%s1576_s1 + $0xa0] sm:$0xff]   ;;  %v1177_v23 = vld [vmem:[%s1576_s1 + $0xa8] sm:$0xff]  }
   0x9   :  { %1088 = vmatpush3.bf16.msra.mxu1 %v1161_v7  ;;  %1067 = vmatprep.subr.bf16.mxu0 %v1162_v8  ;;  %v1178_v24 = vld [vmem:[%s1576_s1 + $0x70] sm:$0xff]   ;;  %v1182_v28 = vld [vmem:[%s1576_s1 + $0x78] sm:$0xff]   ;;  %v1413_v33 = vld [vmem:[%s1575_s0] sm:$0xff] }
   0xa   :  { %1089 = vmatprep.subr.bf16.mxu1 %v1163_v9  ;;  %v1179_v25 = vld [vmem:[%s1576_s1 + $0xf0] sm:$0xff]   ;;  %v1183_v29 = vld [vmem:[%s1576_s1 + $0xf8] sm:$0xff]   ;;  %v30_v38 = vcombine.high %v1413_v33, %v1413_v33  ;;  %v37_v40 = vrot.slane %v1413_v33, %v1420_v39 }
   0xb   :  { %v1180_v26 = vld [vmem:[%s1576_s1 + $0x30] sm:$0xff]   ;;  %v1184_v31 = vld [vmem:[%s1576_s1 + $0x38] sm:$0xff]  }
   0xc   :  { %1068 = vmatpush3.bf16.msra.mxu0 %v1164_v10  ;;  %v1181_v27 = vld [vmem:[%s1576_s1 + $0xb0] sm:$0xff]   ;;  %v1185_v32 = vld [vmem:[%s1576_s1 + $0xb8] sm:$0xff]   ;;  %v44_v41 = vrot.slane %v30_v38, %v1420_v39  ;;  %v45_v42 = vcombine.high %v37_v40, %v37_v40  ;;  %v51_v44 = vpack.c.bf16 %v37_v40, %v37_v40 }
   0xd   :  { %1090 = vmatpush3.bf16.msra.mxu1 %v1165_v11  ;;  %1069 = vmatprep.subr.bf16.mxu0 %v1166_v12 }
   0xe   :  { %1091 = vmatprep.subr.bf16.mxu1 %v1167_v13  ;;  %v46_v43 = vcombine.high %v44_v41, %v44_v41  ;;  %v53_v45 = vpack.c.bf16 %v44_v41, %v44_v41  ;;  %v52_v46 = vpack.c.bf16 %v45_v42, %v45_v42 }
  0x10   :  { %1070 = vmatpush3.bf16.msra.mxu0 %v1168_v14  ;;  %v54_v47 = vpack.c.bf16 %v46_v43, %v46_v43  ;;  %350 = vmatprep.mubr.bf16.mxu0 %v52_v46 }
  0x11   :  { %1092 = vmatpush3.bf16.msra.mxu1 %v1169_v15  ;;  %1071 = vmatprep.subr.bf16.mxu0 %v1170_v16 }
  0x12   :  { %1093 = vmatprep.subr.bf16.mxu1 %v1171_v17  ;;  %390 = vmatprep.mubr.bf16.mxu1 %v54_v47 }
  0x14   :  { %1072 = vmatpush3.bf16.msra.mxu0 %v1172_v18 }
  0x15   :  { %1094 = vmatpush3.bf16.msra.mxu1 %v1173_v19  ;;  %1073 = vmatprep.subr.bf16.mxu0 %v1174_v20 }
  0x16   :  { %1095 = vmatprep.subr.bf16.mxu1 %v1175_v21 }
  0x18   :  { %1074 = vmatpush3.bf16.msra.mxu0 %v1176_v22 }
  0x19   :  { %1096 = vmatpush3.bf16.msra.mxu1 %v1177_v23  ;;  %1075 = vmatprep.subr.bf16.mxu0 %v1178_v24 }
  0x1a   :  { %1097 = vmatprep.subr.bf16.mxu1 %v1179_v25 }
  0x1c   :  { %1076 = vmatpush3.bf16.msra.mxu0 %v1180_v26 }
  0x1d   :  { %1098 = vmatpush3.bf16.msra.mxu1 %v1181_v27  ;;  %1077 = vmatprep.subr.bf16.mxu0 %v1182_v28 }
  0x1e   :  { %1099 = vmatprep.subr.bf16.mxu1 %v1183_v29 }
  0x20   :  { %1078 = vmatpush3.bf16.msra.mxu0 %v1184_v31 }
  0x21   :  { %1100 = vmatpush3.bf16.msra.mxu1 %v1185_v32 }
  0x23   :  { %351 = vmatmul.mubr.bf16.vlgmr.msra.gmra.mrb[0].mxu0 %v51_v44 }
  0x24   :  { %391 = vmatmul.mubr.bf16.vlgmr.msra.gmra.mrb[0].mxu1 %v53_v45 }
  0x25   :  { %12 = vsyncpa [#allocation3], 0  ;;  %v1189_v48 = vld [vmem:[%s1578_s3 + $0x4] ss:$16 sps:$4 sm:$0xff]   ;;  %v1192_v49 = vld [vmem:[%s1578_s3 + $0xc] ss:$16 sps:$4 sm:$0xff]  }
  0x26   :  { %v1187_v50 = vld [vmem:[%s1578_s3] ss:$16 sps:$4 sm:$0xff]   ;;  %v1190_v51 = vld [vmem:[%s1578_s3 + $0x8] ss:$16 sps:$4 sm:$0xff]   ;;  %474 = vmatprep.subr.bf16.mxu0 %v1189_v48  ;;  %515 = vmatprep.subr.bf16.mxu1 %v1192_v49  ;;  %v1195_v52 = vld [vmem:[%s1578_s3 + $0x24] ss:$16 sps:$4 sm:$0xff]  }
  0x27   :  { %475 = vmatpush1.bf16.msra.mxu0 %v1187_v50  ;;  %516 = vmatpush1.bf16.msra.mxu1 %v1190_v51  ;;  %v1198_v53 = vld [vmem:[%s1578_s3 + $0x2c] ss:$16 sps:$4 sm:$0xff]   ;;  %v1193_v54 = vld [vmem:[%s1578_s3 + $0x20] ss:$16 sps:$4 sm:$0xff]   ;;  %v1196_v55 = vld [vmem:[%s1578_s3 + $0x28] ss:$16 sps:$4 sm:$0xff]  }
  0x28   :  { %476 = vmatprep.subr.bf16.mxu0 %v1195_v52  ;;  %517 = vmatprep.subr.bf16.mxu1 %v1198_v53  ;;  %v1272_v56 = vmov 0   ;;  %v987_v59 = vld [vmem:[%s1577_s2] ss:$0 sm:$0xff]  ;;  %vm470_vm0 = vcmask 261120   ;;  %v1203_v12 = vld [vmem:[%s1580_s5 + $0x48] sm:$0xff]   ;;  %v1207_v16 = vld [vmem:[%s1580_s5 + $0x50] sm:$0xff]  }
  0x29   :  { %506 = vmatprep.mubr.bf16.mxu0 %v1272_v56  ;;  %547 = vmatprep.mubr.bf16.mxu1 %v1272_v56  ;;  %v1199_v8 = vld [vmem:[%s1580_s5 + $0x40] sm:$0xff]   ;;  %v1204_v13 = vld [vmem:[%s1580_s5 + $0x8] sm:$0xff]   ;;  %v1208_v17 = vld [vmem:[%s1580_s5 + $0x10] sm:$0xff]   ;;  %v412_v43 = vsub.s32 0, %v1415_v36  ;;  %v420_v44 = vsub.s32 2, %v1415_v36  ;;  %v416_v46 = vsub.s32 1, %v1415_v36 }
  0x2a   :  { %v1200_v9 = vld [vmem:[%s1580_s5] sm:$0xff]   ;;  %v1205_v14 = vld [vmem:[%s1580_s5 + $0xc8] sm:$0xff]   ;;  %v1209_v18 = vld [vmem:[%s1580_s5 + $0xd0] sm:$0xff]   ;;  %v424_v47 = vsub.s32 3, %v1415_v36  ;;  %s1273_s22 = smov [#allocation2]  }
  0x2b   :  { %477 = vmatpush1.bf16.msra.mxu0 %v1193_v54  ;;  %518 = vmatpush1.bf16.msra.mxu1 %v1196_v55  ;;  %v1201_v10 = vld [vmem:[%s1580_s5 + $0xc0] sm:$0xff]   ;;  %v1206_v15 = vld [vmem:[%s1580_s5 + $0x88] sm:$0xff]   ;;  %v1210_v19 = vld [vmem:[%s1580_s5 + $0x90] sm:$0xff]   ;;  %s979_s23 = sshll.u32 %s1273_s22, 4  ;;  %s980_s23 = int_to_ptr.vmem [resolvable:$true] %s979_s23 }
  0x2c   :  { %1107 = vmatprep.subr.bf16.mxu0 %v1199_v8  ;;  %v1202_v11 = vld [vmem:[%s1580_s5 + $0x80] sm:$0xff]   ;;  %1129 = vmatprep.subr.bf16.mxu1 %v1201_v10  ;;  %v1211_v20 = vld [vmem:[%s1580_s5 + $0x58] sm:$0xff]   ;;  %v1219_v27 = vld [vmem:[%s1580_s5 + $0x68] sm:$0xff]   ;;  %s1247_s24 = scalar_lea.vmem %s980_s23, 32  ;;  %p1252_p1 = scmp.lt.s32.totalorder %s980_s23, %s980_s23 }
  0x2d   :  { %v1213_v21 = vld [vmem:[%s1580_s5 + $0xd8] sm:$0xff]   ;;  %v1215_v23 = vld [vmem:[%s1580_s5 + $0x60] sm:$0xff]   ;;  %v1221_v29 = vld [vmem:[%s1580_s5 + $0xe8] sm:$0xff]   ;;  %p1248_p0 = scmp.ne.s32.totalorder %s980_s23, %s1247_s24  ;;  %p1253_p2 = scmp.lt.s32.totalorder %s1247_s24, %s1247_s24 }
  0x2e   :  { %v1212_v22 = vld [vmem:[%s1580_s5 + $0x18] sm:$0xff]   ;;  %v1217_v25 = vld [vmem:[%s1580_s5 + $0xe0] sm:$0xff]   ;;  %v1220_v30 = vld [vmem:[%s1580_s5 + $0x28] sm:$0xff]  }
  0x2f   :  { %v1214_v24 = vld [vmem:[%s1580_s5 + $0x98] sm:$0xff]   ;;  %v1216_v26 = vld [vmem:[%s1580_s5 + $0x20] sm:$0xff]   ;;  %v1223_v31 = vld [vmem:[%s1580_s5 + $0x70] sm:$0xff]   ;;  %p1254_p3 = por %p1253_p2, %p1252_p1 }
  0x30   :  { %v1218_v28 = vld [vmem:[%s1580_s5 + $0xa0] sm:$0xff]   ;;  %v1222_v32 = vld [vmem:[%s1580_s5 + $0xa8] sm:$0xff]   ;;  %v1225_v34 = vld [vmem:[%s1580_s5 + $0xf0] sm:$0xff]  }
  0x31   :  { %v1224_v35 = vld [vmem:[%s1580_s5 + $0x30] sm:$0xff]   ;;  %v1227_v37 = vld [vmem:[%s1580_s5 + $0x78] sm:$0xff]   ;;  %v408_v45 = vld [vmem:[%s1579_s4] sm:$0xf]  ;;  %p1255_p4 = pnand %p1254_p3, %p1248_p0 }
  0x32   :  { %v1226_v38 = vld [vmem:[%s1580_s5 + $0xb0] sm:$0xff]   ;;  %v1229_v40 = vld [vmem:[%s1580_s5 + $0xf8] sm:$0xff]   ;;  %v413_v48 = vrot.slane %v408_v45, %v412_v43  ;;  %v421_v49 = vrot.slane %v408_v45, %v420_v44  ;;  %v417_v50 = vrot.slane %v408_v45, %v416_v46  ;;  %v425_v51 = vrot.slane %v408_v45, %v424_v47 }
  0x33   :  { %v1228_v41 = vld [vmem:[%s1580_s5 + $0x38] sm:$0xff]  }
  0x34   :  { %v1230_v42 = vld [vmem:[%s1580_s5 + $0xb8] sm:$0xff]  }
  0xf6   :  { %v1079_v57 = vpop.f32.mrb[0].mxu0 }
  0xf7   :  { %v1101_v58 = vpop.f32.mrb[0].mxu1  ;;  %v1080_v60 = vpop.f32.mrb[1].mxu0 }
  0xf8   :  { %v1102_v61 = vpop.f32.mrb[1].mxu1  ;;  %v1081_v62 = vadd.f32 %v1080_v60, %v1079_v57  ;;  %v1082_v0 = vpop.f32.mrb[2].mxu0 }
  0xf9   :  { %v1103_v63 = vadd.f32 %v1102_v61, %v1101_v58  ;;  %v1104_v1 = vpop.f32.mrb[2].mxu1  ;;  %v1083_v2 = vpop.f32.mrb[3].mxu0 }
  0xfa   :  { %v1105_v3 = vpop.f32.mrb[3].mxu1  ;;  %v353_v4 = vadd.f32 %v1081_v62, %v987_v59 }
  0xfc   :  { %v393_v5 = vadd.f32 %v1103_v63, %v353_v4 }
  0xfe   :  { %v398_v6 = vmax.f32 %v393_v5, 0.0 }
 0x100   :  { %v399_v7 = vpack.c.bf16 %v398_v6, %v398_v6 }
 0x102   :  { %1028 = vmatmul.mubr.msk.bf16.vlgmr.msra.gmra.mrb[4].mxu0 %vm470_vm0, %v399_v7  ;;  %1029 = vmatmul.mubr.msk.bf16.vlgmr.msra.gmra.mrb[4].mxu1 %vm470_vm0, %v399_v7 }
 0x103   :  { %1108 = vmatpush3.bf16.msra.mxu0 %v1200_v9  ;;  %1130 = vmatpush3.bf16.msra.mxu1 %v1202_v11 }
 0x104   :  { %1109 = vmatprep.subr.bf16.mxu0 %v1203_v12  ;;  %1131 = vmatprep.subr.bf16.mxu1 %v1205_v14 }
 0x107   :  { %1110 = vmatpush3.bf16.msra.mxu0 %v1204_v13  ;;  %1132 = vmatpush3.bf16.msra.mxu1 %v1206_v15 }
 0x108   :  { %1111 = vmatprep.subr.bf16.mxu0 %v1207_v16  ;;  %1133 = vmatprep.subr.bf16.mxu1 %v1209_v18 }
 0x10b   :  { %1112 = vmatpush3.bf16.msra.mxu0 %v1208_v17  ;;  %1134 = vmatpush3.bf16.msra.mxu1 %v1210_v19 }
 0x10c   :  { %1113 = vmatprep.subr.bf16.mxu0 %v1211_v20  ;;  %1135 = vmatprep.subr.bf16.mxu1 %v1213_v21 }
 0x10f   :  { %1114 = vmatpush3.bf16.msra.mxu0 %v1212_v22  ;;  %1136 = vmatpush3.bf16.msra.mxu1 %v1214_v24 }
 0x110   :  { %1115 = vmatprep.subr.bf16.mxu0 %v1215_v23  ;;  %1137 = vmatprep.subr.bf16.mxu1 %v1217_v25 }
 0x113   :  { %1116 = vmatpush3.bf16.msra.mxu0 %v1216_v26  ;;  %1138 = vmatpush3.bf16.msra.mxu1 %v1218_v28 }
 0x114   :  { %1117 = vmatprep.subr.bf16.mxu0 %v1219_v27  ;;  %1139 = vmatprep.subr.bf16.mxu1 %v1221_v29 }
 0x117   :  { %1118 = vmatpush3.bf16.msra.mxu0 %v1220_v30  ;;  %1140 = vmatpush3.bf16.msra.mxu1 %v1222_v32 }
 0x118   :  { %1119 = vmatprep.subr.bf16.mxu0 %v1223_v31  ;;  %1141 = vmatprep.subr.bf16.mxu1 %v1225_v34 }
 0x11b   :  { %1120 = vmatpush3.bf16.msra.mxu0 %v1224_v35  ;;  %1142 = vmatpush3.bf16.msra.mxu1 %v1226_v38 }
 0x11c   :  { %1121 = vmatprep.subr.bf16.mxu0 %v1227_v37  ;;  %1143 = vmatprep.subr.bf16.mxu1 %v1229_v40 }
 0x11f   :  { %1122 = vmatpush3.bf16.msra.mxu0 %v1228_v41  ;;  %1144 = vmatpush3.bf16.msra.mxu1 %v1230_v42 }
 0x1d5   :  { %v508_v52 = vpop.f32.mrb[4].mxu0  ;;  %v549_v53 = vpop.f32.mrb[4].mxu1 }
 0x1d6   :  { %v509_v54 = vadd.f32 %v508_v52, %v413_v48  ;;  %v550_v55 = vadd.f32 %v549_v53, %v421_v49  ;;  %v510_v56 = vpop.f32.mrb[5].mxu0  ;;  %v551_v57 = vpop.f32.mrb[5].mxu1 }
 0x1d7   :  { %v511_v58 = vadd.f32 %v510_v56, %v417_v50  ;;  %v552_v59 = vadd.f32 %v551_v57, %v425_v51  ;;  %v512_v60 = vpop.f32.mrb[6].mxu0  ;;  %v553_v61 = vpop.f32.mrb[6].mxu1 }
 0x1d8   :  { %v556_v62 = vsub.f32 0.0, %v509_v54  ;;  %v558_v63 = vsub.f32 0.0, %v550_v55  ;;  %v513_v0 = vpop.f32.mrb[7].mxu0  ;;  %v554_v1 = vpop.f32.mrb[7].mxu1 }
 0x1d9   :  { %v557_v2 = vsub.f32 0.0, %v511_v58  ;;  %v559_v36 = vsub.f32 0.0, %v552_v59 }
 0x1da   :  { %v560_v3 = vmul.f32 1.442695, %v556_v62  ;;  %v564_v4 = vmul.f32 1.442695, %v558_v63 }
 0x1db   :  { %v562_v5 = vmul.f32 1.442695, %v557_v2  ;;  %v566_v6 = vmul.f32 1.442695, %v559_v36 }
 0x1dc   :  { %1231 = vpow2.f32 %v560_v3 }
 0x1dd   :  { %1233 = vpow2.f32 %v564_v4 }
 0x1de   :  { %1235 = vpow2.f32 %v562_v5 }
 0x1df   :  { %1237 = vpow2.f32 %v566_v6 }
 0x1e6   :  { %v1232_v7 = vpop.eup %1231 }
 0x1e7   :  { %v1234_v8 = vpop.eup %1233  ;;  %v568_v9 = vadd.f32 1.0, %v1232_v7 }
 0x1e8   :  { %v1236_v10 = vpop.eup %1235  ;;  %v570_v11 = vadd.f32 1.0, %v1234_v8 }
 0x1e9   :  { %v1238_v12 = vpop.eup %1237  ;;  %1239 = vrcp.f32 %v568_v9  ;;  %v569_v13 = vadd.f32 1.0, %v1236_v10 }
 0x1ea   :  { %1241 = vrcp.f32 %v570_v11  ;;  %v571_v14 = vadd.f32 1.0, %v1238_v12 }
 0x1eb   :  { %1243 = vrcp.f32 %v569_v13 }
 0x1ec   :  { %1245 = vrcp.f32 %v571_v14 }
 0x1f3   :  { %v1240_v15 = vpop.eup %1239 }
 0x1f4   :  { %v1242_v16 = vpop.eup %1241 }
 0x1f5   :  { %v1244_v17 = vpop.eup %1243 }
 0x1f6   :  { %v1246_v18 = vpop.eup %1245  ;;  %v584_v19 = vcombine.low %v1240_v15, %v1244_v17 }
 0x1f7   :  { %v585_v20 = vcombine.low %v1242_v16, %v1246_v18 }
 0x1f8   :  { %v592_v21 = vrot.slane %v584_v19, %v1420_v39 }
 0x1f9   :  { %v599_v22 = vrot.slane %v585_v20, %v1420_v39 }
 0x1fb   :  { %v600_v23 = vcombine.low %v592_v21, %v599_v22 }
 0x1fd   :  { %v602_v24 = vmul.f32 %v600_v23, %v1413_v33  ;;  %v1030_v33 = vld [vmem:[%s1581_s6] ss:$0 sm:$0xff] }
 0x1ff   :  { %v611_v25 = vrot.slane %v602_v24, %v1420_v39  ;;  %v604_v26 = vcombine.high %v602_v24, %v602_v24 }
 0x201   :  { %v619_v27 = vcombine.high %v611_v25, %v611_v25  ;;  %v618_v28 = vrot.slane %v604_v26, %v1420_v39  ;;  %v625_v31 = vpack.c.bf16 %v611_v25, %v611_v25 }
 0x203   :  { %v626_v29 = vpack.c.bf16 %v619_v27, %v619_v27  ;;  %v620_v30 = vcombine.high %v618_v28, %v618_v28  ;;  %v627_v34 = vpack.c.bf16 %v618_v28, %v618_v28 }
 0x205   :  { %924 = vmatprep.mubr.bf16.mxu0 %v626_v29  ;;  %v628_v32 = vpack.c.bf16 %v620_v30, %v620_v30 }
 0x206   :  { %925 = vmatmul.mubr.bf16.vlgmr.msra.gmra.mrb[8].mxu0 %v625_v31 }
 0x207   :  { %964 = vmatprep.mubr.bf16.mxu1 %v628_v32 }
 0x208   :  { %965 = vmatmul.mubr.bf16.vlgmr.msra.gmra.mrb[8].mxu1 %v627_v34 }
 0x2d9   :  { %v1123_v35 = vpop.f32.mrb[8].mxu0 }
 0x2da   :  { %v1124_v37 = vpop.f32.mrb[9].mxu0 }
 0x2db   :  { %v1125_v38 = vadd.f32 %v1124_v37, %v1123_v35  ;;  %v1126_v40 = vpop.f32.mrb[10].mxu0  ;;  %v1145_v41 = vpop.f32.mrb[8].mxu1 }
 0x2dc   :  { %v1127_v42 = vpop.f32.mrb[11].mxu0  ;;  %v1146_v39 = vpop.f32.mrb[9].mxu1 }
 0x2dd   :  { %v927_v43 = vadd.f32 %v1125_v38, %v1030_v33  ;;  %v1147_v44 = vadd.f32 %v1146_v39, %v1145_v41  ;;  %v1148_v45 = vpop.f32.mrb[10].mxu1 }
 0x2de   :  { %v1149_v46 = vpop.f32.mrb[11].mxu1 }
 0x2df   :  { %v967_v47 = vadd.f32 %v1147_v44, %v927_v43 }
 0x2e1   :  { %972 = vst [vmem:[#allocation2] sm:$0x3] %v967_v47 }
 0x2e2   :  { %1258 = shalt.err (!%p1255_p4)
}
 0x2e3   :  { %s1259_s26 = scalar_lea.hbm %s1582_s7, 32 }
 0x2e4   :  { %p1260_p5 = scmp.ne.s32.totalorder %s1582_s7, %s1259_s26  ;;  %p1263_p6 = scmp.lt.u32.totalorder %s1259_s26, %s1582_s7 }
 0x2e6   :  { %p1265_p7 = pnand %p1263_p6, %p1260_p5 }
 0x2e8   :  { %1268 = shalt.err (!%p1265_p7)
}
 0x2e9   :  { %982 = dma.vmem_to_hbm [thread:$0]  %s980_s23, 32, %s1582_s7, [#allocation3]  }
 0x2ea   :  { %1269 = dma.done.wait [#allocation3], 32  }
 0x2eb   :  { %1270 = vsyncadd [#allocation3], 4294967264 }
 0x2ec   :  { %986 = vsyncpa [#allocation3], 1 }

// kernel: mobilefacenet_forward.86
= control target key start
LH: loop header
LB: loop body
LE: loop exit
PB: predicated region body
PF: predicated region fallthrough
CT: control target
= control target key end

     0   :  { %s685_s12 = smov 0   ;;  %s809_s0 = inlined_call_operand.vmem [shape: bf16[2,1,128], index: 0, kind: input, shape index: {}]   ;;  %s810_s1 = inlined_call_operand.vmem [shape: bf16[128,512], index: 1, kind: input, shape index: {}]   ;;  %s811_s2 = inlined_call_operand.vmem [shape: f32[1,512], index: 2, kind: input, shape index: {}]   ;;  %s812_s3 = inlined_call_operand.vmem [shape: f32[2,1,512], index: 3, kind: output, shape index: {}]  }
   0x1 LB: > { %s557_s13 = sadd.s32 4294967295, %s661_s12   ;;  %p561_p0 = scmp.ge.s32.totalorder %s661_s12, 1  ;;  %s661_s12 = sphi %s685_s12, %s13_s12  }
   0x2   : > { %p135_p1 = scmp.lt.s32.totalorder %s661_s12, 3 }
   0x4   : > { %p136_p2 = pnand %p561_p0, %p135_p1 }
   0x5   : > { %v607_v0 = vld [vmem:[%s810_s1 + $0x4] ss:$16 sps:$4 sm:$0xff] (!%p136_p2)   ;;  %v609_v1 = vld [vmem:[%s810_s1 + $0xc] ss:$16 sps:$4 sm:$0xff] (!%p136_p2)   ;;  %v663_v2 = vmov (!%p136_p2), 0   ;;  %p156_p3 = scmp.lt.s32.totalorder (!%p136_p2), %s557_s13, 1  ;;  %v359_v34 = vlaneseq (!%p136_p2) }
   0x6   : > { %139 = sbr.rel (%p136_p2) target bundleno = 267 (0x10b), region = 32  ;;  %411 = vmatprep.mubr.bf16.mxu0 (!%p136_p2), %v663_v2  ;;  %452 = vmatprep.mubr.bf16.mxu1 (!%p136_p2), %v663_v2  ;;  %v611_v3 = vld [vmem:[%s810_s1] ss:$16 sps:$4 sm:$0xff] (!%p136_p2)   ;;  %v612_v4 = vld [vmem:[%s810_s1 + $0x8] ss:$16 sps:$4 sm:$0xff] (!%p136_p2)  }
   0x7   : > { %379 = vmatprep.subr.bf16.mxu0 (!%p136_p2), %v607_v0  ;;  %420 = vmatprep.subr.bf16.mxu1 (!%p136_p2), %v609_v1  ;;  %v613_v5 = vld [vmem:[%s810_s1 + $0x24] ss:$16 sps:$4 sm:$0xff] (!%p136_p2)   ;;  %v615_v6 = vld [vmem:[%s810_s1 + $0x2c] ss:$16 sps:$4 sm:$0xff] (!%p136_p2)   ;;  %v617_v7 = vld [vmem:[%s810_s1 + $0x20] ss:$16 sps:$4 sm:$0xff] (!%p136_p2)  }
   0x8   : > { %380 = vmatpush1.bf16.msra.mxu0 (!%p136_p2), %v611_v3  ;;  %421 = vmatpush1.bf16.msra.mxu1 (!%p136_p2), %v612_v4  ;;  %v618_v8 = vld [vmem:[%s810_s1 + $0x28] ss:$16 sps:$4 sm:$0xff] (!%p136_p2)   ;;  %v619_v9 = vld [vmem:[%s810_s1 + $0x44] ss:$16 sps:$4 sm:$0xff] (!%p136_p2)   ;;  %v621_v10 = vld [vmem:[%s810_s1 + $0x4c] ss:$16 sps:$4 sm:$0xff] (!%p136_p2)  }
   0x9   : > { %381 = vmatprep.subr.bf16.mxu0 (!%p136_p2), %v613_v5  ;;  %422 = vmatprep.subr.bf16.mxu1 (!%p136_p2), %v615_v6  ;;  %v623_v11 = vld [vmem:[%s810_s1 + $0x40] ss:$16 sps:$4 sm:$0xff] (!%p136_p2)   ;;  %v624_v12 = vld [vmem:[%s810_s1 + $0x48] ss:$16 sps:$4 sm:$0xff] (!%p136_p2)   ;;  %v625_v13 = vld [vmem:[%s810_s1 + $0x64] ss:$16 sps:$4 sm:$0xff] (!%p136_p2)  }
   0xa   : > { %v627_v14 = vld [vmem:[%s810_s1 + $0x6c] ss:$16 sps:$4 sm:$0xff] (!%p136_p2)   ;;  %v629_v15 = vld [vmem:[%s810_s1 + $0x60] ss:$16 sps:$4 sm:$0xff] (!%p136_p2)   ;;  %v630_v16 = vld [vmem:[%s810_s1 + $0x68] ss:$16 sps:$4 sm:$0xff] (!%p136_p2)  }
   0xb   : > { %v631_v17 = vld [vmem:[%s810_s1 + $0x84] ss:$16 sps:$4 sm:$0xff] (!%p136_p2)   ;;  %v633_v18 = vld [vmem:[%s810_s1 + $0x8c] ss:$16 sps:$4 sm:$0xff] (!%p136_p2)   ;;  %v635_v19 = vld [vmem:[%s810_s1 + $0x80] ss:$16 sps:$4 sm:$0xff] (!%p136_p2)  }
   0xc   : > { %382 = vmatpush1.bf16.msra.mxu0 (!%p136_p2), %v617_v7  ;;  %423 = vmatpush1.bf16.msra.mxu1 (!%p136_p2), %v618_v8  ;;  %v636_v20 = vld [vmem:[%s810_s1 + $0x88] ss:$16 sps:$4 sm:$0xff] (!%p136_p2)   ;;  %v637_v21 = vld [vmem:[%s810_s1 + $0xa4] ss:$16 sps:$4 sm:$0xff] (!%p136_p2)   ;;  %v639_v22 = vld [vmem:[%s810_s1 + $0xac] ss:$16 sps:$4 sm:$0xff] (!%p136_p2)  }
   0xd   : > { %383 = vmatprep.subr.bf16.mxu0 %v619_v9  ;;  %424 = vmatprep.subr.bf16.mxu1 %v621_v10  ;;  %v641_v23 = vld [vmem:[%s810_s1 + $0xa0] ss:$16 sps:$4 sm:$0xff]   ;;  %v642_v24 = vld [vmem:[%s810_s1 + $0xa8] ss:$16 sps:$4 sm:$0xff]   ;;  %v643_v25 = vld [vmem:[%s810_s1 + $0xc4] ss:$16 sps:$4 sm:$0xff]  }
   0xe   : > { %v645_v26 = vld [vmem:[%s810_s1 + $0xcc] ss:$16 sps:$4 sm:$0xff]   ;;  %v647_v27 = vld [vmem:[%s810_s1 + $0xc0] ss:$16 sps:$4 sm:$0xff]   ;;  %v648_v28 = vld [vmem:[%s810_s1 + $0xc8] ss:$16 sps:$4 sm:$0xff]  }
   0xf   : > { %v649_v29 = vld [vmem:[%s810_s1 + $0xe4] ss:$16 sps:$4 sm:$0xff]   ;;  %v651_v30 = vld [vmem:[%s810_s1 + $0xec] ss:$16 sps:$4 sm:$0xff]   ;;  %s814_s13 = smov (!%p156_p3, %s557_s13), 1  ;;  %v360_v35 = vshrl.u32 %v359_v34, 7 }
  0x10   : > { %384 = vmatpush1.bf16.msra.mxu0 %v623_v11  ;;  %425 = vmatpush1.bf16.msra.mxu1 %v624_v12  ;;  %v653_v31 = vld [vmem:[%s810_s1 + $0xe0] ss:$16 sps:$4 sm:$0xff]   ;;  %v654_v32 = vld [vmem:[%s810_s1 + $0xe8] ss:$16 sps:$4 sm:$0xff]   ;;  %s158_s30 = scalar_lea.vmem %s809_s0, %s814_s13  ;;  %v664_v44 = vmov 1966171168  }
  0x11   : > { %385 = vmatprep.subr.bf16.mxu0 %v625_v13  ;;  %426 = vmatprep.subr.bf16.mxu1 %v627_v14  ;;  %v164_v33 = vld [vmem:[%s158_s30] sm:$0x1]  ;;  %v361_v36 = vsub.s32 0, %v360_v35  ;;  %v369_v37 = vsub.s32 2, %v360_v35  ;;  %v365_v39 = vsub.s32 1, %v360_v35  ;;  %v373_v40 = vsub.s32 3, %v360_v35 }
  0x12   : > { %v197_v38 = vld [vmem:[%s811_s2] sm:$0xf]  ;;  %v480_v45 = vunpack.c.l.s4 %v664_v44  ;;  %s562_s6 = sshll.u32 %s814_s13, 2  ;;  %vm504_vm0 = vcmp.lt.s32.totalorder %v359_v34, 512 }
  0x13   : > { %v362_v41 = vrot.slane %v197_v38, %v361_v36  ;;  %v370_v42 = vrot.slane %v197_v38, %v369_v37  ;;  %v366_v43 = vrot.slane %v197_v38, %v365_v39  ;;  %v374_v46 = vrot.slane %v197_v38, %v373_v40  ;;  %s162_s9 = scalar_lea.vmem %s812_s3, %s562_s6 }
  0x14   : > { %386 = vmatpush1.bf16.msra.mxu0 %v629_v15  ;;  %427 = vmatpush1.bf16.msra.mxu1 %v630_v16  ;;  %v481_v54 = vunpack.c.0.s8 %v480_v45 }
  0x15   : > { %387 = vmatprep.subr.bf16.mxu0 %v631_v17  ;;  %428 = vmatprep.subr.bf16.mxu1 %v633_v18 }
  0x16   : > { %v484_v3 = vsub.s32 %v481_v54, %v360_v35 }
  0x18   : > { %388 = vmatpush1.bf16.msra.mxu0 %v635_v19  ;;  %429 = vmatpush1.bf16.msra.mxu1 %v636_v20 }
  0x19   : > { %389 = vmatprep.subr.bf16.mxu0 %v637_v21  ;;  %430 = vmatprep.subr.bf16.mxu1 %v639_v22 }
  0x1c   : > { %390 = vmatpush1.bf16.msra.mxu0 %v641_v23  ;;  %431 = vmatpush1.bf16.msra.mxu1 %v642_v24 }
  0x1d   : > { %391 = vmatprep.subr.bf16.mxu0 %v643_v25  ;;  %432 = vmatprep.subr.bf16.mxu1 %v645_v26 }
  0x20   : > { %392 = vmatpush1.bf16.msra.mxu0 %v647_v27  ;;  %433 = vmatpush1.bf16.msra.mxu1 %v648_v28 }
  0x21   : > { %393 = vmatprep.subr.bf16.mxu0 %v649_v29  ;;  %434 = vmatprep.subr.bf16.mxu1 %v651_v30 }
  0x24   : > { %394 = vmatpush1.bf16.msra.mxu0 %v653_v31  ;;  %435 = vmatpush1.bf16.msra.mxu1 %v654_v32 }
  0x27   : > { %412 = vmatmul.mubr.bf16.vlgmr.msra.gmra.mrb[0].mxu0 %v164_v33  ;;  %453 = vmatmul.mubr.bf16.vlgmr.msra.gmra.mrb[0].mxu1 %v164_v33 }
  0xfa   : > { %v413_v47 = vpop.f32.mrb[0].mxu0  ;;  %v454_v48 = vpop.f32.mrb[0].mxu1 }
  0xfb   : > { %v414_v49 = vadd.f32 %v413_v47, %v362_v41  ;;  %v455_v50 = vadd.f32 %v454_v48, %v370_v42  ;;  %v415_v51 = vpop.f32.mrb[1].mxu0  ;;  %v456_v52 = vpop.f32.mrb[1].mxu1 }
  0xfc   : > { %v416_v53 = vadd.f32 %v415_v51, %v366_v43  ;;  %v457_v55 = vadd.f32 %v456_v52, %v374_v46  ;;  %v417_v56 = vpop.f32.mrb[2].mxu0  ;;  %v458_v57 = vpop.f32.mrb[2].mxu1 }
  0xfd   : > { %v461_v58 = vmax.f32 %v414_v49, 0.0  ;;  %v463_v59 = vmax.f32 %v455_v50, 0.0  ;;  %v418_v60 = vpop.f32.mrb[3].mxu0  ;;  %v459_v61 = vpop.f32.mrb[3].mxu1 }
  0xfe   : > { %v462_v62 = vmax.f32 %v416_v53, 0.0  ;;  %v464_v63 = vmax.f32 %v457_v55, 0.0 }
  0xff   : > { %v465_v0 = vmin.f32 %v461_v58, 6.0  ;;  %v467_v1 = vmin.f32 %v463_v59, 6.0 }
 0x100   : > { %v466_v2 = vmin.f32 %v462_v62, 6.0  ;;  %v468_v4 = vmin.f32 %v464_v63, 6.0 }
 0x102   : > { %v477_v5 = vcombine.low %v465_v0, %v466_v2  ;;  %v478_v6 = vcombine.low %v467_v1, %v468_v4 }
 0x104   : > { %v485_v7 = vrot.slane %v477_v5, %v484_v3  ;;  %v492_v8 = vrot.slane %v478_v6, %v484_v3 }
 0x106   : > { %v493_v9 = vcombine.low %v485_v7, %v492_v8 }
 0x108   : > { %v500_v10 = vrot.slane %v493_v9, %v484_v3 }
 0x10a   : > { %506 = vst.msk [vmem:[%s162_s9] sm:$0xf] %vm504_vm0, %v500_v10 }
 0x10b PF: > { %s13_s12 = sadd.s32 1, %s661_s12  }
 0x10c   : > { %p10_p4 = scmp.ge.s32.totalorder %s13_s12, 4  }
 0x10e   :  { %12 = sbr.rel (!%p10_p4) target bundleno = 1 (0x1), region = 62 }

</bundles_post_ra>
